<compile_context>
chip_gen: v5e
topology: v5e:2x2
jax: 0.10.0
libtpu: 0.0.40
codegen_flags: <defaults>
</compile_context>

<pallas_src>
import functools
import math

import jax
import jax.numpy as jnp
from jax.experimental import pallas as pl
from jax.experimental.pallas import tpu as pltpu


# ----------------------------- common helpers -------------------------------

_VMEM_LIMIT = 48 * 1024 * 1024  # safe on v5e/v6e (128 MiB) and v7x (64 MiB)


def _cparams(sem):
    return pltpu.CompilerParams(dimension_semantics=sem,
                                vmem_limit_bytes=_VMEM_LIMIT)


def _tile_m(dim, target):
    """Row (sublane) tile: <= target (multiple of 8); for small dims try to
    split in half so every grid has >=2 parallel steps (v7x megacore)."""
    if dim > target:
        return target
    half = dim // 2
    if half >= 8 and half % 8 == 0:
        return half
    return dim                       # full dim is always a legal block


def _tile_n(dim, target):
    """Lane tile: <= target (multiple of 128) or the full dim."""
    return target if dim > target else dim


def _layernorm_f32(z, g, b):
    mu = jnp.mean(z, axis=-1, keepdims=True)
    var = jnp.mean(jnp.square(z - mu), axis=-1, keepdims=True)
    return (z - mu) * jax.lax.rsqrt(var + 1e-5) * g + b


# ----------------------------- Pallas kernels --------------------------------

def _linear_kernel(x_ref, w_ref, b_ref, o_ref, *, act):
    y = jnp.dot(x_ref[...], w_ref[...],
                preferred_element_type=jnp.float32) + b_ref[...]
    if act == "relu":
        y = jnp.maximum(y, 0.0)
    o_ref[...] = y.astype(o_ref.dtype)


def pallas_linear(x, w, b, act="none", out_dtype=jnp.bfloat16,
                  tm_target=256, tn_target=512):
    """x: (M,K) bf16, w: (K,N) bf16, b: (N,) f32 -> (M,N)."""
    M, K = x.shape
    N = w.shape[1]
    tm = _tile_m(M, tm_target)
    tn = _tile_n(N, tn_target)
    grid = (pl.cdiv(M, tm), pl.cdiv(N, tn))
    return pl.pallas_call(
        functools.partial(_linear_kernel, act=act),
        grid=grid,
        in_specs=[
            pl.BlockSpec((tm, K), lambda i, j: (i, 0)),
            pl.BlockSpec((K, tn), lambda i, j: (0, j)),
            pl.BlockSpec((1, tn), lambda i, j: (0, j)),
        ],
        out_specs=pl.BlockSpec((tm, tn), lambda i, j: (i, j)),
        out_shape=jax.ShapeDtypeStruct((M, N), out_dtype),
        compiler_params=_cparams(("parallel", "parallel")),
    )(x, w, b.reshape(1, N))


def _qkv_kernel(x_ref, pos_ref, wqk_ref, bqk_ref, wv_ref, bv_ref,
                q_ref, k_ref, v_ref):
    # q,k = (x + pos) @ [Wq*scale | Wk] ; v = x @ Wv   (pos-add fused in VMEM)
    x = x_ref[...]
    xp = (x.astype(jnp.float32) + pos_ref[...].astype(jnp.float32)
          ).astype(jnp.bfloat16)
    qk = jnp.dot(xp, wqk_ref[...],
                 preferred_element_type=jnp.float32) + bqk_ref[...]
    D = wv_ref.shape[1]
    q_ref[...] = qk[:, :D].astype(q_ref.dtype)
    k_ref[...] = qk[:, D:].astype(k_ref.dtype)
    v = jnp.dot(x, wv_ref[...], preferred_element_type=jnp.float32) + bv_ref[...]
    v_ref[...] = v.astype(v_ref.dtype)


def pallas_qkv(x, pos, wqk, bqk, wv, bv, tm_target=256):
    M, D = x.shape
    tm = _tile_m(M, tm_target)
    grid = (pl.cdiv(M, tm),)
    return pl.pallas_call(
        _qkv_kernel,
        grid=grid,
        in_specs=[
            pl.BlockSpec((tm, D), lambda i: (i, 0)),
            pl.BlockSpec((tm, D), lambda i: (i, 0)),
            pl.BlockSpec((D, 2 * D), lambda i: (0, 0)),
            pl.BlockSpec((1, 2 * D), lambda i: (0, 0)),
            pl.BlockSpec((D, D), lambda i: (0, 0)),
            pl.BlockSpec((1, D), lambda i: (0, 0)),
        ],
        out_specs=(pl.BlockSpec((tm, D), lambda i: (i, 0)),) * 3,
        out_shape=(jax.ShapeDtypeStruct((M, D), jnp.bfloat16),) * 3,
        compiler_params=_cparams(("parallel",)),
    )(x, pos, wqk, bqk.reshape(1, 2 * D), wv, bv.reshape(1, D))


def _kv_kernel(x_ref, pos_ref, wk_ref, bk_ref, wv_ref, bv_ref, k_ref, v_ref):
    # k = (x + pos) @ Wk ; v = x @ Wv   (cross-attention memory side)
    x = x_ref[...]
    xp = (x.astype(jnp.float32) + pos_ref[...].astype(jnp.float32)
          ).astype(jnp.bfloat16)
    k_ref[...] = (jnp.dot(xp, wk_ref[...], preferred_element_type=jnp.float32)
                  + bk_ref[...]).astype(k_ref.dtype)
    v_ref[...] = (jnp.dot(x, wv_ref[...], preferred_element_type=jnp.float32)
                  + bv_ref[...]).astype(v_ref.dtype)


def pallas_kv(x, pos, wk, bk, wv, bv, tm_target=256):
    M, D = x.shape
    tm = _tile_m(M, tm_target)
    grid = (pl.cdiv(M, tm),)
    return pl.pallas_call(
        _kv_kernel,
        grid=grid,
        in_specs=[
            pl.BlockSpec((tm, D), lambda i: (i, 0)),
            pl.BlockSpec((tm, D), lambda i: (i, 0)),
            pl.BlockSpec((D, D), lambda i: (0, 0)),
            pl.BlockSpec((1, D), lambda i: (0, 0)),
            pl.BlockSpec((D, D), lambda i: (0, 0)),
            pl.BlockSpec((1, D), lambda i: (0, 0)),
        ],
        out_specs=(pl.BlockSpec((tm, D), lambda i: (i, 0)),) * 2,
        out_shape=(jax.ShapeDtypeStruct((M, D), jnp.bfloat16),) * 2,
        compiler_params=_cparams(("parallel",)),
    )(x, pos, wk, bk.reshape(1, D), wv, bv.reshape(1, D))


def _addlin_kernel(x_ref, pos_ref, w_ref, b_ref, o_ref):
    # (x + pos) @ W + b   (cross-attention query projection, W pre-scaled)
    xp = (x_ref[...].astype(jnp.float32) + pos_ref[...].astype(jnp.float32)
          ).astype(jnp.bfloat16)
    o_ref[...] = (jnp.dot(xp, w_ref[...], preferred_element_type=jnp.float32)
                  + b_ref[...]).astype(o_ref.dtype)


def pallas_addproj(x, pos, w, b, tm_target=256):
    M, D = x.shape
    N = w.shape[1]
    tm = _tile_m(M, tm_target)
    grid = (pl.cdiv(M, tm),)
    return pl.pallas_call(
        _addlin_kernel,
        grid=grid,
        in_specs=[
            pl.BlockSpec((tm, D), lambda i: (i, 0)),
            pl.BlockSpec((tm, D), lambda i: (i, 0)),
            pl.BlockSpec((D, N), lambda i: (0, 0)),
            pl.BlockSpec((1, N), lambda i: (0, 0)),
        ],
        out_specs=pl.BlockSpec((tm, N), lambda i: (i, 0)),
        out_shape=jax.ShapeDtypeStruct((M, N), jnp.bfloat16),
        compiler_params=_cparams(("parallel",)),
    )(x, pos, w, b.reshape(1, N))


def _attn_kernel(*refs, num_heads, use_bias):
    # One (batch, Sq-tile) per grid step; all heads computed here.
    # Q is pre-scaled (scale folded into Wq at parameter prep).
    if use_bias:
        q_ref, k_ref, v_ref, bias_ref, o_ref = refs
    else:
        q_ref, k_ref, v_ref, o_ref = refs
        bias_ref = None
    q = q_ref[0]                                  # (tq, D)  bf16
    k = k_ref[0]                                  # (Sk, D)  bf16
    v = v_ref[0]                                  # (Sk, D)  bf16
    D = q.shape[-1]
    Dh = D // num_heads
    outs = []
    for h in range(num_heads):
        sl = slice(h * Dh, (h + 1) * Dh)
        s = jax.lax.dot_general(q[:, sl], k[:, sl], (((1,), (1,)), ((), ())),
                                preferred_element_type=jnp.float32)   # (tq, Sk)
        if use_bias:
            s = s + bias_ref[0]                   # (1, Sk) additive mask bias
        m = jnp.max(s, axis=-1, keepdims=True)
        p = jnp.exp(s - m)
        p = p * pl.reciprocal(jnp.sum(p, axis=-1, keepdims=True), approx=True)
        outs.append(jnp.dot(p.astype(jnp.bfloat16), v[:, sl],
                            preferred_element_type=jnp.float32))
    # lane-dense: concatenate heads in VMEM, ONE full-width store.
    o_ref[0] = jnp.concatenate(outs, axis=-1).astype(o_ref.dtype)


def pallas_attention(q, k, v, bias, num_heads, tq_target=256):
    """q: (B,Sq,D), k/v: (B,Sk,D), bias: (B,1,Sk) additive or None -> (B,Sq,D)."""
    B, Sq, D = q.shape
    Sk = k.shape[1]
    tq = _tile_m(Sq, tq_target)
    grid = (B, pl.cdiv(Sq, tq))
    use_bias = bias is not None
    in_specs = [
        pl.BlockSpec((1, tq, D), lambda b, i: (b, i, 0)),
        pl.BlockSpec((1, Sk, D), lambda b, i: (b, 0, 0)),
        pl.BlockSpec((1, Sk, D), lambda b, i: (b, 0, 0)),
    ]
    args = [q, k, v]
    if use_bias:
        in_specs.append(pl.BlockSpec((1, 1, Sk), lambda b, i: (b, 0, 0)))
        args.append(bias)
    return pl.pallas_call(
        functools.partial(_attn_kernel, num_heads=num_heads, use_bias=use_bias),
        grid=grid,
        in_specs=in_specs,
        out_specs=pl.BlockSpec((1, tq, D), lambda b, i: (b, i, 0)),
        out_shape=jax.ShapeDtypeStruct((B, Sq, D), jnp.bfloat16),
        compiler_params=_cparams(("parallel", "parallel")),
    )(*args)


def _proj_add_ln_kernel(a_ref, r_ref, w_ref, b_ref, g_ref, bt_ref, o_ref):
    # LN( residual + attn @ Wo + bo )
    y = jnp.dot(a_ref[...], w_ref[...],
                preferred_element_type=jnp.float32) + b_ref[...]
    z = r_ref[...].astype(jnp.float32) + y
    o_ref[...] = _layernorm_f32(z, g_ref[...], bt_ref[...]).astype(o_ref.dtype)


def pallas_proj_add_ln(a, r, w, b, g, bt, tm_target=256):
    M, D = a.shape
    tm = _tile_m(M, tm_target)
    grid = (pl.cdiv(M, tm),)
    return pl.pallas_call(
        _proj_add_ln_kernel,
        grid=grid,
        in_specs=[
            pl.BlockSpec((tm, D), lambda i: (i, 0)),
            pl.BlockSpec((tm, D), lambda i: (i, 0)),
            pl.BlockSpec((D, D), lambda i: (0, 0)),
            pl.BlockSpec((1, D), lambda i: (0, 0)),
            pl.BlockSpec((1, D), lambda i: (0, 0)),
            pl.BlockSpec((1, D), lambda i: (0, 0)),
        ],
        out_specs=pl.BlockSpec((tm, D), lambda i: (i, 0)),
        out_shape=jax.ShapeDtypeStruct((M, D), jnp.bfloat16),
        compiler_params=_cparams(("parallel",)),
    )(a, r, w, b.reshape(1, D), g.reshape(1, D), bt.reshape(1, D))


def _ffn_ln_kernel(x_ref, w1_ref, b1_ref, w2_ref, b2_ref, g_ref, bt_ref, o_ref):
    # LN( x + relu(x @ W1 + b1) @ W2 + b2 ) -- FF hidden never touches HBM
    x = x_ref[...]
    h = jnp.dot(x, w1_ref[...], preferred_element_type=jnp.float32) + b1_ref[...]
    h = jnp.maximum(h, 0.0)
    y = jnp.dot(h.astype(jnp.bfloat16), w2_ref[...],
                preferred_element_type=jnp.float32) + b2_ref[...]
    z = x.astype(jnp.float32) + y
    o_ref[...] = _layernorm_f32(z, g_ref[...], bt_ref[...]).astype(o_ref.dtype)


def pallas_ffn_ln(x, w1, b1, w2, b2, g, bt, tm_target=256):
    M, D = x.shape
    FF = w1.shape[1]
    tm = _tile_m(M, tm_target)          # kept <=256: fits v7x 64 MiB VMEM
    grid = (pl.cdiv(M, tm),)
    return pl.pallas_call(
        _ffn_ln_kernel,
        grid=grid,
        in_specs=[
            pl.BlockSpec((tm, D), lambda i: (i, 0)),
            pl.BlockSpec((D, FF), lambda i: (0, 0)),
            pl.BlockSpec((1, FF), lambda i: (0, 0)),
            pl.BlockSpec((FF, D), lambda i: (0, 0)),
            pl.BlockSpec((1, D), lambda i: (0, 0)),
            pl.BlockSpec((1, D), lambda i: (0, 0)),
            pl.BlockSpec((1, D), lambda i: (0, 0)),
        ],
        out_specs=pl.BlockSpec((tm, D), lambda i: (i, 0)),
        out_shape=jax.ShapeDtypeStruct((M, D), jnp.bfloat16),
        compiler_params=_cparams(("parallel",)),
    )(x, w1, b1.reshape(1, FF), w2, b2.reshape(1, D),
      g.reshape(1, D), bt.reshape(1, D))


def _head_kernel(x_ref, g_ref, bln_ref, wc_ref, bc_ref, w1_ref, b1_ref,
                 w2_ref, b2_ref, w3_ref, b3_ref, o_ref, *, nc1):
    # decoder final LN + class head + 3-layer bbox MLP (sigmoid); logits and
    # boxes packed into one 128-wide lane-dense slab: [0:nc1]=logits,
    # [nc1:nc1+4]=boxes.
    x = _layernorm_f32(x_ref[...].astype(jnp.float32), g_ref[...], bln_ref[...])
    xb = x.astype(jnp.bfloat16)
    logits = jnp.dot(xb, wc_ref[...],
                     preferred_element_type=jnp.float32) + bc_ref[...]
    h = jnp.maximum(jnp.dot(xb, w1_ref[...],
                            preferred_element_type=jnp.float32) + b1_ref[...], 0.0)
    h = jnp.maximum(jnp.dot(h.astype(jnp.bfloat16), w2_ref[...],
                            preferred_element_type=jnp.float32) + b2_ref[...], 0.0)
    bx = jnp.dot(h.astype(jnp.bfloat16), w3_ref[...],
                 preferred_element_type=jnp.float32) + b3_ref[...]
    boxes = 0.5 * (jnp.tanh(0.5 * bx) + 1.0)            # stable sigmoid (EUP)
    n_pad = o_ref.shape[-1]
    col = jax.lax.broadcasted_iota(jnp.int32, (1, n_pad), 1)
    is_box = (col >= nc1) & (col < nc1 + 4)
    o_ref[...] = jnp.where(is_box, boxes, logits).astype(o_ref.dtype)


def pallas_head(x, head, nc1, tm_target=256):
    """x: (M, D) bf16. Returns (logits (M, nc1), boxes (M, 4)) f32."""
    M, D = x.shape
    n_pad = head["wc"].shape[1]
    tm = _tile_m(M, tm_target)
    grid = (pl.cdiv(M, tm),)
    out = pl.pallas_call(
        functools.partial(_head_kernel, nc1=nc1),
        grid=grid,
        in_specs=[
            pl.BlockSpec((tm, D), lambda i: (i, 0)),
            pl.BlockSpec((1, D), lambda i: (0, 0)),
            pl.BlockSpec((1, D), lambda i: (0, 0)),
            pl.BlockSpec((D, n_pad), lambda i: (0, 0)),
            pl.BlockSpec((1, n_pad), lambda i: (0, 0)),
            pl.BlockSpec((D, D), lambda i: (0, 0)),
            pl.BlockSpec((1, D), lambda i: (0, 0)),
            pl.BlockSpec((D, D), lambda i: (0, 0)),
            pl.BlockSpec((1, D), lambda i: (0, 0)),
            pl.BlockSpec((D, n_pad), lambda i: (0, 0)),
            pl.BlockSpec((1, n_pad), lambda i: (0, 0)),
        ],
        out_specs=pl.BlockSpec((tm, n_pad), lambda i: (i, 0)),
        out_shape=jax.ShapeDtypeStruct((M, n_pad), jnp.float32),
        compiler_params=_cparams(("parallel",)),
    )(x, head["ln"]["g"].reshape(1, D), head["ln"]["b"].reshape(1, D),
      head["wc"], head["bc"].reshape(1, n_pad),
      head["w1"], head["b1"].reshape(1, D),
      head["w2"], head["b2"].reshape(1, D),
      head["w3"], head["b3"].reshape(1, n_pad))
    return out[:, :nc1], out[:, nc1:nc1 + 4]


# ------------------------- transformer building blocks ----------------------

def encoder_layer(p, src, pos, key_bias, num_heads):
    # post-norm (pre_norm=False), dropout inactive (eval)
    B, S, D = src.shape
    sa = p["self_attn"]
    q, k, v = pallas_qkv(src.reshape(B * S, D), pos.reshape(B * S, D),
                         sa["wqk"], sa["bqk"], sa["wv"], sa["bv"])
    attn = pallas_attention(q.reshape(B, S, D), k.reshape(B, S, D),
                            v.reshape(B, S, D), key_bias, num_heads)
    x = pallas_proj_add_ln(attn.reshape(B * S, D), src.reshape(B * S, D),
                           sa["wo"], sa["bo"], p["norm1"]["g"], p["norm1"]["b"])
    x = pallas_ffn_ln(x, p["ff1"]["w"], p["ff1"]["b"],
                      p["ff2"]["w"], p["ff2"]["b"],
                      p["norm2"]["g"], p["norm2"]["b"])
    return x.reshape(B, S, D)


def decoder_layer(p, tgt, memory, pos, query_pos, key_bias, num_heads):
    B, Qn, D = tgt.shape
    S = memory.shape[1]

    # --- self-attention (no mask -> no bias add) ---
    sa = p["self_attn"]
    q, k, v = pallas_qkv(tgt.reshape(B * Qn, D), query_pos.reshape(B * Qn, D),
                         sa["wqk"], sa["bqk"], sa["wv"], sa["bv"])
    attn = pallas_attention(q.reshape(B, Qn, D), k.reshape(B, Qn, D),
                            v.reshape(B, Qn, D), None, num_heads)
    t = pallas_proj_add_ln(attn.reshape(B * Qn, D), tgt.reshape(B * Qn, D),
                           sa["wo"], sa["bo"], p["norm1"]["g"], p["norm1"]["b"])

    # --- cross-attention over encoder memory ---
    ca = p["cross_attn"]
    qx = pallas_addproj(t, query_pos.reshape(B * Qn, D), ca["wq"], ca["bq"])
    kx, vx = pallas_kv(memory.reshape(B * S, D), pos.reshape(B * S, D),
                       ca["wk"], ca["bk"], ca["wv"], ca["bv"])
    attn2 = pallas_attention(qx.reshape(B, Qn, D), kx.reshape(B, S, D),
                             vx.reshape(B, S, D), key_bias, num_heads)
    t = pallas_proj_add_ln(attn2.reshape(B * Qn, D), t,
                           ca["wo"], ca["bo"], p["norm2"]["g"], p["norm2"]["b"])

    # --- FFN ---
    t = pallas_ffn_ln(t, p["ff1"]["w"], p["ff1"]["b"],
                      p["ff2"]["w"], p["ff2"]["b"],
                      p["norm3"]["g"], p["norm3"]["b"])
    return t.reshape(B, Qn, D)


def position_embedding_sine(mask, num_pos_feats, temperature=10000.0,
                            scale=2.0 * math.pi, eps=1e-6):
    """mask: (B, H, W) bool padding mask -> pos (B, H, W, 2*num_pos_feats)."""
    not_mask = (~mask).astype(jnp.float32)
    y_embed = jnp.cumsum(not_mask, axis=1)
    x_embed = jnp.cumsum(not_mask, axis=2)
    y_embed = y_embed / (y_embed[:, -1:, :] + eps) * scale
    x_embed = x_embed / (x_embed[:, :, -1:] + eps) * scale
    dim_t = jnp.arange(num_pos_feats, dtype=jnp.float32)
    dim_t = temperature ** (2.0 * (dim_t // 2) / num_pos_feats)
    pos_x = x_embed[..., None] / dim_t
    pos_y = y_embed[..., None] / dim_t
    pos_x = jnp.stack([jnp.sin(pos_x[..., 0::2]), jnp.cos(pos_x[..., 1::2])],
                      axis=4).reshape(*pos_x.shape[:3], -1)
    pos_y = jnp.stack([jnp.sin(pos_y[..., 0::2]), jnp.cos(pos_y[..., 1::2])],
                      axis=4).reshape(*pos_y.shape[:3], -1)
    return jnp.concatenate([pos_y, pos_x], axis=3)        # (B, H, W, D)


# ------------------------------ parameters ----------------------------------

def _init_linear(key, din, dout, scale=0.05):
    kw, kb = jax.random.split(key)
    return {"w": scale * jax.random.normal(kw, (din, dout), jnp.float32),
            "b": scale * jax.random.normal(kb, (dout,), jnp.float32)}


def _init_ln(d):
    return {"g": jnp.ones((d,), jnp.float32), "b": jnp.zeros((d,), jnp.float32)}


def _init_mha(key, d):
    ks = jax.random.split(key, 4)
    return {"q": _init_linear(ks[0], d, d), "k": _init_linear(ks[1], d, d),
            "v": _init_linear(ks[2], d, d), "o": _init_linear(ks[3], d, d)}


def init_detr_params(key, cfg):
    D, FF = cfg["hidden_dim"], cfg["dim_feedforward"]
    keys = iter(jax.random.split(key, 64))
    params = {
        "input_proj": _init_linear(next(keys), cfg["num_channels"], D),
        "query_embed": 0.05 * jax.random.normal(next(keys),
                                                (cfg["num_queries"], D),
                                                jnp.float32),
        "encoder": [],
        "decoder": [],
        "dec_norm": _init_ln(D),
        "class_embed": _init_linear(next(keys), D, cfg["nc"] + 1),
        "bbox_embed": [_init_linear(next(keys), D, D),
                       _init_linear(next(keys), D, D),
                       _init_linear(next(keys), D, 4)],
    }
    for _ in range(cfg["enc_layers"]):
        params["encoder"].append({
            "self_attn": _init_mha(next(keys), D),
            "norm1": _init_ln(D), "norm2": _init_ln(D),
            "ff1": _init_linear(next(keys), D, FF),
            "ff2": _init_linear(next(keys), FF, D),
        })
    for _ in range(cfg["dec_layers"]):
        params["decoder"].append({
            "self_attn": _init_mha(next(keys), D),
            "cross_attn": _init_mha(next(keys), D),
            "norm1": _init_ln(D), "norm2": _init_ln(D), "norm3": _init_ln(D),
            "ff1": _init_linear(next(keys), D, FF),
            "ff2": _init_linear(next(keys), FF, D),
        })
    return params


def prepare_params(raw, cfg):
    """One-time prep: bf16 weights, fused [Wq*scale | Wk] concat, padded head."""
    D = cfg["hidden_dim"]
    scale = 1.0 / math.sqrt(D // cfg["num_heads"])
    nc1 = cfg["nc"] + 1

    def lin(p):
        return {"w": p["w"].astype(jnp.bfloat16), "b": p["b"]}

    def mha(p):
        wq = p["q"]["w"] * scale            # fold attention scale into Wq / bq
        bq = p["q"]["b"] * scale
        return {
            "wqk": jnp.concatenate([wq, p["k"]["w"]], axis=1).astype(jnp.bfloat16),
            "bqk": jnp.concatenate([bq, p["k"]["b"]], axis=0),
            "wq": wq.astype(jnp.bfloat16), "bq": bq,
            "wk": p["k"]["w"].astype(jnp.bfloat16), "bk": p["k"]["b"],
            "wv": p["v"]["w"].astype(jnp.bfloat16), "bv": p["v"]["b"],
            "wo": p["o"]["w"].astype(jnp.bfloat16), "bo": p["o"]["b"],
        }

    enc = [{"self_attn": mha(lp["self_attn"]),
            "norm1": lp["norm1"], "norm2": lp["norm2"],
            "ff1": lin(lp["ff1"]), "ff2": lin(lp["ff2"])}
           for lp in raw["encoder"]]
    dec = [{"self_attn": mha(lp["self_attn"]), "cross_attn": mha(lp["cross_attn"]),
            "norm1": lp["norm1"], "norm2": lp["norm2"], "norm3": lp["norm3"],
            "ff1": lin(lp["ff1"]), "ff2": lin(lp["ff2"])}
           for lp in raw["decoder"]]

    n_pad = ((nc1 + 4 + 127) // 128) * 128
    wc = jnp.zeros((D, n_pad), jnp.float32).at[:, :nc1].set(raw["class_embed"]["w"])
    bc = jnp.zeros((n_pad,), jnp.float32).at[:nc1].set(raw["class_embed"]["b"])
    w3 = jnp.zeros((D, n_pad), jnp.float32).at[:, nc1:nc1 + 4].set(
        raw["bbox_embed"][2]["w"])
    b3 = jnp.zeros((n_pad,), jnp.float32).at[nc1:nc1 + 4].set(
        raw["bbox_embed"][2]["b"])

    return {
        "input_proj": lin(raw["input_proj"]),
        "query_embed": raw["query_embed"].astype(jnp.bfloat16),
        "encoder": enc,
        "decoder": dec,
        "head": {
            "ln": raw["dec_norm"],
            "wc": wc.astype(jnp.bfloat16), "bc": bc,
            "w1": raw["bbox_embed"][0]["w"].astype(jnp.bfloat16),
            "b1": raw["bbox_embed"][0]["b"],
            "w2": raw["bbox_embed"][1]["w"].astype(jnp.bfloat16),
            "b2": raw["bbox_embed"][1]["b"],
            "w3": w3.astype(jnp.bfloat16), "b3": b3,
        },
    }


# ------------------------------ full forward ---------------------------------

def detr_forward(params, features, mask, cfg):
    """features: (B, C, H, W) backbone output; mask: (B, H, W) bool padding."""
    B, C, Hh, Ww = features.shape
    D, nh = cfg["hidden_dim"], cfg["num_heads"]
    S = Hh * Ww
    Q = cfg["num_queries"]
    nc1 = cfg["nc"] + 1

    pos = position_embedding_sine(mask, D // 2).reshape(B, S, D).astype(jnp.bfloat16)

    # input_proj: 1x1 conv == per-pixel matmul over channels
    x_nhwc = jnp.transpose(features, (0, 2, 3, 1)).reshape(B * S, C).astype(jnp.bfloat16)
    src = pallas_linear(x_nhwc, params["input_proj"]["w"],
                        params["input_proj"]["b"]).reshape(B, S, D)

    mask_flat = mask.reshape(B, S)
    key_bias = jnp.where(mask_flat, jnp.float32(-1e9),
                         jnp.float32(0.0))[:, None, :]                 # (B,1,S)

    query_pos = jnp.broadcast_to(params["query_embed"][None], (B, Q, D))
    tgt = jnp.zeros((B, Q, D), jnp.bfloat16)

    memory = src
    for lp in params["encoder"]:
        memory = encoder_layer(lp, memory, pos, key_bias, nh)

    t = tgt
    for lp in params["decoder"]:
        t = decoder_layer(lp, t, memory, pos, query_pos, key_bias, nh)

    # aux_loss=False: final norm + detection heads only on the last layer.
    logits, boxes = pallas_head(t.reshape(B * Q, D), params["head"], nc1)
    return {"pred_logits": logits.reshape(B, Q, nc1),
            "pred_boxes": boxes.reshape(B, Q, 4)}


# --------------------------------- main --------------------------------------

if __name__ == "__main__":
    cfg = {
        "hidden_dim": 32,
        "num_heads": 4,
        "dim_feedforward": 64,
        "enc_layers": 2,
        "dec_layers": 2,
        "num_channels": 8,
        "num_queries": 8,
        "nc": 4,
        "aux_loss": False,
        "pre_norm": False,
        "dropout": 0.0,
    }

    root = jax.random.PRNGKey(0)
    k_feat, k_params = jax.random.split(root)

    B, C, H, W = 2, cfg["num_channels"], 8, 8
    features = jax.random.normal(k_feat, (B, C, H, W), jnp.float32)
    mask = jnp.zeros((B, H, W), jnp.bool_)          # no padding

    raw_params = init_detr_params(k_params, cfg)
    params = prepare_params(raw_params, cfg)

    forward = jax.jit(functools.partial(detr_forward, cfg=cfg))
    out = forward(params, features, mask)
    jax.block_until_ready(out)

    assert out["pred_logits"].shape == (B, cfg["num_queries"], cfg["nc"] + 1)
    assert out["pred_boxes"].shape == (B, cfg["num_queries"], 4)
    print("KERNEL_OK")
</pallas_src>

<mosaic_0001>
module attributes {stable_mosaic.version = 11 : i64} {
  func.func @_linear_kernel(%arg0: i32, %arg1: i32, %arg2: memref<64x8xbf16, #tpu.memory_space<vmem>>, %arg3: memref<8x32xbf16, #tpu.memory_space<vmem>>, %arg4: memref<1x32xf32, #tpu.memory_space<vmem>>, %arg5: memref<64x32xbf16, #tpu.memory_space<vmem>>) attributes {dimension_semantics = [#tpu.dimension_semantics<parallel>, #tpu.dimension_semantics<parallel>], iteration_bounds = array<i64: 2, 1>, scalar_prefetch = 0 : i64, scratch_operands = 0 : i64, tpu.core_type = #tpu.core_type<tc>, window_params = [{transform_indices = @transform_0, window_bounds = array<i64: 64, 8>}, {transform_indices = @transform_1, window_bounds = array<i64: 8, 32>}, {transform_indices = @transform_2, window_bounds = array<i64: 1, 32>}, {transform_indices = @transform_3, window_bounds = array<i64: 64, 32>}]} {
    %c0 = arith.constant 0 : index
    %c0_0 = arith.constant 0 : index
    %0 = vector.load %arg2[%c0, %c0_0] : memref<64x8xbf16, #tpu.memory_space<vmem>>, vector<64x8xbf16>
    %c0_1 = arith.constant 0 : index
    %c0_2 = arith.constant 0 : index
    %1 = vector.load %arg3[%c0_1, %c0_2] : memref<8x32xbf16, #tpu.memory_space<vmem>>, vector<8x32xbf16>
    %cst = arith.constant dense<0.000000e+00> : vector<64x32xf32>
    %2 = tpu.matmul %0, %1, %cst {dimension_numbers = #tpu.dot_dimension_numbers<[1], [0], [0], [1], [0, 0, 1, 1], [], []>} : vector<64x8xbf16>, vector<8x32xbf16>, vector<64x32xf32> -> vector<64x32xf32>
    %c0_3 = arith.constant 0 : index
    %c0_4 = arith.constant 0 : index
    %3 = vector.load %arg4[%c0_3, %c0_4] : memref<1x32xf32, #tpu.memory_space<vmem>>, vector<1x32xf32>
    %4 = vector.broadcast %3 : vector<1x32xf32> to vector<64x32xf32>
    %5 = arith.addf %2, %4 : vector<64x32xf32>
    %6 = arith.truncf %5 : vector<64x32xf32> to vector<64x32xbf16>
    %c0_5 = arith.constant 0 : index
    %c0_6 = arith.constant 0 : index
    %7 = vector.load %arg5[%c0_5, %c0_6] : memref<64x32xbf16, #tpu.memory_space<vmem>>, vector<64x32xbf16>
    tpu.vector_store %arg5[%c0_5, %c0_6], %6 {strides = array<i32>} : memref<64x32xbf16, #tpu.memory_space<vmem>>, vector<64x32xbf16>,
    return
  }
  func.func @transform_0(%arg0: i32, %arg1: i32) -> (i32, i32) {
    %c0_i32 = arith.constant 0 : i32
    %c0_i32_0 = arith.constant 0 : i32
    return %arg0, %c0_i32 : i32, i32
  }
  func.func @transform_1(%arg0: i32, %arg1: i32) -> (i32, i32) {
    %c0_i32 = arith.constant 0 : i32
    %c0_i32_0 = arith.constant 0 : i32
    return %c0_i32, %arg1 : i32, i32
  }
  func.func @transform_2(%arg0: i32, %arg1: i32) -> (i32, i32) {
    %c0_i32 = arith.constant 0 : i32
    %c0_i32_0 = arith.constant 0 : i32
    return %c0_i32, %arg1 : i32, i32
  }
  func.func @transform_3(%arg0: i32, %arg1: i32) -> (i32, i32) {
    %c0_i32 = arith.constant 0 : i32
    return %arg0, %arg1 : i32, i32
  }
}

module attributes {stable_mosaic.version = 11 : i64} {
  func.func @_qkv_kernel(%arg0: i32, %arg1: memref<64x32xbf16, #tpu.memory_space<vmem>>, %arg2: memref<64x32xbf16, #tpu.memory_space<vmem>>, %arg3: memref<32x64xbf16, #tpu.memory_space<vmem>>, %arg4: memref<1x64xf32, #tpu.memory_space<vmem>>, %arg5: memref<32x32xbf16, #tpu.memory_space<vmem>>, %arg6: memref<1x32xf32, #tpu.memory_space<vmem>>, %arg7: memref<64x32xbf16, #tpu.memory_space<vmem>>, %arg8: memref<64x32xbf16, #tpu.memory_space<vmem>>, %arg9: memref<64x32xbf16, #tpu.memory_space<vmem>>) attributes {dimension_semantics = [#tpu.dimension_semantics<parallel>], iteration_bounds = array<i64: 2>, scalar_prefetch = 0 : i64, scratch_operands = 0 : i64, tpu.core_type = #tpu.core_type<tc>, window_params = [{transform_indices = @transform_0, window_bounds = array<i64: 64, 32>}, {transform_indices = @transform_1, window_bounds = array<i64: 64, 32>}, {pipeline_mode = #tpu.pipeline_mode<synchronous>, transform_indices = @transform_2, window_bounds = array<i64: 32, 64>}, {pipeline_mode = #tpu.pipeline_mode<synchronous>, transform_indices = @transform_3, window_bounds = array<i64: 1, 64>}, {pipeline_mode = #tpu.pipeline_mode<synchronous>, transform_indices = @transform_4, window_bounds = array<i64: 32, 32>}, {pipeline_mode = #tpu.pipeline_mode<synchronous>, transform_indices = @transform_5, window_bounds = array<i64: 1, 32>}, {transform_indices = @transform_6, window_bounds = array<i64: 64, 32>}, {transform_indices = @transform_7, window_bounds = array<i64: 64, 32>}, {transform_indices = @transform_8, window_bounds = array<i64: 64, 32>}]} {
    %c0 = arith.constant 0 : index
    %c0_0 = arith.constant 0 : index
    %0 = vector.load %arg1[%c0, %c0_0] : memref<64x32xbf16, #tpu.memory_space<vmem>>, vector<64x32xbf16>
    %1 = arith.extf %0 : vector<64x32xbf16> to vector<64x32xf32>
    %c0_1 = arith.constant 0 : index
    %c0_2 = arith.constant 0 : index
    %2 = vector.load %arg2[%c0_1, %c0_2] : memref<64x32xbf16, #tpu.memory_space<vmem>>, vector<64x32xbf16>
    %3 = arith.extf %2 : vector<64x32xbf16> to vector<64x32xf32>
    %4 = arith.addf %1, %3 : vector<64x32xf32>
    %5 = arith.truncf %4 : vector<64x32xf32> to vector<64x32xbf16>
    %c0_3 = arith.constant 0 : index
    %c0_4 = arith.constant 0 : index
    %6 = vector.load %arg3[%c0_3, %c0_4] : memref<32x64xbf16, #tpu.memory_space<vmem>>, vector<32x64xbf16>
    %cst = arith.constant dense<0.000000e+00> : vector<64x64xf32>
    %7 = tpu.matmul %5, %6, %cst {dimension_numbers = #tpu.dot_dimension_numbers<[1], [0], [0], [1], [0, 0, 1, 1], [], []>} : vector<64x32xbf16>, vector<32x64xbf16>, vector<64x64xf32> -> vector<64x64xf32>
    %c0_5 = arith.constant 0 : index
    %c0_6 = arith.constant 0 : index
    %8 = vector.load %arg4[%c0_5, %c0_6] : memref<1x64xf32, #tpu.memory_space<vmem>>, vector<1x64xf32>
    %9 = vector.broadcast %8 : vector<1x64xf32> to vector<64x64xf32>
    %10 = arith.addf %7, %9 : vector<64x64xf32>
    %11 = vector.extract_strided_slice %10 {offsets = [0, 0], sizes = [64, 32], strides = [1, 1]} : vector<64x64xf32> to vector<64x32xf32>
    %12 = arith.truncf %11 : vector<64x32xf32> to vector<64x32xbf16>
    %c0_7 = arith.constant 0 : index
    %c0_8 = arith.constant 0 : index
    %13 = vector.load %arg7[%c0_7, %c0_8] : memref<64x32xbf16, #tpu.memory_space<vmem>>, vector<64x32xbf16>
    tpu.vector_store %arg7[%c0_7, %c0_8], %12 {strides = array<i32>} : memref<64x32xbf16, #tpu.memory_space<vmem>>, vector<64x32xbf16>,
    %14 = vector.extract_strided_slice %10 {offsets = [0, 32], sizes = [64, 32], strides = [1, 1]} : vector<64x64xf32> to vector<64x32xf32>
    %15 = arith.truncf %14 : vector<64x32xf32> to vector<64x32xbf16>
    %c0_9 = arith.constant 0 : index
    %c0_10 = arith.constant 0 : index
    %16 = vector.load %arg8[%c0_9, %c0_10] : memref<64x32xbf16, #tpu.memory_space<vmem>>, vector<64x32xbf16>
    tpu.vector_store %arg8[%c0_9, %c0_10], %15 {strides = array<i32>} : memref<64x32xbf16, #tpu.memory_space<vmem>>, vector<64x32xbf16>,
    %c0_11 = arith.constant 0 : index
    %c0_12 = arith.constant 0 : index
    %17 = vector.load %arg5[%c0_11, %c0_12] : memref<32x32xbf16, #tpu.memory_space<vmem>>, vector<32x32xbf16>
    %cst_13 = arith.constant dense<0.000000e+00> : vector<64x32xf32>
    %18 = tpu.matmul %0, %17, %cst_13 {dimension_numbers = #tpu.dot_dimension_numbers<[1], [0], [0], [1], [0, 0, 1, 1], [], []>} : vector<64x32xbf16>, vector<32x32xbf16>, vector<64x32xf32> -> vector<64x32xf32>
    %c0_14 = arith.constant 0 : index
    %c0_15 = arith.constant 0 : index
    %19 = vector.load %arg6[%c0_14, %c0_15] : memref<1x32xf32, #tpu.memory_space<vmem>>, vector<1x32xf32>
    %20 = vector.broadcast %19 : vector<1x32xf32> to vector<64x32xf32>
    %21 = arith.addf %18, %20 : vector<64x32xf32>
    %22 = arith.truncf %21 : vector<64x32xf32> to vector<64x32xbf16>
    %c0_16 = arith.constant 0 : index
    %c0_17 = arith.constant 0 : index
    %23 = vector.load %arg9[%c0_16, %c0_17] : memref<64x32xbf16, #tpu.memory_space<vmem>>, vector<64x32xbf16>
    tpu.vector_store %arg9[%c0_16, %c0_17], %22 {strides = array<i32>} : memref<64x32xbf16, #tpu.memory_space<vmem>>, vector<64x32xbf16>,
    return
  }
  func.func @transform_0(%arg0: i32) -> (i32, i32) {
    %c0_i32 = arith.constant 0 : i32
    %c0_i32_0 = arith.constant 0 : i32
    return %arg0, %c0_i32 : i32, i32
  }
  func.func @transform_1(%arg0: i32) -> (i32, i32) {
    %c0_i32 = arith.constant 0 : i32
    %c0_i32_0 = arith.constant 0 : i32
    return %arg0, %c0_i32 : i32, i32
  }
  func.func @transform_2(%arg0: i32) -> (i32, i32) {
    %c0_i32 = arith.constant 0 : i32
    %c0_i32_0 = arith.constant 0 : i32
    %c0_i32_1 = arith.constant 0 : i32
    return %c0_i32, %c0_i32_0 : i32, i32
  }
  func.func @transform_3(%arg0: i32) -> (i32, i32) {
    %c0_i32 = arith.constant 0 : i32
    %c0_i32_0 = arith.constant 0 : i32
    %c0_i32_1 = arith.constant 0 : i32
    return %c0_i32, %c0_i32_0 : i32, i32
  }
  func.func @transform_4(%arg0: i32) -> (i32, i32) {
    %c0_i32 = arith.constant 0 : i32
    %c0_i32_0 = arith.constant 0 : i32
    %c0_i32_1 = arith.constant 0 : i32
    return %c0_i32, %c0_i32_0 : i32, i32
  }
  func.func @transform_5(%arg0: i32) -> (i32, i32) {
    %c0_i32 = arith.constant 0 : i32
    %c0_i32_0 = arith.constant 0 : i32
    %c0_i32_1 = arith.constant 0 : i32
    return %c0_i32, %c0_i32_0 : i32, i32
  }
  func.func @transform_6(%arg0: i32) -> (i32, i32) {
    %c0_i32 = arith.constant 0 : i32
    %c0_i32_0 = arith.constant 0 : i32
    return %arg0, %c0_i32 : i32, i32
  }
  func.func @transform_7(%arg0: i32) -> (i32, i32) {
    %c0_i32 = arith.constant 0 : i32
    %c0_i32_0 = arith.constant 0 : i32
    return %arg0, %c0_i32 : i32, i32
  }
  func.func @transform_8(%arg0: i32) -> (i32, i32) {
    %c0_i32 = arith.constant 0 : i32
    %c0_i32_0 = arith.constant 0 : i32
    return %arg0, %c0_i32 : i32, i32
  }
}

module attributes {stable_mosaic.version = 11 : i64} {
  func.func @_attn_kernel(%arg0: i32, %arg1: i32, %arg2: memref<1x32x32xbf16, #tpu.memory_space<vmem>>, %arg3: memref<1x64x32xbf16, #tpu.memory_space<vmem>>, %arg4: memref<1x64x32xbf16, #tpu.memory_space<vmem>>, %arg5: memref<1x1x64xf32, #tpu.memory_space<vmem>>, %arg6: memref<1x32x32xbf16, #tpu.memory_space<vmem>>) attributes {dimension_semantics = [#tpu.dimension_semantics<parallel>, #tpu.dimension_semantics<parallel>], iteration_bounds = array<i64: 2, 2>, scalar_prefetch = 0 : i64, scratch_operands = 0 : i64, tpu.core_type = #tpu.core_type<tc>, window_params = [{transform_indices = @transform_0, window_bounds = array<i64: 1, 32, 32>}, {transform_indices = @transform_1, window_bounds = array<i64: 1, 64, 32>}, {transform_indices = @transform_2, window_bounds = array<i64: 1, 64, 32>}, {transform_indices = @transform_3, window_bounds = array<i64: 1, 1, 64>}, {transform_indices = @transform_4, window_bounds = array<i64: 1, 32, 32>}]} {
    %c0 = arith.constant 0 : index
    %c0_0 = arith.constant 0 : index
    %c0_1 = arith.constant 0 : index
    %0 = vector.load %arg2[%c0, %c0_0, %c0_1] : memref<1x32x32xbf16, #tpu.memory_space<vmem>>, vector<1x32x32xbf16>
    %1 = vector.shape_cast %0 : vector<1x32x32xbf16> to vector<32x32xbf16>
    %c0_2 = arith.constant 0 : index
    %c0_3 = arith.constant 0 : index
    %c0_4 = arith.constant 0 : index
    %2 = vector.load %arg3[%c0_2, %c0_3, %c0_4] : memref<1x64x32xbf16, #tpu.memory_space<vmem>>, vector<1x64x32xbf16>
    %3 = vector.shape_cast %2 : vector<1x64x32xbf16> to vector<64x32xbf16>
    %c0_5 = arith.constant 0 : index
    %c0_6 = arith.constant 0 : index
    %c0_7 = arith.constant 0 : index
    %4 = vector.load %arg4[%c0_5, %c0_6, %c0_7] : memref<1x64x32xbf16, #tpu.memory_space<vmem>>, vector<1x64x32xbf16>
    %5 = vector.shape_cast %4 : vector<1x64x32xbf16> to vector<64x32xbf16>
    %6 = vector.extract_strided_slice %1 {offsets = [0, 0], sizes = [32, 8], strides = [1, 1]} : vector<32x32xbf16> to vector<32x8xbf16>
    %7 = vector.extract_strided_slice %3 {offsets = [0, 0], sizes = [64, 8], strides = [1, 1]} : vector<64x32xbf16> to vector<64x8xbf16>
    %cst = arith.constant dense<0.000000e+00> : vector<32x64xf32>
    %8 = tpu.matmul %6, %7, %cst {dimension_numbers = #tpu.dot_dimension_numbers<[1], [1], [0], [0], [0, 0, 1, 0], [], []>} : vector<32x8xbf16>, vector<64x8xbf16>, vector<32x64xf32> -> vector<32x64xf32>
    %c0_8 = arith.constant 0 : index
    %c0_9 = arith.constant 0 : index
    %c0_10 = arith.constant 0 : index
    %9 = vector.load %arg5[%c0_8, %c0_9, %c0_10] : memref<1x1x64xf32, #tpu.memory_space<vmem>>, vector<1x1x64xf32>
    %10 = vector.shape_cast %9 : vector<1x1x64xf32> to vector<1x64xf32>
    %11 = vector.broadcast %10 : vector<1x64xf32> to vector<32x64xf32>
    %12 = arith.addf %8, %11 : vector<32x64xf32>
    %cst_11 = arith.constant dense<0xFF800000> : vector<32xf32>
    %13 = vector.multi_reduction <maximumf>, %12, %cst_11 [1] : vector<32x64xf32> to vector<32xf32>
    %14 = vector.shape_cast %13 : vector<32xf32> to vector<32x1xf32>
    %15 = vector.broadcast %14 : vector<32x1xf32> to vector<32x64xf32>
    %16 = arith.subf %12, %15 : vector<32x64xf32>
    %17 = math.exp %16 : vector<32x64xf32>
    %cst_12 = arith.constant dense<0.000000e+00> : vector<32xf32>
    %18 = vector.multi_reduction <add>, %17, %cst_12 [1] : vector<32x64xf32> to vector<32xf32>
    %19 = vector.shape_cast %18 : vector<32xf32> to vector<32x1xf32>
    %20 = tpu.reciprocal %19 {approx = true} : vector<32x1xf32> -> vector<32x1xf32>
    %21 = vector.broadcast %20 : vector<32x1xf32> to vector<32x64xf32>
    %22 = arith.mulf %17, %21 : vector<32x64xf32>
    %23 = arith.truncf %22 : vector<32x64xf32> to vector<32x64xbf16>
    %24 = vector.extract_strided_slice %5 {offsets = [0, 0], sizes = [64, 8], strides = [1, 1]} : vector<64x32xbf16> to vector<64x8xbf16>
    %cst_13 = arith.constant dense<0.000000e+00> : vector<32x8xf32>
    %25 = tpu.matmul %23, %24, %cst_13 {dimension_numbers = #tpu.dot_dimension_numbers<[1], [0], [0], [1], [0, 0, 1, 1], [], []>} : vector<32x64xbf16>, vector<64x8xbf16>, vector<32x8xf32> -> vector<32x8xf32>
    %26 = vector.extract_strided_slice %1 {offsets = [0, 8], sizes = [32, 8], strides = [1, 1]} : vector<32x32xbf16> to vector<32x8xbf16>
    %27 = vector.extract_strided_slice %3 {offsets = [0, 8], sizes = [64, 8], strides = [1, 1]} : vector<64x32xbf16> to vector<64x8xbf16>
    %cst_14 = arith.constant dense<0.000000e+00> : vector<32x64xf32>
    %28 = tpu.matmul %26, %27, %cst_14 {dimension_numbers = #tpu.dot_dimension_numbers<[1], [1], [0], [0], [0, 0, 1, 0], [], []>} : vector<32x8xbf16>, vector<64x8xbf16>, vector<32x64xf32> -> vector<32x64xf32>
    %c0_15 = arith.constant 0 : index
    %c0_16 = arith.constant 0 : index
    %c0_17 = arith.constant 0 : index
    %29 = vector.load %arg5[%c0_15, %c0_16, %c0_17] : memref<1x1x64xf32, #tpu.memory_space<vmem>>, vector<1x1x64xf32>
    %30 = vector.shape_cast %29 : vector<1x1x64xf32> to vector<1x64xf32>
    %31 = vector.broadcast %30 : vector<1x64xf32> to vector<32x64xf32>
    %32 = arith.addf %28, %31 : vector<32x64xf32>
    %cst_18 = arith.constant dense<0xFF800000> : vector<32xf32>
    %33 = vector.multi_reduction <maximumf>, %32, %cst_18 [1] : vector<32x64xf32> to vector<32xf32>
    %34 = vector.shape_cast %33 : vector<32xf32> to vector<32x1xf32>
    %35 = vector.broadcast %34 : vector<32x1xf32> to vector<32x64xf32>
    %36 = arith.subf %32, %35 : vector<32x64xf32>
    %37 = math.exp %36 : vector<32x64xf32>
    %cst_19 = arith.constant dense<0.000000e+00> : vector<32xf32>
    %38 = vector.multi_reduction <add>, %37, %cst_19 [1] : vector<32x64xf32> to vector<32xf32>
    %39 = vector.shape_cast %38 : vector<32xf32> to vector<32x1xf32>
    %40 = tpu.reciprocal %39 {approx = true} : vector<32x1xf32> -> vector<32x1xf32>
    %41 = vector.broadcast %40 : vector<32x1xf32> to vector<32x64xf32>
    %42 = arith.mulf %37, %41 : vector<32x64xf32>
    %43 = arith.truncf %42 : vector<32x64xf32> to vector<32x64xbf16>
    %44 = vector.extract_strided_slice %5 {offsets = [0, 8], sizes = [64, 8], strides = [1, 1]} : vector<64x32xbf16> to vector<64x8xbf16>
    %cst_20 = arith.constant dense<0.000000e+00> : vector<32x8xf32>
    %45 = tpu.matmul %43, %44, %cst_20 {dimension_numbers = #tpu.dot_dimension_numbers<[1], [0], [0], [1], [0, 0, 1, 1], [], []>} : vector<32x64xbf16>, vector<64x8xbf16>, vector<32x8xf32> -> vector<32x8xf32>
    %46 = vector.extract_strided_slice %1 {offsets = [0, 16], sizes = [32, 8], strides = [1, 1]} : vector<32x32xbf16> to vector<32x8xbf16>
    %47 = vector.extract_strided_slice %3 {offsets = [0, 16], sizes = [64, 8], strides = [1, 1]} : vector<64x32xbf16> to vector<64x8xbf16>
    %cst_21 = arith.constant dense<0.000000e+00> : vector<32x64xf32>
    %48 = tpu.matmul %46, %47, %cst_21 {dimension_numbers = #tpu.dot_dimension_numbers<[1], [1], [0], [0], [0, 0, 1, 0], [], []>} : vector<32x8xbf16>, vector<64x8xbf16>, vector<32x64xf32> -> vector<32x64xf32>
    %c0_22 = arith.constant 0 : index
    %c0_23 = arith.constant 0 : index
    %c0_24 = arith.constant 0 : index
    %49 = vector.load %arg5[%c0_22, %c0_23, %c0_24] : memref<1x1x64xf32, #tpu.memory_space<vmem>>, vector<1x1x64xf32>
    %50 = vector.shape_cast %49 : vector<1x1x64xf32> to vector<1x64xf32>
    %51 = vector.broadcast %50 : vector<1x64xf32> to vector<32x64xf32>
    %52 = arith.addf %48, %51 : vector<32x64xf32>
    %cst_25 = arith.constant dense<0xFF800000> : vector<32xf32>
    %53 = vector.multi_reduction <maximumf>, %52, %cst_25 [1] : vector<32x64xf32> to vector<32xf32>
    %54 = vector.shape_cast %53 : vector<32xf32> to vector<32x1xf32>
    %55 = vector.broadcast %54 : vector<32x1xf32> to vector<32x64xf32>
    %56 = arith.subf %52, %55 : vector<32x64xf32>
    %57 = math.exp %56 : vector<32x64xf32>
    %cst_26 = arith.constant dense<0.000000e+00> : vector<32xf32>
    %58 = vector.multi_reduction <add>, %57, %cst_26 [1] : vector<32x64xf32> to vector<32xf32>
    %59 = vector.shape_cast %58 : vector<32xf32> to vector<32x1xf32>
    %60 = tpu.reciprocal %59 {approx = true} : vector<32x1xf32> -> vector<32x1xf32>
    %61 = vector.broadcast %60 : vector<32x1xf32> to vector<32x64xf32>
    %62 = arith.mulf %57, %61 : vector<32x64xf32>
    %63 = arith.truncf %62 : vector<32x64xf32> to vector<32x64xbf16>
    %64 = vector.extract_strided_slice %5 {offsets = [0, 16], sizes = [64, 8], strides = [1, 1]} : vector<64x32xbf16> to vector<64x8xbf16>
    %cst_27 = arith.constant dense<0.000000e+00> : vector<32x8xf32>
    %65 = tpu.matmul %63, %64, %cst_27 {dimension_numbers = #tpu.dot_dimension_numbers<[1], [0], [0], [1], [0, 0, 1, 1], [], []>} : vector<32x64xbf16>, vector<64x8xbf16>, vector<32x8xf32> -> vector<32x8xf32>
    %66 = vector.extract_strided_slice %1 {offsets = [0, 24], sizes = [32, 8], strides = [1, 1]} : vector<32x32xbf16> to vector<32x8xbf16>
    %67 = vector.extract_strided_slice %3 {offsets = [0, 24], sizes = [64, 8], strides = [1, 1]} : vector<64x32xbf16> to vector<64x8xbf16>
    %cst_28 = arith.constant dense<0.000000e+00> : vector<32x64xf32>
    %68 = tpu.matmul %66, %67, %cst_28 {dimension_numbers = #tpu.dot_dimension_numbers<[1], [1], [0], [0], [0, 0, 1, 0], [], []>} : vector<32x8xbf16>, vector<64x8xbf16>, vector<32x64xf32> -> vector<32x64xf32>
    %c0_29 = arith.constant 0 : index
    %c0_30 = arith.constant 0 : index
    %c0_31 = arith.constant 0 : index
    %69 = vector.load %arg5[%c0_29, %c0_30, %c0_31] : memref<1x1x64xf32, #tpu.memory_space<vmem>>, vector<1x1x64xf32>
    %70 = vector.shape_cast %69 : vector<1x1x64xf32> to vector<1x64xf32>
    %71 = vector.broadcast %70 : vector<1x64xf32> to vector<32x64xf32>
    %72 = arith.addf %68, %71 : vector<32x64xf32>
    %cst_32 = arith.constant dense<0xFF800000> : vector<32xf32>
    %73 = vector.multi_reduction <maximumf>, %72, %cst_32 [1] : vector<32x64xf32> to vector<32xf32>
    %74 = vector.shape_cast %73 : vector<32xf32> to vector<32x1xf32>
    %75 = vector.broadcast %74 : vector<32x1xf32> to vector<32x64xf32>
    %76 = arith.subf %72, %75 : vector<32x64xf32>
    %77 = math.exp %76 : vector<32x64xf32>
    %cst_33 = arith.constant dense<0.000000e+00> : vector<32xf32>
    %78 = vector.multi_reduction <add>, %77, %cst_33 [1] : vector<32x64xf32> to vector<32xf32>
    %79 = vector.shape_cast %78 : vector<32xf32> to vector<32x1xf32>
    %80 = tpu.reciprocal %79 {approx = true} : vector<32x1xf32> -> vector<32x1xf32>
    %81 = vector.broadcast %80 : vector<32x1xf32> to vector<32x64xf32>
    %82 = arith.mulf %77, %81 : vector<32x64xf32>
    %83 = arith.truncf %82 : vector<32x64xf32> to vector<32x64xbf16>
    %84 = vector.extract_strided_slice %5 {offsets = [0, 24], sizes = [64, 8], strides = [1, 1]} : vector<64x32xbf16> to vector<64x8xbf16>
    %cst_34 = arith.constant dense<0.000000e+00> : vector<32x8xf32>
    %85 = tpu.matmul %83, %84, %cst_34 {dimension_numbers = #tpu.dot_dimension_numbers<[1], [0], [0], [1], [0, 0, 1, 1], [], []>} : vector<32x64xbf16>, vector<64x8xbf16>, vector<32x8xf32> -> vector<32x8xf32>
    %86 = tpu.concatenate %25, %45, %65, %85 in 1 : vector<32x8xf32>, vector<32x8xf32>, vector<32x8xf32>, vector<32x8xf32> -> vector<32x32xf32>
    %87 = arith.truncf %86 : vector<32x32xf32> to vector<32x32xbf16>
    %c0_35 = arith.constant 0 : index
    %c0_36 = arith.constant 0 : index
    %c0_37 = arith.constant 0 : index
    %88 = vector.load %arg6[%c0_35, %c0_36, %c0_37] : memref<1x32x32xbf16, #tpu.memory_space<vmem>>, vector<1x32x32xbf16>
    %89 = vector.shape_cast %88 : vector<1x32x32xbf16> to vector<32x32xbf16>
    %90 = vector.shape_cast %87 : vector<32x32xbf16> to vector<1x32x32xbf16>
    tpu.vector_store %arg6[%c0_35, %c0_36, %c0_37], %90 {strides = array<i32>} : memref<1x32x32xbf16, #tpu.memory_space<vmem>>, vector<1x32x32xbf16>,
    return
  }
  func.func @transform_0(%arg0: i32, %arg1: i32) -> (i32, i32, i32) {
    %c0_i32 = arith.constant 0 : i32
    %c0_i32_0 = arith.constant 0 : i32
    return %arg0, %arg1, %c0_i32 : i32, i32, i32
  }
  func.func @transform_1(%arg0: i32, %arg1: i32) -> (i32, i32, i32) {
    %c0_i32 = arith.constant 0 : i32
    %c0_i32_0 = arith.constant 0 : i32
    %c0_i32_1 = arith.constant 0 : i32
    return %arg0, %c0_i32, %c0_i32_0 : i32, i32, i32
  }
  func.func @transform_2(%arg0: i32, %arg1: i32) -> (i32, i32, i32) {
    %c0_i32 = arith.constant 0 : i32
    %c0_i32_0 = arith.constant 0 : i32
    %c0_i32_1 = arith.constant 0 : i32
    return %arg0, %c0_i32, %c0_i32_0 : i32, i32, i32
  }
  func.func @transform_3(%arg0: i32, %arg1: i32) -> (i32, i32, i32) {
    %c0_i32 = arith.constant 0 : i32
    %c0_i32_0 = arith.constant 0 : i32
    %c0_i32_1 = arith.constant 0 : i32
    return %arg0, %c0_i32, %c0_i32_0 : i32, i32, i32
  }
  func.func @transform_4(%arg0: i32, %arg1: i32) -> (i32, i32, i32) {
    %c0_i32 = arith.constant 0 : i32
    %c0_i32_0 = arith.constant 0 : i32
    return %arg0, %arg1, %c0_i32 : i32, i32, i32
  }
}

module attributes {stable_mosaic.version = 11 : i64} {
  func.func @_proj_add_ln_kernel(%arg0: i32, %arg1: memref<64x32xbf16, #tpu.memory_space<vmem>>, %arg2: memref<64x32xbf16, #tpu.memory_space<vmem>>, %arg3: memref<32x32xbf16, #tpu.memory_space<vmem>>, %arg4: memref<1x32xf32, #tpu.memory_space<vmem>>, %arg5: memref<1x32xf32, #tpu.memory_space<vmem>>, %arg6: memref<1x32xf32, #tpu.memory_space<vmem>>, %arg7: memref<64x32xbf16, #tpu.memory_space<vmem>>) attributes {dimension_semantics = [#tpu.dimension_semantics<parallel>], iteration_bounds = array<i64: 2>, scalar_prefetch = 0 : i64, scratch_operands = 0 : i64, tpu.core_type = #tpu.core_type<tc>, window_params = [{transform_indices = @transform_0, window_bounds = array<i64: 64, 32>}, {transform_indices = @transform_1, window_bounds = array<i64: 64, 32>}, {pipeline_mode = #tpu.pipeline_mode<synchronous>, transform_indices = @transform_2, window_bounds = array<i64: 32, 32>}, {pipeline_mode = #tpu.pipeline_mode<synchronous>, transform_indices = @transform_3, window_bounds = array<i64: 1, 32>}, {pipeline_mode = #tpu.pipeline_mode<synchronous>, transform_indices = @transform_4, window_bounds = array<i64: 1, 32>}, {pipeline_mode = #tpu.pipeline_mode<synchronous>, transform_indices = @transform_5, window_bounds = array<i64: 1, 32>}, {transform_indices = @transform_6, window_bounds = array<i64: 64, 32>}]} {
    %c0 = arith.constant 0 : index
    %c0_0 = arith.constant 0 : index
    %0 = vector.load %arg1[%c0, %c0_0] : memref<64x32xbf16, #tpu.memory_space<vmem>>, vector<64x32xbf16>
    %c0_1 = arith.constant 0 : index
    %c0_2 = arith.constant 0 : index
    %1 = vector.load %arg3[%c0_1, %c0_2] : memref<32x32xbf16, #tpu.memory_space<vmem>>, vector<32x32xbf16>
    %cst = arith.constant dense<0.000000e+00> : vector<64x32xf32>
    %2 = tpu.matmul %0, %1, %cst {dimension_numbers = #tpu.dot_dimension_numbers<[1], [0], [0], [1], [0, 0, 1, 1], [], []>} : vector<64x32xbf16>, vector<32x32xbf16>, vector<64x32xf32> -> vector<64x32xf32>
    %c0_3 = arith.constant 0 : index
    %c0_4 = arith.constant 0 : index
    %3 = vector.load %arg4[%c0_3, %c0_4] : memref<1x32xf32, #tpu.memory_space<vmem>>, vector<1x32xf32>
    %4 = vector.broadcast %3 : vector<1x32xf32> to vector<64x32xf32>
    %5 = arith.addf %2, %4 : vector<64x32xf32>
    %c0_5 = arith.constant 0 : index
    %c0_6 = arith.constant 0 : index
    %6 = vector.load %arg2[%c0_5, %c0_6] : memref<64x32xbf16, #tpu.memory_space<vmem>>, vector<64x32xbf16>
    %7 = arith.extf %6 : vector<64x32xbf16> to vector<64x32xf32>
    %8 = arith.addf %7, %5 : vector<64x32xf32>
    %c0_7 = arith.constant 0 : index
    %c0_8 = arith.constant 0 : index
    %9 = vector.load %arg5[%c0_7, %c0_8] : memref<1x32xf32, #tpu.memory_space<vmem>>, vector<1x32xf32>
    %c0_9 = arith.constant 0 : index
    %c0_10 = arith.constant 0 : index
    %10 = vector.load %arg6[%c0_9, %c0_10] : memref<1x32xf32, #tpu.memory_space<vmem>>, vector<1x32xf32>
    %cst_11 = arith.constant dense<0.000000e+00> : vector<64xf32>
    %11 = vector.multi_reduction <add>, %8, %cst_11 [1] : vector<64x32xf32> to vector<64xf32>
    %12 = vector.shape_cast %11 : vector<64xf32> to vector<64x1xf32>
    %cst_12 = arith.constant 3.200000e+01 : f32
    %13 = vector.broadcast %cst_12 : f32 to vector<64x1xf32>
    %14 = arith.divf %12, %13 : vector<64x1xf32>
    %15 = vector.broadcast %14 : vector<64x1xf32> to vector<64x32xf32>
    %16 = arith.subf %8, %15 : vector<64x32xf32>
    %17 = arith.mulf %16, %16 : vector<64x32xf32>
    %cst_13 = arith.constant dense<0.000000e+00> : vector<64xf32>
    %18 = vector.multi_reduction <add>, %17, %cst_13 [1] : vector<64x32xf32> to vector<64xf32>
    %19 = vector.shape_cast %18 : vector<64xf32> to vector<64x1xf32>
    %cst_14 = arith.constant 3.200000e+01 : f32
    %20 = vector.broadcast %cst_14 : f32 to vector<64x1xf32>
    %21 = arith.divf %19, %20 : vector<64x1xf32>
    %22 = vector.broadcast %14 : vector<64x1xf32> to vector<64x32xf32>
    %23 = arith.subf %8, %22 : vector<64x32xf32>
    %cst_15 = arith.constant 9.99999974E-6 : f32
    %24 = vector.broadcast %cst_15 : f32 to vector<64x1xf32>
    %25 = arith.addf %21, %24 : vector<64x1xf32>
    %26 = math.rsqrt %25 : vector<64x1xf32>
    %27 = vector.broadcast %26 : vector<64x1xf32> to vector<64x32xf32>
    %28 = arith.mulf %23, %27 : vector<64x32xf32>
    %29 = vector.broadcast %9 : vector<1x32xf32> to vector<64x32xf32>
    %30 = arith.mulf %28, %29 : vector<64x32xf32>
    %31 = vector.broadcast %10 : vector<1x32xf32> to vector<64x32xf32>
    %32 = arith.addf %30, %31 : vector<64x32xf32>
    %33 = arith.truncf %32 : vector<64x32xf32> to vector<64x32xbf16>
    %c0_16 = arith.constant 0 : index
    %c0_17 = arith.constant 0 : index
    %34 = vector.load %arg7[%c0_16, %c0_17] : memref<64x32xbf16, #tpu.memory_space<vmem>>, vector<64x32xbf16>
    tpu.vector_store %arg7[%c0_16, %c0_17], %33 {strides = array<i32>} : memref<64x32xbf16, #tpu.memory_space<vmem>>, vector<64x32xbf16>,
    return
  }
  func.func @transform_0(%arg0: i32) -> (i32, i32) {
    %c0_i32 = arith.constant 0 : i32
    %c0_i32_0 = arith.constant 0 : i32
    return %arg0, %c0_i32 : i32, i32
  }
  func.func @transform_1(%arg0: i32) -> (i32, i32) {
    %c0_i32 = arith.constant 0 : i32
    %c0_i32_0 = arith.constant 0 : i32
    return %arg0, %c0_i32 : i32, i32
  }
  func.func @transform_2(%arg0: i32) -> (i32, i32) {
    %c0_i32 = arith.constant 0 : i32
    %c0_i32_0 = arith.constant 0 : i32
    %c0_i32_1 = arith.constant 0 : i32
    return %c0_i32, %c0_i32_0 : i32, i32
  }
  func.func @transform_3(%arg0: i32) -> (i32, i32) {
    %c0_i32 = arith.constant 0 : i32
    %c0_i32_0 = arith.constant 0 : i32
    %c0_i32_1 = arith.constant 0 : i32
    return %c0_i32, %c0_i32_0 : i32, i32
  }
  func.func @transform_4(%arg0: i32) -> (i32, i32) {
    %c0_i32 = arith.constant 0 : i32
    %c0_i32_0 = arith.constant 0 : i32
    %c0_i32_1 = arith.constant 0 : i32
    return %c0_i32, %c0_i32_0 : i32, i32
  }
  func.func @transform_5(%arg0: i32) -> (i32, i32) {
    %c0_i32 = arith.constant 0 : i32
    %c0_i32_0 = arith.constant 0 : i32
    %c0_i32_1 = arith.constant 0 : i32
    return %c0_i32, %c0_i32_0 : i32, i32
  }
  func.func @transform_6(%arg0: i32) -> (i32, i32) {
    %c0_i32 = arith.constant 0 : i32
    %c0_i32_0 = arith.constant 0 : i32
    return %arg0, %c0_i32 : i32, i32
  }
}

module attributes {stable_mosaic.version = 11 : i64} {
  func.func @_ffn_ln_kernel(%arg0: i32, %arg1: memref<64x32xbf16, #tpu.memory_space<vmem>>, %arg2: memref<32x64xbf16, #tpu.memory_space<vmem>>, %arg3: memref<1x64xf32, #tpu.memory_space<vmem>>, %arg4: memref<64x32xbf16, #tpu.memory_space<vmem>>, %arg5: memref<1x32xf32, #tpu.memory_space<vmem>>, %arg6: memref<1x32xf32, #tpu.memory_space<vmem>>, %arg7: memref<1x32xf32, #tpu.memory_space<vmem>>, %arg8: memref<64x32xbf16, #tpu.memory_space<vmem>>) attributes {dimension_semantics = [#tpu.dimension_semantics<parallel>], iteration_bounds = array<i64: 2>, scalar_prefetch = 0 : i64, scratch_operands = 0 : i64, tpu.core_type = #tpu.core_type<tc>, window_params = [{transform_indices = @transform_0, window_bounds = array<i64: 64, 32>}, {pipeline_mode = #tpu.pipeline_mode<synchronous>, transform_indices = @transform_1, window_bounds = array<i64: 32, 64>}, {pipeline_mode = #tpu.pipeline_mode<synchronous>, transform_indices = @transform_2, window_bounds = array<i64: 1, 64>}, {pipeline_mode = #tpu.pipeline_mode<synchronous>, transform_indices = @transform_3, window_bounds = array<i64: 64, 32>}, {pipeline_mode = #tpu.pipeline_mode<synchronous>, transform_indices = @transform_4, window_bounds = array<i64: 1, 32>}, {pipeline_mode = #tpu.pipeline_mode<synchronous>, transform_indices = @transform_5, window_bounds = array<i64: 1, 32>}, {pipeline_mode = #tpu.pipeline_mode<synchronous>, transform_indices = @transform_6, window_bounds = array<i64: 1, 32>}, {transform_indices = @transform_7, window_bounds = array<i64: 64, 32>}]} {
    %c0 = arith.constant 0 : index
    %c0_0 = arith.constant 0 : index
    %0 = vector.load %arg1[%c0, %c0_0] : memref<64x32xbf16, #tpu.memory_space<vmem>>, vector<64x32xbf16>
    %c0_1 = arith.constant 0 : index
    %c0_2 = arith.constant 0 : index
    %1 = vector.load %arg2[%c0_1, %c0_2] : memref<32x64xbf16, #tpu.memory_space<vmem>>, vector<32x64xbf16>
    %cst = arith.constant dense<0.000000e+00> : vector<64x64xf32>
    %2 = tpu.matmul %0, %1, %cst {dimension_numbers = #tpu.dot_dimension_numbers<[1], [0], [0], [1], [0, 0, 1, 1], [], []>} : vector<64x32xbf16>, vector<32x64xbf16>, vector<64x64xf32> -> vector<64x64xf32>
    %c0_3 = arith.constant 0 : index
    %c0_4 = arith.constant 0 : index
    %3 = vector.load %arg3[%c0_3, %c0_4] : memref<1x64xf32, #tpu.memory_space<vmem>>, vector<1x64xf32>
    %4 = vector.broadcast %3 : vector<1x64xf32> to vector<64x64xf32>
    %5 = arith.addf %2, %4 : vector<64x64xf32>
    %cst_5 = arith.constant 0.000000e+00 : f32
    %6 = vector.broadcast %cst_5 : f32 to vector<64x64xf32>
    %7 = arith.maximumf %5, %6 : vector<64x64xf32>
    %8 = arith.truncf %7 : vector<64x64xf32> to vector<64x64xbf16>
    %c0_6 = arith.constant 0 : index
    %c0_7 = arith.constant 0 : index
    %9 = vector.load %arg4[%c0_6, %c0_7] : memref<64x32xbf16, #tpu.memory_space<vmem>>, vector<64x32xbf16>
    %cst_8 = arith.constant dense<0.000000e+00> : vector<64x32xf32>
    %10 = tpu.matmul %8, %9, %cst_8 {dimension_numbers = #tpu.dot_dimension_numbers<[1], [0], [0], [1], [0, 0, 1, 1], [], []>} : vector<64x64xbf16>, vector<64x32xbf16>, vector<64x32xf32> -> vector<64x32xf32>
    %c0_9 = arith.constant 0 : index
    %c0_10 = arith.constant 0 : index
    %11 = vector.load %arg5[%c0_9, %c0_10] : memref<1x32xf32, #tpu.memory_space<vmem>>, vector<1x32xf32>
    %12 = vector.broadcast %11 : vector<1x32xf32> to vector<64x32xf32>
    %13 = arith.addf %10, %12 : vector<64x32xf32>
    %14 = arith.extf %0 : vector<64x32xbf16> to vector<64x32xf32>
    %15 = arith.addf %14, %13 : vector<64x32xf32>
    %c0_11 = arith.constant 0 : index
    %c0_12 = arith.constant 0 : index
    %16 = vector.load %arg6[%c0_11, %c0_12] : memref<1x32xf32, #tpu.memory_space<vmem>>, vector<1x32xf32>
    %c0_13 = arith.constant 0 : index
    %c0_14 = arith.constant 0 : index
    %17 = vector.load %arg7[%c0_13, %c0_14] : memref<1x32xf32, #tpu.memory_space<vmem>>, vector<1x32xf32>
    %cst_15 = arith.constant dense<0.000000e+00> : vector<64xf32>
    %18 = vector.multi_reduction <add>, %15, %cst_15 [1] : vector<64x32xf32> to vector<64xf32>
    %19 = vector.shape_cast %18 : vector<64xf32> to vector<64x1xf32>
    %cst_16 = arith.constant 3.200000e+01 : f32
    %20 = vector.broadcast %cst_16 : f32 to vector<64x1xf32>
    %21 = arith.divf %19, %20 : vector<64x1xf32>
    %22 = vector.broadcast %21 : vector<64x1xf32> to vector<64x32xf32>
    %23 = arith.subf %15, %22 : vector<64x32xf32>
    %24 = arith.mulf %23, %23 : vector<64x32xf32>
    %cst_17 = arith.constant dense<0.000000e+00> : vector<64xf32>
    %25 = vector.multi_reduction <add>, %24, %cst_17 [1] : vector<64x32xf32> to vector<64xf32>
    %26 = vector.shape_cast %25 : vector<64xf32> to vector<64x1xf32>
    %cst_18 = arith.constant 3.200000e+01 : f32
    %27 = vector.broadcast %cst_18 : f32 to vector<64x1xf32>
    %28 = arith.divf %26, %27 : vector<64x1xf32>
    %29 = vector.broadcast %21 : vector<64x1xf32> to vector<64x32xf32>
    %30 = arith.subf %15, %29 : vector<64x32xf32>
    %cst_19 = arith.constant 9.99999974E-6 : f32
    %31 = vector.broadcast %cst_19 : f32 to vector<64x1xf32>
    %32 = arith.addf %28, %31 : vector<64x1xf32>
    %33 = math.rsqrt %32 : vector<64x1xf32>
    %34 = vector.broadcast %33 : vector<64x1xf32> to vector<64x32xf32>
    %35 = arith.mulf %30, %34 : vector<64x32xf32>
    %36 = vector.broadcast %16 : vector<1x32xf32> to vector<64x32xf32>
    %37 = arith.mulf %35, %36 : vector<64x32xf32>
    %38 = vector.broadcast %17 : vector<1x32xf32> to vector<64x32xf32>
    %39 = arith.addf %37, %38 : vector<64x32xf32>
    %40 = arith.truncf %39 : vector<64x32xf32> to vector<64x32xbf16>
    %c0_20 = arith.constant 0 : index
    %c0_21 = arith.constant 0 : index
    %41 = vector.load %arg8[%c0_20, %c0_21] : memref<64x32xbf16, #tpu.memory_space<vmem>>, vector<64x32xbf16>
    tpu.vector_store %arg8[%c0_20, %c0_21], %40 {strides = array<i32>} : memref<64x32xbf16, #tpu.memory_space<vmem>>, vector<64x32xbf16>,
    return
  }
  func.func @transform_0(%arg0: i32) -> (i32, i32) {
    %c0_i32 = arith.constant 0 : i32
    %c0_i32_0 = arith.constant 0 : i32
    return %arg0, %c0_i32 : i32, i32
  }
  func.func @transform_1(%arg0: i32) -> (i32, i32) {
    %c0_i32 = arith.constant 0 : i32
    %c0_i32_0 = arith.constant 0 : i32
    %c0_i32_1 = arith.constant 0 : i32
    return %c0_i32, %c0_i32_0 : i32, i32
  }
  func.func @transform_2(%arg0: i32) -> (i32, i32) {
    %c0_i32 = arith.constant 0 : i32
    %c0_i32_0 = arith.constant 0 : i32
    %c0_i32_1 = arith.constant 0 : i32
    return %c0_i32, %c0_i32_0 : i32, i32
  }
  func.func @transform_3(%arg0: i32) -> (i32, i32) {
    %c0_i32 = arith.constant 0 : i32
    %c0_i32_0 = arith.constant 0 : i32
    %c0_i32_1 = arith.constant 0 : i32
    return %c0_i32, %c0_i32_0 : i32, i32
  }
  func.func @transform_4(%arg0: i32) -> (i32, i32) {
    %c0_i32 = arith.constant 0 : i32
    %c0_i32_0 = arith.constant 0 : i32
    %c0_i32_1 = arith.constant 0 : i32
    return %c0_i32, %c0_i32_0 : i32, i32
  }
  func.func @transform_5(%arg0: i32) -> (i32, i32) {
    %c0_i32 = arith.constant 0 : i32
    %c0_i32_0 = arith.constant 0 : i32
    %c0_i32_1 = arith.constant 0 : i32
    return %c0_i32, %c0_i32_0 : i32, i32
  }
  func.func @transform_6(%arg0: i32) -> (i32, i32) {
    %c0_i32 = arith.constant 0 : i32
    %c0_i32_0 = arith.constant 0 : i32
    %c0_i32_1 = arith.constant 0 : i32
    return %c0_i32, %c0_i32_0 : i32, i32
  }
  func.func @transform_7(%arg0: i32) -> (i32, i32) {
    %c0_i32 = arith.constant 0 : i32
    %c0_i32_0 = arith.constant 0 : i32
    return %arg0, %c0_i32 : i32, i32
  }
}

module attributes {stable_mosaic.version = 11 : i64} {
  func.func @_ffn_ln_kernel(%arg0: i32, %arg1: memref<64x32xbf16, #tpu.memory_space<vmem>>, %arg2: memref<32x64xbf16, #tpu.memory_space<vmem>>, %arg3: memref<1x64xf32, #tpu.memory_space<vmem>>, %arg4: memref<64x32xbf16, #tpu.memory_space<vmem>>, %arg5: memref<1x32xf32, #tpu.memory_space<vmem>>, %arg6: memref<1x32xf32, #tpu.memory_space<vmem>>, %arg7: memref<1x32xf32, #tpu.memory_space<vmem>>, %arg8: memref<64x32xbf16, #tpu.memory_space<vmem>>) attributes {dimension_semantics = [#tpu.dimension_semantics<parallel>], iteration_bounds = array<i64: 2>, scalar_prefetch = 0 : i64, scratch_operands = 0 : i64, tpu.core_type = #tpu.core_type<tc>, window_params = [{transform_indices = @transform_0, window_bounds = array<i64: 64, 32>}, {pipeline_mode = #tpu.pipeline_mode<synchronous>, transform_indices = @transform_1, window_bounds = array<i64: 32, 64>}, {pipeline_mode = #tpu.pipeline_mode<synchronous>, transform_indices = @transform_2, window_bounds = array<i64: 1, 64>}, {pipeline_mode = #tpu.pipeline_mode<synchronous>, transform_indices = @transform_3, window_bounds = array<i64: 64, 32>}, {pipeline_mode = #tpu.pipeline_mode<synchronous>, transform_indices = @transform_4, window_bounds = array<i64: 1, 32>}, {pipeline_mode = #tpu.pipeline_mode<synchronous>, transform_indices = @transform_5, window_bounds = array<i64: 1, 32>}, {pipeline_mode = #tpu.pipeline_mode<synchronous>, transform_indices = @transform_6, window_bounds = array<i64: 1, 32>}, {transform_indices = @transform_7, window_bounds = array<i64: 64, 32>}]} {
    %c0 = arith.constant 0 : index
    %c0_0 = arith.constant 0 : index
    %0 = vector.load %arg1[%c0, %c0_0] : memref<64x32xbf16, #tpu.memory_space<vmem>>, vector<64x32xbf16>
    %c0_1 = arith.constant 0 : index
    %c0_2 = arith.constant 0 : index
    %1 = vector.load %arg2[%c0_1, %c0_2] : memref<32x64xbf16, #tpu.memory_space<vmem>>, vector<32x64xbf16>
    %cst = arith.constant dense<0.000000e+00> : vector<64x64xf32>
    %2 = tpu.matmul %0, %1, %cst {dimension_numbers = #tpu.dot_dimension_numbers<[1], [0], [0], [1], [0, 0, 1, 1], [], []>} : vector<64x32xbf16>, vector<32x64xbf16>, vector<64x64xf32> -> vector<64x64xf32>
    %c0_3 = arith.constant 0 : index
    %c0_4 = arith.constant 0 : index
    %3 = vector.load %arg3[%c0_3, %c0_4] : memref<1x64xf32, #tpu.memory_space<vmem>>, vector<1x64xf32>
    %4 = vector.broadcast %3 : vector<1x64xf32> to vector<64x64xf32>
    %5 = arith.addf %2, %4 : vector<64x64xf32>
    %cst_5 = arith.constant 0.000000e+00 : f32
    %6 = vector.broadcast %cst_5 : f32 to vector<64x64xf32>
    %7 = arith.maximumf %5, %6 : vector<64x64xf32>
    %8 = arith.truncf %7 : vector<64x64xf32> to vector<64x64xbf16>
    %c0_6 = arith.constant 0 : index
    %c0_7 = arith.constant 0 : index
    %9 = vector.load %arg4[%c0_6, %c0_7] : memref<64x32xbf16, #tpu.memory_space<vmem>>, vector<64x32xbf16>
    %cst_8 = arith.constant dense<0.000000e+00> : vector<64x32xf32>
    %10 = tpu.matmul %8, %9, %cst_8 {dimension_numbers = #tpu.dot_dimension_numbers<[1], [0], [0], [1], [0, 0, 1, 1], [], []>} : vector<64x64xbf16>, vector<64x32xbf16>, vector<64x32xf32> -> vector<64x32xf32>
    %c0_9 = arith.constant 0 : index
    %c0_10 = arith.constant 0 : index
    %11 = vector.load %arg5[%c0_9, %c0_10] : memref<1x32xf32, #tpu.memory_space<vmem>>, vector<1x32xf32>
    %12 = vector.broadcast %11 : vector<1x32xf32> to vector<64x32xf32>
    %13 = arith.addf %10, %12 : vector<64x32xf32>
    %14 = arith.extf %0 : vector<64x32xbf16> to vector<64x32xf32>
    %15 = arith.addf %14, %13 : vector<64x32xf32>
    %c0_11 = arith.constant 0 : index
    %c0_12 = arith.constant 0 : index
    %16 = vector.load %arg6[%c0_11, %c0_12] : memref<1x32xf32, #tpu.memory_space<vmem>>, vector<1x32xf32>
    %c0_13 = arith.constant 0 : index
    %c0_14 = arith.constant 0 : index
    %17 = vector.load %arg7[%c0_13, %c0_14] : memref<1x32xf32, #tpu.memory_space<vmem>>, vector<1x32xf32>
    %cst_15 = arith.constant dense<0.000000e+00> : vector<64xf32>
    %18 = vector.multi_reduction <add>, %15, %cst_15 [1] : vector<64x32xf32> to vector<64xf32>
    %19 = vector.shape_cast %18 : vector<64xf32> to vector<64x1xf32>
    %cst_16 = arith.constant 3.200000e+01 : f32
    %20 = vector.broadcast %cst_16 : f32 to vector<64x1xf32>
    %21 = arith.divf %19, %20 : vector<64x1xf32>
    %22 = vector.broadcast %21 : vector<64x1xf32> to vector<64x32xf32>
    %23 = arith.subf %15, %22 : vector<64x32xf32>
    %24 = arith.mulf %23, %23 : vector<64x32xf32>
    %cst_17 = arith.constant dense<0.000000e+00> : vector<64xf32>
    %25 = vector.multi_reduction <add>, %24, %cst_17 [1] : vector<64x32xf32> to vector<64xf32>
    %26 = vector.shape_cast %25 : vector<64xf32> to vector<64x1xf32>
    %cst_18 = arith.constant 3.200000e+01 : f32
    %27 = vector.broadcast %cst_18 : f32 to vector<64x1xf32>
    %28 = arith.divf %26, %27 : vector<64x1xf32>
    %29 = vector.broadcast %21 : vector<64x1xf32> to vector<64x32xf32>
    %30 = arith.subf %15, %29 : vector<64x32xf32>
    %cst_19 = arith.constant 9.99999974E-6 : f32
    %31 = vector.broadcast %cst_19 : f32 to vector<64x1xf32>
    %32 = arith.addf %28, %31 : vector<64x1xf32>
    %33 = math.rsqrt %32 : vector<64x1xf32>
    %34 = vector.broadcast %33 : vector<64x1xf32> to vector<64x32xf32>
    %35 = arith.mulf %30, %34 : vector<64x32xf32>
    %36 = vector.broadcast %16 : vector<1x32xf32> to vector<64x32xf32>
    %37 = arith.mulf %35, %36 : vector<64x32xf32>
    %38 = vector.broadcast %17 : vector<1x32xf32> to vector<64x32xf32>
    %39 = arith.addf %37, %38 : vector<64x32xf32>
    %40 = arith.truncf %39 : vector<64x32xf32> to vector<64x32xbf16>
    %c0_20 = arith.constant 0 : index
    %c0_21 = arith.constant 0 : index
    %41 = vector.load %arg8[%c0_20, %c0_21] : memref<64x32xbf16, #tpu.memory_space<vmem>>, vector<64x32xbf16>
    tpu.vector_store %arg8[%c0_20, %c0_21], %40 {strides = array<i32>} : memref<64x32xbf16, #tpu.memory_space<vmem>>, vector<64x32xbf16>,
    return
  }
  func.func @transform_0(%arg0: i32) -> (i32, i32) {
    %c0_i32 = arith.constant 0 : i32
    %c0_i32_0 = arith.constant 0 : i32
    return %arg0, %c0_i32 : i32, i32
  }
  func.func @transform_1(%arg0: i32) -> (i32, i32) {
    %c0_i32 = arith.constant 0 : i32
    %c0_i32_0 = arith.constant 0 : i32
    %c0_i32_1 = arith.constant 0 : i32
    return %c0_i32, %c0_i32_0 : i32, i32
  }
  func.func @transform_2(%arg0: i32) -> (i32, i32) {
    %c0_i32 = arith.constant 0 : i32
    %c0_i32_0 = arith.constant 0 : i32
    %c0_i32_1 = arith.constant 0 : i32
    return %c0_i32, %c0_i32_0 : i32, i32
  }
  func.func @transform_3(%arg0: i32) -> (i32, i32) {
    %c0_i32 = arith.constant 0 : i32
    %c0_i32_0 = arith.constant 0 : i32
    %c0_i32_1 = arith.constant 0 : i32
    return %c0_i32, %c0_i32_0 : i32, i32
  }
  func.func @transform_4(%arg0: i32) -> (i32, i32) {
    %c0_i32 = arith.constant 0 : i32
    %c0_i32_0 = arith.constant 0 : i32
    %c0_i32_1 = arith.constant 0 : i32
    return %c0_i32, %c0_i32_0 : i32, i32
  }
  func.func @transform_5(%arg0: i32) -> (i32, i32) {
    %c0_i32 = arith.constant 0 : i32
    %c0_i32_0 = arith.constant 0 : i32
    %c0_i32_1 = arith.constant 0 : i32
    return %c0_i32, %c0_i32_0 : i32, i32
  }
  func.func @transform_6(%arg0: i32) -> (i32, i32) {
    %c0_i32 = arith.constant 0 : i32
    %c0_i32_0 = arith.constant 0 : i32
    %c0_i32_1 = arith.constant 0 : i32
    return %c0_i32, %c0_i32_0 : i32, i32
  }
  func.func @transform_7(%arg0: i32) -> (i32, i32) {
    %c0_i32 = arith.constant 0 : i32
    %c0_i32_0 = arith.constant 0 : i32
    return %arg0, %c0_i32 : i32, i32
  }
}

module attributes {stable_mosaic.version = 11 : i64} {
  func.func @_kv_kernel(%arg0: i32, %arg1: memref<64x32xbf16, #tpu.memory_space<vmem>>, %arg2: memref<64x32xbf16, #tpu.memory_space<vmem>>, %arg3: memref<32x32xbf16, #tpu.memory_space<vmem>>, %arg4: memref<1x32xf32, #tpu.memory_space<vmem>>, %arg5: memref<32x32xbf16, #tpu.memory_space<vmem>>, %arg6: memref<1x32xf32, #tpu.memory_space<vmem>>, %arg7: memref<64x32xbf16, #tpu.memory_space<vmem>>, %arg8: memref<64x32xbf16, #tpu.memory_space<vmem>>) attributes {dimension_semantics = [#tpu.dimension_semantics<parallel>], iteration_bounds = array<i64: 2>, scalar_prefetch = 0 : i64, scratch_operands = 0 : i64, tpu.core_type = #tpu.core_type<tc>, window_params = [{transform_indices = @transform_0, window_bounds = array<i64: 64, 32>}, {transform_indices = @transform_1, window_bounds = array<i64: 64, 32>}, {pipeline_mode = #tpu.pipeline_mode<synchronous>, transform_indices = @transform_2, window_bounds = array<i64: 32, 32>}, {pipeline_mode = #tpu.pipeline_mode<synchronous>, transform_indices = @transform_3, window_bounds = array<i64: 1, 32>}, {pipeline_mode = #tpu.pipeline_mode<synchronous>, transform_indices = @transform_4, window_bounds = array<i64: 32, 32>}, {pipeline_mode = #tpu.pipeline_mode<synchronous>, transform_indices = @transform_5, window_bounds = array<i64: 1, 32>}, {transform_indices = @transform_6, window_bounds = array<i64: 64, 32>}, {transform_indices = @transform_7, window_bounds = array<i64: 64, 32>}]} {
    %c0 = arith.constant 0 : index
    %c0_0 = arith.constant 0 : index
    %0 = vector.load %arg1[%c0, %c0_0] : memref<64x32xbf16, #tpu.memory_space<vmem>>, vector<64x32xbf16>
    %1 = arith.extf %0 : vector<64x32xbf16> to vector<64x32xf32>
    %c0_1 = arith.constant 0 : index
    %c0_2 = arith.constant 0 : index
    %2 = vector.load %arg2[%c0_1, %c0_2] : memref<64x32xbf16, #tpu.memory_space<vmem>>, vector<64x32xbf16>
    %3 = arith.extf %2 : vector<64x32xbf16> to vector<64x32xf32>
    %4 = arith.addf %1, %3 : vector<64x32xf32>
    %5 = arith.truncf %4 : vector<64x32xf32> to vector<64x32xbf16>
    %c0_3 = arith.constant 0 : index
    %c0_4 = arith.constant 0 : index
    %6 = vector.load %arg3[%c0_3, %c0_4] : memref<32x32xbf16, #tpu.memory_space<vmem>>, vector<32x32xbf16>
    %cst = arith.constant dense<0.000000e+00> : vector<64x32xf32>
    %7 = tpu.matmul %5, %6, %cst {dimension_numbers = #tpu.dot_dimension_numbers<[1], [0], [0], [1], [0, 0, 1, 1], [], []>} : vector<64x32xbf16>, vector<32x32xbf16>, vector<64x32xf32> -> vector<64x32xf32>
    %c0_5 = arith.constant 0 : index
    %c0_6 = arith.constant 0 : index
    %8 = vector.load %arg4[%c0_5, %c0_6] : memref<1x32xf32, #tpu.memory_space<vmem>>, vector<1x32xf32>
    %9 = vector.broadcast %8 : vector<1x32xf32> to vector<64x32xf32>
    %10 = arith.addf %7, %9 : vector<64x32xf32>
    %11 = arith.truncf %10 : vector<64x32xf32> to vector<64x32xbf16>
    %c0_7 = arith.constant 0 : index
    %c0_8 = arith.constant 0 : index
    %12 = vector.load %arg7[%c0_7, %c0_8] : memref<64x32xbf16, #tpu.memory_space<vmem>>, vector<64x32xbf16>
    tpu.vector_store %arg7[%c0_7, %c0_8], %11 {strides = array<i32>} : memref<64x32xbf16, #tpu.memory_space<vmem>>, vector<64x32xbf16>,
    %c0_9 = arith.constant 0 : index
    %c0_10 = arith.constant 0 : index
    %13 = vector.load %arg5[%c0_9, %c0_10] : memref<32x32xbf16, #tpu.memory_space<vmem>>, vector<32x32xbf16>
    %cst_11 = arith.constant dense<0.000000e+00> : vector<64x32xf32>
    %14 = tpu.matmul %0, %13, %cst_11 {dimension_numbers = #tpu.dot_dimension_numbers<[1], [0], [0], [1], [0, 0, 1, 1], [], []>} : vector<64x32xbf16>, vector<32x32xbf16>, vector<64x32xf32> -> vector<64x32xf32>
    %c0_12 = arith.constant 0 : index
    %c0_13 = arith.constant 0 : index
    %15 = vector.load %arg6[%c0_12, %c0_13] : memref<1x32xf32, #tpu.memory_space<vmem>>, vector<1x32xf32>
    %16 = vector.broadcast %15 : vector<1x32xf32> to vector<64x32xf32>
    %17 = arith.addf %14, %16 : vector<64x32xf32>
    %18 = arith.truncf %17 : vector<64x32xf32> to vector<64x32xbf16>
    %c0_14 = arith.constant 0 : index
    %c0_15 = arith.constant 0 : index
    %19 = vector.load %arg8[%c0_14, %c0_15] : memref<64x32xbf16, #tpu.memory_space<vmem>>, vector<64x32xbf16>
    tpu.vector_store %arg8[%c0_14, %c0_15], %18 {strides = array<i32>} : memref<64x32xbf16, #tpu.memory_space<vmem>>, vector<64x32xbf16>,
    return
  }
  func.func @transform_0(%arg0: i32) -> (i32, i32) {
    %c0_i32 = arith.constant 0 : i32
    %c0_i32_0 = arith.constant 0 : i32
    return %arg0, %c0_i32 : i32, i32
  }
  func.func @transform_1(%arg0: i32) -> (i32, i32) {
    %c0_i32 = arith.constant 0 : i32
    %c0_i32_0 = arith.constant 0 : i32
    return %arg0, %c0_i32 : i32, i32
  }
  func.func @transform_2(%arg0: i32) -> (i32, i32) {
    %c0_i32 = arith.constant 0 : i32
    %c0_i32_0 = arith.constant 0 : i32
    %c0_i32_1 = arith.constant 0 : i32
    return %c0_i32, %c0_i32_0 : i32, i32
  }
  func.func @transform_3(%arg0: i32) -> (i32, i32) {
    %c0_i32 = arith.constant 0 : i32
    %c0_i32_0 = arith.constant 0 : i32
    %c0_i32_1 = arith.constant 0 : i32
    return %c0_i32, %c0_i32_0 : i32, i32
  }
  func.func @transform_4(%arg0: i32) -> (i32, i32) {
    %c0_i32 = arith.constant 0 : i32
    %c0_i32_0 = arith.constant 0 : i32
    %c0_i32_1 = arith.constant 0 : i32
    return %c0_i32, %c0_i32_0 : i32, i32
  }
  func.func @transform_5(%arg0: i32) -> (i32, i32) {
    %c0_i32 = arith.constant 0 : i32
    %c0_i32_0 = arith.constant 0 : i32
    %c0_i32_1 = arith.constant 0 : i32
    return %c0_i32, %c0_i32_0 : i32, i32
  }
  func.func @transform_6(%arg0: i32) -> (i32, i32) {
    %c0_i32 = arith.constant 0 : i32
    %c0_i32_0 = arith.constant 0 : i32
    return %arg0, %c0_i32 : i32, i32
  }
  func.func @transform_7(%arg0: i32) -> (i32, i32) {
    %c0_i32 = arith.constant 0 : i32
    %c0_i32_0 = arith.constant 0 : i32
    return %arg0, %c0_i32 : i32, i32
  }
}

module attributes {stable_mosaic.version = 11 : i64} {
  func.func @_kv_kernel(%arg0: i32, %arg1: memref<64x32xbf16, #tpu.memory_space<vmem>>, %arg2: memref<64x32xbf16, #tpu.memory_space<vmem>>, %arg3: memref<32x32xbf16, #tpu.memory_space<vmem>>, %arg4: memref<1x32xf32, #tpu.memory_space<vmem>>, %arg5: memref<32x32xbf16, #tpu.memory_space<vmem>>, %arg6: memref<1x32xf32, #tpu.memory_space<vmem>>, %arg7: memref<64x32xbf16, #tpu.memory_space<vmem>>, %arg8: memref<64x32xbf16, #tpu.memory_space<vmem>>) attributes {dimension_semantics = [#tpu.dimension_semantics<parallel>], iteration_bounds = array<i64: 2>, scalar_prefetch = 0 : i64, scratch_operands = 0 : i64, tpu.core_type = #tpu.core_type<tc>, window_params = [{transform_indices = @transform_0, window_bounds = array<i64: 64, 32>}, {transform_indices = @transform_1, window_bounds = array<i64: 64, 32>}, {pipeline_mode = #tpu.pipeline_mode<synchronous>, transform_indices = @transform_2, window_bounds = array<i64: 32, 32>}, {pipeline_mode = #tpu.pipeline_mode<synchronous>, transform_indices = @transform_3, window_bounds = array<i64: 1, 32>}, {pipeline_mode = #tpu.pipeline_mode<synchronous>, transform_indices = @transform_4, window_bounds = array<i64: 32, 32>}, {pipeline_mode = #tpu.pipeline_mode<synchronous>, transform_indices = @transform_5, window_bounds = array<i64: 1, 32>}, {transform_indices = @transform_6, window_bounds = array<i64: 64, 32>}, {transform_indices = @transform_7, window_bounds = array<i64: 64, 32>}]} {
    %c0 = arith.constant 0 : index
    %c0_0 = arith.constant 0 : index
    %0 = vector.load %arg1[%c0, %c0_0] : memref<64x32xbf16, #tpu.memory_space<vmem>>, vector<64x32xbf16>
    %1 = arith.extf %0 : vector<64x32xbf16> to vector<64x32xf32>
    %c0_1 = arith.constant 0 : index
    %c0_2 = arith.constant 0 : index
    %2 = vector.load %arg2[%c0_1, %c0_2] : memref<64x32xbf16, #tpu.memory_space<vmem>>, vector<64x32xbf16>
    %3 = arith.extf %2 : vector<64x32xbf16> to vector<64x32xf32>
    %4 = arith.addf %1, %3 : vector<64x32xf32>
    %5 = arith.truncf %4 : vector<64x32xf32> to vector<64x32xbf16>
    %c0_3 = arith.constant 0 : index
    %c0_4 = arith.constant 0 : index
    %6 = vector.load %arg3[%c0_3, %c0_4] : memref<32x32xbf16, #tpu.memory_space<vmem>>, vector<32x32xbf16>
    %cst = arith.constant dense<0.000000e+00> : vector<64x32xf32>
    %7 = tpu.matmul %5, %6, %cst {dimension_numbers = #tpu.dot_dimension_numbers<[1], [0], [0], [1], [0, 0, 1, 1], [], []>} : vector<64x32xbf16>, vector<32x32xbf16>, vector<64x32xf32> -> vector<64x32xf32>
    %c0_5 = arith.constant 0 : index
    %c0_6 = arith.constant 0 : index
    %8 = vector.load %arg4[%c0_5, %c0_6] : memref<1x32xf32, #tpu.memory_space<vmem>>, vector<1x32xf32>
    %9 = vector.broadcast %8 : vector<1x32xf32> to vector<64x32xf32>
    %10 = arith.addf %7, %9 : vector<64x32xf32>
    %11 = arith.truncf %10 : vector<64x32xf32> to vector<64x32xbf16>
    %c0_7 = arith.constant 0 : index
    %c0_8 = arith.constant 0 : index
    %12 = vector.load %arg7[%c0_7, %c0_8] : memref<64x32xbf16, #tpu.memory_space<vmem>>, vector<64x32xbf16>
    tpu.vector_store %arg7[%c0_7, %c0_8], %11 {strides = array<i32>} : memref<64x32xbf16, #tpu.memory_space<vmem>>, vector<64x32xbf16>,
    %c0_9 = arith.constant 0 : index
    %c0_10 = arith.constant 0 : index
    %13 = vector.load %arg5[%c0_9, %c0_10] : memref<32x32xbf16, #tpu.memory_space<vmem>>, vector<32x32xbf16>
    %cst_11 = arith.constant dense<0.000000e+00> : vector<64x32xf32>
    %14 = tpu.matmul %0, %13, %cst_11 {dimension_numbers = #tpu.dot_dimension_numbers<[1], [0], [0], [1], [0, 0, 1, 1], [], []>} : vector<64x32xbf16>, vector<32x32xbf16>, vector<64x32xf32> -> vector<64x32xf32>
    %c0_12 = arith.constant 0 : index
    %c0_13 = arith.constant 0 : index
    %15 = vector.load %arg6[%c0_12, %c0_13] : memref<1x32xf32, #tpu.memory_space<vmem>>, vector<1x32xf32>
    %16 = vector.broadcast %15 : vector<1x32xf32> to vector<64x32xf32>
    %17 = arith.addf %14, %16 : vector<64x32xf32>
    %18 = arith.truncf %17 : vector<64x32xf32> to vector<64x32xbf16>
    %c0_14 = arith.constant 0 : index
    %c0_15 = arith.constant 0 : index
    %19 = vector.load %arg8[%c0_14, %c0_15] : memref<64x32xbf16, #tpu.memory_space<vmem>>, vector<64x32xbf16>
    tpu.vector_store %arg8[%c0_14, %c0_15], %18 {strides = array<i32>} : memref<64x32xbf16, #tpu.memory_space<vmem>>, vector<64x32xbf16>,
    return
  }
  func.func @transform_0(%arg0: i32) -> (i32, i32) {
    %c0_i32 = arith.constant 0 : i32
    %c0_i32_0 = arith.constant 0 : i32
    return %arg0, %c0_i32 : i32, i32
  }
  func.func @transform_1(%arg0: i32) -> (i32, i32) {
    %c0_i32 = arith.constant 0 : i32
    %c0_i32_0 = arith.constant 0 : i32
    return %arg0, %c0_i32 : i32, i32
  }
  func.func @transform_2(%arg0: i32) -> (i32, i32) {
    %c0_i32 = arith.constant 0 : i32
    %c0_i32_0 = arith.constant 0 : i32
    %c0_i32_1 = arith.constant 0 : i32
    return %c0_i32, %c0_i32_0 : i32, i32
  }
  func.func @transform_3(%arg0: i32) -> (i32, i32) {
    %c0_i32 = arith.constant 0 : i32
    %c0_i32_0 = arith.constant 0 : i32
    %c0_i32_1 = arith.constant 0 : i32
    return %c0_i32, %c0_i32_0 : i32, i32
  }
  func.func @transform_4(%arg0: i32) -> (i32, i32) {
    %c0_i32 = arith.constant 0 : i32
    %c0_i32_0 = arith.constant 0 : i32
    %c0_i32_1 = arith.constant 0 : i32
    return %c0_i32, %c0_i32_0 : i32, i32
  }
  func.func @transform_5(%arg0: i32) -> (i32, i32) {
    %c0_i32 = arith.constant 0 : i32
    %c0_i32_0 = arith.constant 0 : i32
    %c0_i32_1 = arith.constant 0 : i32
    return %c0_i32, %c0_i32_0 : i32, i32
  }
  func.func @transform_6(%arg0: i32) -> (i32, i32) {
    %c0_i32 = arith.constant 0 : i32
    %c0_i32_0 = arith.constant 0 : i32
    return %arg0, %c0_i32 : i32, i32
  }
  func.func @transform_7(%arg0: i32) -> (i32, i32) {
    %c0_i32 = arith.constant 0 : i32
    %c0_i32_0 = arith.constant 0 : i32
    return %arg0, %c0_i32 : i32, i32
  }
}

module attributes {stable_mosaic.version = 11 : i64} {
  func.func @_qkv_kernel(%arg0: i32, %arg1: memref<8x32xbf16, #tpu.memory_space<vmem>>, %arg2: memref<8x32xbf16, #tpu.memory_space<vmem>>, %arg3: memref<32x64xbf16, #tpu.memory_space<vmem>>, %arg4: memref<1x64xf32, #tpu.memory_space<vmem>>, %arg5: memref<32x32xbf16, #tpu.memory_space<vmem>>, %arg6: memref<1x32xf32, #tpu.memory_space<vmem>>, %arg7: memref<8x32xbf16, #tpu.memory_space<vmem>>, %arg8: memref<8x32xbf16, #tpu.memory_space<vmem>>, %arg9: memref<8x32xbf16, #tpu.memory_space<vmem>>) attributes {dimension_semantics = [#tpu.dimension_semantics<parallel>], iteration_bounds = array<i64: 2>, scalar_prefetch = 0 : i64, scratch_operands = 0 : i64, tpu.core_type = #tpu.core_type<tc>, window_params = [{transform_indices = @transform_0, window_bounds = array<i64: 8, 32>}, {transform_indices = @transform_1, window_bounds = array<i64: 8, 32>}, {pipeline_mode = #tpu.pipeline_mode<synchronous>, transform_indices = @transform_2, window_bounds = array<i64: 32, 64>}, {pipeline_mode = #tpu.pipeline_mode<synchronous>, transform_indices = @transform_3, window_bounds = array<i64: 1, 64>}, {pipeline_mode = #tpu.pipeline_mode<synchronous>, transform_indices = @transform_4, window_bounds = array<i64: 32, 32>}, {pipeline_mode = #tpu.pipeline_mode<synchronous>, transform_indices = @transform_5, window_bounds = array<i64: 1, 32>}, {transform_indices = @transform_6, window_bounds = array<i64: 8, 32>}, {transform_indices = @transform_7, window_bounds = array<i64: 8, 32>}, {transform_indices = @transform_8, window_bounds = array<i64: 8, 32>}]} {
    %c0 = arith.constant 0 : index
    %c0_0 = arith.constant 0 : index
    %0 = vector.load %arg1[%c0, %c0_0] : memref<8x32xbf16, #tpu.memory_space<vmem>>, vector<8x32xbf16>
    %1 = arith.extf %0 : vector<8x32xbf16> to vector<8x32xf32>
    %c0_1 = arith.constant 0 : index
    %c0_2 = arith.constant 0 : index
    %2 = vector.load %arg2[%c0_1, %c0_2] : memref<8x32xbf16, #tpu.memory_space<vmem>>, vector<8x32xbf16>
    %3 = arith.extf %2 : vector<8x32xbf16> to vector<8x32xf32>
    %4 = arith.addf %1, %3 : vector<8x32xf32>
    %5 = arith.truncf %4 : vector<8x32xf32> to vector<8x32xbf16>
    %c0_3 = arith.constant 0 : index
    %c0_4 = arith.constant 0 : index
    %6 = vector.load %arg3[%c0_3, %c0_4] : memref<32x64xbf16, #tpu.memory_space<vmem>>, vector<32x64xbf16>
    %cst = arith.constant dense<0.000000e+00> : vector<8x64xf32>
    %7 = tpu.matmul %5, %6, %cst {dimension_numbers = #tpu.dot_dimension_numbers<[1], [0], [0], [1], [0, 0, 1, 1], [], []>} : vector<8x32xbf16>, vector<32x64xbf16>, vector<8x64xf32> -> vector<8x64xf32>
    %c0_5 = arith.constant 0 : index
    %c0_6 = arith.constant 0 : index
    %8 = vector.load %arg4[%c0_5, %c0_6] : memref<1x64xf32, #tpu.memory_space<vmem>>, vector<1x64xf32>
    %9 = vector.broadcast %8 : vector<1x64xf32> to vector<8x64xf32>
    %10 = arith.addf %7, %9 : vector<8x64xf32>
    %11 = vector.extract_strided_slice %10 {offsets = [0, 0], sizes = [8, 32], strides = [1, 1]} : vector<8x64xf32> to vector<8x32xf32>
    %12 = arith.truncf %11 : vector<8x32xf32> to vector<8x32xbf16>
    %c0_7 = arith.constant 0 : index
    %c0_8 = arith.constant 0 : index
    %13 = vector.load %arg7[%c0_7, %c0_8] : memref<8x32xbf16, #tpu.memory_space<vmem>>, vector<8x32xbf16>
    tpu.vector_store %arg7[%c0_7, %c0_8], %12 {strides = array<i32>} : memref<8x32xbf16, #tpu.memory_space<vmem>>, vector<8x32xbf16>,
    %14 = vector.extract_strided_slice %10 {offsets = [0, 32], sizes = [8, 32], strides = [1, 1]} : vector<8x64xf32> to vector<8x32xf32>
    %15 = arith.truncf %14 : vector<8x32xf32> to vector<8x32xbf16>
    %c0_9 = arith.constant 0 : index
    %c0_10 = arith.constant 0 : index
    %16 = vector.load %arg8[%c0_9, %c0_10] : memref<8x32xbf16, #tpu.memory_space<vmem>>, vector<8x32xbf16>
    tpu.vector_store %arg8[%c0_9, %c0_10], %15 {strides = array<i32>} : memref<8x32xbf16, #tpu.memory_space<vmem>>, vector<8x32xbf16>,
    %c0_11 = arith.constant 0 : index
    %c0_12 = arith.constant 0 : index
    %17 = vector.load %arg5[%c0_11, %c0_12] : memref<32x32xbf16, #tpu.memory_space<vmem>>, vector<32x32xbf16>
    %cst_13 = arith.constant dense<0.000000e+00> : vector<8x32xf32>
    %18 = tpu.matmul %0, %17, %cst_13 {dimension_numbers = #tpu.dot_dimension_numbers<[1], [0], [0], [1], [0, 0, 1, 1], [], []>} : vector<8x32xbf16>, vector<32x32xbf16>, vector<8x32xf32> -> vector<8x32xf32>
    %c0_14 = arith.constant 0 : index
    %c0_15 = arith.constant 0 : index
    %19 = vector.load %arg6[%c0_14, %c0_15] : memref<1x32xf32, #tpu.memory_space<vmem>>, vector<1x32xf32>
    %20 = vector.broadcast %19 : vector<1x32xf32> to vector<8x32xf32>
    %21 = arith.addf %18, %20 : vector<8x32xf32>
    %22 = arith.truncf %21 : vector<8x32xf32> to vector<8x32xbf16>
    %c0_16 = arith.constant 0 : index
    %c0_17 = arith.constant 0 : index
    %23 = vector.load %arg9[%c0_16, %c0_17] : memref<8x32xbf16, #tpu.memory_space<vmem>>, vector<8x32xbf16>
    tpu.vector_store %arg9[%c0_16, %c0_17], %22 {strides = array<i32>} : memref<8x32xbf16, #tpu.memory_space<vmem>>, vector<8x32xbf16>,
    return
  }
  func.func @transform_0(%arg0: i32) -> (i32, i32) {
    %c0_i32 = arith.constant 0 : i32
    %c0_i32_0 = arith.constant 0 : i32
    return %arg0, %c0_i32 : i32, i32
  }
  func.func @transform_1(%arg0: i32) -> (i32, i32) {
    %c0_i32 = arith.constant 0 : i32
    %c0_i32_0 = arith.constant 0 : i32
    return %arg0, %c0_i32 : i32, i32
  }
  func.func @transform_2(%arg0: i32) -> (i32, i32) {
    %c0_i32 = arith.constant 0 : i32
    %c0_i32_0 = arith.constant 0 : i32
    %c0_i32_1 = arith.constant 0 : i32
    return %c0_i32, %c0_i32_0 : i32, i32
  }
  func.func @transform_3(%arg0: i32) -> (i32, i32) {
    %c0_i32 = arith.constant 0 : i32
    %c0_i32_0 = arith.constant 0 : i32
    %c0_i32_1 = arith.constant 0 : i32
    return %c0_i32, %c0_i32_0 : i32, i32
  }
  func.func @transform_4(%arg0: i32) -> (i32, i32) {
    %c0_i32 = arith.constant 0 : i32
    %c0_i32_0 = arith.constant 0 : i32
    %c0_i32_1 = arith.constant 0 : i32
    return %c0_i32, %c0_i32_0 : i32, i32
  }
  func.func @transform_5(%arg0: i32) -> (i32, i32) {
    %c0_i32 = arith.constant 0 : i32
    %c0_i32_0 = arith.constant 0 : i32
    %c0_i32_1 = arith.constant 0 : i32
    return %c0_i32, %c0_i32_0 : i32, i32
  }
  func.func @transform_6(%arg0: i32) -> (i32, i32) {
    %c0_i32 = arith.constant 0 : i32
    %c0_i32_0 = arith.constant 0 : i32
    return %arg0, %c0_i32 : i32, i32
  }
  func.func @transform_7(%arg0: i32) -> (i32, i32) {
    %c0_i32 = arith.constant 0 : i32
    %c0_i32_0 = arith.constant 0 : i32
    return %arg0, %c0_i32 : i32, i32
  }
  func.func @transform_8(%arg0: i32) -> (i32, i32) {
    %c0_i32 = arith.constant 0 : i32
    %c0_i32_0 = arith.constant 0 : i32
    return %arg0, %c0_i32 : i32, i32
  }
}

module attributes {stable_mosaic.version = 11 : i64} {
  func.func @_addlin_kernel(%arg0: i32, %arg1: memref<8x32xbf16, #tpu.memory_space<vmem>>, %arg2: memref<8x32xbf16, #tpu.memory_space<vmem>>, %arg3: memref<32x32xbf16, #tpu.memory_space<vmem>>, %arg4: memref<1x32xf32, #tpu.memory_space<vmem>>, %arg5: memref<8x32xbf16, #tpu.memory_space<vmem>>) attributes {dimension_semantics = [#tpu.dimension_semantics<parallel>], iteration_bounds = array<i64: 2>, scalar_prefetch = 0 : i64, scratch_operands = 0 : i64, tpu.core_type = #tpu.core_type<tc>, window_params = [{transform_indices = @transform_0, window_bounds = array<i64: 8, 32>}, {transform_indices = @transform_1, window_bounds = array<i64: 8, 32>}, {pipeline_mode = #tpu.pipeline_mode<synchronous>, transform_indices = @transform_2, window_bounds = array<i64: 32, 32>}, {pipeline_mode = #tpu.pipeline_mode<synchronous>, transform_indices = @transform_3, window_bounds = array<i64: 1, 32>}, {transform_indices = @transform_4, window_bounds = array<i64: 8, 32>}]} {
    %c0 = arith.constant 0 : index
    %c0_0 = arith.constant 0 : index
    %0 = vector.load %arg1[%c0, %c0_0] : memref<8x32xbf16, #tpu.memory_space<vmem>>, vector<8x32xbf16>
    %1 = arith.extf %0 : vector<8x32xbf16> to vector<8x32xf32>
    %c0_1 = arith.constant 0 : index
    %c0_2 = arith.constant 0 : index
    %2 = vector.load %arg2[%c0_1, %c0_2] : memref<8x32xbf16, #tpu.memory_space<vmem>>, vector<8x32xbf16>
    %3 = arith.extf %2 : vector<8x32xbf16> to vector<8x32xf32>
    %4 = arith.addf %1, %3 : vector<8x32xf32>
    %5 = arith.truncf %4 : vector<8x32xf32> to vector<8x32xbf16>
    %c0_3 = arith.constant 0 : index
    %c0_4 = arith.constant 0 : index
    %6 = vector.load %arg3[%c0_3, %c0_4] : memref<32x32xbf16, #tpu.memory_space<vmem>>, vector<32x32xbf16>
    %cst = arith.constant dense<0.000000e+00> : vector<8x32xf32>
    %7 = tpu.matmul %5, %6, %cst {dimension_numbers = #tpu.dot_dimension_numbers<[1], [0], [0], [1], [0, 0, 1, 1], [], []>} : vector<8x32xbf16>, vector<32x32xbf16>, vector<8x32xf32> -> vector<8x32xf32>
    %c0_5 = arith.constant 0 : index
    %c0_6 = arith.constant 0 : index
    %8 = vector.load %arg4[%c0_5, %c0_6] : memref<1x32xf32, #tpu.memory_space<vmem>>, vector<1x32xf32>
    %9 = vector.broadcast %8 : vector<1x32xf32> to vector<8x32xf32>
    %10 = arith.addf %7, %9 : vector<8x32xf32>
    %11 = arith.truncf %10 : vector<8x32xf32> to vector<8x32xbf16>
    %c0_7 = arith.constant 0 : index
    %c0_8 = arith.constant 0 : index
    %12 = vector.load %arg5[%c0_7, %c0_8] : memref<8x32xbf16, #tpu.memory_space<vmem>>, vector<8x32xbf16>
    tpu.vector_store %arg5[%c0_7, %c0_8], %11 {strides = array<i32>} : memref<8x32xbf16, #tpu.memory_space<vmem>>, vector<8x32xbf16>,
    return
  }
  func.func @transform_0(%arg0: i32) -> (i32, i32) {
    %c0_i32 = arith.constant 0 : i32
    %c0_i32_0 = arith.constant 0 : i32
    return %arg0, %c0_i32 : i32, i32
  }
  func.func @transform_1(%arg0: i32) -> (i32, i32) {
    %c0_i32 = arith.constant 0 : i32
    %c0_i32_0 = arith.constant 0 : i32
    return %arg0, %c0_i32 : i32, i32
  }
  func.func @transform_2(%arg0: i32) -> (i32, i32) {
    %c0_i32 = arith.constant 0 : i32
    %c0_i32_0 = arith.constant 0 : i32
    %c0_i32_1 = arith.constant 0 : i32
    return %c0_i32, %c0_i32_0 : i32, i32
  }
  func.func @transform_3(%arg0: i32) -> (i32, i32) {
    %c0_i32 = arith.constant 0 : i32
    %c0_i32_0 = arith.constant 0 : i32
    %c0_i32_1 = arith.constant 0 : i32
    return %c0_i32, %c0_i32_0 : i32, i32
  }
  func.func @transform_4(%arg0: i32) -> (i32, i32) {
    %c0_i32 = arith.constant 0 : i32
    %c0_i32_0 = arith.constant 0 : i32
    return %arg0, %c0_i32 : i32, i32
  }
}

module attributes {stable_mosaic.version = 11 : i64} {
  func.func @_proj_add_ln_kernel(%arg0: i32, %arg1: memref<8x32xbf16, #tpu.memory_space<vmem>>, %arg2: memref<8x32xbf16, #tpu.memory_space<vmem>>, %arg3: memref<32x32xbf16, #tpu.memory_space<vmem>>, %arg4: memref<1x32xf32, #tpu.memory_space<vmem>>, %arg5: memref<1x32xf32, #tpu.memory_space<vmem>>, %arg6: memref<1x32xf32, #tpu.memory_space<vmem>>, %arg7: memref<8x32xbf16, #tpu.memory_space<vmem>>) attributes {dimension_semantics = [#tpu.dimension_semantics<parallel>], iteration_bounds = array<i64: 2>, scalar_prefetch = 0 : i64, scratch_operands = 0 : i64, tpu.core_type = #tpu.core_type<tc>, window_params = [{transform_indices = @transform_0, window_bounds = array<i64: 8, 32>}, {transform_indices = @transform_1, window_bounds = array<i64: 8, 32>}, {pipeline_mode = #tpu.pipeline_mode<synchronous>, transform_indices = @transform_2, window_bounds = array<i64: 32, 32>}, {pipeline_mode = #tpu.pipeline_mode<synchronous>, transform_indices = @transform_3, window_bounds = array<i64: 1, 32>}, {pipeline_mode = #tpu.pipeline_mode<synchronous>, transform_indices = @transform_4, window_bounds = array<i64: 1, 32>}, {pipeline_mode = #tpu.pipeline_mode<synchronous>, transform_indices = @transform_5, window_bounds = array<i64: 1, 32>}, {transform_indices = @transform_6, window_bounds = array<i64: 8, 32>}]} {
    %c0 = arith.constant 0 : index
    %c0_0 = arith.constant 0 : index
    %0 = vector.load %arg1[%c0, %c0_0] : memref<8x32xbf16, #tpu.memory_space<vmem>>, vector<8x32xbf16>
    %c0_1 = arith.constant 0 : index
    %c0_2 = arith.constant 0 : index
    %1 = vector.load %arg3[%c0_1, %c0_2] : memref<32x32xbf16, #tpu.memory_space<vmem>>, vector<32x32xbf16>
    %cst = arith.constant dense<0.000000e+00> : vector<8x32xf32>
    %2 = tpu.matmul %0, %1, %cst {dimension_numbers = #tpu.dot_dimension_numbers<[1], [0], [0], [1], [0, 0, 1, 1], [], []>} : vector<8x32xbf16>, vector<32x32xbf16>, vector<8x32xf32> -> vector<8x32xf32>
    %c0_3 = arith.constant 0 : index
    %c0_4 = arith.constant 0 : index
    %3 = vector.load %arg4[%c0_3, %c0_4] : memref<1x32xf32, #tpu.memory_space<vmem>>, vector<1x32xf32>
    %4 = vector.broadcast %3 : vector<1x32xf32> to vector<8x32xf32>
    %5 = arith.addf %2, %4 : vector<8x32xf32>
    %c0_5 = arith.constant 0 : index
    %c0_6 = arith.constant 0 : index
    %6 = vector.load %arg2[%c0_5, %c0_6] : memref<8x32xbf16, #tpu.memory_space<vmem>>, vector<8x32xbf16>
    %7 = arith.extf %6 : vector<8x32xbf16> to vector<8x32xf32>
    %8 = arith.addf %7, %5 : vector<8x32xf32>
    %c0_7 = arith.constant 0 : index
    %c0_8 = arith.constant 0 : index
    %9 = vector.load %arg5[%c0_7, %c0_8] : memref<1x32xf32, #tpu.memory_space<vmem>>, vector<1x32xf32>
    %c0_9 = arith.constant 0 : index
    %c0_10 = arith.constant 0 : index
    %10 = vector.load %arg6[%c0_9, %c0_10] : memref<1x32xf32, #tpu.memory_space<vmem>>, vector<1x32xf32>
    %cst_11 = arith.constant dense<0.000000e+00> : vector<8xf32>
    %11 = vector.multi_reduction <add>, %8, %cst_11 [1] : vector<8x32xf32> to vector<8xf32>
    %12 = vector.shape_cast %11 : vector<8xf32> to vector<8x1xf32>
    %cst_12 = arith.constant 3.200000e+01 : f32
    %13 = vector.broadcast %cst_12 : f32 to vector<8x1xf32>
    %14 = arith.divf %12, %13 : vector<8x1xf32>
    %15 = vector.broadcast %14 : vector<8x1xf32> to vector<8x32xf32>
    %16 = arith.subf %8, %15 : vector<8x32xf32>
    %17 = arith.mulf %16, %16 : vector<8x32xf32>
    %cst_13 = arith.constant dense<0.000000e+00> : vector<8xf32>
    %18 = vector.multi_reduction <add>, %17, %cst_13 [1] : vector<8x32xf32> to vector<8xf32>
    %19 = vector.shape_cast %18 : vector<8xf32> to vector<8x1xf32>
    %cst_14 = arith.constant 3.200000e+01 : f32
    %20 = vector.broadcast %cst_14 : f32 to vector<8x1xf32>
    %21 = arith.divf %19, %20 : vector<8x1xf32>
    %22 = vector.broadcast %14 : vector<8x1xf32> to vector<8x32xf32>
    %23 = arith.subf %8, %22 : vector<8x32xf32>
    %cst_15 = arith.constant 9.99999974E-6 : f32
    %24 = vector.broadcast %cst_15 : f32 to vector<8x1xf32>
    %25 = arith.addf %21, %24 : vector<8x1xf32>
    %26 = math.rsqrt %25 : vector<8x1xf32>
    %27 = vector.broadcast %26 : vector<8x1xf32> to vector<8x32xf32>
    %28 = arith.mulf %23, %27 : vector<8x32xf32>
    %29 = vector.broadcast %9 : vector<1x32xf32> to vector<8x32xf32>
    %30 = arith.mulf %28, %29 : vector<8x32xf32>
    %31 = vector.broadcast %10 : vector<1x32xf32> to vector<8x32xf32>
    %32 = arith.addf %30, %31 : vector<8x32xf32>
    %33 = arith.truncf %32 : vector<8x32xf32> to vector<8x32xbf16>
    %c0_16 = arith.constant 0 : index
    %c0_17 = arith.constant 0 : index
    %34 = vector.load %arg7[%c0_16, %c0_17] : memref<8x32xbf16, #tpu.memory_space<vmem>>, vector<8x32xbf16>
    tpu.vector_store %arg7[%c0_16, %c0_17], %33 {strides = array<i32>} : memref<8x32xbf16, #tpu.memory_space<vmem>>, vector<8x32xbf16>,
    return
  }
  func.func @transform_0(%arg0: i32) -> (i32, i32) {
    %c0_i32 = arith.constant 0 : i32
    %c0_i32_0 = arith.constant 0 : i32
    return %arg0, %c0_i32 : i32, i32
  }
  func.func @transform_1(%arg0: i32) -> (i32, i32) {
    %c0_i32 = arith.constant 0 : i32
    %c0_i32_0 = arith.constant 0 : i32
    return %arg0, %c0_i32 : i32, i32
  }
  func.func @transform_2(%arg0: i32) -> (i32, i32) {
    %c0_i32 = arith.constant 0 : i32
    %c0_i32_0 = arith.constant 0 : i32
    %c0_i32_1 = arith.constant 0 : i32
    return %c0_i32, %c0_i32_0 : i32, i32
  }
  func.func @transform_3(%arg0: i32) -> (i32, i32) {
    %c0_i32 = arith.constant 0 : i32
    %c0_i32_0 = arith.constant 0 : i32
    %c0_i32_1 = arith.constant 0 : i32
    return %c0_i32, %c0_i32_0 : i32, i32
  }
  func.func @transform_4(%arg0: i32) -> (i32, i32) {
    %c0_i32 = arith.constant 0 : i32
    %c0_i32_0 = arith.constant 0 : i32
    %c0_i32_1 = arith.constant 0 : i32
    return %c0_i32, %c0_i32_0 : i32, i32
  }
  func.func @transform_5(%arg0: i32) -> (i32, i32) {
    %c0_i32 = arith.constant 0 : i32
    %c0_i32_0 = arith.constant 0 : i32
    %c0_i32_1 = arith.constant 0 : i32
    return %c0_i32, %c0_i32_0 : i32, i32
  }
  func.func @transform_6(%arg0: i32) -> (i32, i32) {
    %c0_i32 = arith.constant 0 : i32
    %c0_i32_0 = arith.constant 0 : i32
    return %arg0, %c0_i32 : i32, i32
  }
}

module attributes {stable_mosaic.version = 11 : i64} {
  func.func @_attn_kernel(%arg0: i32, %arg1: i32, %arg2: memref<1x8x32xbf16, #tpu.memory_space<vmem>>, %arg3: memref<1x8x32xbf16, #tpu.memory_space<vmem>>, %arg4: memref<1x8x32xbf16, #tpu.memory_space<vmem>>, %arg5: memref<1x8x32xbf16, #tpu.memory_space<vmem>>) attributes {dimension_semantics = [#tpu.dimension_semantics<parallel>, #tpu.dimension_semantics<parallel>], iteration_bounds = array<i64: 2, 1>, scalar_prefetch = 0 : i64, scratch_operands = 0 : i64, tpu.core_type = #tpu.core_type<tc>, window_params = [{transform_indices = @transform_0, window_bounds = array<i64: 1, 8, 32>}, {transform_indices = @transform_1, window_bounds = array<i64: 1, 8, 32>}, {transform_indices = @transform_2, window_bounds = array<i64: 1, 8, 32>}, {transform_indices = @transform_3, window_bounds = array<i64: 1, 8, 32>}]} {
    %c0 = arith.constant 0 : index
    %c0_0 = arith.constant 0 : index
    %c0_1 = arith.constant 0 : index
    %0 = vector.load %arg2[%c0, %c0_0, %c0_1] : memref<1x8x32xbf16, #tpu.memory_space<vmem>>, vector<1x8x32xbf16>
    %1 = vector.shape_cast %0 : vector<1x8x32xbf16> to vector<8x32xbf16>
    %c0_2 = arith.constant 0 : index
    %c0_3 = arith.constant 0 : index
    %c0_4 = arith.constant 0 : index
    %2 = vector.load %arg3[%c0_2, %c0_3, %c0_4] : memref<1x8x32xbf16, #tpu.memory_space<vmem>>, vector<1x8x32xbf16>
    %3 = vector.shape_cast %2 : vector<1x8x32xbf16> to vector<8x32xbf16>
    %c0_5 = arith.constant 0 : index
    %c0_6 = arith.constant 0 : index
    %c0_7 = arith.constant 0 : index
    %4 = vector.load %arg4[%c0_5, %c0_6, %c0_7] : memref<1x8x32xbf16, #tpu.memory_space<vmem>>, vector<1x8x32xbf16>
    %5 = vector.shape_cast %4 : vector<1x8x32xbf16> to vector<8x32xbf16>
    %6 = vector.extract_strided_slice %1 {offsets = [0, 0], sizes = [8, 8], strides = [1, 1]} : vector<8x32xbf16> to vector<8x8xbf16>
    %7 = vector.extract_strided_slice %3 {offsets = [0, 0], sizes = [8, 8], strides = [1, 1]} : vector<8x32xbf16> to vector<8x8xbf16>
    %cst = arith.constant dense<0.000000e+00> : vector<8x8xf32>
    %8 = tpu.matmul %6, %7, %cst {dimension_numbers = #tpu.dot_dimension_numbers<[1], [1], [0], [0], [0, 0, 1, 0], [], []>} : vector<8x8xbf16>, vector<8x8xbf16>, vector<8x8xf32> -> vector<8x8xf32>
    %cst_8 = arith.constant dense<0xFF800000> : vector<8xf32>
    %9 = vector.multi_reduction <maximumf>, %8, %cst_8 [1] : vector<8x8xf32> to vector<8xf32>
    %10 = vector.shape_cast %9 : vector<8xf32> to vector<8x1xf32>
    %11 = vector.broadcast %10 : vector<8x1xf32> to vector<8x8xf32>
    %12 = arith.subf %8, %11 : vector<8x8xf32>
    %13 = math.exp %12 : vector<8x8xf32>
    %cst_9 = arith.constant dense<0.000000e+00> : vector<8xf32>
    %14 = vector.multi_reduction <add>, %13, %cst_9 [1] : vector<8x8xf32> to vector<8xf32>
    %15 = vector.shape_cast %14 : vector<8xf32> to vector<8x1xf32>
    %16 = tpu.reciprocal %15 {approx = true} : vector<8x1xf32> -> vector<8x1xf32>
    %17 = vector.broadcast %16 : vector<8x1xf32> to vector<8x8xf32>
    %18 = arith.mulf %13, %17 : vector<8x8xf32>
    %19 = arith.truncf %18 : vector<8x8xf32> to vector<8x8xbf16>
    %20 = vector.extract_strided_slice %5 {offsets = [0, 0], sizes = [8, 8], strides = [1, 1]} : vector<8x32xbf16> to vector<8x8xbf16>
    %cst_10 = arith.constant dense<0.000000e+00> : vector<8x8xf32>
    %21 = tpu.matmul %19, %20, %cst_10 {dimension_numbers = #tpu.dot_dimension_numbers<[1], [0], [0], [1], [0, 0, 1, 1], [], []>} : vector<8x8xbf16>, vector<8x8xbf16>, vector<8x8xf32> -> vector<8x8xf32>
    %22 = vector.extract_strided_slice %1 {offsets = [0, 8], sizes = [8, 8], strides = [1, 1]} : vector<8x32xbf16> to vector<8x8xbf16>
    %23 = vector.extract_strided_slice %3 {offsets = [0, 8], sizes = [8, 8], strides = [1, 1]} : vector<8x32xbf16> to vector<8x8xbf16>
    %cst_11 = arith.constant dense<0.000000e+00> : vector<8x8xf32>
    %24 = tpu.matmul %22, %23, %cst_11 {dimension_numbers = #tpu.dot_dimension_numbers<[1], [1], [0], [0], [0, 0, 1, 0], [], []>} : vector<8x8xbf16>, vector<8x8xbf16>, vector<8x8xf32> -> vector<8x8xf32>
    %cst_12 = arith.constant dense<0xFF800000> : vector<8xf32>
    %25 = vector.multi_reduction <maximumf>, %24, %cst_12 [1] : vector<8x8xf32> to vector<8xf32>
    %26 = vector.shape_cast %25 : vector<8xf32> to vector<8x1xf32>
    %27 = vector.broadcast %26 : vector<8x1xf32> to vector<8x8xf32>
    %28 = arith.subf %24, %27 : vector<8x8xf32>
    %29 = math.exp %28 : vector<8x8xf32>
    %cst_13 = arith.constant dense<0.000000e+00> : vector<8xf32>
    %30 = vector.multi_reduction <add>, %29, %cst_13 [1] : vector<8x8xf32> to vector<8xf32>
    %31 = vector.shape_cast %30 : vector<8xf32> to vector<8x1xf32>
    %32 = tpu.reciprocal %31 {approx = true} : vector<8x1xf32> -> vector<8x1xf32>
    %33 = vector.broadcast %32 : vector<8x1xf32> to vector<8x8xf32>
    %34 = arith.mulf %29, %33 : vector<8x8xf32>
    %35 = arith.truncf %34 : vector<8x8xf32> to vector<8x8xbf16>
    %36 = vector.extract_strided_slice %5 {offsets = [0, 8], sizes = [8, 8], strides = [1, 1]} : vector<8x32xbf16> to vector<8x8xbf16>
    %cst_14 = arith.constant dense<0.000000e+00> : vector<8x8xf32>
    %37 = tpu.matmul %35, %36, %cst_14 {dimension_numbers = #tpu.dot_dimension_numbers<[1], [0], [0], [1], [0, 0, 1, 1], [], []>} : vector<8x8xbf16>, vector<8x8xbf16>, vector<8x8xf32> -> vector<8x8xf32>
    %38 = vector.extract_strided_slice %1 {offsets = [0, 16], sizes = [8, 8], strides = [1, 1]} : vector<8x32xbf16> to vector<8x8xbf16>
    %39 = vector.extract_strided_slice %3 {offsets = [0, 16], sizes = [8, 8], strides = [1, 1]} : vector<8x32xbf16> to vector<8x8xbf16>
    %cst_15 = arith.constant dense<0.000000e+00> : vector<8x8xf32>
    %40 = tpu.matmul %38, %39, %cst_15 {dimension_numbers = #tpu.dot_dimension_numbers<[1], [1], [0], [0], [0, 0, 1, 0], [], []>} : vector<8x8xbf16>, vector<8x8xbf16>, vector<8x8xf32> -> vector<8x8xf32>
    %cst_16 = arith.constant dense<0xFF800000> : vector<8xf32>
    %41 = vector.multi_reduction <maximumf>, %40, %cst_16 [1] : vector<8x8xf32> to vector<8xf32>
    %42 = vector.shape_cast %41 : vector<8xf32> to vector<8x1xf32>
    %43 = vector.broadcast %42 : vector<8x1xf32> to vector<8x8xf32>
    %44 = arith.subf %40, %43 : vector<8x8xf32>
    %45 = math.exp %44 : vector<8x8xf32>
    %cst_17 = arith.constant dense<0.000000e+00> : vector<8xf32>
    %46 = vector.multi_reduction <add>, %45, %cst_17 [1] : vector<8x8xf32> to vector<8xf32>
    %47 = vector.shape_cast %46 : vector<8xf32> to vector<8x1xf32>
    %48 = tpu.reciprocal %47 {approx = true} : vector<8x1xf32> -> vector<8x1xf32>
    %49 = vector.broadcast %48 : vector<8x1xf32> to vector<8x8xf32>
    %50 = arith.mulf %45, %49 : vector<8x8xf32>
    %51 = arith.truncf %50 : vector<8x8xf32> to vector<8x8xbf16>
    %52 = vector.extract_strided_slice %5 {offsets = [0, 16], sizes = [8, 8], strides = [1, 1]} : vector<8x32xbf16> to vector<8x8xbf16>
    %cst_18 = arith.constant dense<0.000000e+00> : vector<8x8xf32>
    %53 = tpu.matmul %51, %52, %cst_18 {dimension_numbers = #tpu.dot_dimension_numbers<[1], [0], [0], [1], [0, 0, 1, 1], [], []>} : vector<8x8xbf16>, vector<8x8xbf16>, vector<8x8xf32> -> vector<8x8xf32>
    %54 = vector.extract_strided_slice %1 {offsets = [0, 24], sizes = [8, 8], strides = [1, 1]} : vector<8x32xbf16> to vector<8x8xbf16>
    %55 = vector.extract_strided_slice %3 {offsets = [0, 24], sizes = [8, 8], strides = [1, 1]} : vector<8x32xbf16> to vector<8x8xbf16>
    %cst_19 = arith.constant dense<0.000000e+00> : vector<8x8xf32>
    %56 = tpu.matmul %54, %55, %cst_19 {dimension_numbers = #tpu.dot_dimension_numbers<[1], [1], [0], [0], [0, 0, 1, 0], [], []>} : vector<8x8xbf16>, vector<8x8xbf16>, vector<8x8xf32> -> vector<8x8xf32>
    %cst_20 = arith.constant dense<0xFF800000> : vector<8xf32>
    %57 = vector.multi_reduction <maximumf>, %56, %cst_20 [1] : vector<8x8xf32> to vector<8xf32>
    %58 = vector.shape_cast %57 : vector<8xf32> to vector<8x1xf32>
    %59 = vector.broadcast %58 : vector<8x1xf32> to vector<8x8xf32>
    %60 = arith.subf %56, %59 : vector<8x8xf32>
    %61 = math.exp %60 : vector<8x8xf32>
    %cst_21 = arith.constant dense<0.000000e+00> : vector<8xf32>
    %62 = vector.multi_reduction <add>, %61, %cst_21 [1] : vector<8x8xf32> to vector<8xf32>
    %63 = vector.shape_cast %62 : vector<8xf32> to vector<8x1xf32>
    %64 = tpu.reciprocal %63 {approx = true} : vector<8x1xf32> -> vector<8x1xf32>
    %65 = vector.broadcast %64 : vector<8x1xf32> to vector<8x8xf32>
    %66 = arith.mulf %61, %65 : vector<8x8xf32>
    %67 = arith.truncf %66 : vector<8x8xf32> to vector<8x8xbf16>
    %68 = vector.extract_strided_slice %5 {offsets = [0, 24], sizes = [8, 8], strides = [1, 1]} : vector<8x32xbf16> to vector<8x8xbf16>
    %cst_22 = arith.constant dense<0.000000e+00> : vector<8x8xf32>
    %69 = tpu.matmul %67, %68, %cst_22 {dimension_numbers = #tpu.dot_dimension_numbers<[1], [0], [0], [1], [0, 0, 1, 1], [], []>} : vector<8x8xbf16>, vector<8x8xbf16>, vector<8x8xf32> -> vector<8x8xf32>
    %70 = tpu.concatenate %21, %37, %53, %69 in 1 : vector<8x8xf32>, vector<8x8xf32>, vector<8x8xf32>, vector<8x8xf32> -> vector<8x32xf32>
    %71 = arith.truncf %70 : vector<8x32xf32> to vector<8x32xbf16>
    %c0_23 = arith.constant 0 : index
    %c0_24 = arith.constant 0 : index
    %c0_25 = arith.constant 0 : index
    %72 = vector.load %arg5[%c0_23, %c0_24, %c0_25] : memref<1x8x32xbf16, #tpu.memory_space<vmem>>, vector<1x8x32xbf16>
    %73 = vector.shape_cast %72 : vector<1x8x32xbf16> to vector<8x32xbf16>
    %74 = vector.shape_cast %71 : vector<8x32xbf16> to vector<1x8x32xbf16>
    tpu.vector_store %arg5[%c0_23, %c0_24, %c0_25], %74 {strides = array<i32>} : memref<1x8x32xbf16, #tpu.memory_space<vmem>>, vector<1x8x32xbf16>,
    return
  }
  func.func @transform_0(%arg0: i32, %arg1: i32) -> (i32, i32, i32) {
    %c0_i32 = arith.constant 0 : i32
    %c0_i32_0 = arith.constant 0 : i32
    return %arg0, %arg1, %c0_i32 : i32, i32, i32
  }
  func.func @transform_1(%arg0: i32, %arg1: i32) -> (i32, i32, i32) {
    %c0_i32 = arith.constant 0 : i32
    %c0_i32_0 = arith.constant 0 : i32
    %c0_i32_1 = arith.constant 0 : i32
    return %arg0, %c0_i32, %c0_i32_0 : i32, i32, i32
  }
  func.func @transform_2(%arg0: i32, %arg1: i32) -> (i32, i32, i32) {
    %c0_i32 = arith.constant 0 : i32
    %c0_i32_0 = arith.constant 0 : i32
    %c0_i32_1 = arith.constant 0 : i32
    return %arg0, %c0_i32, %c0_i32_0 : i32, i32, i32
  }
  func.func @transform_3(%arg0: i32, %arg1: i32) -> (i32, i32, i32) {
    %c0_i32 = arith.constant 0 : i32
    %c0_i32_0 = arith.constant 0 : i32
    return %arg0, %arg1, %c0_i32 : i32, i32, i32
  }
}

module attributes {stable_mosaic.version = 11 : i64} {
  func.func @_attn_kernel(%arg0: i32, %arg1: i32, %arg2: memref<1x8x32xbf16, #tpu.memory_space<vmem>>, %arg3: memref<1x64x32xbf16, #tpu.memory_space<vmem>>, %arg4: memref<1x64x32xbf16, #tpu.memory_space<vmem>>, %arg5: memref<1x1x64xf32, #tpu.memory_space<vmem>>, %arg6: memref<1x8x32xbf16, #tpu.memory_space<vmem>>) attributes {dimension_semantics = [#tpu.dimension_semantics<parallel>, #tpu.dimension_semantics<parallel>], iteration_bounds = array<i64: 2, 1>, scalar_prefetch = 0 : i64, scratch_operands = 0 : i64, tpu.core_type = #tpu.core_type<tc>, window_params = [{transform_indices = @transform_0, window_bounds = array<i64: 1, 8, 32>}, {transform_indices = @transform_1, window_bounds = array<i64: 1, 64, 32>}, {transform_indices = @transform_2, window_bounds = array<i64: 1, 64, 32>}, {transform_indices = @transform_3, window_bounds = array<i64: 1, 1, 64>}, {transform_indices = @transform_4, window_bounds = array<i64: 1, 8, 32>}]} {
    %c0 = arith.constant 0 : index
    %c0_0 = arith.constant 0 : index
    %c0_1 = arith.constant 0 : index
    %0 = vector.load %arg2[%c0, %c0_0, %c0_1] : memref<1x8x32xbf16, #tpu.memory_space<vmem>>, vector<1x8x32xbf16>
    %1 = vector.shape_cast %0 : vector<1x8x32xbf16> to vector<8x32xbf16>
    %c0_2 = arith.constant 0 : index
    %c0_3 = arith.constant 0 : index
    %c0_4 = arith.constant 0 : index
    %2 = vector.load %arg3[%c0_2, %c0_3, %c0_4] : memref<1x64x32xbf16, #tpu.memory_space<vmem>>, vector<1x64x32xbf16>
    %3 = vector.shape_cast %2 : vector<1x64x32xbf16> to vector<64x32xbf16>
    %c0_5 = arith.constant 0 : index
    %c0_6 = arith.constant 0 : index
    %c0_7 = arith.constant 0 : index
    %4 = vector.load %arg4[%c0_5, %c0_6, %c0_7] : memref<1x64x32xbf16, #tpu.memory_space<vmem>>, vector<1x64x32xbf16>
    %5 = vector.shape_cast %4 : vector<1x64x32xbf16> to vector<64x32xbf16>
    %6 = vector.extract_strided_slice %1 {offsets = [0, 0], sizes = [8, 8], strides = [1, 1]} : vector<8x32xbf16> to vector<8x8xbf16>
    %7 = vector.extract_strided_slice %3 {offsets = [0, 0], sizes = [64, 8], strides = [1, 1]} : vector<64x32xbf16> to vector<64x8xbf16>
    %cst = arith.constant dense<0.000000e+00> : vector<8x64xf32>
    %8 = tpu.matmul %6, %7, %cst {dimension_numbers = #tpu.dot_dimension_numbers<[1], [1], [0], [0], [0, 0, 1, 0], [], []>} : vector<8x8xbf16>, vector<64x8xbf16>, vector<8x64xf32> -> vector<8x64xf32>
    %c0_8 = arith.constant 0 : index
    %c0_9 = arith.constant 0 : index
    %c0_10 = arith.constant 0 : index
    %9 = vector.load %arg5[%c0_8, %c0_9, %c0_10] : memref<1x1x64xf32, #tpu.memory_space<vmem>>, vector<1x1x64xf32>
    %10 = vector.shape_cast %9 : vector<1x1x64xf32> to vector<1x64xf32>
    %11 = vector.broadcast %10 : vector<1x64xf32> to vector<8x64xf32>
    %12 = arith.addf %8, %11 : vector<8x64xf32>
    %cst_11 = arith.constant dense<0xFF800000> : vector<8xf32>
    %13 = vector.multi_reduction <maximumf>, %12, %cst_11 [1] : vector<8x64xf32> to vector<8xf32>
    %14 = vector.shape_cast %13 : vector<8xf32> to vector<8x1xf32>
    %15 = vector.broadcast %14 : vector<8x1xf32> to vector<8x64xf32>
    %16 = arith.subf %12, %15 : vector<8x64xf32>
    %17 = math.exp %16 : vector<8x64xf32>
    %cst_12 = arith.constant dense<0.000000e+00> : vector<8xf32>
    %18 = vector.multi_reduction <add>, %17, %cst_12 [1] : vector<8x64xf32> to vector<8xf32>
    %19 = vector.shape_cast %18 : vector<8xf32> to vector<8x1xf32>
    %20 = tpu.reciprocal %19 {approx = true} : vector<8x1xf32> -> vector<8x1xf32>
    %21 = vector.broadcast %20 : vector<8x1xf32> to vector<8x64xf32>
    %22 = arith.mulf %17, %21 : vector<8x64xf32>
    %23 = arith.truncf %22 : vector<8x64xf32> to vector<8x64xbf16>
    %24 = vector.extract_strided_slice %5 {offsets = [0, 0], sizes = [64, 8], strides = [1, 1]} : vector<64x32xbf16> to vector<64x8xbf16>
    %cst_13 = arith.constant dense<0.000000e+00> : vector<8x8xf32>
    %25 = tpu.matmul %23, %24, %cst_13 {dimension_numbers = #tpu.dot_dimension_numbers<[1], [0], [0], [1], [0, 0, 1, 1], [], []>} : vector<8x64xbf16>, vector<64x8xbf16>, vector<8x8xf32> -> vector<8x8xf32>
    %26 = vector.extract_strided_slice %1 {offsets = [0, 8], sizes = [8, 8], strides = [1, 1]} : vector<8x32xbf16> to vector<8x8xbf16>
    %27 = vector.extract_strided_slice %3 {offsets = [0, 8], sizes = [64, 8], strides = [1, 1]} : vector<64x32xbf16> to vector<64x8xbf16>
    %cst_14 = arith.constant dense<0.000000e+00> : vector<8x64xf32>
    %28 = tpu.matmul %26, %27, %cst_14 {dimension_numbers = #tpu.dot_dimension_numbers<[1], [1], [0], [0], [0, 0, 1, 0], [], []>} : vector<8x8xbf16>, vector<64x8xbf16>, vector<8x64xf32> -> vector<8x64xf32>
    %c0_15 = arith.constant 0 : index
    %c0_16 = arith.constant 0 : index
    %c0_17 = arith.constant 0 : index
    %29 = vector.load %arg5[%c0_15, %c0_16, %c0_17] : memref<1x1x64xf32, #tpu.memory_space<vmem>>, vector<1x1x64xf32>
    %30 = vector.shape_cast %29 : vector<1x1x64xf32> to vector<1x64xf32>
    %31 = vector.broadcast %30 : vector<1x64xf32> to vector<8x64xf32>
    %32 = arith.addf %28, %31 : vector<8x64xf32>
    %cst_18 = arith.constant dense<0xFF800000> : vector<8xf32>
    %33 = vector.multi_reduction <maximumf>, %32, %cst_18 [1] : vector<8x64xf32> to vector<8xf32>
    %34 = vector.shape_cast %33 : vector<8xf32> to vector<8x1xf32>
    %35 = vector.broadcast %34 : vector<8x1xf32> to vector<8x64xf32>
    %36 = arith.subf %32, %35 : vector<8x64xf32>
    %37 = math.exp %36 : vector<8x64xf32>
    %cst_19 = arith.constant dense<0.000000e+00> : vector<8xf32>
    %38 = vector.multi_reduction <add>, %37, %cst_19 [1] : vector<8x64xf32> to vector<8xf32>
    %39 = vector.shape_cast %38 : vector<8xf32> to vector<8x1xf32>
    %40 = tpu.reciprocal %39 {approx = true} : vector<8x1xf32> -> vector<8x1xf32>
    %41 = vector.broadcast %40 : vector<8x1xf32> to vector<8x64xf32>
    %42 = arith.mulf %37, %41 : vector<8x64xf32>
    %43 = arith.truncf %42 : vector<8x64xf32> to vector<8x64xbf16>
    %44 = vector.extract_strided_slice %5 {offsets = [0, 8], sizes = [64, 8], strides = [1, 1]} : vector<64x32xbf16> to vector<64x8xbf16>
    %cst_20 = arith.constant dense<0.000000e+00> : vector<8x8xf32>
    %45 = tpu.matmul %43, %44, %cst_20 {dimension_numbers = #tpu.dot_dimension_numbers<[1], [0], [0], [1], [0, 0, 1, 1], [], []>} : vector<8x64xbf16>, vector<64x8xbf16>, vector<8x8xf32> -> vector<8x8xf32>
    %46 = vector.extract_strided_slice %1 {offsets = [0, 16], sizes = [8, 8], strides = [1, 1]} : vector<8x32xbf16> to vector<8x8xbf16>
    %47 = vector.extract_strided_slice %3 {offsets = [0, 16], sizes = [64, 8], strides = [1, 1]} : vector<64x32xbf16> to vector<64x8xbf16>
    %cst_21 = arith.constant dense<0.000000e+00> : vector<8x64xf32>
    %48 = tpu.matmul %46, %47, %cst_21 {dimension_numbers = #tpu.dot_dimension_numbers<[1], [1], [0], [0], [0, 0, 1, 0], [], []>} : vector<8x8xbf16>, vector<64x8xbf16>, vector<8x64xf32> -> vector<8x64xf32>
    %c0_22 = arith.constant 0 : index
    %c0_23 = arith.constant 0 : index
    %c0_24 = arith.constant 0 : index
    %49 = vector.load %arg5[%c0_22, %c0_23, %c0_24] : memref<1x1x64xf32, #tpu.memory_space<vmem>>, vector<1x1x64xf32>
    %50 = vector.shape_cast %49 : vector<1x1x64xf32> to vector<1x64xf32>
    %51 = vector.broadcast %50 : vector<1x64xf32> to vector<8x64xf32>
    %52 = arith.addf %48, %51 : vector<8x64xf32>
    %cst_25 = arith.constant dense<0xFF800000> : vector<8xf32>
    %53 = vector.multi_reduction <maximumf>, %52, %cst_25 [1] : vector<8x64xf32> to vector<8xf32>
    %54 = vector.shape_cast %53 : vector<8xf32> to vector<8x1xf32>
    %55 = vector.broadcast %54 : vector<8x1xf32> to vector<8x64xf32>
    %56 = arith.subf %52, %55 : vector<8x64xf32>
    %57 = math.exp %56 : vector<8x64xf32>
    %cst_26 = arith.constant dense<0.000000e+00> : vector<8xf32>
    %58 = vector.multi_reduction <add>, %57, %cst_26 [1] : vector<8x64xf32> to vector<8xf32>
    %59 = vector.shape_cast %58 : vector<8xf32> to vector<8x1xf32>
    %60 = tpu.reciprocal %59 {approx = true} : vector<8x1xf32> -> vector<8x1xf32>
    %61 = vector.broadcast %60 : vector<8x1xf32> to vector<8x64xf32>
    %62 = arith.mulf %57, %61 : vector<8x64xf32>
    %63 = arith.truncf %62 : vector<8x64xf32> to vector<8x64xbf16>
    %64 = vector.extract_strided_slice %5 {offsets = [0, 16], sizes = [64, 8], strides = [1, 1]} : vector<64x32xbf16> to vector<64x8xbf16>
    %cst_27 = arith.constant dense<0.000000e+00> : vector<8x8xf32>
    %65 = tpu.matmul %63, %64, %cst_27 {dimension_numbers = #tpu.dot_dimension_numbers<[1], [0], [0], [1], [0, 0, 1, 1], [], []>} : vector<8x64xbf16>, vector<64x8xbf16>, vector<8x8xf32> -> vector<8x8xf32>
    %66 = vector.extract_strided_slice %1 {offsets = [0, 24], sizes = [8, 8], strides = [1, 1]} : vector<8x32xbf16> to vector<8x8xbf16>
    %67 = vector.extract_strided_slice %3 {offsets = [0, 24], sizes = [64, 8], strides = [1, 1]} : vector<64x32xbf16> to vector<64x8xbf16>
    %cst_28 = arith.constant dense<0.000000e+00> : vector<8x64xf32>
    %68 = tpu.matmul %66, %67, %cst_28 {dimension_numbers = #tpu.dot_dimension_numbers<[1], [1], [0], [0], [0, 0, 1, 0], [], []>} : vector<8x8xbf16>, vector<64x8xbf16>, vector<8x64xf32> -> vector<8x64xf32>
    %c0_29 = arith.constant 0 : index
    %c0_30 = arith.constant 0 : index
    %c0_31 = arith.constant 0 : index
    %69 = vector.load %arg5[%c0_29, %c0_30, %c0_31] : memref<1x1x64xf32, #tpu.memory_space<vmem>>, vector<1x1x64xf32>
    %70 = vector.shape_cast %69 : vector<1x1x64xf32> to vector<1x64xf32>
    %71 = vector.broadcast %70 : vector<1x64xf32> to vector<8x64xf32>
    %72 = arith.addf %68, %71 : vector<8x64xf32>
    %cst_32 = arith.constant dense<0xFF800000> : vector<8xf32>
    %73 = vector.multi_reduction <maximumf>, %72, %cst_32 [1] : vector<8x64xf32> to vector<8xf32>
    %74 = vector.shape_cast %73 : vector<8xf32> to vector<8x1xf32>
    %75 = vector.broadcast %74 : vector<8x1xf32> to vector<8x64xf32>
    %76 = arith.subf %72, %75 : vector<8x64xf32>
    %77 = math.exp %76 : vector<8x64xf32>
    %cst_33 = arith.constant dense<0.000000e+00> : vector<8xf32>
    %78 = vector.multi_reduction <add>, %77, %cst_33 [1] : vector<8x64xf32> to vector<8xf32>
    %79 = vector.shape_cast %78 : vector<8xf32> to vector<8x1xf32>
    %80 = tpu.reciprocal %79 {approx = true} : vector<8x1xf32> -> vector<8x1xf32>
    %81 = vector.broadcast %80 : vector<8x1xf32> to vector<8x64xf32>
    %82 = arith.mulf %77, %81 : vector<8x64xf32>
    %83 = arith.truncf %82 : vector<8x64xf32> to vector<8x64xbf16>
    %84 = vector.extract_strided_slice %5 {offsets = [0, 24], sizes = [64, 8], strides = [1, 1]} : vector<64x32xbf16> to vector<64x8xbf16>
    %cst_34 = arith.constant dense<0.000000e+00> : vector<8x8xf32>
    %85 = tpu.matmul %83, %84, %cst_34 {dimension_numbers = #tpu.dot_dimension_numbers<[1], [0], [0], [1], [0, 0, 1, 1], [], []>} : vector<8x64xbf16>, vector<64x8xbf16>, vector<8x8xf32> -> vector<8x8xf32>
    %86 = tpu.concatenate %25, %45, %65, %85 in 1 : vector<8x8xf32>, vector<8x8xf32>, vector<8x8xf32>, vector<8x8xf32> -> vector<8x32xf32>
    %87 = arith.truncf %86 : vector<8x32xf32> to vector<8x32xbf16>
    %c0_35 = arith.constant 0 : index
    %c0_36 = arith.constant 0 : index
    %c0_37 = arith.constant 0 : index
    %88 = vector.load %arg6[%c0_35, %c0_36, %c0_37] : memref<1x8x32xbf16, #tpu.memory_space<vmem>>, vector<1x8x32xbf16>
    %89 = vector.shape_cast %88 : vector<1x8x32xbf16> to vector<8x32xbf16>
    %90 = vector.shape_cast %87 : vector<8x32xbf16> to vector<1x8x32xbf16>
    tpu.vector_store %arg6[%c0_35, %c0_36, %c0_37], %90 {strides = array<i32>} : memref<1x8x32xbf16, #tpu.memory_space<vmem>>, vector<1x8x32xbf16>,
    return
  }
  func.func @transform_0(%arg0: i32, %arg1: i32) -> (i32, i32, i32) {
    %c0_i32 = arith.constant 0 : i32
    %c0_i32_0 = arith.constant 0 : i32
    return %arg0, %arg1, %c0_i32 : i32, i32, i32
  }
  func.func @transform_1(%arg0: i32, %arg1: i32) -> (i32, i32, i32) {
    %c0_i32 = arith.constant 0 : i32
    %c0_i32_0 = arith.constant 0 : i32
    %c0_i32_1 = arith.constant 0 : i32
    return %arg0, %c0_i32, %c0_i32_0 : i32, i32, i32
  }
  func.func @transform_2(%arg0: i32, %arg1: i32) -> (i32, i32, i32) {
    %c0_i32 = arith.constant 0 : i32
    %c0_i32_0 = arith.constant 0 : i32
    %c0_i32_1 = arith.constant 0 : i32
    return %arg0, %c0_i32, %c0_i32_0 : i32, i32, i32
  }
  func.func @transform_3(%arg0: i32, %arg1: i32) -> (i32, i32, i32) {
    %c0_i32 = arith.constant 0 : i32
    %c0_i32_0 = arith.constant 0 : i32
    %c0_i32_1 = arith.constant 0 : i32
    return %arg0, %c0_i32, %c0_i32_0 : i32, i32, i32
  }
  func.func @transform_4(%arg0: i32, %arg1: i32) -> (i32, i32, i32) {
    %c0_i32 = arith.constant 0 : i32
    %c0_i32_0 = arith.constant 0 : i32
    return %arg0, %arg1, %c0_i32 : i32, i32, i32
  }
}

module attributes {stable_mosaic.version = 11 : i64} {
  func.func @_proj_add_ln_kernel(%arg0: i32, %arg1: memref<8x32xbf16, #tpu.memory_space<vmem>>, %arg2: memref<8x32xbf16, #tpu.memory_space<vmem>>, %arg3: memref<32x32xbf16, #tpu.memory_space<vmem>>, %arg4: memref<1x32xf32, #tpu.memory_space<vmem>>, %arg5: memref<1x32xf32, #tpu.memory_space<vmem>>, %arg6: memref<1x32xf32, #tpu.memory_space<vmem>>, %arg7: memref<8x32xbf16, #tpu.memory_space<vmem>>) attributes {dimension_semantics = [#tpu.dimension_semantics<parallel>], iteration_bounds = array<i64: 2>, scalar_prefetch = 0 : i64, scratch_operands = 0 : i64, tpu.core_type = #tpu.core_type<tc>, window_params = [{transform_indices = @transform_0, window_bounds = array<i64: 8, 32>}, {transform_indices = @transform_1, window_bounds = array<i64: 8, 32>}, {pipeline_mode = #tpu.pipeline_mode<synchronous>, transform_indices = @transform_2, window_bounds = array<i64: 32, 32>}, {pipeline_mode = #tpu.pipeline_mode<synchronous>, transform_indices = @transform_3, window_bounds = array<i64: 1, 32>}, {pipeline_mode = #tpu.pipeline_mode<synchronous>, transform_indices = @transform_4, window_bounds = array<i64: 1, 32>}, {pipeline_mode = #tpu.pipeline_mode<synchronous>, transform_indices = @transform_5, window_bounds = array<i64: 1, 32>}, {transform_indices = @transform_6, window_bounds = array<i64: 8, 32>}]} {
    %c0 = arith.constant 0 : index
    %c0_0 = arith.constant 0 : index
    %0 = vector.load %arg1[%c0, %c0_0] : memref<8x32xbf16, #tpu.memory_space<vmem>>, vector<8x32xbf16>
    %c0_1 = arith.constant 0 : index
    %c0_2 = arith.constant 0 : index
    %1 = vector.load %arg3[%c0_1, %c0_2] : memref<32x32xbf16, #tpu.memory_space<vmem>>, vector<32x32xbf16>
    %cst = arith.constant dense<0.000000e+00> : vector<8x32xf32>
    %2 = tpu.matmul %0, %1, %cst {dimension_numbers = #tpu.dot_dimension_numbers<[1], [0], [0], [1], [0, 0, 1, 1], [], []>} : vector<8x32xbf16>, vector<32x32xbf16>, vector<8x32xf32> -> vector<8x32xf32>
    %c0_3 = arith.constant 0 : index
    %c0_4 = arith.constant 0 : index
    %3 = vector.load %arg4[%c0_3, %c0_4] : memref<1x32xf32, #tpu.memory_space<vmem>>, vector<1x32xf32>
    %4 = vector.broadcast %3 : vector<1x32xf32> to vector<8x32xf32>
    %5 = arith.addf %2, %4 : vector<8x32xf32>
    %c0_5 = arith.constant 0 : index
    %c0_6 = arith.constant 0 : index
    %6 = vector.load %arg2[%c0_5, %c0_6] : memref<8x32xbf16, #tpu.memory_space<vmem>>, vector<8x32xbf16>
    %7 = arith.extf %6 : vector<8x32xbf16> to vector<8x32xf32>
    %8 = arith.addf %7, %5 : vector<8x32xf32>
    %c0_7 = arith.constant 0 : index
    %c0_8 = arith.constant 0 : index
    %9 = vector.load %arg5[%c0_7, %c0_8] : memref<1x32xf32, #tpu.memory_space<vmem>>, vector<1x32xf32>
    %c0_9 = arith.constant 0 : index
    %c0_10 = arith.constant 0 : index
    %10 = vector.load %arg6[%c0_9, %c0_10] : memref<1x32xf32, #tpu.memory_space<vmem>>, vector<1x32xf32>
    %cst_11 = arith.constant dense<0.000000e+00> : vector<8xf32>
    %11 = vector.multi_reduction <add>, %8, %cst_11 [1] : vector<8x32xf32> to vector<8xf32>
    %12 = vector.shape_cast %11 : vector<8xf32> to vector<8x1xf32>
    %cst_12 = arith.constant 3.200000e+01 : f32
    %13 = vector.broadcast %cst_12 : f32 to vector<8x1xf32>
    %14 = arith.divf %12, %13 : vector<8x1xf32>
    %15 = vector.broadcast %14 : vector<8x1xf32> to vector<8x32xf32>
    %16 = arith.subf %8, %15 : vector<8x32xf32>
    %17 = arith.mulf %16, %16 : vector<8x32xf32>
    %cst_13 = arith.constant dense<0.000000e+00> : vector<8xf32>
    %18 = vector.multi_reduction <add>, %17, %cst_13 [1] : vector<8x32xf32> to vector<8xf32>
    %19 = vector.shape_cast %18 : vector<8xf32> to vector<8x1xf32>
    %cst_14 = arith.constant 3.200000e+01 : f32
    %20 = vector.broadcast %cst_14 : f32 to vector<8x1xf32>
    %21 = arith.divf %19, %20 : vector<8x1xf32>
    %22 = vector.broadcast %14 : vector<8x1xf32> to vector<8x32xf32>
    %23 = arith.subf %8, %22 : vector<8x32xf32>
    %cst_15 = arith.constant 9.99999974E-6 : f32
    %24 = vector.broadcast %cst_15 : f32 to vector<8x1xf32>
    %25 = arith.addf %21, %24 : vector<8x1xf32>
    %26 = math.rsqrt %25 : vector<8x1xf32>
    %27 = vector.broadcast %26 : vector<8x1xf32> to vector<8x32xf32>
    %28 = arith.mulf %23, %27 : vector<8x32xf32>
    %29 = vector.broadcast %9 : vector<1x32xf32> to vector<8x32xf32>
    %30 = arith.mulf %28, %29 : vector<8x32xf32>
    %31 = vector.broadcast %10 : vector<1x32xf32> to vector<8x32xf32>
    %32 = arith.addf %30, %31 : vector<8x32xf32>
    %33 = arith.truncf %32 : vector<8x32xf32> to vector<8x32xbf16>
    %c0_16 = arith.constant 0 : index
    %c0_17 = arith.constant 0 : index
    %34 = vector.load %arg7[%c0_16, %c0_17] : memref<8x32xbf16, #tpu.memory_space<vmem>>, vector<8x32xbf16>
    tpu.vector_store %arg7[%c0_16, %c0_17], %33 {strides = array<i32>} : memref<8x32xbf16, #tpu.memory_space<vmem>>, vector<8x32xbf16>,
    return
  }
  func.func @transform_0(%arg0: i32) -> (i32, i32) {
    %c0_i32 = arith.constant 0 : i32
    %c0_i32_0 = arith.constant 0 : i32
    return %arg0, %c0_i32 : i32, i32
  }
  func.func @transform_1(%arg0: i32) -> (i32, i32) {
    %c0_i32 = arith.constant 0 : i32
    %c0_i32_0 = arith.constant 0 : i32
    return %arg0, %c0_i32 : i32, i32
  }
  func.func @transform_2(%arg0: i32) -> (i32, i32) {
    %c0_i32 = arith.constant 0 : i32
    %c0_i32_0 = arith.constant 0 : i32
    %c0_i32_1 = arith.constant 0 : i32
    return %c0_i32, %c0_i32_0 : i32, i32
  }
  func.func @transform_3(%arg0: i32) -> (i32, i32) {
    %c0_i32 = arith.constant 0 : i32
    %c0_i32_0 = arith.constant 0 : i32
    %c0_i32_1 = arith.constant 0 : i32
    return %c0_i32, %c0_i32_0 : i32, i32
  }
  func.func @transform_4(%arg0: i32) -> (i32, i32) {
    %c0_i32 = arith.constant 0 : i32
    %c0_i32_0 = arith.constant 0 : i32
    %c0_i32_1 = arith.constant 0 : i32
    return %c0_i32, %c0_i32_0 : i32, i32
  }
  func.func @transform_5(%arg0: i32) -> (i32, i32) {
    %c0_i32 = arith.constant 0 : i32
    %c0_i32_0 = arith.constant 0 : i32
    %c0_i32_1 = arith.constant 0 : i32
    return %c0_i32, %c0_i32_0 : i32, i32
  }
  func.func @transform_6(%arg0: i32) -> (i32, i32) {
    %c0_i32 = arith.constant 0 : i32
    %c0_i32_0 = arith.constant 0 : i32
    return %arg0, %c0_i32 : i32, i32
  }
}

module attributes {stable_mosaic.version = 11 : i64} {
  func.func @_ffn_ln_kernel(%arg0: i32, %arg1: memref<8x32xbf16, #tpu.memory_space<vmem>>, %arg2: memref<32x64xbf16, #tpu.memory_space<vmem>>, %arg3: memref<1x64xf32, #tpu.memory_space<vmem>>, %arg4: memref<64x32xbf16, #tpu.memory_space<vmem>>, %arg5: memref<1x32xf32, #tpu.memory_space<vmem>>, %arg6: memref<1x32xf32, #tpu.memory_space<vmem>>, %arg7: memref<1x32xf32, #tpu.memory_space<vmem>>, %arg8: memref<8x32xbf16, #tpu.memory_space<vmem>>) attributes {dimension_semantics = [#tpu.dimension_semantics<parallel>], iteration_bounds = array<i64: 2>, scalar_prefetch = 0 : i64, scratch_operands = 0 : i64, tpu.core_type = #tpu.core_type<tc>, window_params = [{transform_indices = @transform_0, window_bounds = array<i64: 8, 32>}, {pipeline_mode = #tpu.pipeline_mode<synchronous>, transform_indices = @transform_1, window_bounds = array<i64: 32, 64>}, {pipeline_mode = #tpu.pipeline_mode<synchronous>, transform_indices = @transform_2, window_bounds = array<i64: 1, 64>}, {pipeline_mode = #tpu.pipeline_mode<synchronous>, transform_indices = @transform_3, window_bounds = array<i64: 64, 32>}, {pipeline_mode = #tpu.pipeline_mode<synchronous>, transform_indices = @transform_4, window_bounds = array<i64: 1, 32>}, {pipeline_mode = #tpu.pipeline_mode<synchronous>, transform_indices = @transform_5, window_bounds = array<i64: 1, 32>}, {pipeline_mode = #tpu.pipeline_mode<synchronous>, transform_indices = @transform_6, window_bounds = array<i64: 1, 32>}, {transform_indices = @transform_7, window_bounds = array<i64: 8, 32>}]} {
    %c0 = arith.constant 0 : index
    %c0_0 = arith.constant 0 : index
    %0 = vector.load %arg1[%c0, %c0_0] : memref<8x32xbf16, #tpu.memory_space<vmem>>, vector<8x32xbf16>
    %c0_1 = arith.constant 0 : index
    %c0_2 = arith.constant 0 : index
    %1 = vector.load %arg2[%c0_1, %c0_2] : memref<32x64xbf16, #tpu.memory_space<vmem>>, vector<32x64xbf16>
    %cst = arith.constant dense<0.000000e+00> : vector<8x64xf32>
    %2 = tpu.matmul %0, %1, %cst {dimension_numbers = #tpu.dot_dimension_numbers<[1], [0], [0], [1], [0, 0, 1, 1], [], []>} : vector<8x32xbf16>, vector<32x64xbf16>, vector<8x64xf32> -> vector<8x64xf32>
    %c0_3 = arith.constant 0 : index
    %c0_4 = arith.constant 0 : index
    %3 = vector.load %arg3[%c0_3, %c0_4] : memref<1x64xf32, #tpu.memory_space<vmem>>, vector<1x64xf32>
    %4 = vector.broadcast %3 : vector<1x64xf32> to vector<8x64xf32>
    %5 = arith.addf %2, %4 : vector<8x64xf32>
    %cst_5 = arith.constant 0.000000e+00 : f32
    %6 = vector.broadcast %cst_5 : f32 to vector<8x64xf32>
    %7 = arith.maximumf %5, %6 : vector<8x64xf32>
    %8 = arith.truncf %7 : vector<8x64xf32> to vector<8x64xbf16>
    %c0_6 = arith.constant 0 : index
    %c0_7 = arith.constant 0 : index
    %9 = vector.load %arg4[%c0_6, %c0_7] : memref<64x32xbf16, #tpu.memory_space<vmem>>, vector<64x32xbf16>
    %cst_8 = arith.constant dense<0.000000e+00> : vector<8x32xf32>
    %10 = tpu.matmul %8, %9, %cst_8 {dimension_numbers = #tpu.dot_dimension_numbers<[1], [0], [0], [1], [0, 0, 1, 1], [], []>} : vector<8x64xbf16>, vector<64x32xbf16>, vector<8x32xf32> -> vector<8x32xf32>
    %c0_9 = arith.constant 0 : index
    %c0_10 = arith.constant 0 : index
    %11 = vector.load %arg5[%c0_9, %c0_10] : memref<1x32xf32, #tpu.memory_space<vmem>>, vector<1x32xf32>
    %12 = vector.broadcast %11 : vector<1x32xf32> to vector<8x32xf32>
    %13 = arith.addf %10, %12 : vector<8x32xf32>
    %14 = arith.extf %0 : vector<8x32xbf16> to vector<8x32xf32>
    %15 = arith.addf %14, %13 : vector<8x32xf32>
    %c0_11 = arith.constant 0 : index
    %c0_12 = arith.constant 0 : index
    %16 = vector.load %arg6[%c0_11, %c0_12] : memref<1x32xf32, #tpu.memory_space<vmem>>, vector<1x32xf32>
    %c0_13 = arith.constant 0 : index
    %c0_14 = arith.constant 0 : index
    %17 = vector.load %arg7[%c0_13, %c0_14] : memref<1x32xf32, #tpu.memory_space<vmem>>, vector<1x32xf32>
    %cst_15 = arith.constant dense<0.000000e+00> : vector<8xf32>
    %18 = vector.multi_reduction <add>, %15, %cst_15 [1] : vector<8x32xf32> to vector<8xf32>
    %19 = vector.shape_cast %18 : vector<8xf32> to vector<8x1xf32>
    %cst_16 = arith.constant 3.200000e+01 : f32
    %20 = vector.broadcast %cst_16 : f32 to vector<8x1xf32>
    %21 = arith.divf %19, %20 : vector<8x1xf32>
    %22 = vector.broadcast %21 : vector<8x1xf32> to vector<8x32xf32>
    %23 = arith.subf %15, %22 : vector<8x32xf32>
    %24 = arith.mulf %23, %23 : vector<8x32xf32>
    %cst_17 = arith.constant dense<0.000000e+00> : vector<8xf32>
    %25 = vector.multi_reduction <add>, %24, %cst_17 [1] : vector<8x32xf32> to vector<8xf32>
    %26 = vector.shape_cast %25 : vector<8xf32> to vector<8x1xf32>
    %cst_18 = arith.constant 3.200000e+01 : f32
    %27 = vector.broadcast %cst_18 : f32 to vector<8x1xf32>
    %28 = arith.divf %26, %27 : vector<8x1xf32>
    %29 = vector.broadcast %21 : vector<8x1xf32> to vector<8x32xf32>
    %30 = arith.subf %15, %29 : vector<8x32xf32>
    %cst_19 = arith.constant 9.99999974E-6 : f32
    %31 = vector.broadcast %cst_19 : f32 to vector<8x1xf32>
    %32 = arith.addf %28, %31 : vector<8x1xf32>
    %33 = math.rsqrt %32 : vector<8x1xf32>
    %34 = vector.broadcast %33 : vector<8x1xf32> to vector<8x32xf32>
    %35 = arith.mulf %30, %34 : vector<8x32xf32>
    %36 = vector.broadcast %16 : vector<1x32xf32> to vector<8x32xf32>
    %37 = arith.mulf %35, %36 : vector<8x32xf32>
    %38 = vector.broadcast %17 : vector<1x32xf32> to vector<8x32xf32>
    %39 = arith.addf %37, %38 : vector<8x32xf32>
    %40 = arith.truncf %39 : vector<8x32xf32> to vector<8x32xbf16>
    %c0_20 = arith.constant 0 : index
    %c0_21 = arith.constant 0 : index
    %41 = vector.load %arg8[%c0_20, %c0_21] : memref<8x32xbf16, #tpu.memory_space<vmem>>, vector<8x32xbf16>
    tpu.vector_store %arg8[%c0_20, %c0_21], %40 {strides = array<i32>} : memref<8x32xbf16, #tpu.memory_space<vmem>>, vector<8x32xbf16>,
    return
  }
  func.func @transform_0(%arg0: i32) -> (i32, i32) {
    %c0_i32 = arith.constant 0 : i32
    %c0_i32_0 = arith.constant 0 : i32
    return %arg0, %c0_i32 : i32, i32
  }
  func.func @transform_1(%arg0: i32) -> (i32, i32) {
    %c0_i32 = arith.constant 0 : i32
    %c0_i32_0 = arith.constant 0 : i32
    %c0_i32_1 = arith.constant 0 : i32
    return %c0_i32, %c0_i32_0 : i32, i32
  }
  func.func @transform_2(%arg0: i32) -> (i32, i32) {
    %c0_i32 = arith.constant 0 : i32
    %c0_i32_0 = arith.constant 0 : i32
    %c0_i32_1 = arith.constant 0 : i32
    return %c0_i32, %c0_i32_0 : i32, i32
  }
  func.func @transform_3(%arg0: i32) -> (i32, i32) {
    %c0_i32 = arith.constant 0 : i32
    %c0_i32_0 = arith.constant 0 : i32
    %c0_i32_1 = arith.constant 0 : i32
    return %c0_i32, %c0_i32_0 : i32, i32
  }
  func.func @transform_4(%arg0: i32) -> (i32, i32) {
    %c0_i32 = arith.constant 0 : i32
    %c0_i32_0 = arith.constant 0 : i32
    %c0_i32_1 = arith.constant 0 : i32
    return %c0_i32, %c0_i32_0 : i32, i32
  }
  func.func @transform_5(%arg0: i32) -> (i32, i32) {
    %c0_i32 = arith.constant 0 : i32
    %c0_i32_0 = arith.constant 0 : i32
    %c0_i32_1 = arith.constant 0 : i32
    return %c0_i32, %c0_i32_0 : i32, i32
  }
  func.func @transform_6(%arg0: i32) -> (i32, i32) {
    %c0_i32 = arith.constant 0 : i32
    %c0_i32_0 = arith.constant 0 : i32
    %c0_i32_1 = arith.constant 0 : i32
    return %c0_i32, %c0_i32_0 : i32, i32
  }
  func.func @transform_7(%arg0: i32) -> (i32, i32) {
    %c0_i32 = arith.constant 0 : i32
    %c0_i32_0 = arith.constant 0 : i32
    return %arg0, %c0_i32 : i32, i32
  }
}

module attributes {stable_mosaic.version = 11 : i64} {
  func.func @_qkv_kernel(%arg0: i32, %arg1: memref<8x32xbf16, #tpu.memory_space<vmem>>, %arg2: memref<8x32xbf16, #tpu.memory_space<vmem>>, %arg3: memref<32x64xbf16, #tpu.memory_space<vmem>>, %arg4: memref<1x64xf32, #tpu.memory_space<vmem>>, %arg5: memref<32x32xbf16, #tpu.memory_space<vmem>>, %arg6: memref<1x32xf32, #tpu.memory_space<vmem>>, %arg7: memref<8x32xbf16, #tpu.memory_space<vmem>>, %arg8: memref<8x32xbf16, #tpu.memory_space<vmem>>, %arg9: memref<8x32xbf16, #tpu.memory_space<vmem>>) attributes {dimension_semantics = [#tpu.dimension_semantics<parallel>], iteration_bounds = array<i64: 2>, scalar_prefetch = 0 : i64, scratch_operands = 0 : i64, tpu.core_type = #tpu.core_type<tc>, window_params = [{transform_indices = @transform_0, window_bounds = array<i64: 8, 32>}, {transform_indices = @transform_1, window_bounds = array<i64: 8, 32>}, {pipeline_mode = #tpu.pipeline_mode<synchronous>, transform_indices = @transform_2, window_bounds = array<i64: 32, 64>}, {pipeline_mode = #tpu.pipeline_mode<synchronous>, transform_indices = @transform_3, window_bounds = array<i64: 1, 64>}, {pipeline_mode = #tpu.pipeline_mode<synchronous>, transform_indices = @transform_4, window_bounds = array<i64: 32, 32>}, {pipeline_mode = #tpu.pipeline_mode<synchronous>, transform_indices = @transform_5, window_bounds = array<i64: 1, 32>}, {transform_indices = @transform_6, window_bounds = array<i64: 8, 32>}, {transform_indices = @transform_7, window_bounds = array<i64: 8, 32>}, {transform_indices = @transform_8, window_bounds = array<i64: 8, 32>}]} {
    %c0 = arith.constant 0 : index
    %c0_0 = arith.constant 0 : index
    %0 = vector.load %arg1[%c0, %c0_0] : memref<8x32xbf16, #tpu.memory_space<vmem>>, vector<8x32xbf16>
    %1 = arith.extf %0 : vector<8x32xbf16> to vector<8x32xf32>
    %c0_1 = arith.constant 0 : index
    %c0_2 = arith.constant 0 : index
    %2 = vector.load %arg2[%c0_1, %c0_2] : memref<8x32xbf16, #tpu.memory_space<vmem>>, vector<8x32xbf16>
    %3 = arith.extf %2 : vector<8x32xbf16> to vector<8x32xf32>
    %4 = arith.addf %1, %3 : vector<8x32xf32>
    %5 = arith.truncf %4 : vector<8x32xf32> to vector<8x32xbf16>
    %c0_3 = arith.constant 0 : index
    %c0_4 = arith.constant 0 : index
    %6 = vector.load %arg3[%c0_3, %c0_4] : memref<32x64xbf16, #tpu.memory_space<vmem>>, vector<32x64xbf16>
    %cst = arith.constant dense<0.000000e+00> : vector<8x64xf32>
    %7 = tpu.matmul %5, %6, %cst {dimension_numbers = #tpu.dot_dimension_numbers<[1], [0], [0], [1], [0, 0, 1, 1], [], []>} : vector<8x32xbf16>, vector<32x64xbf16>, vector<8x64xf32> -> vector<8x64xf32>
    %c0_5 = arith.constant 0 : index
    %c0_6 = arith.constant 0 : index
    %8 = vector.load %arg4[%c0_5, %c0_6] : memref<1x64xf32, #tpu.memory_space<vmem>>, vector<1x64xf32>
    %9 = vector.broadcast %8 : vector<1x64xf32> to vector<8x64xf32>
    %10 = arith.addf %7, %9 : vector<8x64xf32>
    %11 = vector.extract_strided_slice %10 {offsets = [0, 0], sizes = [8, 32], strides = [1, 1]} : vector<8x64xf32> to vector<8x32xf32>
    %12 = arith.truncf %11 : vector<8x32xf32> to vector<8x32xbf16>
    %c0_7 = arith.constant 0 : index
    %c0_8 = arith.constant 0 : index
    %13 = vector.load %arg7[%c0_7, %c0_8] : memref<8x32xbf16, #tpu.memory_space<vmem>>, vector<8x32xbf16>
    tpu.vector_store %arg7[%c0_7, %c0_8], %12 {strides = array<i32>} : memref<8x32xbf16, #tpu.memory_space<vmem>>, vector<8x32xbf16>,
    %14 = vector.extract_strided_slice %10 {offsets = [0, 32], sizes = [8, 32], strides = [1, 1]} : vector<8x64xf32> to vector<8x32xf32>
    %15 = arith.truncf %14 : vector<8x32xf32> to vector<8x32xbf16>
    %c0_9 = arith.constant 0 : index
    %c0_10 = arith.constant 0 : index
    %16 = vector.load %arg8[%c0_9, %c0_10] : memref<8x32xbf16, #tpu.memory_space<vmem>>, vector<8x32xbf16>
    tpu.vector_store %arg8[%c0_9, %c0_10], %15 {strides = array<i32>} : memref<8x32xbf16, #tpu.memory_space<vmem>>, vector<8x32xbf16>,
    %c0_11 = arith.constant 0 : index
    %c0_12 = arith.constant 0 : index
    %17 = vector.load %arg5[%c0_11, %c0_12] : memref<32x32xbf16, #tpu.memory_space<vmem>>, vector<32x32xbf16>
    %cst_13 = arith.constant dense<0.000000e+00> : vector<8x32xf32>
    %18 = tpu.matmul %0, %17, %cst_13 {dimension_numbers = #tpu.dot_dimension_numbers<[1], [0], [0], [1], [0, 0, 1, 1], [], []>} : vector<8x32xbf16>, vector<32x32xbf16>, vector<8x32xf32> -> vector<8x32xf32>
    %c0_14 = arith.constant 0 : index
    %c0_15 = arith.constant 0 : index
    %19 = vector.load %arg6[%c0_14, %c0_15] : memref<1x32xf32, #tpu.memory_space<vmem>>, vector<1x32xf32>
    %20 = vector.broadcast %19 : vector<1x32xf32> to vector<8x32xf32>
    %21 = arith.addf %18, %20 : vector<8x32xf32>
    %22 = arith.truncf %21 : vector<8x32xf32> to vector<8x32xbf16>
    %c0_16 = arith.constant 0 : index
    %c0_17 = arith.constant 0 : index
    %23 = vector.load %arg9[%c0_16, %c0_17] : memref<8x32xbf16, #tpu.memory_space<vmem>>, vector<8x32xbf16>
    tpu.vector_store %arg9[%c0_16, %c0_17], %22 {strides = array<i32>} : memref<8x32xbf16, #tpu.memory_space<vmem>>, vector<8x32xbf16>,
    return
  }
  func.func @transform_0(%arg0: i32) -> (i32, i32) {
    %c0_i32 = arith.constant 0 : i32
    %c0_i32_0 = arith.constant 0 : i32
    return %arg0, %c0_i32 : i32, i32
  }
  func.func @transform_1(%arg0: i32) -> (i32, i32) {
    %c0_i32 = arith.constant 0 : i32
    %c0_i32_0 = arith.constant 0 : i32
    return %arg0, %c0_i32 : i32, i32
  }
  func.func @transform_2(%arg0: i32) -> (i32, i32) {
    %c0_i32 = arith.constant 0 : i32
    %c0_i32_0 = arith.constant 0 : i32
    %c0_i32_1 = arith.constant 0 : i32
    return %c0_i32, %c0_i32_0 : i32, i32
  }
  func.func @transform_3(%arg0: i32) -> (i32, i32) {
    %c0_i32 = arith.constant 0 : i32
    %c0_i32_0 = arith.constant 0 : i32
    %c0_i32_1 = arith.constant 0 : i32
    return %c0_i32, %c0_i32_0 : i32, i32
  }
  func.func @transform_4(%arg0: i32) -> (i32, i32) {
    %c0_i32 = arith.constant 0 : i32
    %c0_i32_0 = arith.constant 0 : i32
    %c0_i32_1 = arith.constant 0 : i32
    return %c0_i32, %c0_i32_0 : i32, i32
  }
  func.func @transform_5(%arg0: i32) -> (i32, i32) {
    %c0_i32 = arith.constant 0 : i32
    %c0_i32_0 = arith.constant 0 : i32
    %c0_i32_1 = arith.constant 0 : i32
    return %c0_i32, %c0_i32_0 : i32, i32
  }
  func.func @transform_6(%arg0: i32) -> (i32, i32) {
    %c0_i32 = arith.constant 0 : i32
    %c0_i32_0 = arith.constant 0 : i32
    return %arg0, %c0_i32 : i32, i32
  }
  func.func @transform_7(%arg0: i32) -> (i32, i32) {
    %c0_i32 = arith.constant 0 : i32
    %c0_i32_0 = arith.constant 0 : i32
    return %arg0, %c0_i32 : i32, i32
  }
  func.func @transform_8(%arg0: i32) -> (i32, i32) {
    %c0_i32 = arith.constant 0 : i32
    %c0_i32_0 = arith.constant 0 : i32
    return %arg0, %c0_i32 : i32, i32
  }
}

module attributes {stable_mosaic.version = 11 : i64} {
  func.func @_head_kernel(%arg0: i32, %arg1: memref<8x32xbf16, #tpu.memory_space<vmem>>, %arg2: memref<1x32xf32, #tpu.memory_space<vmem>>, %arg3: memref<1x32xf32, #tpu.memory_space<vmem>>, %arg4: memref<32x128xbf16, #tpu.memory_space<vmem>>, %arg5: memref<1x128xf32, #tpu.memory_space<vmem>>, %arg6: memref<32x32xbf16, #tpu.memory_space<vmem>>, %arg7: memref<1x32xf32, #tpu.memory_space<vmem>>, %arg8: memref<32x32xbf16, #tpu.memory_space<vmem>>, %arg9: memref<1x32xf32, #tpu.memory_space<vmem>>, %arg10: memref<32x128xbf16, #tpu.memory_space<vmem>>, %arg11: memref<1x128xf32, #tpu.memory_space<vmem>>, %arg12: memref<8x128xf32, #tpu.memory_space<vmem>>) attributes {dimension_semantics = [#tpu.dimension_semantics<parallel>], iteration_bounds = array<i64: 2>, scalar_prefetch = 0 : i64, scratch_operands = 0 : i64, tpu.core_type = #tpu.core_type<tc>, window_params = [{transform_indices = @transform_0, window_bounds = array<i64: 8, 32>}, {pipeline_mode = #tpu.pipeline_mode<synchronous>, transform_indices = @transform_1, window_bounds = array<i64: 1, 32>}, {pipeline_mode = #tpu.pipeline_mode<synchronous>, transform_indices = @transform_2, window_bounds = array<i64: 1, 32>}, {pipeline_mode = #tpu.pipeline_mode<synchronous>, transform_indices = @transform_3, window_bounds = array<i64: 32, 128>}, {pipeline_mode = #tpu.pipeline_mode<synchronous>, transform_indices = @transform_4, window_bounds = array<i64: 1, 128>}, {pipeline_mode = #tpu.pipeline_mode<synchronous>, transform_indices = @transform_5, window_bounds = array<i64: 32, 32>}, {pipeline_mode = #tpu.pipeline_mode<synchronous>, transform_indices = @transform_6, window_bounds = array<i64: 1, 32>}, {pipeline_mode = #tpu.pipeline_mode<synchronous>, transform_indices = @transform_7, window_bounds = array<i64: 32, 32>}, {pipeline_mode = #tpu.pipeline_mode<synchronous>, transform_indices = @transform_8, window_bounds = array<i64: 1, 32>}, {pipeline_mode = #tpu.pipeline_mode<synchronous>, transform_indices = @transform_9, window_bounds = array<i64: 32, 128>}, {pipeline_mode = #tpu.pipeline_mode<synchronous>, transform_indices = @transform_10, window_bounds = array<i64: 1, 128>}, {transform_indices = @transform_11, window_bounds = array<i64: 8, 128>}]} {
    %c0 = arith.constant 0 : index
    %c0_0 = arith.constant 0 : index
    %0 = vector.load %arg1[%c0, %c0_0] : memref<8x32xbf16, #tpu.memory_space<vmem>>, vector<8x32xbf16>
    %1 = arith.extf %0 : vector<8x32xbf16> to vector<8x32xf32>
    %c0_1 = arith.constant 0 : index
    %c0_2 = arith.constant 0 : index
    %2 = vector.load %arg2[%c0_1, %c0_2] : memref<1x32xf32, #tpu.memory_space<vmem>>, vector<1x32xf32>
    %c0_3 = arith.constant 0 : index
    %c0_4 = arith.constant 0 : index
    %3 = vector.load %arg3[%c0_3, %c0_4] : memref<1x32xf32, #tpu.memory_space<vmem>>, vector<1x32xf32>
    %cst = arith.constant dense<0.000000e+00> : vector<8xf32>
    %4 = vector.multi_reduction <add>, %1, %cst [1] : vector<8x32xf32> to vector<8xf32>
    %5 = vector.shape_cast %4 : vector<8xf32> to vector<8x1xf32>
    %cst_5 = arith.constant 3.200000e+01 : f32
    %6 = vector.broadcast %cst_5 : f32 to vector<8x1xf32>
    %7 = arith.divf %5, %6 : vector<8x1xf32>
    %8 = vector.broadcast %7 : vector<8x1xf32> to vector<8x32xf32>
    %9 = arith.subf %1, %8 : vector<8x32xf32>
    %10 = arith.mulf %9, %9 : vector<8x32xf32>
    %cst_6 = arith.constant dense<0.000000e+00> : vector<8xf32>
    %11 = vector.multi_reduction <add>, %10, %cst_6 [1] : vector<8x32xf32> to vector<8xf32>
    %12 = vector.shape_cast %11 : vector<8xf32> to vector<8x1xf32>
    %cst_7 = arith.constant 3.200000e+01 : f32
    %13 = vector.broadcast %cst_7 : f32 to vector<8x1xf32>
    %14 = arith.divf %12, %13 : vector<8x1xf32>
    %15 = vector.broadcast %7 : vector<8x1xf32> to vector<8x32xf32>
    %16 = arith.subf %1, %15 : vector<8x32xf32>
    %cst_8 = arith.constant 9.99999974E-6 : f32
    %17 = vector.broadcast %cst_8 : f32 to vector<8x1xf32>
    %18 = arith.addf %14, %17 : vector<8x1xf32>
    %19 = math.rsqrt %18 : vector<8x1xf32>
    %20 = vector.broadcast %19 : vector<8x1xf32> to vector<8x32xf32>
    %21 = arith.mulf %16, %20 : vector<8x32xf32>
    %22 = vector.broadcast %2 : vector<1x32xf32> to vector<8x32xf32>
    %23 = arith.mulf %21, %22 : vector<8x32xf32>
    %24 = vector.broadcast %3 : vector<1x32xf32> to vector<8x32xf32>
    %25 = arith.addf %23, %24 : vector<8x32xf32>
    %26 = arith.truncf %25 : vector<8x32xf32> to vector<8x32xbf16>
    %c0_9 = arith.constant 0 : index
    %c0_10 = arith.constant 0 : index
    %27 = vector.load %arg4[%c0_9, %c0_10] : memref<32x128xbf16, #tpu.memory_space<vmem>>, vector<32x128xbf16>
    %cst_11 = arith.constant dense<0.000000e+00> : vector<8x128xf32>
    %28 = tpu.matmul %26, %27, %cst_11 {dimension_numbers = #tpu.dot_dimension_numbers<[1], [0], [0], [1], [0, 0, 1, 1], [], []>} : vector<8x32xbf16>, vector<32x128xbf16>, vector<8x128xf32> -> vector<8x128xf32>
    %c0_12 = arith.constant 0 : index
    %c0_13 = arith.constant 0 : index
    %29 = vector.load %arg5[%c0_12, %c0_13] : memref<1x128xf32, #tpu.memory_space<vmem>>, vector<1x128xf32>
    %30 = vector.broadcast %29 : vector<1x128xf32> to vector<8x128xf32>
    %31 = arith.addf %28, %30 : vector<8x128xf32>
    %c0_14 = arith.constant 0 : index
    %c0_15 = arith.constant 0 : index
    %32 = vector.load %arg6[%c0_14, %c0_15] : memref<32x32xbf16, #tpu.memory_space<vmem>>, vector<32x32xbf16>
    %cst_16 = arith.constant dense<0.000000e+00> : vector<8x32xf32>
    %33 = tpu.matmul %26, %32, %cst_16 {dimension_numbers = #tpu.dot_dimension_numbers<[1], [0], [0], [1], [0, 0, 1, 1], [], []>} : vector<8x32xbf16>, vector<32x32xbf16>, vector<8x32xf32> -> vector<8x32xf32>
    %c0_17 = arith.constant 0 : index
    %c0_18 = arith.constant 0 : index
    %34 = vector.load %arg7[%c0_17, %c0_18] : memref<1x32xf32, #tpu.memory_space<vmem>>, vector<1x32xf32>
    %35 = vector.broadcast %34 : vector<1x32xf32> to vector<8x32xf32>
    %36 = arith.addf %33, %35 : vector<8x32xf32>
    %cst_19 = arith.constant 0.000000e+00 : f32
    %37 = vector.broadcast %cst_19 : f32 to vector<8x32xf32>
    %38 = arith.maximumf %36, %37 : vector<8x32xf32>
    %39 = arith.truncf %38 : vector<8x32xf32> to vector<8x32xbf16>
    %c0_20 = arith.constant 0 : index
    %c0_21 = arith.constant 0 : index
    %40 = vector.load %arg8[%c0_20, %c0_21] : memref<32x32xbf16, #tpu.memory_space<vmem>>, vector<32x32xbf16>
    %cst_22 = arith.constant dense<0.000000e+00> : vector<8x32xf32>
    %41 = tpu.matmul %39, %40, %cst_22 {dimension_numbers = #tpu.dot_dimension_numbers<[1], [0], [0], [1], [0, 0, 1, 1], [], []>} : vector<8x32xbf16>, vector<32x32xbf16>, vector<8x32xf32> -> vector<8x32xf32>
    %c0_23 = arith.constant 0 : index
    %c0_24 = arith.constant 0 : index
    %42 = vector.load %arg9[%c0_23, %c0_24] : memref<1x32xf32, #tpu.memory_space<vmem>>, vector<1x32xf32>
    %43 = vector.broadcast %42 : vector<1x32xf32> to vector<8x32xf32>
    %44 = arith.addf %41, %43 : vector<8x32xf32>
    %cst_25 = arith.constant 0.000000e+00 : f32
    %45 = vector.broadcast %cst_25 : f32 to vector<8x32xf32>
    %46 = arith.maximumf %44, %45 : vector<8x32xf32>
    %47 = arith.truncf %46 : vector<8x32xf32> to vector<8x32xbf16>
    %c0_26 = arith.constant 0 : index
    %c0_27 = arith.constant 0 : index
    %48 = vector.load %arg10[%c0_26, %c0_27] : memref<32x128xbf16, #tpu.memory_space<vmem>>, vector<32x128xbf16>
    %cst_28 = arith.constant dense<0.000000e+00> : vector<8x128xf32>
    %49 = tpu.matmul %47, %48, %cst_28 {dimension_numbers = #tpu.dot_dimension_numbers<[1], [0], [0], [1], [0, 0, 1, 1], [], []>} : vector<8x32xbf16>, vector<32x128xbf16>, vector<8x128xf32> -> vector<8x128xf32>
    %c0_29 = arith.constant 0 : index
    %c0_30 = arith.constant 0 : index
    %50 = vector.load %arg11[%c0_29, %c0_30] : memref<1x128xf32, #tpu.memory_space<vmem>>, vector<1x128xf32>
    %51 = vector.broadcast %50 : vector<1x128xf32> to vector<8x128xf32>
    %52 = arith.addf %49, %51 : vector<8x128xf32>
    %cst_31 = arith.constant 5.000000e-01 : f32
    %53 = vector.broadcast %cst_31 : f32 to vector<8x128xf32>
    %54 = arith.mulf %53, %52 : vector<8x128xf32>
    %55 = math.tanh %54 : vector<8x128xf32>
    %cst_32 = arith.constant 1.000000e+00 : f32
    %56 = vector.broadcast %cst_32 : f32 to vector<8x128xf32>
    %57 = arith.addf %55, %56 : vector<8x128xf32>
    %cst_33 = arith.constant 5.000000e-01 : f32
    %58 = vector.broadcast %cst_33 : f32 to vector<8x128xf32>
    %59 = arith.mulf %58, %57 : vector<8x128xf32>
    %60 = tpu.iota {dimensions = array<i32: 1>} : vector<1x128xi32>
    %c5_i32 = arith.constant 5 : i32
    %61 = vector.broadcast %c5_i32 : i32 to vector<1x128xi32>
    %62 = arith.cmpi sge, %60, %61 : vector<1x128xi32>
    %c9_i32 = arith.constant 9 : i32
    %63 = vector.broadcast %c9_i32 : i32 to vector<1x128xi32>
    %64 = arith.cmpi slt, %60, %63 : vector<1x128xi32>
    %65 = arith.andi %62, %64 : vector<1x128xi1>
    %66 = vector.shape_cast %65 : vector<1x128xi1> to vector<1x128xi1>
    %67 = vector.broadcast %66 : vector<1x128xi1> to vector<8x128xi1>
    %68 = arith.select %67, %59, %31 : vector<8x128xi1>, vector<8x128xf32>
    %c0_34 = arith.constant 0 : index
    %c0_35 = arith.constant 0 : index
    %69 = vector.load %arg12[%c0_34, %c0_35] : memref<8x128xf32, #tpu.memory_space<vmem>>, vector<8x128xf32>
    tpu.vector_store %arg12[%c0_34, %c0_35], %68 {strides = array<i32>} : memref<8x128xf32, #tpu.memory_space<vmem>>, vector<8x128xf32>,
    return
  }
  func.func @transform_0(%arg0: i32) -> (i32, i32) {
    %c0_i32 = arith.constant 0 : i32
    %c0_i32_0 = arith.constant 0 : i32
    return %arg0, %c0_i32 : i32, i32
  }
  func.func @transform_1(%arg0: i32) -> (i32, i32) {
    %c0_i32 = arith.constant 0 : i32
    %c0_i32_0 = arith.constant 0 : i32
    %c0_i32_1 = arith.constant 0 : i32
    return %c0_i32, %c0_i32_0 : i32, i32
  }
  func.func @transform_2(%arg0: i32) -> (i32, i32) {
    %c0_i32 = arith.constant 0 : i32
    %c0_i32_0 = arith.constant 0 : i32
    %c0_i32_1 = arith.constant 0 : i32
    return %c0_i32, %c0_i32_0 : i32, i32
  }
  func.func @transform_3(%arg0: i32) -> (i32, i32) {
    %c0_i32 = arith.constant 0 : i32
    %c0_i32_0 = arith.constant 0 : i32
    %c0_i32_1 = arith.constant 0 : i32
    return %c0_i32, %c0_i32_0 : i32, i32
  }
  func.func @transform_4(%arg0: i32) -> (i32, i32) {
    %c0_i32 = arith.constant 0 : i32
    %c0_i32_0 = arith.constant 0 : i32
    %c0_i32_1 = arith.constant 0 : i32
    return %c0_i32, %c0_i32_0 : i32, i32
  }
  func.func @transform_5(%arg0: i32) -> (i32, i32) {
    %c0_i32 = arith.constant 0 : i32
    %c0_i32_0 = arith.constant 0 : i32
    %c0_i32_1 = arith.constant 0 : i32
    return %c0_i32, %c0_i32_0 : i32, i32
  }
  func.func @transform_6(%arg0: i32) -> (i32, i32) {
    %c0_i32 = arith.constant 0 : i32
    %c0_i32_0 = arith.constant 0 : i32
    %c0_i32_1 = arith.constant 0 : i32
    return %c0_i32, %c0_i32_0 : i32, i32
  }
  func.func @transform_7(%arg0: i32) -> (i32, i32) {
    %c0_i32 = arith.constant 0 : i32
    %c0_i32_0 = arith.constant 0 : i32
    %c0_i32_1 = arith.constant 0 : i32
    return %c0_i32, %c0_i32_0 : i32, i32
  }
  func.func @transform_8(%arg0: i32) -> (i32, i32) {
    %c0_i32 = arith.constant 0 : i32
    %c0_i32_0 = arith.constant 0 : i32
    %c0_i32_1 = arith.constant 0 : i32
    return %c0_i32, %c0_i32_0 : i32, i32
  }
  func.func @transform_9(%arg0: i32) -> (i32, i32) {
    %c0_i32 = arith.constant 0 : i32
    %c0_i32_0 = arith.constant 0 : i32
    %c0_i32_1 = arith.constant 0 : i32
    return %c0_i32, %c0_i32_0 : i32, i32
  }
  func.func @transform_10(%arg0: i32) -> (i32, i32) {
    %c0_i32 = arith.constant 0 : i32
    %c0_i32_0 = arith.constant 0 : i32
    %c0_i32_1 = arith.constant 0 : i32
    return %c0_i32, %c0_i32_0 : i32, i32
  }
  func.func @transform_11(%arg0: i32) -> (i32, i32) {
    %c0_i32 = arith.constant 0 : i32
    %c0_i32_0 = arith.constant 0 : i32
    return %arg0, %c0_i32 : i32, i32
  }
}

</mosaic_0001>

<bundles_post_ra>
// kernel: detr_forward.26
= control target key start
LH: loop header
LB: loop body
LE: loop exit
PB: predicated region body
PF: predicated region fallthrough
CT: control target
= control target key end

     0   :  { %s533_s12 = smov 0   ;;  %s535_s13 = smov 0   ;;  %s580_s0 = inlined_call_operand.vmem [shape: bf16[128,8], index: 0, kind: input, shape index: {}]   ;;  %s581_s1 = inlined_call_operand.vmem [shape: bf16[8,32], index: 1, kind: input, shape index: {}]   ;;  %s582_s2 = inlined_call_operand.vmem [shape: f32[1,32], index: 2, kind: input, shape index: {}]   ;;  %s583_s3 = inlined_call_operand.vmem [shape: bf16[128,32], index: 3, kind: output, shape index: {}]  }
   0x1   :  { %s537_s14 = smov 0  }
   0x2 LB: > { %s25_s15 = sadd.s32 1, %s507_s13  ;;  %p430_p0 = scmp.ge.s32.totalorder %s511_s14, 1  ;;  %s511_s14 = sphi %s537_s14, %s13_s14   ;;  %s507_s13 = sphi %s535_s13, %s585_s13   ;;  %s503_s12 = sphi %s533_s12, %s584_s12  }
   0x3   : > { %p27_p1 = scmp.ge.s32.totalorder %s25_s15, 2  ;;  %p169_p2 = scmp.lt.s32.totalorder %s511_s14, 3 }
   0x5   : > { %s587_s15 = smov (%p27_p1, %s25_s15), 0  ;;  %p170_p3 = pnand %p430_p0, %p169_p2 }
   0x6   : > { %s431_s18 = sshll.u32 (!%p170_p3), %s503_s12, 3 }
   0x7   : > { %173 = sbr.rel (%p170_p3) target bundleno = 164 (0xa4), region = 32  ;;  %p204_p4 = scmp.lt.s32.totalorder (!%p170_p3), %s431_s18, 15 }
   0xc   : > { %v234_v0 = vld [vmem:[%s581_s1] sm:$0xf]  ;;  %vm272_vm0 = vcmask 1043456   ;;  %s589_s18 = smov (!%p204_p4, %s431_s18), 15  ;;  %vm259_vm1 = vcmask 64512   ;;  %vm313_vm2 = vcmask 257024  }
   0xd   : > { %v274_v1 = vsel %vm272_vm0, %v234_v0, 0  ;;  %s432_s19 = sshll.u32 %s589_s18, 2  ;;  %v488_v6 = vld [vmem:[%s582_s2] ss:$0 sm:$0xff] }
   0xe   : > { %283 = vmatpush.bf16.msra.mxu0 %v274_v1  ;;  %461 = vmatpush.bf16.msra.mxu1 %v274_v1  ;;  %s207_s22 = scalar_lea.vmem %s580_s0, %s432_s19  ;;  %s223_s27 = scalar_lea.vmem %s583_s3, %s432_s19 }
   0xf   : > { %462 = vmatpush.bf16.msra.mxu2 %v274_v1  ;;  %463 = vmatpush.bf16.msra.mxu3 %v274_v1  ;;  %v457_v2 = vld [vmem:[%s207_s22] sm:$0xff]  ;;  %v458_v3 = vld [vmem:[%s207_s22 + $0x8] sm:$0xff]  ;;  %v459_v4 = vld [vmem:[%s207_s22 + $0x10] sm:$0xff] }
  0x10   : > { %v460_v5 = vld [vmem:[%s207_s22 + $0x18] sm:$0xff] }
  0x11   : > { %451 = vmatmul.msk.bf16.vlgmr.msra.gmra.mxu0 %vm259_vm1, %v457_v2  ;;  %452 = vmatmul.msk.bf16.vlgmr.msra.gmra.mxu1 %vm259_vm1, %v458_v3 }
  0x12   : > { %453 = vmatmul.msk.bf16.vlgmr.msra.gmra.mxu2 %vm259_vm1, %v459_v4  ;;  %454 = vmatmul.msk.bf16.vlgmr.msra.gmra.mxu3 %vm259_vm1, %v460_v5 }
  0x8e   : > { %v285_v7 = vpop.f32.mrf.mxu0  ;;  %v290_v8 = vpop.f32.mrf.mxu1 }
  0x8f   : > { %v286_v9 = vadd.f32 %v488_v6, %v285_v7  ;;  %v291_v10 = vadd.f32 %v488_v6, %v290_v8 }
  0x91   : > { %v305_v11 = vpack.c.bf16 %v286_v9, %v286_v9  ;;  %v307_v12 = vpack.c.bf16 %v291_v10, %v291_v10 }
  0x93   : > { %314 = vst.msk [vmem:[%s223_s27] sm:$0xf] %vm313_vm2, %v305_v11 }
  0x94   : > { %316 = vst.msk [vmem:[%s223_s27 + $0x8] sm:$0xf] %vm313_vm2, %v307_v12 }
  0x95   : > { %v295_v13 = vpop.f32.mrf.mxu2  ;;  %v300_v14 = vpop.f32.mrf.mxu3 }
  0x96   : > { %v296_v15 = vadd.f32 %v488_v6, %v295_v13  ;;  %v301_v16 = vadd.f32 %v488_v6, %v300_v14  ;;  %v287_v17 = vpop.f32.mrf.mxu0  ;;  %v292_v18 = vpop.f32.mrf.mxu1 }
  0x97   : > { %v288_v19 = vadd.f32 %v488_v6, %v287_v17  ;;  %v293_v20 = vadd.f32 %v488_v6, %v292_v18 }
  0x98   : > { %v309_v21 = vpack.c.bf16 %v296_v15, %v296_v15  ;;  %v311_v22 = vpack.c.bf16 %v301_v16, %v301_v16 }
  0x99   : > { %v306_v23 = vpack.c.bf16 %v288_v19, %v288_v19  ;;  %v308_v24 = vpack.c.bf16 %v293_v20, %v293_v20 }
  0x9a   : > { %318 = vst.msk [vmem:[%s223_s27 + $0x10] sm:$0xf] %vm313_vm2, %v309_v21 }
  0x9b   : > { %320 = vst.msk [vmem:[%s223_s27 + $0x18] sm:$0xf] %vm313_vm2, %v311_v22 }
  0x9c   : > { %315 = vst.msk [vmem:[%s223_s27 + $0x4] sm:$0xf] %vm313_vm2, %v306_v23 }
  0x9d   : > { %317 = vst.msk [vmem:[%s223_s27 + $0xc] sm:$0xf] %vm313_vm2, %v308_v24  ;;  %v297_v25 = vpop.f32.mrf.mxu2  ;;  %v302_v26 = vpop.f32.mrf.mxu3 }
  0x9e   : > { %v298_v27 = vadd.f32 %v488_v6, %v297_v25  ;;  %v303_v28 = vadd.f32 %v488_v6, %v302_v26 }
  0xa0   : > { %v310_v29 = vpack.c.bf16 %v298_v27, %v298_v27  ;;  %v312_v30 = vpack.c.bf16 %v303_v28, %v303_v28 }
  0xa2   : > { %319 = vst.msk [vmem:[%s223_s27 + $0x14] sm:$0xf] %vm313_vm2, %v310_v29 }
  0xa3   : > { %321 = vst.msk [vmem:[%s223_s27 + $0x1c] sm:$0xf] %vm313_vm2, %v312_v30 }
  0xa4 PF: > { %s13_s14 = sadd.s32 1, %s511_s14   ;;  %s584_s12 = smov %s507_s13 }
  0xa5   : > { %p10_p5 = scmp.ge.s32.totalorder %s13_s14, 4   ;;  %s585_s13 = smov %s587_s15 }
  0xa7   :  { %12 = sbr.rel (!%p10_p5) target bundleno = 2 (0x2), region = 68 }

// kernel: detr_forward.27
= control target key start
LH: loop header
LB: loop body
LE: loop exit
PB: predicated region body
PF: predicated region fallthrough
CT: control target
= control target key end

     0   :  { %s908_s27 = smov 0   ;;  %s1045_s0 = inlined_call_operand.vmem [shape: bf16[128,32], index: 0, kind: input, shape index: {}]   ;;  %s1046_s1 = inlined_call_operand.vmem [shape: bf16[128,32], index: 1, kind: input, shape index: {}]   ;;  %s1047_s2 = inlined_call_operand.vmem [shape: bf16[32,64], index: 2, kind: input, shape index: {}]   ;;  %s1048_s3 = inlined_call_operand.vmem [shape: f32[1,64], index: 3, kind: input, shape index: {}]   ;;  %s1049_s4 = inlined_call_operand.vmem [shape: bf16[32,32], index: 4, kind: input, shape index: {}]   ;;  %s1050_s5 = inlined_call_operand.vmem [shape: f32[1,32], index: 5, kind: input, shape index: {}]   ;;  %s1051_s6 = inlined_call_operand.vmem [shape: bf16[128,32], index: 6, kind: output, shape index: {0}]   ;;  %s1052_s7 = inlined_call_operand.vmem [shape: bf16[128,32], index: 7, kind: output, shape index: {1}]   ;;  %s1053_s8 = inlined_call_operand.vmem [shape: bf16[128,32], index: 8, kind: output, shape index: {2}]  }
   0x1 LB: > { %s755_s28 = sadd.s32 4294967295, %s860_s27   ;;  %p759_p0 = scmp.ge.s32.totalorder %s860_s27, 1  ;;  %s860_s27 = sphi %s908_s27, %s19_s27  }
   0x2   : > { %p279_p1 = scmp.lt.s32.totalorder %s860_s27, 3 }
   0x4   : > { %p280_p2 = pnand %p759_p0, %p279_p1 }
   0x5   : > { %s760_s9 = sshll.u32 (!%p280_p2), %s755_s28, 3  ;;  %s862_s29 = smov (!%p280_p2), 96  }
   0x6   : > { %283 = sbr.rel (%p280_p2) target bundleno = 300 (0x12c), region = 44  ;;  %p329_p3 = scmp.lt.s32.totalorder (!%p280_p2), %s760_s9, 15 }
   0xb   : > { %v817_v0 = vld [vmem:[%s1047_s2 + $0x8] sm:$0xff]  ;;  %v816_v2 = vld [vmem:[%s1047_s2] sm:$0xff]  ;;  %s1055_s9 = smov (!%p329_p3, %s760_s9), 15  ;;  %vm423_vm0 = vcmask 261120   ;;  %vm473_vm1 = vcmask 257024  }
   0xc   : > { %v819_v1 = vld [vmem:[%s1049_s4 + $0x8] sm:$0xff]  ;;  %442 = vmatpush.bf16.msra.mxu0 %v817_v0  ;;  %839 = vmatpush.bf16.msra.mxu2 %v817_v0  ;;  %v818_v3 = vld [vmem:[%s1049_s4] sm:$0xff]  ;;  %s928_s16 = sshll.u32 %s1055_s9, 2 }
   0xd   : > { %841 = vmatpush.bf16.msra.mxu3 %v819_v1  ;;  %580 = vmatpush.bf16.msra.mxu1 %v819_v1  ;;  %s934_s19 = scalar_lea.vmem %s1045_s0, %s928_s16  ;;  %s940_s22 = scalar_lea.vmem %s1046_s1, %s928_s16  ;;  %v852_v44 = vld [vmem:[%s1048_s3] ss:$0 sm:$0xff] }
   0xe   : > { %v359_v4 = vld [vmem:[%s934_s19] sm:$0xff]   ;;  %v363_v6 = vld [vmem:[%s934_s19 + $0x10] sm:$0xff]   ;;  %v361_v24 = vld [vmem:[%s934_s19 + $0x8] sm:$0xff]   ;;  %s969_s28 = scalar_lea.vmem %s1051_s6, %s928_s16  ;;  %s1002_s12 = scalar_lea.vmem %s1053_s8, %s928_s16 }
   0xf   : > { %v821_v5 = vld [vmem:[%s940_s22] sm:$0xff]   ;;  %v367_v7 = vunpack.c.l.bf16 %v359_v4  ;;  %v368_v8 = vunpack.c.h.bf16 %v359_v4  ;;  %v837_v11 = vld [vmem:[%s940_s22 + $0x10] sm:$0xff]   ;;  %v371_v12 = vunpack.c.l.bf16 %v363_v6  ;;  %v372_v13 = vunpack.c.h.bf16 %v363_v6  ;;  %v836_v25 = vld [vmem:[%s940_s22 + $0x8] sm:$0xff]   ;;  %s1016_s15 = scalar_lea.vmem %s1052_s7, %s928_s16 }
  0x10   : > { %443 = vmatpush.bf16.msra.mxu0 %v816_v2  ;;  %840 = vmatpush.bf16.msra.mxu2 %v816_v2  ;;  %v822_v9 = vunpack.c.l.bf16 %v821_v5  ;;  %v823_v10 = vunpack.c.h.bf16 %v821_v5  ;;  %v830_v14 = vunpack.c.l.bf16 %v837_v11  ;;  %v831_v15 = vunpack.c.h.bf16 %v837_v11  ;;  %v814_v16 = vld [vmem:[%s934_s19 + $0x10] sm:$0xff]  ;;  %v812_v19 = vld [vmem:[%s934_s19] sm:$0xff]  ;;  %v365_v26 = vld [vmem:[%s934_s19 + $0x18] sm:$0xff]  }
  0x11   : > { %842 = vmatpush.bf16.msra.mxu3 %v818_v3  ;;  %581 = vmatpush.bf16.msra.mxu1 %v818_v3  ;;  %v838_v27 = vld [vmem:[%s940_s22 + $0x18] sm:$0xff]   ;;  %v369_v28 = vunpack.c.l.bf16 %v361_v24  ;;  %v370_v29 = vunpack.c.h.bf16 %v361_v24  ;;  %v826_v30 = vunpack.c.l.bf16 %v836_v25  ;;  %v827_v31 = vunpack.c.h.bf16 %v836_v25  ;;  %v813_v43 = vld [vmem:[%s934_s19 + $0x8] sm:$0xff]  ;;  %v853_v5 = vld [vmem:[%s1050_s5] ss:$0 sm:$0xff] }
  0x12   : > { %v391_v17 = vadd.f32 %v822_v9, %v367_v7  ;;  %v392_v18 = vadd.f32 %v823_v10, %v368_v8  ;;  %v395_v20 = vadd.f32 %v830_v14, %v371_v12  ;;  %v396_v21 = vadd.f32 %v831_v15, %v372_v13  ;;  %v815_v42 = vld [vmem:[%s934_s19 + $0x18] sm:$0xff] }
  0x13   : > { %v373_v32 = vunpack.c.l.bf16 %v365_v26  ;;  %v374_v33 = vunpack.c.h.bf16 %v365_v26  ;;  %v834_v34 = vunpack.c.l.bf16 %v838_v27  ;;  %v835_v35 = vunpack.c.h.bf16 %v838_v27 }
  0x14   : > { %808 = vmatmul.msk.bf16.vlgmr.msra.gmra.mxu3 %vm423_vm0, %v814_v16  ;;  %v399_v22 = vpack.c.bf16 %v392_v18, %v391_v17  ;;  %806 = vmatmul.msk.bf16.vlgmr.msra.gmra.mxu1 %vm423_vm0, %v812_v19  ;;  %v401_v23 = vpack.c.bf16 %v396_v21, %v395_v20  ;;  %v393_v36 = vadd.f32 %v826_v30, %v369_v28 }
  0x15   : > { %v394_v37 = vadd.f32 %v827_v31, %v370_v29  ;;  %v397_v38 = vadd.f32 %v834_v34, %v373_v32  ;;  %v398_v39 = vadd.f32 %v835_v35, %v374_v33 }
  0x16   : > { %778 = vmatmul.msk.bf16.vlgmr.msra.gmra.mxu0 %vm423_vm0, %v399_v22  ;;  %780 = vmatmul.msk.bf16.vlgmr.msra.gmra.mxu2 %vm423_vm0, %v401_v23 }
  0x17   : > { %v400_v40 = vpack.c.bf16 %v394_v37, %v393_v36  ;;  %v402_v41 = vpack.c.bf16 %v398_v39, %v397_v38 }
  0x24   : > { %809 = vmatmul.msk.bf16.gmra.mxu3 %vm423_vm0, %v815_v42  ;;  %807 = vmatmul.msk.bf16.gmra.mxu1 %vm423_vm0, %v813_v43 }
  0x26   : > { %779 = vmatmul.msk.bf16.gmra.mxu0 %vm423_vm0, %v400_v40  ;;  %781 = vmatmul.msk.bf16.gmra.mxu2 %vm423_vm0, %v402_v41 }
  0x91   : > { %v583_v6 = vpop.f32.mrf.mxu1 }
  0x92   : > { %v584_v8 = vadd.f32 %v853_v5, %v583_v6 }
  0x93   : > { %v445_v45 = vpop.f32.mrf.mxu0 }
  0x94   : > { %v446_v46 = vadd.f32 %v852_v44, %v445_v45  ;;  %v603_v10 = vpack.c.bf16 %v584_v8, %v584_v8 }
  0x96   : > { %v465_v47 = vpack.c.bf16 %v446_v46, %v446_v46  ;;  %611 = vst.msk [vmem:[%s1002_s12] sm:$0xf] %vm473_vm1, %v603_v10 }
  0x97   : > { %v593_v7 = vpop.f32.mrf.mxu3 }
  0x98   : > { %474 = vst.msk [vmem:[%s969_s28] sm:$0xf] %vm473_vm1, %v465_v47  ;;  %490 = vrot.lane.b32.xlu0 %v465_v47, %s862_s29  ;;  %v594_v9 = vadd.f32 %v853_v5, %v593_v7 }
  0x99   : > { %v455_v48 = vpop.f32.mrf.mxu2  ;;  %v585_v12 = vpop.f32.mrf.mxu1 }
  0x9a   : > { %v456_v49 = vadd.f32 %v852_v44, %v455_v48  ;;  %v607_v11 = vpack.c.bf16 %v594_v9, %v594_v9  ;;  %v586_v14 = vadd.f32 %v853_v5, %v585_v12 }
  0x9b   : > { %v447_v50 = vpop.f32.mrf.mxu0 }
  0x9c   : > { %v448_v51 = vadd.f32 %v852_v44, %v447_v50  ;;  %v469_v52 = vpack.c.bf16 %v456_v49, %v456_v49  ;;  %615 = vst.msk [vmem:[%s1002_s12 + $0x10] sm:$0xf] %vm473_vm1, %v607_v11  ;;  %v604_v16 = vpack.c.bf16 %v586_v14, %v586_v14 }
  0x9e   : > { %v466_v53 = vpack.c.bf16 %v448_v51, %v448_v51  ;;  %478 = vst.msk [vmem:[%s969_s28 + $0x10] sm:$0xf] %vm473_vm1, %v469_v52  ;;  %498 = vrot.lane.b32.xlu2 %v469_v52, %s862_s29 }
  0x9f   : > { %v595_v13 = vpop.f32.mrf.mxu3  ;;  %612 = vst.msk [vmem:[%s1002_s12 + $0x4] sm:$0xf] %vm473_vm1, %v604_v16 }
  0xa0   : > { %475 = vst.msk [vmem:[%s969_s28 + $0x4] sm:$0xf] %vm473_vm1, %v466_v53  ;;  %492 = vrot.lane.b32.xlu0 %v466_v53, %s862_s29  ;;  %v596_v15 = vadd.f32 %v853_v5, %v595_v13 }
  0xa1   : > { %v457_v54 = vpop.f32.mrf.mxu2  ;;  %v588_v18 = vpop.f32.mrf.mxu1 }
  0xa2   : > { %v458_v55 = vadd.f32 %v852_v44, %v457_v54  ;;  %v608_v17 = vpack.c.bf16 %v596_v15, %v596_v15  ;;  %v589_v20 = vadd.f32 %v853_v5, %v588_v18 }
  0xa3   : > { %v450_v56 = vpop.f32.mrf.mxu0 }
  0xa4   : > { %v451_v57 = vadd.f32 %v852_v44, %v450_v56  ;;  %v470_v58 = vpack.c.bf16 %v458_v55, %v458_v55  ;;  %616 = vst.msk [vmem:[%s1002_s12 + $0x14] sm:$0xf] %vm473_vm1, %v608_v17  ;;  %v605_v23 = vpack.c.bf16 %v589_v20, %v589_v20 }
  0xa6   : > { %v467_v59 = vpack.c.bf16 %v451_v57, %v451_v57  ;;  %479 = vst.msk [vmem:[%s969_s28 + $0x14] sm:$0xf] %vm473_vm1, %v470_v58  ;;  %500 = vrot.lane.b32.xlu2 %v470_v58, %s862_s29 }
  0xa7   : > { %v598_v19 = vpop.f32.mrf.mxu3  ;;  %613 = vst.msk [vmem:[%s1002_s12 + $0x8] sm:$0xf] %vm473_vm1, %v605_v23 }
  0xa8   : > { %476 = vst.msk [vmem:[%s969_s28 + $0x8] sm:$0xf] %vm473_vm1, %v467_v59  ;;  %494 = vrot.lane.b32.xlu1 %v467_v59, %s862_s29  ;;  %v599_v21 = vadd.f32 %v853_v5, %v598_v19 }
  0xa9   : > { %v460_v60 = vpop.f32.mrf.mxu2  ;;  %v590_v25 = vpop.f32.mrf.mxu1 }
  0xaa   : > { %v461_v61 = vadd.f32 %v852_v44, %v460_v60  ;;  %v609_v24 = vpack.c.bf16 %v599_v21, %v599_v21  ;;  %v591_v27 = vadd.f32 %v853_v5, %v590_v25 }
  0xab   : > { %v452_v62 = vpop.f32.mrf.mxu0 }
  0xac   : > { %v453_v63 = vadd.f32 %v852_v44, %v452_v62  ;;  %v471_v0 = vpack.c.bf16 %v461_v61, %v461_v61  ;;  %617 = vst.msk [vmem:[%s1002_s12 + $0x18] sm:$0xf] %vm473_vm1, %v609_v24  ;;  %v606_v30 = vpack.c.bf16 %v591_v27, %v591_v27 }
  0xae   : > { %v468_v1 = vpack.c.bf16 %v453_v63, %v453_v63  ;;  %480 = vst.msk [vmem:[%s969_s28 + $0x18] sm:$0xf] %vm473_vm1, %v471_v0  ;;  %502 = vrot.lane.b32.xlu0 %v471_v0, %s862_s29 }
  0xaf   : > { %v600_v26 = vpop.f32.mrf.mxu3  ;;  %614 = vst.msk [vmem:[%s1002_s12 + $0xc] sm:$0xf] %vm473_vm1, %v606_v30 }
  0xb0   : > { %477 = vst.msk [vmem:[%s969_s28 + $0xc] sm:$0xf] %vm473_vm1, %v468_v1  ;;  %496 = vrot.lane.b32.xlu1 %v468_v1, %s862_s29  ;;  %v601_v28 = vadd.f32 %v853_v5, %v600_v26 }
  0xb1   : > { %v462_v2 = vpop.f32.mrf.mxu2 }
  0xb2   : > { %v463_v3 = vadd.f32 %v852_v44, %v462_v2  ;;  %v610_v31 = vpack.c.bf16 %v601_v28, %v601_v28 }
  0xb4   : > { %v472_v4 = vpack.c.bf16 %v463_v3, %v463_v3  ;;  %618 = vst.msk [vmem:[%s1002_s12 + $0x1c] sm:$0xf] %vm473_vm1, %v610_v31 }
  0xb6   : > { %481 = vst.msk [vmem:[%s969_s28 + $0x1c] sm:$0xf] %vm473_vm1, %v472_v4 }
  0xb8   : > { %504 = vrot.lane.b32.xlu1 %v472_v4, %s862_s29 }
  0xf8   : > { %v499_v22 = vpop.permute.xlu2 %498 }
  0xf9   : > { %518 = vst.msk [vmem:[%s1016_s15 + $0x10] sm:$0xf] %vm473_vm1, %v499_v22 }
 0x100   : > { %v501_v29 = vpop.permute.xlu2 %500 }
 0x101   : > { %519 = vst.msk [vmem:[%s1016_s15 + $0x14] sm:$0xf] %vm473_vm1, %v501_v29 }
 0x10a   : > { %v491_v32 = vpop.permute.xlu0 %490 }
 0x10b   : > { %514 = vst.msk [vmem:[%s1016_s15] sm:$0xf] %vm473_vm1, %v491_v32 }
 0x112   : > { %v493_v33 = vpop.permute.xlu0 %492 }
 0x113   : > { %515 = vst.msk [vmem:[%s1016_s15 + $0x4] sm:$0xf] %vm473_vm1, %v493_v33 }
 0x11a   : > { %v495_v34 = vpop.permute.xlu1 %494 }
 0x11b   : > { %516 = vst.msk [vmem:[%s1016_s15 + $0x8] sm:$0xf] %vm473_vm1, %v495_v34 }
 0x120   : > { %v503_v35 = vpop.permute.xlu0 %502 }
 0x121   : > { %520 = vst.msk [vmem:[%s1016_s15 + $0x18] sm:$0xf] %vm473_vm1, %v503_v35 }
 0x122   : > { %v497_v36 = vpop.permute.xlu1 %496 }
 0x123   : > { %517 = vst.msk [vmem:[%s1016_s15 + $0xc] sm:$0xf] %vm473_vm1, %v497_v36 }
 0x12a   : > { %v505_v37 = vpop.permute.xlu1 %504 }
 0x12b   : > { %521 = vst.msk [vmem:[%s1016_s15 + $0x1c] sm:$0xf] %vm473_vm1, %v505_v37 }
 0x12c PF: > { %s19_s27 = sadd.s32 1, %s860_s27  }
 0x12d   : > { %p16_p4 = scmp.ge.s32.totalorder %s19_s27, 4  }
 0x12f   :  { %18 = sbr.rel (!%p16_p4) target bundleno = 1 (0x1), region = 101 }

// kernel: detr_forward.29
= control target key start
LH: loop header
LB: loop body
LE: loop exit
PB: predicated region body
PF: predicated region fallthrough
CT: control target
= control target key end

     0   :  { %s830_s21 = smov 0   ;;  %s1017_s0 = inlined_call_operand.vmem [shape: bf16[128,32], index: 0, kind: input, shape index: {}]   ;;  %s1018_s1 = inlined_call_operand.vmem [shape: bf16[128,32], index: 1, kind: input, shape index: {}]   ;;  %s1019_s2 = inlined_call_operand.vmem [shape: bf16[32,32], index: 2, kind: input, shape index: {}]   ;;  %s1020_s3 = inlined_call_operand.vmem [shape: f32[1,32], index: 3, kind: input, shape index: {}]   ;;  %s1021_s4 = inlined_call_operand.vmem [shape: f32[1,32], index: 4, kind: input, shape index: {}]   ;;  %s1022_s5 = inlined_call_operand.vmem [shape: f32[1,32], index: 5, kind: input, shape index: {}]   ;;  %s1023_s6 = inlined_call_operand.vmem [shape: bf16[128,32], index: 6, kind: output, shape index: {}]  }
   0x1 LB: > { %s684_s22 = sadd.s32 4294967295, %s792_s21   ;;  %p688_p0 = scmp.ge.s32.totalorder %s792_s21, 1  ;;  %s792_s21 = sphi %s830_s21, %s16_s21  }
   0x2   : > { %p224_p1 = scmp.lt.s32.totalorder %s792_s21, 3 }
   0x4   : > { %p225_p2 = pnand %p688_p0, %p224_p1 }
   0x5   : > { %s689_s25 = sshll.u32 (!%p225_p2), %s684_s22, 3 }
   0x6   : > { %228 = sbr.rel (%p225_p2) target bundleno = 443 (0x1bb), region = 44  ;;  %p260_p3 = scmp.lt.s32.totalorder (!%p225_p2), %s689_s25, 15 }
   0xb   : > { %v730_v0 = vld [vmem:[%s1019_s2 + $0x8] sm:$0xff]  ;;  %v729_v1 = vld [vmem:[%s1019_s2] sm:$0xff]  ;;  %s1025_s25 = smov (!%p260_p3, %s689_s25), 15  ;;  %vm326_vm0 = vcmask 261120   ;;  %v794_v51 = vmov 32.0   ;;  %vm607_vm8 = vcmask 257024  }
   0xc   : > { %345 = vmatpush.bf16.msra.mxu0 %v730_v0  ;;  %750 = vmatpush.bf16.msra.mxu1 %v730_v0  ;;  %s844_s28 = sshll.u32 %s1025_s25, 2  ;;  %v765_v8 = vld [vmem:[%s1020_s3] ss:$0 sm:$0xff]  ;;  %768 = vrcp.f32 %v794_v51 }
   0xd   : > { %751 = vmatpush.bf16.msra.mxu2 %v730_v0  ;;  %752 = vmatpush.bf16.msra.mxu3 %v730_v0  ;;  %s263_s7 = scalar_lea.vmem %s1017_s0, %s844_s28  ;;  %s269_s10 = scalar_lea.vmem %s1018_s1, %s844_s28 }
   0xe   : > { %v725_v2 = vld [vmem:[%s263_s7] sm:$0xff]  ;;  %v726_v3 = vld [vmem:[%s263_s7 + $0x8] sm:$0xff]  ;;  %v727_v4 = vld [vmem:[%s263_s7 + $0x10] sm:$0xff]  ;;  %s966_s19 = scalar_lea.vmem %s1023_s6, %s844_s28 }
   0xf   : > { %v728_v5 = vld [vmem:[%s263_s7 + $0x18] sm:$0xff]  ;;  %v747_v6 = vld [vmem:[%s269_s10 + $0x8] sm:$0xff]   ;;  %v732_v7 = vld [vmem:[%s269_s10] sm:$0xff]  }
  0x10   : > { %346 = vmatpush.bf16.msra.mxu0 %v729_v1  ;;  %753 = vmatpush.bf16.msra.mxu1 %v729_v1  ;;  %v737_v9 = vunpack.c.l.bf16 %v747_v6  ;;  %v733_v10 = vunpack.c.l.bf16 %v732_v7  ;;  %v748_v17 = vld [vmem:[%s269_s10 + $0x10] sm:$0xff]   ;;  %v738_v23 = vunpack.c.h.bf16 %v747_v6  ;;  %v734_v24 = vunpack.c.h.bf16 %v732_v7  ;;  %v749_v31 = vld [vmem:[%s269_s10 + $0x18] sm:$0xff]  }
  0x11   : > { %754 = vmatpush.bf16.msra.mxu2 %v729_v1  ;;  %755 = vmatpush.bf16.msra.mxu3 %v729_v1  ;;  %v741_v20 = vunpack.c.l.bf16 %v748_v17  ;;  %v745_v38 = vunpack.c.l.bf16 %v749_v31  ;;  %v742_v39 = vunpack.c.h.bf16 %v748_v17  ;;  %v746_v40 = vunpack.c.h.bf16 %v749_v31 }
  0x12   : > { %v769_v52 = vpop.eup %768 }
  0x13   : > { %719 = vmatmul.msk.bf16.vlgmr.msra.gmra.mxu0 %vm326_vm0, %v725_v2  ;;  %720 = vmatmul.msk.bf16.vlgmr.msra.gmra.mxu1 %vm326_vm0, %v726_v3  ;;  %v419_v53 = vmul.f32 32.0, %v769_v52  ;;  %vm423_vm1 = vweird.f32 %v769_v52 }
  0x14   : > { %721 = vmatmul.msk.bf16.vlgmr.msra.gmra.mxu2 %vm326_vm0, %v727_v4  ;;  %722 = vmatmul.msk.bf16.vlgmr.msra.gmra.mxu3 %vm326_vm0, %v728_v5 }
  0x15   : > { %v420_v54 = vsub.f32 1.0, %v419_v53 }
  0x17   : > { %v421_v55 = vmul.f32 %v769_v52, %v420_v54 }
  0x19   : > { %v422_v56 = vadd.f32 %v769_v52, %v421_v55 }
  0x1b   : > { %v869_v57 = vsel %vm423_vm1, %v769_v52, %v422_v56 }
  0x90   : > { %v348_v11 = vpop.f32.mrf.mxu0  ;;  %v353_v12 = vpop.f32.mrf.mxu1 }
  0x91   : > { %v349_v13 = vadd.f32 %v765_v8, %v348_v11  ;;  %v354_v14 = vadd.f32 %v765_v8, %v353_v12 }
  0x93   : > { %v386_v15 = vadd.f32 %v737_v9, %v354_v14  ;;  %v384_v16 = vadd.f32 %v733_v10, %v349_v13 }
  0x95   : > { %v400_v18 = vsel %vm326_vm0, %v386_v15, 0.0  ;;  %v394_v19 = vsel %vm326_vm0, %v384_v16, 0.0 }
  0x96   : > { %401 = vadd.xlane.f32.xlu1 %v400_v18  ;;  %395 = vadd.xlane.f32.xlu0 %v394_v19 }
  0x97   : > { %v358_v21 = vpop.f32.mrf.mxu2  ;;  %v363_v22 = vpop.f32.mrf.mxu3 }
  0x98   : > { %v359_v25 = vadd.f32 %v765_v8, %v358_v21  ;;  %v350_v26 = vpop.f32.mrf.mxu0  ;;  %v355_v27 = vpop.f32.mrf.mxu1  ;;  %v364_v35 = vadd.f32 %v765_v8, %v363_v22 }
  0x99   : > { %v351_v28 = vadd.f32 %v765_v8, %v350_v26  ;;  %v356_v29 = vadd.f32 %v765_v8, %v355_v27 }
  0x9a   : > { %v388_v30 = vadd.f32 %v741_v20, %v359_v25  ;;  %v390_v45 = vadd.f32 %v745_v38, %v364_v35 }
  0x9b   : > { %v387_v32 = vadd.f32 %v738_v23, %v356_v29  ;;  %v385_v33 = vadd.f32 %v734_v24, %v351_v28 }
  0x9c   : > { %v406_v34 = vsel %vm326_vm0, %v388_v30, 0.0  ;;  %v412_v50 = vsel %vm326_vm0, %v390_v45, 0.0 }
  0x9d   : > { %407 = vadd.xlane.f32.xlu2 %v406_v34  ;;  %v403_v36 = vsel %vm326_vm0, %v387_v32, 0.0  ;;  %v397_v37 = vsel %vm326_vm0, %v385_v33, 0.0 }
  0x9e   : > { %404 = vadd.xlane.f32.xlu1 %v403_v36  ;;  %398 = vadd.xlane.f32.xlu0 %v397_v37 }
  0x9f   : > { %v360_v41 = vpop.f32.mrf.mxu2  ;;  %v365_v42 = vpop.f32.mrf.mxu3 }
  0xa0   : > { %v361_v43 = vadd.f32 %v765_v8, %v360_v41  ;;  %v366_v44 = vadd.f32 %v765_v8, %v365_v42 }
  0xa2   : > { %v389_v46 = vadd.f32 %v742_v39, %v361_v43  ;;  %v391_v47 = vadd.f32 %v746_v40, %v366_v44 }
  0xa4   : > { %v409_v48 = vsel %vm326_vm0, %v389_v46, 0.0  ;;  %v415_v49 = vsel %vm326_vm0, %v391_v47, 0.0 }
  0xa5   : > { %410 = vadd.xlane.f32.xlu2 %v409_v48 }
  0xa6   : > { %416 = vadd.xlane.f32.xlu1 %v415_v49  ;;  %413 = vadd.xlane.f32.xlu0 %v412_v50 }
 0x109   : > { %v402_v58 = vpop.xlane.xlu1 %401  ;;  %v396_v59 = vpop.xlane.xlu0 %395 }
 0x10a   : > { %v427_v60 = vmul.f32 %v869_v57, %v402_v58  ;;  %v425_v61 = vmul.f32 %v869_v57, %v396_v59 }
 0x10c   : > { %v873_v62 = vsub.f32 %v386_v15, %v427_v60  ;;  %v875_v63 = vsub.f32 %v384_v16, %v425_v61 }
 0x10e   : > { %v443_v0 = vmul.f32 %v873_v62, %v873_v62  ;;  %v441_v1 = vmul.f32 %v875_v63, %v875_v63 }
 0x110   : > { %v408_v2 = vpop.xlane.xlu2 %407  ;;  %v455_v3 = vsel %vm326_vm0, %v443_v0, 0.0  ;;  %v449_v4 = vsel %vm326_vm0, %v441_v1, 0.0 }
 0x111   : > { %v429_v5 = vmul.f32 %v869_v57, %v408_v2  ;;  %456 = vadd.xlane.f32.xlu1 %v455_v3  ;;  %v405_v6 = vpop.xlane.xlu1 %404  ;;  %450 = vadd.xlane.f32.xlu2 %v449_v4  ;;  %v399_v7 = vpop.xlane.xlu0 %398 }
 0x112   : > { %v428_v8 = vmul.f32 %v869_v57, %v405_v6  ;;  %v426_v10 = vmul.f32 %v869_v57, %v399_v7 }
 0x113   : > { %v885_v9 = vsub.f32 %v388_v30, %v429_v5 }
 0x114   : > { %v888_v11 = vsub.f32 %v387_v32, %v428_v8  ;;  %v894_v14 = vsub.f32 %v385_v33, %v426_v10  ;;  %v944_v10 = vld [vmem:[%s1021_s4] ss:$0 sm:$0xff] }
 0x115   : > { %v445_v12 = vmul.f32 %v885_v9, %v885_v9 }
 0x116   : > { %v444_v13 = vmul.f32 %v888_v11, %v888_v11  ;;  %v442_v24 = vmul.f32 %v894_v14, %v894_v14 }
 0x117   : > { %v461_v15 = vsel %vm326_vm0, %v445_v12, 0.0 }
 0x118   : > { %v411_v16 = vpop.xlane.xlu2 %410  ;;  %462 = vadd.xlane.f32.xlu0 %v461_v15  ;;  %v458_v17 = vsel %vm326_vm0, %v444_v13, 0.0  ;;  %v452_v30 = vsel %vm326_vm0, %v442_v24, 0.0 }
 0x119   : > { %v430_v18 = vmul.f32 %v869_v57, %v411_v16  ;;  %v417_v19 = vpop.xlane.xlu1 %416  ;;  %459 = vadd.xlane.f32.xlu2 %v458_v17  ;;  %v414_v20 = vpop.xlane.xlu0 %413  ;;  %v951_v17 = vld [vmem:[%s1022_s5] ss:$0 sm:$0xff] }
 0x11a   : > { %v431_v21 = vmul.f32 %v869_v57, %v414_v20  ;;  %v432_v23 = vmul.f32 %v869_v57, %v417_v19 }
 0x11b   : > { %v900_v22 = vsub.f32 %v389_v46, %v430_v18 }
 0x11c   : > { %v905_v25 = vsub.f32 %v390_v45, %v431_v21  ;;  %v911_v28 = vsub.f32 %v391_v47, %v432_v23 }
 0x11d   : > { %v446_v26 = vmul.f32 %v900_v22, %v900_v22 }
 0x11e   : > { %v447_v27 = vmul.f32 %v905_v25, %v905_v25  ;;  %v448_v32 = vmul.f32 %v911_v28, %v911_v28 }
 0x11f   : > { %v464_v29 = vsel %vm326_vm0, %v446_v26, 0.0 }
 0x120   : > { %465 = vadd.xlane.f32.xlu1 %v464_v29  ;;  %453 = vadd.xlane.f32.xlu0 %v452_v30  ;;  %v467_v31 = vsel %vm326_vm0, %v447_v27, 0.0  ;;  %v470_v33 = vsel %vm326_vm0, %v448_v32, 0.0 }
 0x121   : > { %468 = vadd.xlane.f32.xlu2 %v467_v31 }
 0x128   : > { %471 = vadd.xlane.f32.xlu0 %v470_v33 }
 0x184   : > { %v457_v34 = vpop.xlane.xlu1 %456  ;;  %v451_v35 = vpop.xlane.xlu2 %450 }
 0x185   : > { %v475_v36 = vmul.f32 %v457_v34, %v869_v57  ;;  %v473_v37 = vmul.f32 %v451_v35, %v869_v57 }
 0x187   : > { %v483_v38 = vadd.f32 1e-05, %v475_v36  ;;  %v481_v39 = vadd.f32 1e-05, %v473_v37 }
 0x189   : > { %770 = vrsqrt.f32 %v483_v38  ;;  %vm515_vm4 = vweird.f32 %v483_v38  ;;  %vm495_vm6 = vweird.f32 %v481_v39 }
 0x18a   : > { %772 = vrsqrt.f32 %v481_v39 }
 0x18b   : > { %v463_v40 = vpop.xlane.xlu0 %462 }
 0x18c   : > { %v477_v41 = vmul.f32 %v463_v40, %v869_v57  ;;  %v460_v42 = vpop.xlane.xlu2 %459 }
 0x18d   : > { %v476_v43 = vmul.f32 %v460_v42, %v869_v57 }
 0x18e   : > { %v923_v44 = vadd.f32 1e-05, %v477_v41 }
 0x18f   : > { %v771_v45 = vpop.eup %770  ;;  %v925_v46 = vadd.f32 1e-05, %v476_v43 }
 0x190   : > { %v773_v47 = vpop.eup %772  ;;  %v510_v48 = vmul.f32 %v771_v45, %v483_v38  ;;  %774 = vrsqrt.f32 %v923_v44  ;;  %vm516_vm2 = vweird.f32 %v771_v45  ;;  %vm535_vm10 = vweird.f32 %v923_v44 }
 0x191   : > { %v490_v49 = vmul.f32 %v773_v47, %v481_v39  ;;  %776 = vrsqrt.f32 %v925_v46  ;;  %vm496_vm3 = vweird.f32 %v773_v47  ;;  %vm517_vm5 = vmor %vm515_vm4, %vm516_vm2  ;;  %vm525_vm12 = vweird.f32 %v925_v46 }
 0x192   : > { %v511_v50 = vmul.f32 %v771_v45, %v510_v48  ;;  %vm497_vm7 = vmor %vm495_vm6, %vm496_vm3 }
 0x193   : > { %v491_v51 = vmul.f32 %v773_v47, %v490_v49  ;;  %v466_v52 = vpop.xlane.xlu1 %465  ;;  %v454_v53 = vpop.xlane.xlu0 %453 }
 0x194   : > { %v512_v54 = vmul.f32 0.5, %v511_v50  ;;  %v478_v55 = vmul.f32 %v466_v52, %v869_v57  ;;  %v474_v56 = vmul.f32 %v454_v53, %v869_v57  ;;  %v469_v58 = vpop.xlane.xlu2 %468 }
 0x195   : > { %v492_v59 = vmul.f32 0.5, %v491_v51  ;;  %v479_v60 = vmul.f32 %v469_v58, %v869_v57 }
 0x196   : > { %v775_v61 = vpop.eup %774  ;;  %v513_v0 = vsub.f32 1.5, %v512_v54  ;;  %v932_v1 = vadd.f32 1e-05, %v478_v55  ;;  %v934_v2 = vadd.f32 1e-05, %v474_v56 }
 0x197   : > { %v777_v3 = vpop.eup %776  ;;  %v493_v4 = vsub.f32 1.5, %v492_v59  ;;  %v530_v5 = vmul.f32 %v775_v61, %v923_v44  ;;  %v937_v6 = vadd.f32 1e-05, %v479_v60  ;;  %vm536_vm9 = vweird.f32 %v775_v61 }
 0x198   : > { %v514_v7 = vmul.f32 %v771_v45, %v513_v0  ;;  %v520_v8 = vmul.f32 %v777_v3, %v925_v46  ;;  %778 = vrsqrt.f32 %v932_v1  ;;  %vm526_vm11 = vweird.f32 %v777_v3  ;;  %vm537_vm13 = vmor %vm535_vm10, %vm536_vm9 }
 0x199   : > { %v494_v12 = vmul.f32 %v773_v47, %v493_v4  ;;  %v531_v13 = vmul.f32 %v775_v61, %v530_v5  ;;  %780 = vrsqrt.f32 %v934_v2  ;;  %vm527_vm14 = vmor %vm525_vm12, %vm526_vm11  ;;  %vm545_vm0 = vweird.f32 %v932_v1 }
 0x19a   : > { %v518_v15 = vsel %vm517_vm5, %v771_v45, %v514_v7  ;;  %v521_v16 = vmul.f32 %v777_v3, %v520_v8  ;;  %782 = vrsqrt.f32 %v937_v6  ;;  %vm505_vm4 = vweird.f32 %v934_v2 }
 0x19b   : > { %v571_v18 = vmul.f32 %v518_v15, %v873_v62  ;;  %v498_v19 = vsel %vm497_vm7, %v773_v47, %v494_v12  ;;  %v532_v20 = vmul.f32 0.5, %v531_v13  ;;  %v472_v21 = vpop.xlane.xlu0 %471  ;;  %vm555_vm6 = vweird.f32 %v937_v6 }
 0x19c   : > { %v569_v23 = vmul.f32 %v498_v19, %v875_v63  ;;  %v522_v24 = vmul.f32 0.5, %v521_v16  ;;  %v480_v26 = vmul.f32 %v472_v21, %v869_v57 }
 0x19d   : > { %v582_v27 = vmul.f32 %v944_v10, %v571_v18  ;;  %v533_v29 = vsub.f32 1.5, %v532_v20 }
 0x19e   : > { %v779_v30 = vpop.eup %778  ;;  %v580_v31 = vmul.f32 %v944_v10, %v569_v23  ;;  %v523_v62 = vsub.f32 1.5, %v522_v24  ;;  %v970_v38 = vadd.f32 1e-05, %v480_v26 }
 0x19f   : > { %v781_v32 = vpop.eup %780  ;;  %v593_v33 = vadd.f32 %v951_v17, %v582_v27  ;;  %v534_v63 = vmul.f32 %v775_v61, %v533_v29  ;;  %v540_v57 = vmul.f32 %v779_v30, %v932_v1  ;;  %vm546_vm15 = vweird.f32 %v779_v30 }
 0x1a0   : > { %v783_v34 = vpop.eup %782  ;;  %v591_v35 = vadd.f32 %v951_v17, %v580_v31  ;;  %v524_v36 = vmul.f32 %v777_v3, %v523_v62  ;;  %v500_v37 = vmul.f32 %v781_v32, %v934_v2  ;;  %784 = vrsqrt.f32 %v970_v38  ;;  %vm547_vm3 = vmor %vm545_vm0, %vm546_vm15 }
 0x1a1   : > { %v601_v39 = vpack.c.bf16 %v593_v33, %v593_v33  ;;  %v538_v40 = vsel %vm537_vm13, %v775_v61, %v534_v63  ;;  %v541_v41 = vmul.f32 %v779_v30, %v540_v57  ;;  %v550_v42 = vmul.f32 %v783_v34, %v937_v6 }
 0x1a2   : > { %v599_v43 = vpack.c.bf16 %v591_v35, %v591_v35  ;;  %v573_v44 = vmul.f32 %v538_v40, %v885_v9  ;;  %v528_v45 = vsel %vm527_vm14, %v777_v3, %v524_v36  ;;  %v501_v46 = vmul.f32 %v781_v32, %v500_v37 }
 0x1a3   : > { %610 = vst.msk [vmem:[%s966_s19 + $0x8] sm:$0xf] %vm607_vm8, %v601_v39  ;;  %v572_v47 = vmul.f32 %v528_v45, %v888_v11  ;;  %v542_v48 = vmul.f32 0.5, %v541_v41  ;;  %v551_v49 = vmul.f32 %v783_v34, %v550_v42  ;;  %vm506_vm1 = vweird.f32 %v781_v32 }
 0x1a4   : > { %608 = vst.msk [vmem:[%s966_s19] sm:$0xf] %vm607_vm8, %v599_v43  ;;  %v584_v50 = vmul.f32 %v944_v10, %v573_v44  ;;  %v502_v51 = vmul.f32 0.5, %v501_v46  ;;  %vm556_vm2 = vweird.f32 %v783_v34  ;;  %vm507_vm5 = vmor %vm505_vm4, %vm506_vm1  ;;  %vm565_vm10 = vweird.f32 %v970_v38 }
 0x1a5   : > { %v583_v52 = vmul.f32 %v944_v10, %v572_v47  ;;  %v543_v53 = vsub.f32 1.5, %v542_v48  ;;  %v552_v9 = vmul.f32 0.5, %v551_v49  ;;  %vm557_vm7 = vmor %vm555_vm6, %vm556_vm2 }
 0x1a6   : > { %v595_v54 = vadd.f32 %v951_v17, %v584_v50  ;;  %v503_v55 = vsub.f32 1.5, %v502_v51  ;;  %v785_v1 = vpop.eup %784 }
 0x1a7   : > { %v594_v11 = vadd.f32 %v951_v17, %v583_v52  ;;  %v544_v56 = vmul.f32 %v779_v30, %v543_v53  ;;  %v553_v58 = vsub.f32 1.5, %v552_v9  ;;  %v560_v2 = vmul.f32 %v785_v1, %v970_v38 }
 0x1a8   : > { %v603_v59 = vpack.c.bf16 %v595_v54, %v595_v54  ;;  %v504_v60 = vmul.f32 %v781_v32, %v503_v55  ;;  %vm566_vm9 = vweird.f32 %v785_v1 }
 0x1a9   : > { %v602_v61 = vpack.c.bf16 %v594_v11, %v594_v11  ;;  %v548_v0 = vsel %vm547_vm3, %v779_v30, %v544_v56  ;;  %v554_v3 = vmul.f32 %v783_v34, %v553_v58  ;;  %v561_v15 = vmul.f32 %v785_v1, %v560_v2  ;;  %vm567_vm11 = vmor %vm565_vm10, %vm566_vm9 }
 0x1aa   : > { %612 = vst.msk [vmem:[%s966_s19 + $0x10] sm:$0xf] %vm607_vm8, %v603_v59  ;;  %v574_v4 = vmul.f32 %v548_v0, %v900_v22  ;;  %v508_v5 = vsel %vm507_vm5, %v781_v32, %v504_v60 }
 0x1ab   : > { %611 = vst.msk [vmem:[%s966_s19 + $0xc] sm:$0xf] %vm607_vm8, %v602_v61  ;;  %v570_v7 = vmul.f32 %v508_v5, %v894_v14  ;;  %v558_v8 = vsel %vm557_vm7, %v783_v34, %v554_v3  ;;  %v562_v14 = vmul.f32 0.5, %v561_v15 }
 0x1ac   : > { %v585_v12 = vmul.f32 %v944_v10, %v574_v4  ;;  %v575_v6 = vmul.f32 %v558_v8, %v905_v25 }
 0x1ad   : > { %v581_v13 = vmul.f32 %v944_v10, %v570_v7  ;;  %v563_v23 = vsub.f32 1.5, %v562_v14 }
 0x1ae   : > { %v596_v22 = vadd.f32 %v951_v17, %v585_v12  ;;  %v586_v16 = vmul.f32 %v944_v10, %v575_v6 }
 0x1af   : > { %v592_v18 = vadd.f32 %v951_v17, %v581_v13  ;;  %v564_v24 = vmul.f32 %v785_v1, %v563_v23 }
 0x1b0   : > { %v604_v19 = vpack.c.bf16 %v596_v22, %v596_v22  ;;  %v597_v20 = vadd.f32 %v951_v17, %v586_v16 }
 0x1b1   : > { %v600_v21 = vpack.c.bf16 %v592_v18, %v592_v18  ;;  %v568_v26 = vsel %vm567_vm11, %v785_v1, %v564_v24 }
 0x1b2   : > { %613 = vst.msk [vmem:[%s966_s19 + $0x14] sm:$0xf] %vm607_vm8, %v604_v19  ;;  %v605_v25 = vpack.c.bf16 %v597_v20, %v597_v20  ;;  %v576_v27 = vmul.f32 %v568_v26, %v911_v28 }
 0x1b3   : > { %609 = vst.msk [vmem:[%s966_s19 + $0x4] sm:$0xf] %vm607_vm8, %v600_v21 }
 0x1b4   : > { %614 = vst.msk [vmem:[%s966_s19 + $0x18] sm:$0xf] %vm607_vm8, %v605_v25  ;;  %v587_v29 = vmul.f32 %v944_v10, %v576_v27 }
 0x1b6   : > { %v598_v30 = vadd.f32 %v951_v17, %v587_v29 }
 0x1b8   : > { %v606_v31 = vpack.c.bf16 %v598_v30, %v598_v30 }
 0x1ba   : > { %615 = vst.msk [vmem:[%s966_s19 + $0x1c] sm:$0xf] %vm607_vm8, %v606_v31 }
 0x1bb PF: > { %s16_s21 = sadd.s32 1, %s792_s21  }
 0x1bc   : > { %p13_p4 = scmp.ge.s32.totalorder %s16_s21, 4  }
 0x1be   :  { %15 = sbr.rel (!%p13_p4) target bundleno = 1 (0x1), region = 77 }

// kernel: detr_forward.28
= control target key start
LH: loop header
LB: loop body
LE: loop exit
PB: predicated region body
PF: predicated region fallthrough
CT: control target
= control target key end

     0   :  { %s1367_s15 = smov 0   ;;  %s1369_s16 = smov 0   ;;  %s1733_s0 = inlined_call_operand.vmem [shape: bf16[2,64,32], index: 0, kind: input, shape index: {}]   ;;  %s1734_s1 = inlined_call_operand.vmem [shape: bf16[2,64,32], index: 1, kind: input, shape index: {}]   ;;  %s1735_s2 = inlined_call_operand.vmem [shape: bf16[2,64,32], index: 2, kind: input, shape index: {}]   ;;  %s1736_s3 = inlined_call_operand.vmem [shape: f32[2,1,64], index: 3, kind: input, shape index: {}]   ;;  %s1737_s4 = inlined_call_operand.vmem [shape: bf16[2,64,32], index: 4, kind: output, shape index: {}]  }
   0x1   :  { %s1371_s17 = smov 0   ;;  %s1373_s18 = smov 0  }
   0x2   :  { %s1375_s19 = smov 0  }
   0x3 LB: > { %s23_s20 = sadd.s32 1, %s1326_s17  ;;  %s26_s21 = sadd.s32 1, %s1330_s18  ;;  %s1334_s19 = sphi %s1375_s19, %s14_s19   ;;  %s1330_s18 = sphi %s1373_s18, %s1741_s18   ;;  %s1326_s17 = sphi %s1371_s17, %s1740_s17   ;;  %s1322_s16 = sphi %s1369_s16, %s1739_s16   ;;  %s1318_s15 = sphi %s1367_s15, %s1738_s15  }
   0x4   : > { %p24_p0 = scmp.ge.s32.totalorder %s23_s20, 2  ;;  %p1074_p1 = scmp.ge.s32.totalorder %s1334_s19, 1 }
   0x5   : > { %p211_p2 = scmp.lt.s32.totalorder %s1334_s19, 5 }
   0x6   : > { %s1743_s20 = smov (%p24_p0, %s23_s20), 0  ;;  %s1745_s21 = smov (!%p24_p0, %s26_s21), %s1330_s18 }
   0x7   : > { %p212_p3 = pnand %p1074_p1, %p211_p2  ;;  %p28_p4 = scmp.ge.s32.totalorder %s1745_s21, 2 }
   0x8   : > { %p259_p5 = scmp.lt.s32.totalorder (!%p212_p3), %s1322_s16, 1  ;;  %s1075_s22 = sshll.u32 (!%p212_p3), %s1318_s15, 2 }
   0x9   : > { %s1747_s21 = smov (%p28_p4, %s1745_s21), 0  ;;  %215 = sbr.rel (%p212_p3) target bundleno = 1301 (0x515), region = 36 }
   0xa   : > { %p261_p6 = scmp.lt.s32.totalorder (!%p212_p3), %s1075_s22, 7  ;;  %s1336_s6 = smov (!%p212_p3), 120  }
   0xb   : > { %s1337_s11 = smov (!%p212_p3), 112   ;;  %s1340_s24 = smov (!%p212_p3), 16  }
   0xc   : > { %s1341_s25 = smov (!%p212_p3), 24  }
   0xe   : > { %s1749_s16 = smov (!%p259_p5, %s1322_s16), 1  ;;  %s1751_s22 = smov (!%p261_p6, %s1075_s22), 7  ;;  %vm346_vm0 = vcmask 64512   ;;  %vm384_vm1 = vcmask 523264   ;;  %vm928_vm2 = vcmask 130048   ;;  %vm933_vm3 = vcmask 195584  }
   0xf   : > { %s1143_s23 = sshll.u32 %s1749_s16, 5  ;;  %s280_s26 = scalar_lea.vmem %s1736_s3, %s1749_s16  ;;  %vm942_vm4 = vcmask 257024  }
  0x10   : > { %s272_s29 = scalar_lea.vmem %s1734_s1, %s1143_s23  ;;  %s1076_s30 = sshll.u32 %s1749_s16, 3  ;;  %v1463_v12 = vld [vmem:[%s280_s26] ss:$0 sm:$0xff] }
  0x11   : > { %v1410_v0 = vld [vmem:[%s272_s29 + $0x18] sm:$0xff]  ;;  %v1412_v1 = vld [vmem:[%s272_s29 + $0x8] sm:$0xff]  ;;  %s1414_s5 = sadd.s32 %s1076_s30, %s1751_s22  ;;  %v1416_v2 = vld [vmem:[%s272_s29] sm:$0xff]  ;;  %s277_s22 = scalar_lea.vmem %s1735_s2, %s1143_s23 }
  0x12   : > { %v363_v3 = vsel %vm346_vm0, %v1410_v0, 0  ;;  %486 = vrot.lane.b32.xlu0 %v1412_v1, %s1336_s6  ;;  %490 = vrot.lane.b32.xlu2 %v1410_v0, %s1336_s6  ;;  %s1077_s7 = sshll.u32 %s1414_s5, 2  ;;  %v1149_v4 = vld [vmem:[%s272_s29 + $0x10] sm:$0xff]  ;;  %v357_v7 = vsel %vm346_vm0, %v1412_v1, 0  ;;  %v354_v8 = vsel %vm346_vm0, %v1416_v2, 0  ;;  %v1479_v28 = vld [vmem:[%s277_s22 + $0x18] sm:$0xff] }
  0x13   : > { %369 = vmatpush.bf16.xpose.msra.mxu0 %v363_v3  ;;  %484 = vrot.lane.b32.xlu1 %v1416_v2, %s1336_s6  ;;  %s266_s10 = scalar_lea.vmem %s1733_s0, %s1077_s7  ;;  %v360_v5 = vsel %vm346_vm0, %v1149_v4, 0  ;;  %v1482_v30 = vld [vmem:[%s277_s22 + $0x10] sm:$0xff]  ;;  %v1488_v34 = vld [vmem:[%s277_s22 + $0x8] sm:$0xff]  ;;  %v1491_v37 = vld [vmem:[%s277_s22] sm:$0xff]  ;;  %s1338_s16 = smov 104  }
  0x14   : > { %v1433_v6 = vld [vmem:[%s266_s10] sm:$0xff]  ;;  %v1445_v9 = vld [vmem:[%s266_s10 + $0x8] sm:$0xff]  ;;  %465 = vmatpush.bf16.msra.mxu1 %v1479_v28  ;;  %s1339_s23 = smov 8   ;;  %s289_s28 = scalar_lea.vmem %s1737_s4, %s1077_s7 }
  0x18   : > { %466 = vmatpush.bf16.msra.mxu1 %v1482_v30 }
  0x1a   : > { %488 = vrot.lane.b32.xlu2 %v1149_v4, %s1336_s6 }
  0x1b   : > { %370 = vmatpush.bf16.xpose.msra.mxu0 %v360_v5  ;;  %480 = vrot.lane.b32.xlu1 %v1433_v6, %s1336_s6 }
  0x1c   : > { %467 = vmatpush.bf16.msra.mxu1 %v1488_v34 }
  0x20   : > { %468 = vmatpush.bf16.msra.mxu1 %v1491_v37 }
  0x22   : > { %620 = vrot.lane.b32.xlu2 %v1149_v4, %s1337_s11 }
  0x23   : > { %371 = vmatpush.bf16.xpose.msra.mxu0 %v357_v7  ;;  %622 = vrot.lane.b32.xlu1 %v1410_v0, %s1337_s11 }
  0x2a   : > { %482 = vrot.lane.b32.xlu2 %v1445_v9, %s1336_s6 }
  0x2b   : > { %372 = vmatpush.bf16.xpose.msra.mxu0 %v354_v8 }
  0x32   : > { %1109 = vmatmul.msk.bf16.vlgmr.msra.gmra.mxu0 %vm346_vm0, %v1433_v6  ;;  %618 = vrot.lane.b32.xlu2 %v1412_v1, %s1337_s11 }
  0x3a   : > { %616 = vrot.lane.b32.xlu2 %v1416_v2, %s1337_s11 }
  0x42   : > { %1110 = vmatmul.msk.bf16.gmra.mxu0 %vm346_vm0, %v1445_v9 }
  0x6c   : > { %v491_v10 = vpop.permute.xlu2 %490 }
  0x6d   : > { %v508_v11 = vsel %vm346_vm0, %v491_v10, 0 }
  0x6e   : > { %514 = vmatpush.bf16.xpose.msra.mxu2 %v508_v11 }
  0x74   : > { %v489_v15 = vpop.permute.xlu2 %488 }
  0x75   : > { %v505_v16 = vsel %vm346_vm0, %v489_v15, 0 }
  0x76   : > { %515 = vmatpush.bf16.xpose.msra.mxu2 %v505_v16 }
  0x7c   : > { %v621_v35 = vpop.permute.xlu2 %620 }
  0x7d   : > { %v637_v53 = vsel %vm346_vm0, %v621_v35, 0 }
  0x84   : > { %v487_v18 = vpop.permute.xlu0 %486  ;;  %v483_v39 = vpop.permute.xlu2 %482 }
  0x85   : > { %v502_v20 = vsel %vm346_vm0, %v487_v18, 0  ;;  %v485_v23 = vpop.permute.xlu1 %484 }
  0x86   : > { %516 = vmatpush.bf16.xpose.msra.mxu2 %v502_v20  ;;  %v499_v25 = vsel %vm346_vm0, %v485_v23, 0 }
  0x8c   : > { %v619_v59 = vpop.permute.xlu2 %618 }
  0x8d   : > { %v481_v29 = vpop.permute.xlu1 %480  ;;  %v634_v60 = vsel %vm346_vm0, %v619_v59, 0 }
  0x8e   : > { %517 = vmatpush.bf16.xpose.msra.mxu2 %v499_v25 }
  0x94   : > { %v617_v63 = vpop.permute.xlu2 %616 }
  0x95   : > { %1129 = vmatmul.msk.bf16.vlgmr.msra.gmra.mxu2 %vm346_vm0, %v481_v29  ;;  %v623_v36 = vpop.permute.xlu1 %622 }
  0x96   : > { %v640_v38 = vsel %vm346_vm0, %v623_v36, 0 }
  0x97   : > { %646 = vmatpush.bf16.xpose.msrb.mxu1 %v640_v38 }
  0x9f   : > { %647 = vmatpush.bf16.xpose.msrb.mxu1 %v637_v53 }
  0xa5   : > { %1130 = vmatmul.msk.bf16.gmra.mxu2 %vm346_vm0, %v483_v39 }
  0xa7   : > { %648 = vmatpush.bf16.xpose.msrb.mxu1 %v634_v60 }
  0xaf   : > { %v374_v13 = vpop.f32.mrf.mxu0 }
  0xb0   : > { %v375_v14 = vadd.f32 %v1463_v12, %v374_v13 }
  0xb2   : > { %v385_v17 = vsel %vm384_vm1, %v375_v14, -inf }
  0xb3   : > { %386 = vmax.xlane.f32.xlu0 %v385_v17 }
  0xb7   : > { %v376_v19 = vpop.f32.mrf.mxu0 }
  0xb8   : > { %v377_v21 = vadd.f32 %v1463_v12, %v376_v19 }
  0xba   : > { %v388_v22 = vsel %vm384_vm1, %v377_v21, -inf }
  0xbb   : > { %389 = vmax.xlane.f32.xlu0 %v388_v22 }
  0xbf   : > { %v379_v24 = vpop.f32.mrf.mxu0 }
  0xc0   : > { %v380_v26 = vadd.f32 %v1463_v12, %v379_v24 }
  0xc2   : > { %v391_v27 = vsel %vm384_vm1, %v380_v26, -inf }
  0xc3   : > { %392 = vmax.xlane.f32.xlu1 %v391_v27 }
  0xc7   : > { %v381_v31 = vpop.f32.mrf.mxu0 }
  0xc8   : > { %v382_v32 = vadd.f32 %v1463_v12, %v381_v31 }
  0xca   : > { %v394_v33 = vsel %vm384_vm1, %v382_v32, -inf }
  0xcb   : > { %395 = vmax.xlane.f32.xlu1 %v394_v33 }
  0xcf   : > { %752 = vrot.lane.b32.xlu0 %v1149_v4, %s1338_s16 }
  0xd7   : > { %750 = vrot.lane.b32.xlu0 %v1412_v1, %s1338_s16 }
  0xe4   : > { %754 = vrot.lane.b32.xlu1 %v1410_v0, %s1338_s16  ;;  %v631_v0 = vsel %vm346_vm0, %v617_v63, 0 }
  0xe5   : > { %649 = vmatpush.bf16.xpose.msrb.mxu1 %v631_v0 }
 0x118   : > { %v519_v7 = vpop.f32.mrf.mxu2 }
 0x119   : > { %v1528_v13 = vadd.f32 %v1463_v12, %v519_v7 }
 0x120   : > { %v521_v10 = vpop.f32.mrf.mxu2 }
 0x126   : > { %v387_v40 = vpop.xlane.xlu0 %386 }
 0x127   : > { %v397_v41 = vsub.f32 %v375_v14, %v387_v40  ;;  %v529_v14 = vsel %vm384_vm1, %v1528_v13, -inf }
 0x128   : > { %v524_v11 = vpop.f32.mrf.mxu2 }
 0x129   : > { %v401_v42 = vmul.f32 1.442695, %v397_v41  ;;  %v1541_v17 = vadd.f32 %v1463_v12, %v524_v11 }
 0x12b   : > { %1232 = vpow2.f32 %v401_v42  ;;  %v535_v19 = vsel %vm384_vm1, %v1541_v17, -inf }
 0x12e   : > { %v390_v43 = vpop.xlane.xlu0 %389 }
 0x12f   : > { %v398_v44 = vsub.f32 %v377_v21, %v390_v43 }
 0x130   : > { %v526_v15 = vpop.f32.mrf.mxu2 }
 0x131   : > { %v1501_v45 = vpop.eup %1232  ;;  %v403_v46 = vmul.f32 1.442695, %v398_v44  ;;  %v1533_v16 = vadd.f32 %v1463_v12, %v526_v15 }
 0x132   : > { %v409_v47 = vsel %vm384_vm1, %v1501_v45, 0.0 }
 0x133   : > { %1234 = vpow2.f32 %v403_v46  ;;  %410 = vadd.xlane.f32.xlu2 %v409_v47 }
 0x136   : > { %v393_v48 = vpop.xlane.xlu1 %392 }
 0x137   : > { %v399_v49 = vsub.f32 %v380_v26, %v393_v48 }
 0x139   : > { %v1235_v50 = vpop.eup %1234  ;;  %v405_v51 = vmul.f32 1.442695, %v399_v49 }
 0x13a   : > { %v412_v52 = vsel %vm384_vm1, %v1235_v50, 0.0 }
 0x13b   : > { %1236 = vpow2.f32 %v405_v51  ;;  %413 = vadd.xlane.f32.xlu0 %v412_v52 }
 0x13e   : > { %v396_v54 = vpop.xlane.xlu1 %395 }
 0x13f   : > { %v400_v55 = vsub.f32 %v382_v32, %v396_v54 }
 0x141   : > { %v1507_v56 = vpop.eup %1236  ;;  %v407_v57 = vmul.f32 1.442695, %v400_v55  ;;  %v753_v4 = vpop.permute.xlu0 %752 }
 0x142   : > { %v415_v58 = vsel %vm384_vm1, %v1507_v56, 0.0  ;;  %v769_v5 = vsel %vm346_vm0, %v753_v4, 0 }
 0x143   : > { %1238 = vpow2.f32 %v407_v57  ;;  %416 = vadd.xlane.f32.xlu2 %v415_v58 }
 0x149   : > { %v1239_v61 = vpop.eup %1238  ;;  %v751_v8 = vpop.permute.xlu0 %750 }
 0x14a   : > { %v418_v62 = vsel %vm384_vm1, %v1239_v61, 0.0 }
 0x14b   : > { %419 = vadd.xlane.f32.xlu1 %v418_v62 }
 0x14f   : > { %748 = vrot.lane.b32.xlu0 %v1416_v2, %s1338_s16  ;;  %v766_v2 = vsel %vm346_vm0, %v751_v8, 0 }
 0x156   : > { %v755_v1 = vpop.permute.xlu1 %754 }
 0x157   : > { %614 = vrot.lane.b32.xlu0 %v1445_v9, %s1337_s11  ;;  %v772_v3 = vsel %vm346_vm0, %v755_v1, 0 }
 0x158   : > { %778 = vmatpush.bf16.xpose.msrb.mxu0 %v772_v3 }
 0x15b   : > { %744 = vrot.lane.b32.xlu2 %v1433_v6, %s1338_s16 }
 0x160   : > { %779 = vmatpush.bf16.xpose.msrb.mxu0 %v769_v5 }
 0x163   : > { %746 = vrot.lane.b32.xlu2 %v1445_v9, %s1338_s16  ;;  %v1536_v9 = vadd.f32 %v1463_v12, %v521_v10 }
 0x164   : > { %612 = vrot.lane.b32.xlu1 %v1433_v6, %s1337_s11  ;;  %v538_v6 = vsel %vm384_vm1, %v1533_v16, -inf }
 0x165   : > { %v532_v18 = vsel %vm384_vm1, %v1536_v9, -inf }
 0x168   : > { %780 = vmatpush.bf16.xpose.msrb.mxu0 %v766_v2 }
 0x181   : > { %530 = vmax.xlane.f32.xlu0 %v529_v14 }
 0x189   : > { %539 = vmax.xlane.f32.xlu0 %v538_v6 }
 0x18c   : > { %533 = vmax.xlane.f32.xlu2 %v532_v18 }
 0x18e   : > { %536 = vmax.xlane.f32.xlu1 %v535_v19 }
 0x1a6   : > { %v411_v20 = vpop.xlane.xlu2 %410 }
 0x1a7   : > { %1240 = vrcp.f32 %v411_v20 }
 0x1ad   : > { %v1241_v22 = vpop.eup %1240 }
 0x1ae   : > { %v414_v21 = vpop.xlane.xlu0 %413  ;;  %v425_v24 = vmul.f32 %v1241_v22, %v1501_v45 }
 0x1af   : > { %1242 = vrcp.f32 %v414_v21 }
 0x1b5   : > { %v1243_v23 = vpop.eup %1242 }
 0x1b6   : > { %v426_v25 = vmul.f32 %v1243_v23, %v1235_v50  ;;  %v417_v27 = vpop.xlane.xlu2 %416 }
 0x1b7   : > { %1244 = vrcp.f32 %v417_v27 }
 0x1b8   : > { %v429_v26 = vpack.c.bf16 %v426_v25, %v425_v24 }
 0x1ba   : > { %1127 = vmatmul.msk.bf16.vlgmr.msra.gmra.mxu1 %vm384_vm1, %v429_v26 }
 0x1bd   : > { %v1245_v33 = vpop.eup %1244 }
 0x1be   : > { %v420_v29 = vpop.xlane.xlu1 %419  ;;  %v427_v36 = vmul.f32 %v1245_v33, %v1507_v56  ;;  %v745_v39 = vpop.permute.xlu2 %744 }
 0x1bf   : > { %1246 = vrcp.f32 %v420_v29 }
 0x1c1   : > { %v749_v31 = vpop.permute.xlu0 %748 }
 0x1c2   : > { %v763_v32 = vsel %vm346_vm0, %v749_v31, 0 }
 0x1c3   : > { %781 = vmatpush.bf16.xpose.msrb.mxu0 %v763_v32 }
 0x1c5   : > { %v1247_v35 = vpop.eup %1246 }
 0x1c6   : > { %v428_v38 = vmul.f32 %v1247_v35, %v1239_v61  ;;  %v747_v41 = vpop.permute.xlu2 %746 }
 0x1c8   : > { %v430_v40 = vpack.c.bf16 %v428_v38, %v427_v36 }
 0x1c9   : > { %v615_v43 = vpop.permute.xlu0 %614 }
 0x1ca   : > { %1128 = vmatmul.msk.bf16.gmra.mxu1 %vm384_vm1, %v430_v40  ;;  %1137 = vmatmul.msk.bf16.vlgmr.msrb.gmra.mxu0 %vm346_vm0, %v745_v39 }
 0x1d6   : > { %v613_v42 = vpop.permute.xlu1 %612 }
 0x1da   : > { %1138 = vmatmul.msk.bf16.gmra.mxu0 %vm346_vm0, %v747_v41  ;;  %1133 = vmatmul.msk.bf16.vlgmr.msrb.gmra.mxu1 %vm346_vm0, %v613_v42 }
 0x1ea   : > { %1134 = vmatmul.msk.bf16.gmra.mxu1 %vm346_vm0, %v615_v43 }
 0x1f4   : > { %v531_v59 = vpop.xlane.xlu0 %530 }
 0x1f5   : > { %v541_v61 = vsub.f32 %v1528_v13, %v531_v59 }
 0x1f7   : > { %v545_v62 = vmul.f32 1.442695, %v541_v61 }
 0x1f9   : > { %1248 = vpow2.f32 %v545_v62 }
 0x1fc   : > { %v540_v63 = vpop.xlane.xlu0 %539 }
 0x1fd   : > { %v544_v1 = vsub.f32 %v1533_v16, %v540_v63 }
 0x1ff   : > { %v551_v3 = vmul.f32 1.442695, %v544_v1  ;;  %v1600_v4 = vpop.eup %1248  ;;  %v534_v8 = vpop.xlane.xlu2 %533 }
 0x200   : > { %v553_v5 = vsel %vm384_vm1, %v1600_v4, 0.0 }
 0x201   : > { %1250 = vpow2.f32 %v551_v3  ;;  %v537_v19 = vpop.xlane.xlu1 %536 }
 0x202   : > { %v543_v31 = vsub.f32 %v1541_v17, %v537_v19 }
 0x204   : > { %v549_v35 = vmul.f32 1.442695, %v543_v31 }
 0x207   : > { %v1605_v2 = vpop.eup %1250 }
 0x208   : > { %v562_v11 = vsel %vm384_vm1, %v1605_v2, 0.0 }
 0x237   : > { %v1580_v56 = vpop.f32.mrf.mxu1 }
 0x23f   : > { %v1586_v57 = vpop.f32.mrf.mxu1 }
 0x247   : > { %v783_v44 = vpop.f32.mrf.mxu0  ;;  %v1590_v58 = vpop.f32.mrf.mxu1 }
 0x248   : > { %v1557_v45 = vadd.f32 %v1463_v12, %v783_v44 }
 0x24a   : > { %v793_v46 = vsel %vm384_vm1, %v1557_v45, -inf }
 0x24b   : > { %794 = vmax.xlane.f32.xlu1 %v793_v46 }
 0x24f   : > { %v785_v47 = vpop.f32.mrf.mxu0  ;;  %v1596_v60 = vpop.f32.mrf.mxu1 }
 0x250   : > { %v1562_v48 = vadd.f32 %v1463_v12, %v785_v47 }
 0x252   : > { %v796_v49 = vsel %vm384_vm1, %v1562_v48, -inf }
 0x253   : > { %797 = vmax.xlane.f32.xlu2 %v796_v49 }
 0x257   : > { %v788_v50 = vpop.f32.mrf.mxu0  ;;  %v651_v0 = vpop.f32.mrf.mxu1 }
 0x258   : > { %v1567_v51 = vadd.f32 %v1463_v12, %v788_v50  ;;  %v652_v42 = vadd.f32 %v1463_v12, %v651_v0 }
 0x25a   : > { %v799_v52 = vsel %vm384_vm1, %v1567_v51, -inf  ;;  %v661_v44 = vsel %vm384_vm1, %v652_v42, -inf }
 0x25b   : > { %800 = vmax.xlane.f32.xlu0 %v799_v52 }
 0x25f   : > { %v790_v53 = vpop.f32.mrf.mxu0  ;;  %v653_v7 = vpop.f32.mrf.mxu1 }
 0x260   : > { %v1572_v54 = vadd.f32 %v1463_v12, %v790_v53  ;;  %v654_v13 = vadd.f32 %v1463_v12, %v653_v7 }
 0x262   : > { %v802_v55 = vsel %vm384_vm1, %v1572_v54, -inf  ;;  %v664_v15 = vsel %vm384_vm1, %v654_v13, -inf }
 0x263   : > { %803 = vmax.xlane.f32.xlu1 %v802_v55 }
 0x267   : > { %v656_v14 = vpop.f32.mrf.mxu1 }
 0x268   : > { %v1614_v6 = vadd.f32 %v1463_v12, %v656_v14 }
 0x26a   : > { %v667_v20 = vsel %vm384_vm1, %v1614_v6, -inf }
 0x26b   : > { %581 = vrot.lane.b32.xlu2 %v1479_v28, %s1336_s6 }
 0x26f   : > { %579 = vrot.lane.b32.xlu0 %v1482_v30, %s1336_s6 }
 0x273   : > { %575 = vrot.lane.b32.xlu2 %v1491_v37, %s1336_s6 }
 0x277   : > { %711 = vrot.lane.b32.xlu0 %v1482_v30, %s1337_s11 }
 0x27c   : > { %577 = vrot.lane.b32.xlu1 %v1488_v34, %s1336_s6 }
 0x284   : > { %713 = vrot.lane.b32.xlu1 %v1479_v28, %s1337_s11 }
 0x28c   : > { %845 = vrot.lane.b32.xlu1 %v1479_v28, %s1338_s16  ;;  %v542_v28 = vsub.f32 %v1536_v9, %v534_v8  ;;  %v658_v9 = vpop.f32.mrf.mxu1 }
 0x28d   : > { %v1621_v21 = vadd.f32 %v1463_v12, %v658_v9 }
 0x28e   : > { %v547_v10 = vmul.f32 1.442695, %v542_v28 }
 0x28f   : > { %v670_v22 = vsel %vm384_vm1, %v1621_v21, -inf }
 0x290   : > { %1252 = vpow2.f32 %v547_v10 }
 0x296   : > { %v1611_v16 = vpop.eup %1252 }
 0x297   : > { %v556_v18 = vsel %vm384_vm1, %v1611_v16, 0.0 }
 0x2a1   : > { %554 = vadd.xlane.f32.xlu0 %v553_v5 }
 0x2a9   : > { %563 = vadd.xlane.f32.xlu0 %v562_v11 }
 0x2b1   : > { %665 = vmax.xlane.f32.xlu0 %v664_v15 }
 0x2b6   : > { %557 = vadd.xlane.f32.xlu1 %v556_v18 }
 0x2b9   : > { %668 = vmax.xlane.f32.xlu0 %v667_v20 }
 0x2be   : > { %v795_v23 = vpop.xlane.xlu1 %794  ;;  %671 = vmax.xlane.f32.xlu1 %v670_v22 }
 0x2bf   : > { %v805_v24 = vsub.f32 %v1557_v45, %v795_v23 }
 0x2c1   : > { %v809_v25 = vmul.f32 1.442695, %v805_v24 }
 0x2c3   : > { %1254 = vpow2.f32 %v809_v25 }
 0x2c6   : > { %v798_v26 = vpop.xlane.xlu2 %797 }
 0x2c7   : > { %v806_v27 = vsub.f32 %v1562_v48, %v798_v26 }
 0x2c9   : > { %v1627_v29 = vpop.eup %1254  ;;  %v811_v32 = vmul.f32 1.442695, %v806_v27 }
 0x2ca   : > { %v817_v33 = vsel %vm384_vm1, %v1627_v29, 0.0 }
 0x2cb   : > { %1256 = vpow2.f32 %v811_v32  ;;  %818 = vadd.xlane.f32.xlu2 %v817_v33 }
 0x2cc   : > { %1258 = vpow2.f32 %v549_v35 }
 0x2cd   : > { %709 = vrot.lane.b32.xlu0 %v1488_v34, %s1337_s11 }
 0x2ce   : > { %v582_v36 = vpop.permute.xlu2 %581  ;;  %v1639_v40 = vpop.xlane.xlu0 %800 }
 0x2cf   : > { %597 = vmatpush.bf16.msra.mxu3 %v582_v36 }
 0x2d1   : > { %v1257_v38 = vpop.eup %1256 }
 0x2d2   : > { %v820_v39 = vsel %vm384_vm1, %v1257_v38, 0.0  ;;  %v1637_v17 = vpop.eup %1258 }
 0x2d3   : > { %821 = vadd.xlane.f32.xlu2 %v820_v39  ;;  %v559_v41 = vsel %vm384_vm1, %v1637_v17, 0.0 }
 0x2d5   : > { %707 = vrot.lane.b32.xlu0 %v1491_v37, %s1337_s11 }
 0x2d6   : > { %v1647_v45 = vpop.xlane.xlu1 %803  ;;  %v576_v47 = vpop.permute.xlu2 %575 }
 0x2db   : > { %560 = vadd.xlane.f32.xlu2 %v559_v41 }
 0x2dd   : > { %839 = vrot.lane.b32.xlu0 %v1491_v37, %s1338_s16 }
 0x2e1   : > { %v580_v43 = vpop.permute.xlu0 %579 }
 0x2e2   : > { %598 = vmatpush.bf16.msra.mxu3 %v580_v43 }
 0x2e3   : > { %662 = vmax.xlane.f32.xlu2 %v661_v44 }
 0x2e9   : > { %v712_v49 = vpop.permute.xlu0 %711 }
 0x2ee   : > { %v578_v46 = vpop.permute.xlu1 %577 }
 0x2ef   : > { %599 = vmatpush.bf16.msra.mxu3 %v578_v46 }
 0x2f3   : > { %600 = vmatpush.bf16.msra.mxu3 %v576_v47 }
 0x2f6   : > { %v714_v48 = vpop.permute.xlu1 %713 }
 0x2f7   : > { %729 = vmatpush.bf16.msrb.mxu3 %v714_v48 }
 0x2fb   : > { %730 = vmatpush.bf16.msrb.mxu3 %v712_v49 }
 0x2fe   : > { %v846_v50 = vpop.permute.xlu1 %845 }
 0x2ff   : > { %861 = vmatpush.bf16.msrb.mxu2 %v846_v50 }
 0x314   : > { %v555_v37 = vpop.xlane.xlu0 %554 }
 0x315   : > { %1260 = vrcp.f32 %v555_v37 }
 0x31b   : > { %v1261_v61 = vpop.eup %1260 }
 0x31c   : > { %v564_v52 = vpop.xlane.xlu0 %563  ;;  %v569_v3 = vmul.f32 %v1261_v61, %v1600_v4 }
 0x324   : > { %v666_v12 = vpop.xlane.xlu0 %665 }
 0x325   : > { %v674_v53 = vsub.f32 %v654_v13, %v666_v12 }
 0x327   : > { %v679_v55 = vmul.f32 1.442695, %v674_v53 }
 0x329   : > { %1262 = vpow2.f32 %v679_v55  ;;  %v558_v59 = vpop.xlane.xlu1 %557 }
 0x32a   : > { %1264 = vrcp.f32 %v558_v59 }
 0x32f   : > { %v1649_v62 = vpop.eup %1262 }
 0x330   : > { %v1265_v63 = vpop.eup %1264  ;;  %v688_v0 = vsel %vm384_vm1, %v1649_v62, 0.0 }
 0x331   : > { %v672_v1 = vpop.xlane.xlu1 %671  ;;  %689 = vadd.xlane.f32.xlu2 %v688_v0  ;;  %v570_v5 = vmul.f32 %v1265_v63, %v1611_v16 }
 0x332   : > { %v676_v7 = vsub.f32 %v1621_v21, %v672_v1  ;;  %v669_v21 = vpop.xlane.xlu0 %668 }
 0x333   : > { %v573_v8 = vpack.c.bf16 %v570_v5, %v569_v3  ;;  %v675_v31 = vsub.f32 %v1614_v6, %v669_v21 }
 0x334   : > { %v683_v28 = vmul.f32 1.442695, %v676_v7 }
 0x335   : > { %1131 = vmatmul.msk.bf16.vlgmr.msra.gmra.mxu3 %vm384_vm1, %v573_v8  ;;  %v681_v35 = vmul.f32 1.442695, %v675_v31 }
 0x336   : > { %1266 = vpow2.f32 %v683_v28 }
 0x33c   : > { %v1657_v10 = vpop.eup %1266 }
 0x33d   : > { %v694_v11 = vsel %vm384_vm1, %v1657_v10, 0.0 }
 0x33e   : > { %v819_v13 = vpop.xlane.xlu2 %818  ;;  %695 = vadd.xlane.f32.xlu0 %v694_v11 }
 0x33f   : > { %1268 = vrcp.f32 %v819_v13 }
 0x345   : > { %v1269_v4 = vpop.eup %1268 }
 0x346   : > { %v822_v14 = vpop.xlane.xlu2 %821  ;;  %v1664_v16 = vmul.f32 %v1269_v4, %v1627_v29  ;;  %v710_v29 = vpop.permute.xlu0 %709 }
 0x347   : > { %1270 = vrcp.f32 %v822_v14  ;;  %731 = vmatpush.bf16.msrb.mxu3 %v710_v29 }
 0x348   : > { %1272 = vrcp.f32 %v564_v52 }
 0x349   : > { %843 = vrot.lane.b32.xlu2 %v1482_v30, %s1338_s16 }
 0x34d   : > { %v1271_v15 = vpop.eup %1270 }
 0x34e   : > { %v1666_v9 = vmul.f32 %v1271_v15, %v1257_v38  ;;  %v561_v18 = vpop.xlane.xlu2 %560  ;;  %v1273_v20 = vpop.eup %1272 }
 0x34f   : > { %1274 = vrcp.f32 %v561_v18  ;;  %v572_v30 = vmul.f32 %v1273_v20, %v1605_v2  ;;  %v708_v36 = vpop.permute.xlu0 %707  ;;  %v808_v2 = vsub.f32 %v1572_v54, %v1647_v45 }
 0x350   : > { %v837_v19 = vpack.c.bf16 %v1666_v9, %v1664_v16  ;;  %732 = vmatpush.bf16.msrb.mxu3 %v708_v36 }
 0x351   : > { %v815_v38 = vmul.f32 1.442695, %v808_v2 }
 0x355   : > { %v1275_v22 = vpop.eup %1274 }
 0x356   : > { %v663_v23 = vpop.xlane.xlu2 %662  ;;  %v571_v24 = vmul.f32 %v1275_v22, %v1637_v17 }
 0x357   : > { %v673_v25 = vsub.f32 %v652_v42, %v663_v23  ;;  %v807_v42 = vsub.f32 %v1567_v51, %v1639_v40 }
 0x358   : > { %v574_v26 = vpack.c.bf16 %v572_v30, %v571_v24 }
 0x359   : > { %v677_v27 = vmul.f32 1.442695, %v673_v25  ;;  %v813_v43 = vmul.f32 1.442695, %v807_v42 }
 0x35a   : > { %1132 = vmatmul.msk.bf16.gmra.mxu3 %vm384_vm1, %v574_v26 }
 0x35b   : > { %1276 = vpow2.f32 %v677_v27 }
 0x35c   : > { %1278 = vpow2.f32 %v681_v35 }
 0x35d   : > { %1280 = vpow2.f32 %v815_v38 }
 0x35e   : > { %1282 = vpow2.f32 %v813_v43 }
 0x361   : > { %v1277_v32 = vpop.eup %1276 }
 0x362   : > { %v685_v33 = vsel %vm384_vm1, %v1277_v32, 0.0  ;;  %v1279_v39 = vpop.eup %1278 }
 0x363   : > { %686 = vadd.xlane.f32.xlu1 %v685_v33  ;;  %v691_v17 = vsel %vm384_vm1, %v1279_v39, 0.0  ;;  %v1281_v41 = vpop.eup %1280 }
 0x364   : > { %v826_v6 = vsel %vm384_vm1, %v1281_v41, 0.0  ;;  %v1283_v54 = vpop.eup %1282 }
 0x365   : > { %v823_v45 = vsel %vm384_vm1, %v1283_v54, 0.0 }
 0x372   : > { %692 = vadd.xlane.f32.xlu2 %v691_v17 }
 0x37a   : > { %827 = vadd.xlane.f32.xlu2 %v826_v6 }
 0x37c   : > { %841 = vrot.lane.b32.xlu1 %v1488_v34, %s1338_s16  ;;  %v840_v34 = vpop.permute.xlu0 %839 }
 0x3a4   : > { %v690_v44 = vpop.xlane.xlu2 %689 }
 0x3a5   : > { %1284 = vrcp.f32 %v690_v44 }
 0x3a6   : > { %824 = vadd.xlane.f32.xlu1 %v823_v45 }
 0x3ab   : > { %v1285_v37 = vpop.eup %1284 }
 0x3ac   : > { %v844_v46 = vpop.permute.xlu2 %843  ;;  %v702_v52 = vmul.f32 %v1285_v37, %v1649_v62 }
 0x3ad   : > { %862 = vmatpush.bf16.msrb.mxu2 %v844_v46 }
 0x3b1   : > { %v696_v55 = vpop.xlane.xlu0 %695 }
 0x3b8   : > { %v602_v47 = vpop.f32.mrf.mxu3 }
 0x3c0   : > { %v604_v48 = vpop.f32.mrf.mxu3 }
 0x3c1   : > { %v1201_v49 = vpack.i.bf16 %v604_v48, %v602_v47 }
 0x3c3   : > { %1202 = vrot.lane.b32.xlu0 %v1201_v49, %s1339_s23 }
 0x3d6   : > { %v687_v50 = vpop.xlane.xlu1 %686 }
 0x3d7   : > { %1286 = vrcp.f32 %v687_v50 }
 0x3d8   : > { %1288 = vrcp.f32 %v696_v55 }
 0x3dd   : > { %v1287_v51 = vpop.eup %1286  ;;  %v607_v40 = vpop.f32.mrf.mxu3 }
 0x3de   : > { %v701_v12 = vmul.f32 %v1287_v51, %v1277_v32  ;;  %v1289_v0 = vpop.eup %1288 }
 0x3df   : > { %v704_v5 = vmul.f32 %v1289_v0, %v1657_v10 }
 0x3e0   : > { %v705_v53 = vpack.c.bf16 %v702_v52, %v701_v12 }
 0x3e2   : > { %1135 = vmatmul.msk.bf16.vlgmr.msrb.gmra.mxu3 %vm384_vm1, %v705_v53 }
 0x3e5   : > { %v609_v59 = vpop.f32.mrf.mxu3  ;;  %v693_v61 = vpop.xlane.xlu2 %692 }
 0x3e6   : > { %v1206_v63 = vpack.i.bf16 %v609_v59, %v607_v40  ;;  %1290 = vrcp.f32 %v693_v61 }
 0x3e8   : > { %1207 = vrot.lane.b32.xlu1 %v1206_v63, %s1339_s23 }
 0x3ec   : > { %v1291_v1 = vpop.eup %1290 }
 0x3ed   : > { %v703_v3 = vmul.f32 %v1291_v1, %v1279_v39  ;;  %v828_v62 = vpop.xlane.xlu2 %827 }
 0x3ee   : > { %v842_v7 = vpop.permute.xlu1 %841  ;;  %1292 = vrcp.f32 %v828_v62 }
 0x3ef   : > { %863 = vmatpush.bf16.msrb.mxu2 %v842_v7  ;;  %v706_v8 = vpack.c.bf16 %v704_v5, %v703_v3 }
 0x3f2   : > { %1136 = vmatmul.msk.bf16.gmra.mxu3 %vm384_vm1, %v706_v8 }
 0x3f3   : > { %864 = vmatpush.bf16.msrb.mxu2 %v840_v34 }
 0x3f4   : > { %v1293_v11 = vpop.eup %1292 }
 0x3f5   : > { %v836_v4 = vmul.f32 %v1293_v11, %v1281_v41 }
 0x3f6   : > { %1139 = vmatmul.msk.bf16.vlgmr.msrb.gmra.mxu2 %vm384_vm1, %v837_v19 }
 0x419   : > { %v825_v28 = vpop.xlane.xlu1 %824 }
 0x41a   : > { %1294 = vrcp.f32 %v825_v28 }
 0x420   : > { %v1295_v13 = vpop.eup %1294 }
 0x421   : > { %v835_v14 = vmul.f32 %v1295_v13, %v1283_v54 }
 0x423   : > { %v838_v10 = vpack.c.bf16 %v836_v4, %v835_v14 }
 0x425   : > { %1140 = vmatmul.msk.bf16.gmra.mxu2 %vm384_vm1, %v838_v10 }
 0x435   : > { %v1203_v26 = vpop.permute.xlu0 %1202 }
 0x436   : > { %v1205_v31 = vunpack.i.h.bf16 %v1203_v26  ;;  %v1204_v32 = vunpack.i.l.bf16 %v1203_v26 }
 0x438   : > { %v925_v2 = vsel %vm346_vm0, %v1586_v57, %v1205_v31  ;;  %v924_v38 = vsel %vm346_vm0, %v1580_v56, %v1204_v32 }
 0x45a   : > { %v1208_v56 = vpop.permute.xlu1 %1207 }
 0x45b   : > { %v1210_v44 = vunpack.i.h.bf16 %v1208_v56  ;;  %v1209_v45 = vunpack.i.l.bf16 %v1208_v56 }
 0x45d   : > { %v927_v49 = vsel %vm346_vm0, %v1596_v60, %v1210_v44  ;;  %v926_v50 = vsel %vm346_vm0, %v1590_v58, %v1209_v45 }
 0x465   : > { %v734_v15 = vpop.f32.mrf.mxu3 }
 0x46d   : > { %v736_v18 = vpop.f32.mrf.mxu3 }
 0x46e   : > { %v1211_v20 = vpack.i.bf16 %v736_v18, %v734_v15 }
 0x470   : > { %1212 = vrot.lane.b32.xlu2 %v1211_v20, %s1340_s24 }
 0x475   : > { %v739_v21 = vpop.f32.mrf.mxu3 }
 0x479   : > { %v866_v16 = vpop.f32.mrf.mxu2 }
 0x47d   : > { %v741_v9 = vpop.f32.mrf.mxu3 }
 0x47e   : > { %v1216_v19 = vpack.i.bf16 %v741_v9, %v739_v21 }
 0x480   : > { %1217 = vrot.lane.b32.xlu0 %v1216_v19, %s1340_s24 }
 0x481   : > { %v868_v22 = vpop.f32.mrf.mxu2 }
 0x482   : > { %v1221_v23 = vpack.i.bf16 %v868_v22, %v866_v16 }
 0x488   : > { %1222 = vrot.lane.b32.xlu0 %v1221_v23, %s1341_s25 }
 0x4a8   : > { %v871_v24 = vpop.f32.mrf.mxu2 }
 0x4b0   : > { %v873_v30 = vpop.f32.mrf.mxu2 }
 0x4b1   : > { %v1226_v25 = vpack.i.bf16 %v873_v30, %v871_v24 }
 0x4b3   : > { %1227 = vrot.lane.b32.xlu2 %v1226_v25, %s1341_s25 }
 0x4ca   : > { %v1213_v29 = vpop.permute.xlu2 %1212 }
 0x4cb   : > { %v1215_v33 = vunpack.i.h.bf16 %v1213_v29  ;;  %v1214_v35 = vunpack.i.l.bf16 %v1213_v29 }
 0x4cd   : > { %v929_v41 = vsel %vm928_vm2, %v924_v38, %v1214_v35  ;;  %v930_v6 = vsel %vm928_vm2, %v925_v2, %v1215_v33 }
 0x4f2   : > { %v1218_v27 = vpop.permute.xlu0 %1217 }
 0x4f3   : > { %v1220_v46 = vunpack.i.h.bf16 %v1218_v27  ;;  %v1219_v47 = vunpack.i.l.bf16 %v1218_v27 }
 0x4f5   : > { %v932_v51 = vsel %vm928_vm2, %v927_v49, %v1220_v46  ;;  %v931_v40 = vsel %vm928_vm2, %v926_v50, %v1219_v47 }
 0x4fa   : > { %v1223_v36 = vpop.permute.xlu0 %1222 }
 0x4fb   : > { %v1225_v39 = vunpack.i.h.bf16 %v1223_v36  ;;  %v1224_v17 = vunpack.i.l.bf16 %v1223_v36 }
 0x4fd   : > { %v934_v42 = vsel %vm933_vm3, %v929_v41, %v1224_v17  ;;  %v935_v43 = vsel %vm933_vm3, %v930_v6, %v1225_v39 }
 0x4fe   : > { %v938_v57 = vpack.c.bf16 %v934_v42, %v934_v42  ;;  %v939_v54 = vpack.c.bf16 %v935_v43, %v935_v43 }
 0x500   : > { %943 = vst.msk [vmem:[%s289_s28] sm:$0xf] %vm942_vm4, %v938_v57 }
 0x501   : > { %944 = vst.msk [vmem:[%s289_s28 + $0x4] sm:$0xf] %vm942_vm4, %v939_v54 }
 0x50d   : > { %v1228_v48 = vpop.permute.xlu2 %1227 }
 0x50e   : > { %v1230_v34 = vunpack.i.h.bf16 %v1228_v48  ;;  %v1229_v37 = vunpack.i.l.bf16 %v1228_v48 }
 0x510   : > { %v936_v52 = vsel %vm933_vm3, %v931_v40, %v1229_v37  ;;  %v937_v12 = vsel %vm933_vm3, %v932_v51, %v1230_v34 }
 0x511   : > { %v940_v53 = vpack.c.bf16 %v936_v52, %v936_v52  ;;  %v941_v55 = vpack.c.bf16 %v937_v12, %v937_v12 }
 0x513   : > { %945 = vst.msk [vmem:[%s289_s28 + $0x8] sm:$0xf] %vm942_vm4, %v940_v53 }
 0x514   : > { %946 = vst.msk [vmem:[%s289_s28 + $0xc] sm:$0xf] %vm942_vm4, %v941_v55 }
 0x515 PF: > { %s14_s19 = sadd.s32 1, %s1334_s19   ;;  %s1738_s15 = smov %s1326_s17 }
 0x516   : > { %p11_p7 = scmp.ge.s32.totalorder %s14_s19, 6   ;;  %s1739_s16 = smov %s1330_s18 }
 0x517   : > { %s1740_s17 = smov %s1743_s20  ;;  %s1741_s18 = smov %s1747_s21 }
 0x518   :  { %13 = sbr.rel (!%p11_p7) target bundleno = 3 (0x3), region = 75 }

// kernel: detr_forward.30
= control target key start
LH: loop header
LB: loop body
LE: loop exit
PB: predicated region body
PF: predicated region fallthrough
CT: control target
= control target key end

     0   :  { %s914_s24 = smov 0   ;;  %s1098_s0 = inlined_call_operand.vmem [shape: bf16[128,32], index: 0, kind: input, shape index: {}]   ;;  %s1099_s1 = inlined_call_operand.vmem [shape: bf16[32,64], index: 1, kind: input, shape index: {}]   ;;  %s1100_s2 = inlined_call_operand.vmem [shape: f32[1,64], index: 2, kind: input, shape index: {}]   ;;  %s1101_s3 = inlined_call_operand.vmem [shape: bf16[64,32], index: 3, kind: input, shape index: {}]   ;;  %s1102_s4 = inlined_call_operand.vmem [shape: f32[1,32], index: 4, kind: input, shape index: {}]   ;;  %s1103_s5 = inlined_call_operand.vmem [shape: f32[1,32], index: 5, kind: input, shape index: {}]   ;;  %s1104_s6 = inlined_call_operand.vmem [shape: f32[1,32], index: 6, kind: input, shape index: {}]   ;;  %s1105_s7 = inlined_call_operand.vmem [shape: bf16[128,32], index: 7, kind: output, shape index: {}]  }
   0x1 LB: > { %s759_s25 = sadd.s32 4294967295, %s871_s24   ;;  %p763_p0 = scmp.ge.s32.totalorder %s871_s24, 1  ;;  %s871_s24 = sphi %s914_s24, %s17_s24  }
   0x2   : > { %p238_p1 = scmp.lt.s32.totalorder %s871_s24, 3 }
   0x4   : > { %p239_p2 = pnand %p763_p0, %p238_p1 }
   0x5   : > { %s764_s28 = sshll.u32 (!%p239_p2), %s759_s25, 3 }
   0x6   : > { %242 = sbr.rel (%p239_p2) target bundleno = 612 (0x264), region = 48  ;;  %p271_p3 = scmp.lt.s32.totalorder (!%p239_p2), %s764_s28, 15 }
   0xb   : > { %v823_v0 = vld [vmem:[%s1099_s1 + $0x8] sm:$0xff]  ;;  %v822_v1 = vld [vmem:[%s1099_s1] sm:$0xff]  ;;  %s1107_s28 = smov (!%p271_p3, %s764_s28), 15  ;;  %vm331_vm0 = vcmask 261120   ;;  %v827_v6 = vld [vmem:[%s1101_s3 + $0x18] sm:$0xff]  ;;  %vm421_vm1 = vcmask 523264  }
   0xc   : > { %350 = vmatpush.bf16.msra.mxu0 %v823_v0  ;;  %828 = vmatpush.bf16.msra.mxu3 %v823_v0  ;;  %s765_s8 = sshll.u32 %s1107_s28, 2  ;;  %v826_v7 = vld [vmem:[%s1101_s3 + $0x10] sm:$0xff]  ;;  %v825_v8 = vld [vmem:[%s1101_s3 + $0x8] sm:$0xff]  ;;  %v824_v9 = vld [vmem:[%s1101_s3] sm:$0xff]  ;;  %vm694_vm7 = vcmask 257024  }
   0xd   : > { %s936_s11 = scalar_lea.vmem %s1098_s0, %s765_s8  ;;  %438 = vmatpush.bf16.msra.mxu1 %v827_v6  ;;  %830 = vmatpush.bf16.msra.mxu2 %v827_v6  ;;  %v843_v11 = vld [vmem:[%s1100_s2] ss:$0 sm:$0xff]  ;;  %s1052_s10 = scalar_lea.vmem %s1105_s7, %s765_s8 }
   0xe   : > { %v818_v2 = vld [vmem:[%s936_s11] sm:$0xff]  ;;  %v819_v3 = vld [vmem:[%s936_s11 + $0x8] sm:$0xff]  ;;  %v820_v4 = vld [vmem:[%s936_s11 + $0x10] sm:$0xff] }
   0xf   : > { %v821_v5 = vld [vmem:[%s936_s11 + $0x18] sm:$0xff]  ;;  %v283_v39 = vld [vmem:[%s936_s11] sm:$0xff]   ;;  %v285_v50 = vld [vmem:[%s936_s11 + $0x8] sm:$0xff]  }
  0x10   : > { %351 = vmatpush.bf16.msra.mxu0 %v822_v1  ;;  %829 = vmatpush.bf16.msra.mxu3 %v822_v1  ;;  %v844_v40 = vld [vmem:[%s1102_s4] ss:$0 sm:$0xff]  ;;  %v463_v41 = vunpack.c.l.bf16 %v283_v39  ;;  %v464_v46 = vunpack.c.h.bf16 %v283_v39  ;;  %v465_v52 = vunpack.c.l.bf16 %v285_v50  ;;  %v466_v57 = vunpack.c.h.bf16 %v285_v50  ;;  %v287_v59 = vld [vmem:[%s936_s11 + $0x10] sm:$0xff]  }
  0x11   : > { %439 = vmatpush.bf16.msra.mxu1 %v826_v7  ;;  %831 = vmatpush.bf16.msra.mxu2 %v826_v7  ;;  %v467_v62 = vunpack.c.l.bf16 %v287_v59 }
  0x13   : > { %792 = vmatmul.msk.bf16.vlgmr.msra.gmra.mxu0 %vm331_vm0, %v818_v2  ;;  %793 = vmatmul.msk.bf16.vlgmr.msra.gmra.mxu3 %vm331_vm0, %v819_v3 }
  0x15   : > { %440 = vmatpush.bf16.msra.mxu1 %v825_v8  ;;  %832 = vmatpush.bf16.msra.mxu2 %v825_v8  ;;  %v289_v8 = vld [vmem:[%s936_s11 + $0x18] sm:$0xff]  }
  0x19   : > { %441 = vmatpush.bf16.msra.mxu1 %v824_v9  ;;  %833 = vmatpush.bf16.msra.mxu2 %v824_v9 }
  0x23   : > { %794 = vmatmul.msk.bf16.gmra.mxu3 %vm331_vm0, %v820_v4  ;;  %v468_v4 = vunpack.c.h.bf16 %v287_v59 }
  0x33   : > { %795 = vmatmul.msk.bf16.gmra.mxu3 %vm331_vm0, %v821_v5 }
  0x90   : > { %v353_v10 = vpop.f32.mrf.mxu0 }
  0x91   : > { %v354_v12 = vadd.f32 %v843_v11, %v353_v10  ;;  %v469_v10 = vunpack.c.l.bf16 %v289_v8 }
  0x93   : > { %v373_v15 = vmax.f32 %v354_v12, 0.0 }
  0x96   : > { %v358_v13 = vpop.f32.mrf.mxu3 }
  0x97   : > { %v359_v22 = vadd.f32 %v843_v11, %v358_v13 }
  0x98   : > { %v355_v14 = vpop.f32.mrf.mxu0 }
  0x99   : > { %v356_v16 = vadd.f32 %v843_v11, %v355_v14  ;;  %v375_v24 = vmax.f32 %v359_v22, 0.0 }
  0x9b   : > { %v374_v17 = vmax.f32 %v356_v16, 0.0 }
  0x9d   : > { %v381_v18 = vpack.c.bf16 %v374_v17, %v373_v15  ;;  %v470_v15 = vunpack.c.h.bf16 %v289_v8 }
  0x9e   : > { %v360_v19 = vpop.f32.mrf.mxu3 }
  0x9f   : > { %812 = vmatmul.msk.bf16.vlgmr.msra.gmra.mxu1 %vm421_vm1, %v381_v18  ;;  %v361_v20 = vadd.f32 %v843_v11, %v360_v19 }
  0xa1   : > { %v376_v23 = vmax.f32 %v361_v20, 0.0  ;;  %v873_v20 = vmov 32.0  }
  0xa2   : > { %847 = vrcp.f32 %v873_v20  ;;  %v1036_v20 = vld [vmem:[%s1103_s5] ss:$0 sm:$0xff] }
  0xa3   : > { %v382_v25 = vpack.c.bf16 %v376_v23, %v375_v24 }
  0xa6   : > { %v363_v21 = vpop.f32.mrf.mxu3 }
  0xa7   : > { %v364_v26 = vadd.f32 %v843_v11, %v363_v21 }
  0xa8   : > { %v848_v21 = vpop.eup %847 }
  0xa9   : > { %v377_v29 = vmax.f32 %v364_v26, 0.0  ;;  %v506_v22 = vmul.f32 32.0, %v848_v21  ;;  %vm510_vm2 = vweird.f32 %v848_v21 }
  0xab   : > { %v507_v23 = vsub.f32 1.0, %v506_v22 }
  0xad   : > { %v508_v24 = vmul.f32 %v848_v21, %v507_v23  ;;  %v1041_v23 = vld [vmem:[%s1104_s6] ss:$0 sm:$0xff] }
  0xae   : > { %v365_v27 = vpop.f32.mrf.mxu3 }
  0xaf   : > { %v366_v28 = vadd.f32 %v843_v11, %v365_v27  ;;  %813 = vmatmul.msk.bf16.gmra.mxu1 %vm421_vm1, %v382_v25  ;;  %v509_v25 = vadd.f32 %v848_v21, %v508_v24 }
  0xb1   : > { %v378_v30 = vmax.f32 %v366_v28, 0.0  ;;  %v980_v26 = vsel %vm510_vm2, %v848_v21, %v509_v25 }
  0xb3   : > { %v383_v31 = vpack.c.bf16 %v378_v30, %v377_v29 }
  0xb5   : > { %814 = vmatmul.msk.bf16.vlgmr.msra.gmra.mxu2 %vm421_vm1, %v383_v31 }
  0xb6   : > { %v368_v32 = vpop.f32.mrf.mxu3 }
  0xb7   : > { %v369_v33 = vadd.f32 %v843_v11, %v368_v32 }
  0xb9   : > { %v379_v36 = vmax.f32 %v369_v33, 0.0 }
  0xbe   : > { %v370_v34 = vpop.f32.mrf.mxu3 }
  0xbf   : > { %v371_v35 = vadd.f32 %v843_v11, %v370_v34 }
  0xc1   : > { %v380_v37 = vmax.f32 %v371_v35, 0.0 }
  0xc3   : > { %v384_v38 = vpack.c.bf16 %v380_v37, %v379_v36 }
  0xc5   : > { %815 = vmatmul.msk.bf16.gmra.mxu2 %vm421_vm1, %v384_v38 }
 0x11c   : > { %v443_v42 = vpop.f32.mrf.mxu1 }
 0x11d   : > { %v444_v43 = vadd.f32 %v844_v40, %v443_v42 }
 0x11f   : > { %v471_v44 = vadd.f32 %v463_v41, %v444_v43 }
 0x121   : > { %v481_v45 = vsel %vm331_vm0, %v471_v44, 0.0 }
 0x122   : > { %482 = vadd.xlane.f32.xlu0 %v481_v45 }
 0x124   : > { %v445_v47 = vpop.f32.mrf.mxu1 }
 0x125   : > { %v446_v48 = vadd.f32 %v844_v40, %v445_v47 }
 0x127   : > { %v472_v49 = vadd.f32 %v464_v46, %v446_v48 }
 0x129   : > { %v484_v51 = vsel %vm331_vm0, %v472_v49, 0.0 }
 0x12a   : > { %485 = vadd.xlane.f32.xlu0 %v484_v51 }
 0x12c   : > { %v448_v53 = vpop.f32.mrf.mxu1 }
 0x12d   : > { %v449_v54 = vadd.f32 %v844_v40, %v448_v53 }
 0x12f   : > { %v473_v55 = vadd.f32 %v465_v52, %v449_v54 }
 0x131   : > { %v487_v56 = vsel %vm331_vm0, %v473_v55, 0.0 }
 0x132   : > { %488 = vadd.xlane.f32.xlu1 %v487_v56 }
 0x134   : > { %v450_v58 = vpop.f32.mrf.mxu1 }
 0x135   : > { %v451_v60 = vadd.f32 %v844_v40, %v450_v58 }
 0x137   : > { %v474_v61 = vadd.f32 %v466_v57, %v451_v60 }
 0x138   : > { %v453_v63 = vpop.f32.mrf.mxu2 }
 0x139   : > { %v454_v0 = vadd.f32 %v844_v40, %v453_v63  ;;  %v490_v1 = vsel %vm331_vm0, %v474_v61, 0.0 }
 0x13a   : > { %491 = vadd.xlane.f32.xlu1 %v490_v1 }
 0x13b   : > { %v475_v2 = vadd.f32 %v467_v62, %v454_v0 }
 0x13d   : > { %v493_v3 = vsel %vm331_vm0, %v475_v2, 0.0 }
 0x13e   : > { %494 = vadd.xlane.f32.xlu2 %v493_v3 }
 0x140   : > { %v455_v5 = vpop.f32.mrf.mxu2 }
 0x141   : > { %v456_v6 = vadd.f32 %v844_v40, %v455_v5 }
 0x143   : > { %v476_v7 = vadd.f32 %v468_v4, %v456_v6 }
 0x145   : > { %v496_v9 = vsel %vm331_vm0, %v476_v7, 0.0 }
 0x146   : > { %497 = vadd.xlane.f32.xlu2 %v496_v9 }
 0x148   : > { %v458_v11 = vpop.f32.mrf.mxu2 }
 0x149   : > { %v459_v12 = vadd.f32 %v844_v40, %v458_v11 }
 0x14b   : > { %v477_v13 = vadd.f32 %v469_v10, %v459_v12 }
 0x14d   : > { %v499_v14 = vsel %vm331_vm0, %v477_v13, 0.0 }
 0x14e   : > { %500 = vadd.xlane.f32.xlu0 %v499_v14 }
 0x150   : > { %v460_v16 = vpop.f32.mrf.mxu2 }
 0x151   : > { %v461_v17 = vadd.f32 %v844_v40, %v460_v16 }
 0x153   : > { %v478_v18 = vadd.f32 %v470_v15, %v461_v17 }
 0x155   : > { %v502_v19 = vsel %vm331_vm0, %v478_v18, 0.0 }
 0x156   : > { %503 = vadd.xlane.f32.xlu1 %v502_v19 }
 0x195   : > { %v483_v27 = vpop.xlane.xlu0 %482 }
 0x196   : > { %v512_v28 = vmul.f32 %v980_v26, %v483_v27 }
 0x198   : > { %v983_v29 = vsub.f32 %v471_v44, %v512_v28 }
 0x19a   : > { %v528_v30 = vmul.f32 %v983_v29, %v983_v29 }
 0x19c   : > { %v536_v31 = vsel %vm331_vm0, %v528_v30, 0.0 }
 0x19d   : > { %537 = vadd.xlane.f32.xlu2 %v536_v31  ;;  %v486_v32 = vpop.xlane.xlu0 %485 }
 0x19e   : > { %v513_v33 = vmul.f32 %v980_v26, %v486_v32 }
 0x1a0   : > { %v989_v34 = vsub.f32 %v472_v49, %v513_v33 }
 0x1a2   : > { %v529_v35 = vmul.f32 %v989_v34, %v989_v34 }
 0x1a4   : > { %v539_v36 = vsel %vm331_vm0, %v529_v35, 0.0 }
 0x1a5   : > { %v489_v37 = vpop.xlane.xlu1 %488  ;;  %540 = vadd.xlane.f32.xlu0 %v539_v36 }
 0x1a6   : > { %v514_v38 = vmul.f32 %v980_v26, %v489_v37 }
 0x1a8   : > { %v995_v39 = vsub.f32 %v473_v55, %v514_v38 }
 0x1aa   : > { %v530_v40 = vmul.f32 %v995_v39, %v995_v39 }
 0x1ac   : > { %v542_v41 = vsel %vm331_vm0, %v530_v40, 0.0 }
 0x1ad   : > { %543 = vadd.xlane.f32.xlu1 %v542_v41  ;;  %v492_v42 = vpop.xlane.xlu1 %491 }
 0x1ae   : > { %v515_v43 = vmul.f32 %v980_v26, %v492_v42 }
 0x1b0   : > { %v1001_v44 = vsub.f32 %v474_v61, %v515_v43 }
 0x1b1   : > { %v495_v45 = vpop.xlane.xlu2 %494 }
 0x1b2   : > { %v516_v46 = vmul.f32 %v980_v26, %v495_v45  ;;  %v531_v47 = vmul.f32 %v1001_v44, %v1001_v44 }
 0x1b4   : > { %v1006_v48 = vsub.f32 %v475_v2, %v516_v46  ;;  %v545_v49 = vsel %vm331_vm0, %v531_v47, 0.0 }
 0x1b5   : > { %546 = vadd.xlane.f32.xlu2 %v545_v49 }
 0x1b6   : > { %v532_v50 = vmul.f32 %v1006_v48, %v1006_v48 }
 0x1b8   : > { %v548_v51 = vsel %vm331_vm0, %v532_v50, 0.0 }
 0x1b9   : > { %v498_v52 = vpop.xlane.xlu2 %497  ;;  %549 = vadd.xlane.f32.xlu0 %v548_v51 }
 0x1ba   : > { %v517_v53 = vmul.f32 %v980_v26, %v498_v52 }
 0x1bc   : > { %v1013_v54 = vsub.f32 %v476_v7, %v517_v53 }
 0x1be   : > { %v533_v55 = vmul.f32 %v1013_v54, %v1013_v54 }
 0x1c0   : > { %v551_v56 = vsel %vm331_vm0, %v533_v55, 0.0 }
 0x1c1   : > { %552 = vadd.xlane.f32.xlu1 %v551_v56  ;;  %v501_v57 = vpop.xlane.xlu0 %500 }
 0x1c2   : > { %v518_v58 = vmul.f32 %v980_v26, %v501_v57 }
 0x1c4   : > { %v1019_v59 = vsub.f32 %v477_v13, %v518_v58 }
 0x1c6   : > { %v534_v60 = vmul.f32 %v1019_v59, %v1019_v59 }
 0x1c8   : > { %v554_v61 = vsel %vm331_vm0, %v534_v60, 0.0 }
 0x1c9   : > { %v504_v62 = vpop.xlane.xlu1 %503  ;;  %555 = vadd.xlane.f32.xlu2 %v554_v61 }
 0x1ca   : > { %v519_v63 = vmul.f32 %v980_v26, %v504_v62 }
 0x1cc   : > { %v1025_v0 = vsub.f32 %v478_v18, %v519_v63 }
 0x1ce   : > { %v535_v1 = vmul.f32 %v1025_v0, %v1025_v0 }
 0x1d0   : > { %v557_v2 = vsel %vm331_vm0, %v535_v1, 0.0 }
 0x1d1   : > { %558 = vadd.xlane.f32.xlu0 %v557_v2 }
 0x210   : > { %v538_v3 = vpop.xlane.xlu2 %537 }
 0x211   : > { %v560_v4 = vmul.f32 %v538_v3, %v980_v26 }
 0x213   : > { %v568_v5 = vadd.f32 1e-05, %v560_v4 }
 0x215   : > { %849 = vrsqrt.f32 %v568_v5  ;;  %vm582_vm4 = vweird.f32 %v568_v5 }
 0x218   : > { %v541_v6 = vpop.xlane.xlu0 %540 }
 0x219   : > { %v561_v7 = vmul.f32 %v541_v6, %v980_v26 }
 0x21b   : > { %v850_v8 = vpop.eup %849  ;;  %v569_v9 = vadd.f32 1e-05, %v561_v7 }
 0x21c   : > { %v577_v10 = vmul.f32 %v850_v8, %v568_v5  ;;  %vm583_vm3 = vweird.f32 %v850_v8 }
 0x21d   : > { %851 = vrsqrt.f32 %v569_v9  ;;  %vm584_vm5 = vmor %vm582_vm4, %vm583_vm3  ;;  %vm592_vm8 = vweird.f32 %v569_v9 }
 0x21e   : > { %v578_v11 = vmul.f32 %v850_v8, %v577_v10 }
 0x220   : > { %v579_v12 = vmul.f32 0.5, %v578_v11  ;;  %v544_v13 = vpop.xlane.xlu1 %543 }
 0x221   : > { %v562_v14 = vmul.f32 %v544_v13, %v980_v26 }
 0x222   : > { %v580_v15 = vsub.f32 1.5, %v579_v12 }
 0x223   : > { %v852_v16 = vpop.eup %851  ;;  %v570_v17 = vadd.f32 1e-05, %v562_v14 }
 0x224   : > { %v581_v18 = vmul.f32 %v850_v8, %v580_v15  ;;  %v587_v19 = vmul.f32 %v852_v16, %v569_v9  ;;  %vm593_vm6 = vweird.f32 %v852_v16 }
 0x225   : > { %853 = vrsqrt.f32 %v570_v17  ;;  %vm594_vm9 = vmor %vm592_vm8, %vm593_vm6  ;;  %vm602_vm11 = vweird.f32 %v570_v17 }
 0x226   : > { %v585_v21 = vsel %vm584_vm5, %v850_v8, %v581_v18  ;;  %v588_v22 = vmul.f32 %v852_v16, %v587_v19 }
 0x227   : > { %v656_v24 = vmul.f32 %v585_v21, %v983_v29 }
 0x228   : > { %v589_v25 = vmul.f32 0.5, %v588_v22  ;;  %v547_v27 = vpop.xlane.xlu2 %546 }
 0x229   : > { %v667_v28 = vmul.f32 %v1036_v20, %v656_v24  ;;  %v563_v30 = vmul.f32 %v547_v27, %v980_v26 }
 0x22a   : > { %v590_v31 = vsub.f32 1.5, %v589_v25 }
 0x22b   : > { %v854_v32 = vpop.eup %853  ;;  %v678_v33 = vadd.f32 %v1041_v23, %v667_v28  ;;  %v571_v35 = vadd.f32 1e-05, %v563_v30 }
 0x22c   : > { %v591_v29 = vmul.f32 %v852_v16, %v590_v31  ;;  %v597_v36 = vmul.f32 %v854_v32, %v570_v17  ;;  %v550_v37 = vpop.xlane.xlu0 %549  ;;  %vm603_vm10 = vweird.f32 %v854_v32 }
 0x22d   : > { %v686_v38 = vpack.c.bf16 %v678_v33, %v678_v33  ;;  %855 = vrsqrt.f32 %v571_v35  ;;  %v564_v40 = vmul.f32 %v550_v37, %v980_v26  ;;  %vm604_vm12 = vmor %vm602_vm11, %vm603_vm10  ;;  %vm612_vm14 = vweird.f32 %v571_v35 }
 0x22e   : > { %v595_v41 = vsel %vm594_vm9, %v852_v16, %v591_v29  ;;  %v598_v42 = vmul.f32 %v854_v32, %v597_v36 }
 0x22f   : > { %695 = vst.msk [vmem:[%s1052_s10] sm:$0xf] %vm694_vm7, %v686_v38  ;;  %v657_v43 = vmul.f32 %v595_v41, %v989_v34  ;;  %v572_v45 = vadd.f32 1e-05, %v564_v40 }
 0x230   : > { %v599_v46 = vmul.f32 0.5, %v598_v42 }
 0x231   : > { %v668_v47 = vmul.f32 %v1036_v20, %v657_v43  ;;  %857 = vrsqrt.f32 %v572_v45  ;;  %vm622_vm1 = vweird.f32 %v572_v45 }
 0x232   : > { %v600_v49 = vsub.f32 1.5, %v599_v46 }
 0x233   : > { %v856_v50 = vpop.eup %855  ;;  %v679_v51 = vadd.f32 %v1041_v23, %v668_v47 }
 0x234   : > { %v601_v52 = vmul.f32 %v854_v32, %v600_v49  ;;  %v607_v53 = vmul.f32 %v856_v50, %v571_v35  ;;  %v553_v55 = vpop.xlane.xlu1 %552  ;;  %vm613_vm13 = vweird.f32 %v856_v50 }
 0x235   : > { %v687_v56 = vpack.c.bf16 %v679_v51, %v679_v51  ;;  %v565_v57 = vmul.f32 %v553_v55, %v980_v26  ;;  %vm614_vm15 = vmor %vm612_vm14, %vm613_vm13 }
 0x236   : > { %v605_v34 = vsel %vm604_vm12, %v854_v32, %v601_v52  ;;  %v608_v58 = vmul.f32 %v856_v50, %v607_v53 }
 0x237   : > { %v858_v60 = vpop.eup %857  ;;  %696 = vst.msk [vmem:[%s1052_s10 + $0x4] sm:$0xf] %vm694_vm7, %v687_v56  ;;  %v658_v61 = vmul.f32 %v605_v34, %v995_v39  ;;  %v573_v62 = vadd.f32 1e-05, %v565_v57 }
 0x238   : > { %v609_v63 = vmul.f32 0.5, %v608_v58  ;;  %v617_v1 = vmul.f32 %v858_v60, %v572_v45  ;;  %vm623_vm0 = vweird.f32 %v858_v60 }
 0x239   : > { %v669_v2 = vmul.f32 %v1036_v20, %v658_v61  ;;  %859 = vrsqrt.f32 %v573_v62  ;;  %vm624_vm2 = vmor %vm622_vm1, %vm623_vm0  ;;  %vm632_vm4 = vweird.f32 %v573_v62 }
 0x23a   : > { %v610_v3 = vsub.f32 1.5, %v609_v63  ;;  %v618_v4 = vmul.f32 %v858_v60, %v617_v1 }
 0x23b   : > { %v680_v5 = vadd.f32 %v1041_v23, %v669_v2 }
 0x23c   : > { %v611_v6 = vmul.f32 %v856_v50, %v610_v3  ;;  %v619_v7 = vmul.f32 0.5, %v618_v4  ;;  %v556_v8 = vpop.xlane.xlu2 %555 }
 0x23d   : > { %v688_v9 = vpack.c.bf16 %v680_v5, %v680_v5  ;;  %v566_v39 = vmul.f32 %v556_v8, %v980_v26 }
 0x23e   : > { %v615_v10 = vsel %vm614_vm15, %v856_v50, %v611_v6  ;;  %v620_v11 = vsub.f32 1.5, %v619_v7 }
 0x23f   : > { %v860_v12 = vpop.eup %859  ;;  %697 = vst.msk [vmem:[%s1052_s10 + $0x8] sm:$0xf] %vm694_vm7, %v688_v9  ;;  %v659_v13 = vmul.f32 %v615_v10, %v1001_v44  ;;  %v574_v14 = vadd.f32 1e-05, %v566_v39 }
 0x240   : > { %v621_v15 = vmul.f32 %v858_v60, %v620_v11  ;;  %v627_v16 = vmul.f32 %v860_v12, %v573_v62  ;;  %vm633_vm3 = vweird.f32 %v860_v12 }
 0x241   : > { %v670_v17 = vmul.f32 %v1036_v20, %v659_v13  ;;  %861 = vrsqrt.f32 %v574_v14  ;;  %vm634_vm5 = vmor %vm632_vm4, %vm633_vm3  ;;  %vm642_vm8 = vweird.f32 %v574_v14 }
 0x242   : > { %v625_v18 = vsel %vm624_vm2, %v858_v60, %v621_v15  ;;  %v628_v19 = vmul.f32 %v860_v12, %v627_v16 }
 0x243   : > { %v681_v21 = vadd.f32 %v1041_v23, %v670_v17  ;;  %v660_v22 = vmul.f32 %v625_v18, %v1006_v48 }
 0x244   : > { %v629_v24 = vmul.f32 0.5, %v628_v19  ;;  %v559_v25 = vpop.xlane.xlu0 %558 }
 0x245   : > { %v689_v27 = vpack.c.bf16 %v681_v21, %v681_v21  ;;  %v671_v44 = vmul.f32 %v1036_v20, %v660_v22  ;;  %v567_v28 = vmul.f32 %v559_v25, %v980_v26 }
 0x246   : > { %v630_v30 = vsub.f32 1.5, %v629_v24 }
 0x247   : > { %v862_v31 = vpop.eup %861  ;;  %698 = vst.msk [vmem:[%s1052_s10 + $0xc] sm:$0xf] %vm694_vm7, %v689_v27  ;;  %v682_v32 = vadd.f32 %v1041_v23, %v671_v44  ;;  %v575_v33 = vadd.f32 1e-05, %v567_v28 }
 0x248   : > { %v631_v35 = vmul.f32 %v860_v12, %v630_v30  ;;  %v637_v29 = vmul.f32 %v862_v31, %v574_v14  ;;  %vm643_vm6 = vweird.f32 %v862_v31 }
 0x249   : > { %v690_v48 = vpack.c.bf16 %v682_v32, %v682_v32  ;;  %863 = vrsqrt.f32 %v575_v33  ;;  %vm644_vm9 = vmor %vm642_vm8, %vm643_vm6  ;;  %vm652_vm11 = vweird.f32 %v575_v33 }
 0x24a   : > { %v635_v36 = vsel %vm634_vm5, %v860_v12, %v631_v35  ;;  %v638_v37 = vmul.f32 %v862_v31, %v637_v29 }
 0x24b   : > { %699 = vst.msk [vmem:[%s1052_s10 + $0x10] sm:$0xf] %vm694_vm7, %v690_v48  ;;  %v661_v26 = vmul.f32 %v635_v36, %v1013_v54 }
 0x24c   : > { %v639_v38 = vmul.f32 0.5, %v638_v37 }
 0x24d   : > { %v672_v40 = vmul.f32 %v1036_v20, %v661_v26 }
 0x24e   : > { %v640_v41 = vsub.f32 1.5, %v639_v38 }
 0x24f   : > { %v864_v42 = vpop.eup %863  ;;  %v683_v43 = vadd.f32 %v1041_v23, %v672_v40 }
 0x250   : > { %v641_v45 = vmul.f32 %v862_v31, %v640_v41  ;;  %v647_v46 = vmul.f32 %v864_v42, %v575_v33  ;;  %vm653_vm10 = vweird.f32 %v864_v42 }
 0x251   : > { %v691_v47 = vpack.c.bf16 %v683_v43, %v683_v43  ;;  %vm654_vm12 = vmor %vm652_vm11, %vm653_vm10 }
 0x252   : > { %v645_v49 = vsel %vm644_vm9, %v862_v31, %v641_v45  ;;  %v648_v50 = vmul.f32 %v864_v42, %v647_v46 }
 0x253   : > { %700 = vst.msk [vmem:[%s1052_s10 + $0x14] sm:$0xf] %vm694_vm7, %v691_v47  ;;  %v662_v54 = vmul.f32 %v645_v49, %v1019_v59 }
 0x254   : > { %v649_v51 = vmul.f32 0.5, %v648_v50 }
 0x255   : > { %v673_v52 = vmul.f32 %v1036_v20, %v662_v54 }
 0x256   : > { %v650_v53 = vsub.f32 1.5, %v649_v51 }
 0x257   : > { %v684_v55 = vadd.f32 %v1041_v23, %v673_v52 }
 0x258   : > { %v651_v56 = vmul.f32 %v864_v42, %v650_v53 }
 0x259   : > { %v692_v57 = vpack.c.bf16 %v684_v55, %v684_v55 }
 0x25a   : > { %v655_v34 = vsel %vm654_vm12, %v864_v42, %v651_v56 }
 0x25b   : > { %701 = vst.msk [vmem:[%s1052_s10 + $0x18] sm:$0xf] %vm694_vm7, %v692_v57  ;;  %v663_v58 = vmul.f32 %v655_v34, %v1025_v0 }
 0x25d   : > { %v674_v60 = vmul.f32 %v1036_v20, %v663_v58 }
 0x25f   : > { %v685_v59 = vadd.f32 %v1041_v23, %v674_v60 }
 0x261   : > { %v693_v61 = vpack.c.bf16 %v685_v59, %v685_v59 }
 0x263   : > { %702 = vst.msk [vmem:[%s1052_s10 + $0x1c] sm:$0xf] %vm694_vm7, %v693_v61 }
 0x264 PF: > { %s17_s24 = sadd.s32 1, %s871_s24  }
 0x265   : > { %p14_p4 = scmp.ge.s32.totalorder %s17_s24, 4  }
 0x267   :  { %16 = sbr.rel (!%p14_p4) target bundleno = 1 (0x1), region = 78 }

// kernel: detr_forward.47
= control target key start
LH: loop header
LB: loop body
LE: loop exit
PB: predicated region body
PF: predicated region fallthrough
CT: control target
= control target key end

     0   :  { %13 = vsyncpa [#allocation3], 0  ;;  %s860_s24 = smov 0   ;;  %s977_s0 = inlined_call_operand.vmem [shape: bf16[128,32], index: 0, kind: input, shape index: {}]   ;;  %s978_s1 = inlined_call_operand.vmem [shape: bf16[128,32], index: 1, kind: input, shape index: {}]   ;;  %s979_s2 = inlined_call_operand.vmem [shape: bf16[32,32], index: 2, kind: input, shape index: {}]   ;;  %s980_s3 = inlined_call_operand.vmem [shape: f32[1,32], index: 3, kind: input, shape index: {}]   ;;  %s981_s4 = inlined_call_operand.vmem [shape: bf16[32,32], index: 4, kind: input, shape index: {}]   ;;  %s982_s5 = inlined_call_operand.hbm [shape: f32[1,32], index: 5, kind: input, shape index: {}]   ;;  %s983_s6 = inlined_call_operand.vmem [shape: bf16[128,32], index: 6, kind: output, shape index: {0}]   ;;  %s984_s7 = inlined_call_operand.vmem [shape: bf16[128,32], index: 7, kind: output, shape index: {1}]  }
   0x1 LB: > { %s668_s25 = sadd.s32 4294967295, %s817_s24   ;;  %p670_p0 = scmp.ge.s32.totalorder %s817_s24, 1  ;;  %s817_s24 = sphi %s860_s24, %s19_s24  }
   0x2   : > { %p212_p1 = scmp.lt.s32.totalorder %s817_s24, 3  ;;  %s233_s28 = sshll.u32 %s982_s5, 4  ;;  %s234_s28 = int_to_ptr.hbm [resolvable:$true] %s233_s28 }
   0x3   : > { %p764_p3 = scmp.eq.s32.totalorder %s668_s25, 0  ;;  %s819_s29 = smov [#allocation2]  }
   0x4   : > { %p213_p2 = pnand %p670_p0, %p212_p1  ;;  %s235_s30 = sshll.u32 %s819_s29, 4  ;;  %s236_s30 = int_to_ptr.vmem [resolvable:$true] %s235_s30 }
   0x6   : > { %p760_p4 = pneg %p213_p2  ;;  %266 = sbr.rel (%p213_p2) target bundleno = 187 (0xbb), region = 44 }
   0x8   : > { %p761_p5 = pnand %p764_p3, %p760_p4 }
   0xa   : > { %763 = dma.hbm_to_vmem [thread:$0]  (!%p761_p5), %s234_s28, 16, %s236_s30, [#allocation3]  }
   0xb   : > { %812 = dma.done.wait (%p764_p3), [#allocation3], 16  }
   0xc   : > { %814 = vsyncadd (%p764_p3), [#allocation3], 4294967280  ;;  %s675_s8 = sshll.u32 %s668_s25, 3  ;;  %v730_v0 = vld [vmem:[%s979_s2 + $0x8] sm:$0xff]  ;;  %v729_v4 = vld [vmem:[%s979_s2] sm:$0xff]  ;;  %vm398_vm0 = vcmask 261120  }
   0xd   : > { %p310_p6 = scmp.lt.s32.totalorder %s675_s8, 15  ;;  %v732_v1 = vld [vmem:[%s981_s4 + $0x8] sm:$0xff]  ;;  %417 = vmatpush.bf16.msra.mxu0 %v730_v0  ;;  %752 = vmatpush.bf16.msra.mxu2 %v730_v0  ;;  %v731_v11 = vld [vmem:[%s981_s4] sm:$0xff]  ;;  %vm448_vm1 = vcmask 257024  }
   0xe   : > { %515 = vmatpush.bf16.msra.mxu1 %v732_v1  ;;  %754 = vmatpush.bf16.msra.mxu3 %v732_v1  ;;  %v775_v44 = vld [vmem:[%s980_s3] ss:$0 sm:$0xff] }
   0xf   : > { %s986_s8 = smov (!%p310_p6, %s675_s8), 15  ;;  %v920_v45 = vld [vmem:[#allocation2] ss:$0 sm:$0xff] }
  0x10   : > { %s871_s9 = sshll.u32 %s986_s8, 2 }
  0x11   : > { %s877_s12 = scalar_lea.vmem %s977_s0, %s871_s9  ;;  %s883_s15 = scalar_lea.vmem %s978_s1, %s871_s9  ;;  %418 = vmatpush.bf16.msra.mxu0 %v729_v4  ;;  %753 = vmatpush.bf16.msra.mxu2 %v729_v4 }
  0x12   : > { %v334_v2 = vld [vmem:[%s877_s12] sm:$0xff]   ;;  %v338_v9 = vld [vmem:[%s877_s12 + $0x10] sm:$0xff]   ;;  %516 = vmatpush.bf16.msra.mxu1 %v731_v11  ;;  %755 = vmatpush.bf16.msra.mxu3 %v731_v11  ;;  %v336_v24 = vld [vmem:[%s877_s12 + $0x8] sm:$0xff]   ;;  %s926_s29 = scalar_lea.vmem %s983_s6, %s871_s9  ;;  %s933_s10 = scalar_lea.vmem %s984_s7, %s871_s9 }
  0x13   : > { %v734_v3 = vld [vmem:[%s883_s15] sm:$0xff]   ;;  %v342_v5 = vunpack.c.l.bf16 %v334_v2  ;;  %v343_v6 = vunpack.c.h.bf16 %v334_v2  ;;  %v750_v10 = vld [vmem:[%s883_s15 + $0x10] sm:$0xff]   ;;  %v346_v12 = vunpack.c.l.bf16 %v338_v9  ;;  %v347_v13 = vunpack.c.h.bf16 %v338_v9  ;;  %v749_v25 = vld [vmem:[%s883_s15 + $0x8] sm:$0xff]  }
  0x14   : > { %v735_v7 = vunpack.c.l.bf16 %v734_v3  ;;  %v736_v8 = vunpack.c.h.bf16 %v734_v3  ;;  %v743_v14 = vunpack.c.l.bf16 %v750_v10  ;;  %v744_v15 = vunpack.c.h.bf16 %v750_v10  ;;  %v725_v21 = vld [vmem:[%s877_s12] sm:$0xff]  ;;  %v727_v22 = vld [vmem:[%s877_s12 + $0x10] sm:$0xff]  ;;  %v340_v26 = vld [vmem:[%s877_s12 + $0x18] sm:$0xff]  }
  0x15   : > { %719 = vmatmul.msk.bf16.vlgmr.msra.gmra.mxu1 %vm398_vm0, %v725_v21  ;;  %721 = vmatmul.msk.bf16.vlgmr.msra.gmra.mxu3 %vm398_vm0, %v727_v22  ;;  %v751_v27 = vld [vmem:[%s883_s15 + $0x18] sm:$0xff]   ;;  %v344_v28 = vunpack.c.l.bf16 %v336_v24  ;;  %v345_v29 = vunpack.c.h.bf16 %v336_v24  ;;  %v739_v30 = vunpack.c.l.bf16 %v749_v25  ;;  %v740_v31 = vunpack.c.h.bf16 %v749_v25  ;;  %v726_v42 = vld [vmem:[%s877_s12 + $0x8] sm:$0xff] }
  0x16   : > { %v366_v16 = vadd.f32 %v735_v7, %v342_v5  ;;  %v367_v17 = vadd.f32 %v736_v8, %v343_v6  ;;  %v370_v18 = vadd.f32 %v743_v14, %v346_v12  ;;  %v371_v19 = vadd.f32 %v744_v15, %v347_v13  ;;  %v728_v43 = vld [vmem:[%s877_s12 + $0x18] sm:$0xff] }
  0x17   : > { %v348_v32 = vunpack.c.l.bf16 %v340_v26  ;;  %v349_v33 = vunpack.c.h.bf16 %v340_v26  ;;  %v747_v34 = vunpack.c.l.bf16 %v751_v27  ;;  %v748_v35 = vunpack.c.h.bf16 %v751_v27 }
  0x18   : > { %v374_v20 = vpack.c.bf16 %v367_v17, %v366_v16  ;;  %v376_v23 = vpack.c.bf16 %v371_v19, %v370_v18  ;;  %v368_v36 = vadd.f32 %v739_v30, %v344_v28  ;;  %v369_v37 = vadd.f32 %v740_v31, %v345_v29 }
  0x19   : > { %v372_v38 = vadd.f32 %v747_v34, %v348_v32  ;;  %v373_v39 = vadd.f32 %v748_v35, %v349_v33 }
  0x1a   : > { %691 = vmatmul.msk.bf16.vlgmr.msra.gmra.mxu0 %vm398_vm0, %v374_v20  ;;  %693 = vmatmul.msk.bf16.vlgmr.msra.gmra.mxu2 %vm398_vm0, %v376_v23  ;;  %v375_v40 = vpack.c.bf16 %v369_v37, %v368_v36 }
  0x1b   : > { %v377_v41 = vpack.c.bf16 %v373_v39, %v372_v38 }
  0x25   : > { %720 = vmatmul.msk.bf16.gmra.mxu1 %vm398_vm0, %v726_v42  ;;  %722 = vmatmul.msk.bf16.gmra.mxu3 %vm398_vm0, %v728_v43 }
  0x2a   : > { %692 = vmatmul.msk.bf16.gmra.mxu0 %vm398_vm0, %v375_v40  ;;  %694 = vmatmul.msk.bf16.gmra.mxu2 %vm398_vm0, %v377_v41 }
  0x92   : > { %v518_v48 = vpop.f32.mrf.mxu1 }
  0x93   : > { %v519_v49 = vadd.f32 %v920_v45, %v518_v48 }
  0x95   : > { %v538_v51 = vpack.c.bf16 %v519_v49, %v519_v49 }
  0x97   : > { %v420_v46 = vpop.f32.mrf.mxu0  ;;  %546 = vst.msk [vmem:[%s933_s10] sm:$0xf] %vm448_vm1, %v538_v51 }
  0x98   : > { %v421_v47 = vadd.f32 %v775_v44, %v420_v46  ;;  %v528_v54 = vpop.f32.mrf.mxu3 }
  0x99   : > { %v529_v55 = vadd.f32 %v920_v45, %v528_v54 }
  0x9a   : > { %v440_v50 = vpack.c.bf16 %v421_v47, %v421_v47  ;;  %v520_v59 = vpop.f32.mrf.mxu1 }
  0x9b   : > { %v542_v60 = vpack.c.bf16 %v529_v55, %v529_v55  ;;  %v521_v61 = vadd.f32 %v920_v45, %v520_v59 }
  0x9c   : > { %449 = vst.msk [vmem:[%s926_s29] sm:$0xf] %vm448_vm1, %v440_v50 }
  0x9d   : > { %v430_v52 = vpop.f32.mrf.mxu2  ;;  %550 = vst.msk [vmem:[%s933_s10 + $0x10] sm:$0xf] %vm448_vm1, %v542_v60  ;;  %v539_v63 = vpack.c.bf16 %v521_v61, %v521_v61 }
  0x9e   : > { %v431_v53 = vadd.f32 %v775_v44, %v430_v52 }
  0x9f   : > { %v422_v56 = vpop.f32.mrf.mxu0  ;;  %547 = vst.msk [vmem:[%s933_s10 + $0x4] sm:$0xf] %vm448_vm1, %v539_v63 }
  0xa0   : > { %v444_v57 = vpack.c.bf16 %v431_v53, %v431_v53  ;;  %v423_v58 = vadd.f32 %v775_v44, %v422_v56  ;;  %v530_v2 = vpop.f32.mrf.mxu3 }
  0xa1   : > { %v531_v3 = vadd.f32 %v920_v45, %v530_v2 }
  0xa2   : > { %453 = vst.msk [vmem:[%s926_s29 + $0x10] sm:$0xf] %vm448_vm1, %v444_v57  ;;  %v441_v62 = vpack.c.bf16 %v423_v58, %v423_v58  ;;  %v523_v7 = vpop.f32.mrf.mxu1 }
  0xa3   : > { %v543_v8 = vpack.c.bf16 %v531_v3, %v531_v3  ;;  %v524_v9 = vadd.f32 %v920_v45, %v523_v7 }
  0xa4   : > { %450 = vst.msk [vmem:[%s926_s29 + $0x4] sm:$0xf] %vm448_vm1, %v441_v62 }
  0xa5   : > { %v432_v0 = vpop.f32.mrf.mxu2  ;;  %551 = vst.msk [vmem:[%s933_s10 + $0x14] sm:$0xf] %vm448_vm1, %v543_v8  ;;  %v540_v11 = vpack.c.bf16 %v524_v9, %v524_v9 }
  0xa6   : > { %v433_v1 = vadd.f32 %v775_v44, %v432_v0 }
  0xa7   : > { %v425_v4 = vpop.f32.mrf.mxu0  ;;  %548 = vst.msk [vmem:[%s933_s10 + $0x8] sm:$0xf] %vm448_vm1, %v540_v11 }
  0xa8   : > { %v445_v5 = vpack.c.bf16 %v433_v1, %v433_v1  ;;  %v426_v6 = vadd.f32 %v775_v44, %v425_v4  ;;  %v533_v14 = vpop.f32.mrf.mxu3 }
  0xa9   : > { %v534_v15 = vadd.f32 %v920_v45, %v533_v14 }
  0xaa   : > { %454 = vst.msk [vmem:[%s926_s29 + $0x14] sm:$0xf] %vm448_vm1, %v445_v5  ;;  %v442_v10 = vpack.c.bf16 %v426_v6, %v426_v6  ;;  %v525_v19 = vpop.f32.mrf.mxu1 }
  0xab   : > { %v544_v20 = vpack.c.bf16 %v534_v15, %v534_v15  ;;  %v526_v21 = vadd.f32 %v920_v45, %v525_v19 }
  0xac   : > { %451 = vst.msk [vmem:[%s926_s29 + $0x8] sm:$0xf] %vm448_vm1, %v442_v10 }
  0xad   : > { %v435_v12 = vpop.f32.mrf.mxu2  ;;  %552 = vst.msk [vmem:[%s933_s10 + $0x18] sm:$0xf] %vm448_vm1, %v544_v20  ;;  %v541_v23 = vpack.c.bf16 %v526_v21, %v526_v21 }
  0xae   : > { %v436_v13 = vadd.f32 %v775_v44, %v435_v12 }
  0xaf   : > { %v427_v16 = vpop.f32.mrf.mxu0  ;;  %549 = vst.msk [vmem:[%s933_s10 + $0xc] sm:$0xf] %vm448_vm1, %v541_v23 }
  0xb0   : > { %v446_v17 = vpack.c.bf16 %v436_v13, %v436_v13  ;;  %v428_v18 = vadd.f32 %v775_v44, %v427_v16  ;;  %v535_v26 = vpop.f32.mrf.mxu3 }
  0xb1   : > { %v536_v27 = vadd.f32 %v920_v45, %v535_v26 }
  0xb2   : > { %455 = vst.msk [vmem:[%s926_s29 + $0x18] sm:$0xf] %vm448_vm1, %v446_v17  ;;  %v443_v22 = vpack.c.bf16 %v428_v18, %v428_v18 }
  0xb3   : > { %v545_v29 = vpack.c.bf16 %v536_v27, %v536_v27 }
  0xb4   : > { %452 = vst.msk [vmem:[%s926_s29 + $0xc] sm:$0xf] %vm448_vm1, %v443_v22 }
  0xb5   : > { %v437_v24 = vpop.f32.mrf.mxu2  ;;  %553 = vst.msk [vmem:[%s933_s10 + $0x1c] sm:$0xf] %vm448_vm1, %v545_v29 }
  0xb6   : > { %v438_v25 = vadd.f32 %v775_v44, %v437_v24 }
  0xb8   : > { %v447_v28 = vpack.c.bf16 %v438_v25, %v438_v25 }
  0xba   : > { %456 = vst.msk [vmem:[%s926_s29 + $0x1c] sm:$0xf] %vm448_vm1, %v447_v28 }
  0xbb PF: > { %s19_s24 = sadd.s32 1, %s817_s24  }
  0xbc   : > { %p16_p7 = scmp.ge.s32.totalorder %s19_s24, 4  }
  0xbe   :  { %18 = sbr.rel (!%p16_p7) target bundleno = 1 (0x1), region = 94 }
  0xc3   :  { %593 = vsyncpa [#allocation3], 1 }
  0xc4   :  { %595 = vsyncpa [#allocation3 + $0x1], 1 }

// kernel: detr_forward.34
= control target key start
LH: loop header
LB: loop body
LE: loop exit
PB: predicated region body
PF: predicated region fallthrough
CT: control target
= control target key end

     0   :  { %12 = vsyncpa [#allocation3], 0  ;;  %s989_s24 = smov 0   ;;  %s1173_s0 = inlined_call_operand.vmem [shape: bf16[128,32], index: 0, kind: input, shape index: {}]   ;;  %s1174_s1 = inlined_call_operand.vmem [shape: bf16[32,64], index: 1, kind: input, shape index: {}]   ;;  %s1175_s2 = inlined_call_operand.vmem [shape: f32[1,64], index: 2, kind: input, shape index: {}]   ;;  %s1176_s3 = inlined_call_operand.vmem [shape: bf16[64,32], index: 3, kind: input, shape index: {}]   ;;  %s1177_s4 = inlined_call_operand.vmem [shape: f32[1,32], index: 4, kind: input, shape index: {}]   ;;  %s1178_s5 = inlined_call_operand.vmem [shape: f32[1,32], index: 5, kind: input, shape index: {}]   ;;  %s1179_s6 = inlined_call_operand.hbm [shape: f32[1,32], index: 6, kind: input, shape index: {}]   ;;  %s1180_s7 = inlined_call_operand.vmem [shape: bf16[128,32], index: 7, kind: output, shape index: {}]  }
   0x1 LB: > { %s786_s25 = sadd.s32 4294967295, %s945_s24   ;;  %p788_p0 = scmp.ge.s32.totalorder %s945_s24, 1  ;;  %s945_s24 = sphi %s989_s24, %s18_s24  }
   0x2   : > { %p201_p1 = scmp.lt.s32.totalorder %s945_s24, 3  ;;  %s228_s28 = sshll.u32 %s1179_s6, 4  ;;  %s229_s28 = int_to_ptr.hbm [resolvable:$true] %s228_s28 }
   0x3   : > { %p871_p3 = scmp.eq.s32.totalorder %s786_s25, 0  ;;  %s947_s29 = smov [#allocation2]  }
   0x4   : > { %p202_p2 = pnand %p788_p0, %p201_p1  ;;  %s230_s30 = sshll.u32 %s947_s29, 4  ;;  %s231_s30 = int_to_ptr.vmem [resolvable:$true] %s230_s30 }
   0x6   : > { %p867_p4 = pneg %p202_p2  ;;  %252 = sbr.rel (%p202_p2) target bundleno = 613 (0x265), region = 48 }
   0x8   : > { %p868_p5 = pnand %p871_p3, %p867_p4 }
   0xa   : > { %870 = dma.hbm_to_vmem [thread:$0]  (!%p868_p5), %s229_s28, 16, %s231_s30, [#allocation3]  }
   0xb   : > { %940 = dma.done.wait (%p871_p3), [#allocation3], 16  }
   0xc   : > { %942 = vsyncadd (%p871_p3), [#allocation3], 4294967280  ;;  %s793_s8 = sshll.u32 %s786_s25, 3  ;;  %v852_v0 = vld [vmem:[%s1174_s1 + $0x8] sm:$0xff]  ;;  %v851_v1 = vld [vmem:[%s1174_s1] sm:$0xff]  ;;  %vm346_vm0 = vcmask 261120  }
   0xd   : > { %p286_p6 = scmp.lt.s32.totalorder %s793_s8, 15  ;;  %365 = vmatpush.bf16.msra.mxu0 %v852_v0  ;;  %857 = vmatpush.bf16.msra.mxu3 %v852_v0  ;;  %v856_v6 = vld [vmem:[%s1176_s3 + $0x18] sm:$0xff]  ;;  %v855_v7 = vld [vmem:[%s1176_s3 + $0x10] sm:$0xff]  ;;  %v854_v8 = vld [vmem:[%s1176_s3 + $0x8] sm:$0xff]  ;;  %vm436_vm1 = vcmask 523264   ;;  %vm709_vm7 = vcmask 257024  }
   0xe   : > { %453 = vmatpush.bf16.msra.mxu1 %v856_v6  ;;  %859 = vmatpush.bf16.msra.mxu2 %v856_v6  ;;  %v853_v9 = vld [vmem:[%s1176_s3] sm:$0xff] }
   0xf   : > { %s1182_s8 = smov (!%p286_p6, %s793_s8), 15  ;;  %v883_v11 = vld [vmem:[%s1175_s2] ss:$0 sm:$0xff] }
  0x10   : > { %s794_s9 = sshll.u32 %s1182_s8, 2  ;;  %v884_v40 = vld [vmem:[%s1177_s4] ss:$0 sm:$0xff] }
  0x11   : > { %s1014_s16 = scalar_lea.vmem %s1173_s0, %s794_s9  ;;  %366 = vmatpush.bf16.msra.mxu0 %v851_v1  ;;  %858 = vmatpush.bf16.msra.mxu3 %v851_v1  ;;  %s1127_s13 = scalar_lea.vmem %s1180_s7, %s794_s9 }
  0x12   : > { %v847_v2 = vld [vmem:[%s1014_s16] sm:$0xff]  ;;  %v848_v3 = vld [vmem:[%s1014_s16 + $0x8] sm:$0xff]  ;;  %v849_v4 = vld [vmem:[%s1014_s16 + $0x10] sm:$0xff]  ;;  %454 = vmatpush.bf16.msra.mxu1 %v855_v7  ;;  %860 = vmatpush.bf16.msra.mxu2 %v855_v7 }
  0x13   : > { %v850_v5 = vld [vmem:[%s1014_s16 + $0x18] sm:$0xff]  ;;  %v298_v39 = vld [vmem:[%s1014_s16] sm:$0xff]   ;;  %v300_v50 = vld [vmem:[%s1014_s16 + $0x8] sm:$0xff]  }
  0x14   : > { %821 = vmatmul.msk.bf16.vlgmr.msra.gmra.mxu0 %vm346_vm0, %v847_v2  ;;  %822 = vmatmul.msk.bf16.vlgmr.msra.gmra.mxu3 %vm346_vm0, %v848_v3  ;;  %v478_v41 = vunpack.c.l.bf16 %v298_v39  ;;  %v479_v46 = vunpack.c.h.bf16 %v298_v39  ;;  %v480_v52 = vunpack.c.l.bf16 %v300_v50  ;;  %v481_v57 = vunpack.c.h.bf16 %v300_v50  ;;  %v302_v59 = vld [vmem:[%s1014_s16 + $0x10] sm:$0xff]  }
  0x15   : > { %v482_v62 = vunpack.c.l.bf16 %v302_v59 }
  0x16   : > { %455 = vmatpush.bf16.msra.mxu1 %v854_v8  ;;  %861 = vmatpush.bf16.msra.mxu2 %v854_v8  ;;  %v304_v8 = vld [vmem:[%s1014_s16 + $0x18] sm:$0xff]  }
  0x1a   : > { %456 = vmatpush.bf16.msra.mxu1 %v853_v9  ;;  %862 = vmatpush.bf16.msra.mxu2 %v853_v9 }
  0x24   : > { %823 = vmatmul.msk.bf16.gmra.mxu3 %vm346_vm0, %v849_v4  ;;  %v483_v4 = vunpack.c.h.bf16 %v302_v59 }
  0x34   : > { %824 = vmatmul.msk.bf16.gmra.mxu3 %vm346_vm0, %v850_v5 }
  0x91   : > { %v368_v10 = vpop.f32.mrf.mxu0 }
  0x92   : > { %v369_v12 = vadd.f32 %v883_v11, %v368_v10  ;;  %v484_v10 = vunpack.c.l.bf16 %v304_v8 }
  0x94   : > { %v388_v15 = vmax.f32 %v369_v12, 0.0 }
  0x97   : > { %v373_v13 = vpop.f32.mrf.mxu3 }
  0x98   : > { %v374_v22 = vadd.f32 %v883_v11, %v373_v13 }
  0x99   : > { %v370_v14 = vpop.f32.mrf.mxu0 }
  0x9a   : > { %v371_v16 = vadd.f32 %v883_v11, %v370_v14  ;;  %v390_v24 = vmax.f32 %v374_v22, 0.0 }
  0x9c   : > { %v389_v17 = vmax.f32 %v371_v16, 0.0 }
  0x9e   : > { %v396_v18 = vpack.c.bf16 %v389_v17, %v388_v15  ;;  %v485_v15 = vunpack.c.h.bf16 %v304_v8 }
  0x9f   : > { %v375_v19 = vpop.f32.mrf.mxu3 }
  0xa0   : > { %841 = vmatmul.msk.bf16.vlgmr.msra.gmra.mxu1 %vm436_vm1, %v396_v18  ;;  %v376_v20 = vadd.f32 %v883_v11, %v375_v19 }
  0xa2   : > { %v391_v23 = vmax.f32 %v376_v20, 0.0  ;;  %v948_v20 = vmov 32.0  }
  0xa3   : > { %887 = vrcp.f32 %v948_v20  ;;  %v1114_v20 = vld [vmem:[%s1178_s5] ss:$0 sm:$0xff] }
  0xa4   : > { %v397_v25 = vpack.c.bf16 %v391_v23, %v390_v24 }
  0xa7   : > { %v378_v21 = vpop.f32.mrf.mxu3 }
  0xa8   : > { %v379_v26 = vadd.f32 %v883_v11, %v378_v21 }
  0xa9   : > { %v888_v21 = vpop.eup %887 }
  0xaa   : > { %v392_v29 = vmax.f32 %v379_v26, 0.0  ;;  %v521_v22 = vmul.f32 32.0, %v888_v21  ;;  %vm525_vm2 = vweird.f32 %v888_v21 }
  0xac   : > { %v522_v23 = vsub.f32 1.0, %v521_v22 }
  0xae   : > { %v523_v24 = vmul.f32 %v888_v21, %v522_v23  ;;  %v1116_v23 = vld [vmem:[#allocation2] ss:$0 sm:$0xff] }
  0xaf   : > { %v380_v27 = vpop.f32.mrf.mxu3 }
  0xb0   : > { %v381_v28 = vadd.f32 %v883_v11, %v380_v27  ;;  %842 = vmatmul.msk.bf16.gmra.mxu1 %vm436_vm1, %v397_v25  ;;  %v524_v25 = vadd.f32 %v888_v21, %v523_v24 }
  0xb2   : > { %v393_v30 = vmax.f32 %v381_v28, 0.0  ;;  %v1058_v26 = vsel %vm525_vm2, %v888_v21, %v524_v25 }
  0xb4   : > { %v398_v31 = vpack.c.bf16 %v393_v30, %v392_v29 }
  0xb6   : > { %843 = vmatmul.msk.bf16.vlgmr.msra.gmra.mxu2 %vm436_vm1, %v398_v31 }
  0xb7   : > { %v383_v32 = vpop.f32.mrf.mxu3 }
  0xb8   : > { %v384_v33 = vadd.f32 %v883_v11, %v383_v32 }
  0xba   : > { %v394_v36 = vmax.f32 %v384_v33, 0.0 }
  0xbf   : > { %v385_v34 = vpop.f32.mrf.mxu3 }
  0xc0   : > { %v386_v35 = vadd.f32 %v883_v11, %v385_v34 }
  0xc2   : > { %v395_v37 = vmax.f32 %v386_v35, 0.0 }
  0xc4   : > { %v399_v38 = vpack.c.bf16 %v395_v37, %v394_v36 }
  0xc6   : > { %844 = vmatmul.msk.bf16.gmra.mxu2 %vm436_vm1, %v399_v38 }
 0x11d   : > { %v458_v42 = vpop.f32.mrf.mxu1 }
 0x11e   : > { %v459_v43 = vadd.f32 %v884_v40, %v458_v42 }
 0x120   : > { %v486_v44 = vadd.f32 %v478_v41, %v459_v43 }
 0x122   : > { %v496_v45 = vsel %vm346_vm0, %v486_v44, 0.0 }
 0x123   : > { %497 = vadd.xlane.f32.xlu0 %v496_v45 }
 0x125   : > { %v460_v47 = vpop.f32.mrf.mxu1 }
 0x126   : > { %v461_v48 = vadd.f32 %v884_v40, %v460_v47 }
 0x128   : > { %v487_v49 = vadd.f32 %v479_v46, %v461_v48 }
 0x12a   : > { %v499_v51 = vsel %vm346_vm0, %v487_v49, 0.0 }
 0x12b   : > { %500 = vadd.xlane.f32.xlu0 %v499_v51 }
 0x12d   : > { %v463_v53 = vpop.f32.mrf.mxu1 }
 0x12e   : > { %v464_v54 = vadd.f32 %v884_v40, %v463_v53 }
 0x130   : > { %v488_v55 = vadd.f32 %v480_v52, %v464_v54 }
 0x132   : > { %v502_v56 = vsel %vm346_vm0, %v488_v55, 0.0 }
 0x133   : > { %503 = vadd.xlane.f32.xlu1 %v502_v56 }
 0x135   : > { %v465_v58 = vpop.f32.mrf.mxu1 }
 0x136   : > { %v466_v60 = vadd.f32 %v884_v40, %v465_v58 }
 0x138   : > { %v489_v61 = vadd.f32 %v481_v57, %v466_v60 }
 0x139   : > { %v468_v63 = vpop.f32.mrf.mxu2 }
 0x13a   : > { %v469_v0 = vadd.f32 %v884_v40, %v468_v63  ;;  %v505_v1 = vsel %vm346_vm0, %v489_v61, 0.0 }
 0x13b   : > { %506 = vadd.xlane.f32.xlu1 %v505_v1 }
 0x13c   : > { %v490_v2 = vadd.f32 %v482_v62, %v469_v0 }
 0x13e   : > { %v508_v3 = vsel %vm346_vm0, %v490_v2, 0.0 }
 0x13f   : > { %509 = vadd.xlane.f32.xlu2 %v508_v3 }
 0x141   : > { %v470_v5 = vpop.f32.mrf.mxu2 }
 0x142   : > { %v471_v6 = vadd.f32 %v884_v40, %v470_v5 }
 0x144   : > { %v491_v7 = vadd.f32 %v483_v4, %v471_v6 }
 0x146   : > { %v511_v9 = vsel %vm346_vm0, %v491_v7, 0.0 }
 0x147   : > { %512 = vadd.xlane.f32.xlu2 %v511_v9 }
 0x149   : > { %v473_v11 = vpop.f32.mrf.mxu2 }
 0x14a   : > { %v474_v12 = vadd.f32 %v884_v40, %v473_v11 }
 0x14c   : > { %v492_v13 = vadd.f32 %v484_v10, %v474_v12 }
 0x14e   : > { %v514_v14 = vsel %vm346_vm0, %v492_v13, 0.0 }
 0x14f   : > { %515 = vadd.xlane.f32.xlu0 %v514_v14 }
 0x151   : > { %v475_v16 = vpop.f32.mrf.mxu2 }
 0x152   : > { %v476_v17 = vadd.f32 %v884_v40, %v475_v16 }
 0x154   : > { %v493_v18 = vadd.f32 %v485_v15, %v476_v17 }
 0x156   : > { %v517_v19 = vsel %vm346_vm0, %v493_v18, 0.0 }
 0x157   : > { %518 = vadd.xlane.f32.xlu1 %v517_v19 }
 0x196   : > { %v498_v27 = vpop.xlane.xlu0 %497 }
 0x197   : > { %v527_v28 = vmul.f32 %v1058_v26, %v498_v27 }
 0x199   : > { %v1061_v29 = vsub.f32 %v486_v44, %v527_v28 }
 0x19b   : > { %v543_v30 = vmul.f32 %v1061_v29, %v1061_v29 }
 0x19d   : > { %v551_v31 = vsel %vm346_vm0, %v543_v30, 0.0 }
 0x19e   : > { %552 = vadd.xlane.f32.xlu2 %v551_v31  ;;  %v501_v32 = vpop.xlane.xlu0 %500 }
 0x19f   : > { %v528_v33 = vmul.f32 %v1058_v26, %v501_v32 }
 0x1a1   : > { %v1067_v34 = vsub.f32 %v487_v49, %v528_v33 }
 0x1a3   : > { %v544_v35 = vmul.f32 %v1067_v34, %v1067_v34 }
 0x1a5   : > { %v554_v36 = vsel %vm346_vm0, %v544_v35, 0.0 }
 0x1a6   : > { %v504_v37 = vpop.xlane.xlu1 %503  ;;  %555 = vadd.xlane.f32.xlu0 %v554_v36 }
 0x1a7   : > { %v529_v38 = vmul.f32 %v1058_v26, %v504_v37 }
 0x1a9   : > { %v1073_v39 = vsub.f32 %v488_v55, %v529_v38 }
 0x1ab   : > { %v545_v40 = vmul.f32 %v1073_v39, %v1073_v39 }
 0x1ad   : > { %v557_v41 = vsel %vm346_vm0, %v545_v40, 0.0 }
 0x1ae   : > { %558 = vadd.xlane.f32.xlu1 %v557_v41  ;;  %v507_v42 = vpop.xlane.xlu1 %506 }
 0x1af   : > { %v530_v43 = vmul.f32 %v1058_v26, %v507_v42 }
 0x1b1   : > { %v1079_v44 = vsub.f32 %v489_v61, %v530_v43 }
 0x1b2   : > { %v510_v45 = vpop.xlane.xlu2 %509 }
 0x1b3   : > { %v531_v46 = vmul.f32 %v1058_v26, %v510_v45  ;;  %v546_v47 = vmul.f32 %v1079_v44, %v1079_v44 }
 0x1b5   : > { %v1084_v48 = vsub.f32 %v490_v2, %v531_v46  ;;  %v560_v49 = vsel %vm346_vm0, %v546_v47, 0.0 }
 0x1b6   : > { %561 = vadd.xlane.f32.xlu2 %v560_v49 }
 0x1b7   : > { %v547_v50 = vmul.f32 %v1084_v48, %v1084_v48 }
 0x1b9   : > { %v563_v51 = vsel %vm346_vm0, %v547_v50, 0.0 }
 0x1ba   : > { %v513_v52 = vpop.xlane.xlu2 %512  ;;  %564 = vadd.xlane.f32.xlu0 %v563_v51 }
 0x1bb   : > { %v532_v53 = vmul.f32 %v1058_v26, %v513_v52 }
 0x1bd   : > { %v1091_v54 = vsub.f32 %v491_v7, %v532_v53 }
 0x1bf   : > { %v548_v55 = vmul.f32 %v1091_v54, %v1091_v54 }
 0x1c1   : > { %v566_v56 = vsel %vm346_vm0, %v548_v55, 0.0 }
 0x1c2   : > { %567 = vadd.xlane.f32.xlu1 %v566_v56  ;;  %v516_v57 = vpop.xlane.xlu0 %515 }
 0x1c3   : > { %v533_v58 = vmul.f32 %v1058_v26, %v516_v57 }
 0x1c5   : > { %v1097_v59 = vsub.f32 %v492_v13, %v533_v58 }
 0x1c7   : > { %v549_v60 = vmul.f32 %v1097_v59, %v1097_v59 }
 0x1c9   : > { %v569_v61 = vsel %vm346_vm0, %v549_v60, 0.0 }
 0x1ca   : > { %v519_v62 = vpop.xlane.xlu1 %518  ;;  %570 = vadd.xlane.f32.xlu2 %v569_v61 }
 0x1cb   : > { %v534_v63 = vmul.f32 %v1058_v26, %v519_v62 }
 0x1cd   : > { %v1103_v0 = vsub.f32 %v493_v18, %v534_v63 }
 0x1cf   : > { %v550_v1 = vmul.f32 %v1103_v0, %v1103_v0 }
 0x1d1   : > { %v572_v2 = vsel %vm346_vm0, %v550_v1, 0.0 }
 0x1d2   : > { %573 = vadd.xlane.f32.xlu0 %v572_v2 }
 0x211   : > { %v553_v3 = vpop.xlane.xlu2 %552 }
 0x212   : > { %v575_v4 = vmul.f32 %v553_v3, %v1058_v26 }
 0x214   : > { %v583_v5 = vadd.f32 1e-05, %v575_v4 }
 0x216   : > { %889 = vrsqrt.f32 %v583_v5  ;;  %vm597_vm4 = vweird.f32 %v583_v5 }
 0x219   : > { %v556_v6 = vpop.xlane.xlu0 %555 }
 0x21a   : > { %v576_v7 = vmul.f32 %v556_v6, %v1058_v26 }
 0x21c   : > { %v890_v8 = vpop.eup %889  ;;  %v584_v9 = vadd.f32 1e-05, %v576_v7 }
 0x21d   : > { %v592_v10 = vmul.f32 %v890_v8, %v583_v5  ;;  %vm598_vm3 = vweird.f32 %v890_v8 }
 0x21e   : > { %891 = vrsqrt.f32 %v584_v9  ;;  %vm599_vm5 = vmor %vm597_vm4, %vm598_vm3  ;;  %vm607_vm8 = vweird.f32 %v584_v9 }
 0x21f   : > { %v593_v11 = vmul.f32 %v890_v8, %v592_v10 }
 0x221   : > { %v594_v12 = vmul.f32 0.5, %v593_v11  ;;  %v559_v13 = vpop.xlane.xlu1 %558 }
 0x222   : > { %v577_v14 = vmul.f32 %v559_v13, %v1058_v26 }
 0x223   : > { %v595_v15 = vsub.f32 1.5, %v594_v12 }
 0x224   : > { %v892_v16 = vpop.eup %891  ;;  %v585_v17 = vadd.f32 1e-05, %v577_v14 }
 0x225   : > { %v596_v18 = vmul.f32 %v890_v8, %v595_v15  ;;  %v602_v19 = vmul.f32 %v892_v16, %v584_v9  ;;  %vm608_vm6 = vweird.f32 %v892_v16 }
 0x226   : > { %893 = vrsqrt.f32 %v585_v17  ;;  %vm609_vm9 = vmor %vm607_vm8, %vm608_vm6  ;;  %vm617_vm11 = vweird.f32 %v585_v17 }
 0x227   : > { %v600_v21 = vsel %vm599_vm5, %v890_v8, %v596_v18  ;;  %v603_v22 = vmul.f32 %v892_v16, %v602_v19 }
 0x228   : > { %v671_v24 = vmul.f32 %v600_v21, %v1061_v29 }
 0x229   : > { %v604_v25 = vmul.f32 0.5, %v603_v22  ;;  %v562_v27 = vpop.xlane.xlu2 %561 }
 0x22a   : > { %v682_v28 = vmul.f32 %v1114_v20, %v671_v24  ;;  %v578_v30 = vmul.f32 %v562_v27, %v1058_v26 }
 0x22b   : > { %v605_v31 = vsub.f32 1.5, %v604_v25 }
 0x22c   : > { %v894_v32 = vpop.eup %893  ;;  %v693_v33 = vadd.f32 %v1116_v23, %v682_v28  ;;  %v586_v35 = vadd.f32 1e-05, %v578_v30 }
 0x22d   : > { %v606_v29 = vmul.f32 %v892_v16, %v605_v31  ;;  %v612_v36 = vmul.f32 %v894_v32, %v585_v17  ;;  %v565_v37 = vpop.xlane.xlu0 %564  ;;  %vm618_vm10 = vweird.f32 %v894_v32 }
 0x22e   : > { %v701_v38 = vpack.c.bf16 %v693_v33, %v693_v33  ;;  %895 = vrsqrt.f32 %v586_v35  ;;  %v579_v40 = vmul.f32 %v565_v37, %v1058_v26  ;;  %vm619_vm12 = vmor %vm617_vm11, %vm618_vm10  ;;  %vm627_vm14 = vweird.f32 %v586_v35 }
 0x22f   : > { %v610_v41 = vsel %vm609_vm9, %v892_v16, %v606_v29  ;;  %v613_v42 = vmul.f32 %v894_v32, %v612_v36 }
 0x230   : > { %710 = vst.msk [vmem:[%s1127_s13] sm:$0xf] %vm709_vm7, %v701_v38  ;;  %v672_v43 = vmul.f32 %v610_v41, %v1067_v34  ;;  %v587_v45 = vadd.f32 1e-05, %v579_v40 }
 0x231   : > { %v614_v46 = vmul.f32 0.5, %v613_v42 }
 0x232   : > { %v683_v47 = vmul.f32 %v1114_v20, %v672_v43  ;;  %897 = vrsqrt.f32 %v587_v45  ;;  %vm637_vm1 = vweird.f32 %v587_v45 }
 0x233   : > { %v615_v49 = vsub.f32 1.5, %v614_v46 }
 0x234   : > { %v896_v50 = vpop.eup %895  ;;  %v694_v51 = vadd.f32 %v1116_v23, %v683_v47 }
 0x235   : > { %v616_v52 = vmul.f32 %v894_v32, %v615_v49  ;;  %v622_v53 = vmul.f32 %v896_v50, %v586_v35  ;;  %v568_v55 = vpop.xlane.xlu1 %567  ;;  %vm628_vm13 = vweird.f32 %v896_v50 }
 0x236   : > { %v702_v56 = vpack.c.bf16 %v694_v51, %v694_v51  ;;  %v580_v57 = vmul.f32 %v568_v55, %v1058_v26  ;;  %vm629_vm15 = vmor %vm627_vm14, %vm628_vm13 }
 0x237   : > { %v620_v34 = vsel %vm619_vm12, %v894_v32, %v616_v52  ;;  %v623_v58 = vmul.f32 %v896_v50, %v622_v53 }
 0x238   : > { %v898_v60 = vpop.eup %897  ;;  %711 = vst.msk [vmem:[%s1127_s13 + $0x4] sm:$0xf] %vm709_vm7, %v702_v56  ;;  %v673_v61 = vmul.f32 %v620_v34, %v1073_v39  ;;  %v588_v62 = vadd.f32 1e-05, %v580_v57 }
 0x239   : > { %v624_v63 = vmul.f32 0.5, %v623_v58  ;;  %v632_v1 = vmul.f32 %v898_v60, %v587_v45  ;;  %vm638_vm0 = vweird.f32 %v898_v60 }
 0x23a   : > { %v684_v2 = vmul.f32 %v1114_v20, %v673_v61  ;;  %899 = vrsqrt.f32 %v588_v62  ;;  %vm639_vm2 = vmor %vm637_vm1, %vm638_vm0  ;;  %vm647_vm4 = vweird.f32 %v588_v62 }
 0x23b   : > { %v625_v3 = vsub.f32 1.5, %v624_v63  ;;  %v633_v4 = vmul.f32 %v898_v60, %v632_v1 }
 0x23c   : > { %v695_v5 = vadd.f32 %v1116_v23, %v684_v2 }
 0x23d   : > { %v626_v6 = vmul.f32 %v896_v50, %v625_v3  ;;  %v634_v7 = vmul.f32 0.5, %v633_v4  ;;  %v571_v8 = vpop.xlane.xlu2 %570 }
 0x23e   : > { %v703_v9 = vpack.c.bf16 %v695_v5, %v695_v5  ;;  %v581_v39 = vmul.f32 %v571_v8, %v1058_v26 }
 0x23f   : > { %v630_v10 = vsel %vm629_vm15, %v896_v50, %v626_v6  ;;  %v635_v11 = vsub.f32 1.5, %v634_v7 }
 0x240   : > { %v900_v12 = vpop.eup %899  ;;  %712 = vst.msk [vmem:[%s1127_s13 + $0x8] sm:$0xf] %vm709_vm7, %v703_v9  ;;  %v674_v13 = vmul.f32 %v630_v10, %v1079_v44  ;;  %v589_v14 = vadd.f32 1e-05, %v581_v39 }
 0x241   : > { %v636_v15 = vmul.f32 %v898_v60, %v635_v11  ;;  %v642_v16 = vmul.f32 %v900_v12, %v588_v62  ;;  %vm648_vm3 = vweird.f32 %v900_v12 }
 0x242   : > { %v685_v17 = vmul.f32 %v1114_v20, %v674_v13  ;;  %901 = vrsqrt.f32 %v589_v14  ;;  %vm649_vm5 = vmor %vm647_vm4, %vm648_vm3  ;;  %vm657_vm8 = vweird.f32 %v589_v14 }
 0x243   : > { %v640_v18 = vsel %vm639_vm2, %v898_v60, %v636_v15  ;;  %v643_v19 = vmul.f32 %v900_v12, %v642_v16 }
 0x244   : > { %v696_v21 = vadd.f32 %v1116_v23, %v685_v17  ;;  %v675_v22 = vmul.f32 %v640_v18, %v1084_v48 }
 0x245   : > { %v644_v24 = vmul.f32 0.5, %v643_v19  ;;  %v574_v25 = vpop.xlane.xlu0 %573 }
 0x246   : > { %v704_v27 = vpack.c.bf16 %v696_v21, %v696_v21  ;;  %v686_v44 = vmul.f32 %v1114_v20, %v675_v22  ;;  %v582_v28 = vmul.f32 %v574_v25, %v1058_v26 }
 0x247   : > { %v645_v30 = vsub.f32 1.5, %v644_v24 }
 0x248   : > { %v902_v31 = vpop.eup %901  ;;  %713 = vst.msk [vmem:[%s1127_s13 + $0xc] sm:$0xf] %vm709_vm7, %v704_v27  ;;  %v697_v32 = vadd.f32 %v1116_v23, %v686_v44  ;;  %v590_v33 = vadd.f32 1e-05, %v582_v28 }
 0x249   : > { %v646_v35 = vmul.f32 %v900_v12, %v645_v30  ;;  %v652_v29 = vmul.f32 %v902_v31, %v589_v14  ;;  %vm658_vm6 = vweird.f32 %v902_v31 }
 0x24a   : > { %v705_v48 = vpack.c.bf16 %v697_v32, %v697_v32  ;;  %903 = vrsqrt.f32 %v590_v33  ;;  %vm659_vm9 = vmor %vm657_vm8, %vm658_vm6  ;;  %vm667_vm11 = vweird.f32 %v590_v33 }
 0x24b   : > { %v650_v36 = vsel %vm649_vm5, %v900_v12, %v646_v35  ;;  %v653_v37 = vmul.f32 %v902_v31, %v652_v29 }
 0x24c   : > { %714 = vst.msk [vmem:[%s1127_s13 + $0x10] sm:$0xf] %vm709_vm7, %v705_v48  ;;  %v676_v26 = vmul.f32 %v650_v36, %v1091_v54 }
 0x24d   : > { %v654_v38 = vmul.f32 0.5, %v653_v37 }
 0x24e   : > { %v687_v40 = vmul.f32 %v1114_v20, %v676_v26 }
 0x24f   : > { %v655_v41 = vsub.f32 1.5, %v654_v38 }
 0x250   : > { %v904_v42 = vpop.eup %903  ;;  %v698_v43 = vadd.f32 %v1116_v23, %v687_v40 }
 0x251   : > { %v656_v45 = vmul.f32 %v902_v31, %v655_v41  ;;  %v662_v46 = vmul.f32 %v904_v42, %v590_v33  ;;  %vm668_vm10 = vweird.f32 %v904_v42 }
 0x252   : > { %v706_v47 = vpack.c.bf16 %v698_v43, %v698_v43  ;;  %vm669_vm12 = vmor %vm667_vm11, %vm668_vm10 }
 0x253   : > { %v660_v49 = vsel %vm659_vm9, %v902_v31, %v656_v45  ;;  %v663_v50 = vmul.f32 %v904_v42, %v662_v46 }
 0x254   : > { %715 = vst.msk [vmem:[%s1127_s13 + $0x14] sm:$0xf] %vm709_vm7, %v706_v47  ;;  %v677_v54 = vmul.f32 %v660_v49, %v1097_v59 }
 0x255   : > { %v664_v51 = vmul.f32 0.5, %v663_v50 }
 0x256   : > { %v688_v52 = vmul.f32 %v1114_v20, %v677_v54 }
 0x257   : > { %v665_v53 = vsub.f32 1.5, %v664_v51 }
 0x258   : > { %v699_v55 = vadd.f32 %v1116_v23, %v688_v52 }
 0x259   : > { %v666_v56 = vmul.f32 %v904_v42, %v665_v53 }
 0x25a   : > { %v707_v57 = vpack.c.bf16 %v699_v55, %v699_v55 }
 0x25b   : > { %v670_v34 = vsel %vm669_vm12, %v904_v42, %v666_v56 }
 0x25c   : > { %716 = vst.msk [vmem:[%s1127_s13 + $0x18] sm:$0xf] %vm709_vm7, %v707_v57  ;;  %v678_v58 = vmul.f32 %v670_v34, %v1103_v0 }
 0x25e   : > { %v689_v60 = vmul.f32 %v1114_v20, %v678_v58 }
 0x260   : > { %v700_v59 = vadd.f32 %v1116_v23, %v689_v60 }
 0x262   : > { %v708_v61 = vpack.c.bf16 %v700_v59, %v700_v59 }
 0x264   : > { %717 = vst.msk [vmem:[%s1127_s13 + $0x1c] sm:$0xf] %vm709_vm7, %v708_v61 }
 0x265 PF: > { %s18_s24 = sadd.s32 1, %s945_s24  }
 0x266   : > { %p15_p7 = scmp.ge.s32.totalorder %s18_s24, 4  }
 0x268   :  { %17 = sbr.rel (!%p15_p7) target bundleno = 1 (0x1), region = 83 }
 0x26d   :  { %740 = vsyncpa [#allocation3], 1 }
 0x26e   :  { %742 = vsyncpa [#allocation3 + $0x1], 1 }

// kernel: detr_forward.39
= control target key start
LH: loop header
LB: loop body
LE: loop exit
PB: predicated region body
PF: predicated region fallthrough
CT: control target
= control target key end

     0   :  { %13 = vsyncpa [#allocation3], 0  ;;  %s1071_s0 = inlined_call_operand.vmem [shape: bf16[128,32], index: 0, kind: input, shape index: {}]   ;;  %s1072_s1 = inlined_call_operand.vmem [shape: bf16[128,32], index: 1, kind: input, shape index: {}]   ;;  %s1073_s2 = inlined_call_operand.vmem [shape: bf16[32,32], index: 2, kind: input, shape index: {}]   ;;  %s1074_s3 = inlined_call_operand.hbm [shape: f32[1,32], index: 3, kind: input, shape index: {}]   ;;  %s1075_s4 = inlined_call_operand.vmem [shape: bf16[32,32], index: 4, kind: input, shape index: {}]   ;;  %s1076_s5 = inlined_call_operand.hbm [shape: f32[1,32], index: 5, kind: input, shape index: {}]   ;;  %s1077_s6 = inlined_call_operand.vmem [shape: bf16[128,32], index: 6, kind: output, shape index: {0}]   ;;  %s1078_s7 = inlined_call_operand.vmem [shape: bf16[128,32], index: 7, kind: output, shape index: {1}]  }
   0x1   :  { %14 = vsyncpa [#allocation5], 0  ;;  %s932_s24 = smov 0  }
   0x2 LB: > { %s228_s27 = sshll.u32 %s1074_s3, 4  ;;  %s693_s28 = sadd.s32 4294967295, %s888_s24   ;;  %s888_s24 = sphi %s932_s24, %s20_s24   ;;  %s229_s27 = int_to_ptr.hbm [resolvable:$true] %s228_s27 }
   0x3   : > { %p695_p0 = scmp.ge.s32.totalorder %s888_s24, 1  ;;  %p213_p1 = scmp.lt.s32.totalorder %s888_s24, 3 }
   0x4   : > { %p943_p2 = scmp.eq.s32.totalorder %s693_s28, 0  ;;  %s890_s8 = smov [#allocation2]  }
   0x5   : > { %p947_p3 = pnand %p695_p0, %p213_p1  ;;  %s230_s9 = sshll.u32 %s890_s8, 4  ;;  %s231_s9 = int_to_ptr.vmem [resolvable:$true] %s230_s9 }
   0x6   : > { %s243_s12 = sshll.u32 %s1076_s5, 4  ;;  %s891_s13 = smov [#allocation4]   ;;  %s244_s12 = int_to_ptr.hbm [resolvable:$true] %s243_s12 }
   0x7   : > { %p791_p4 = pneg %p947_p3  ;;  %s245_s14 = sshll.u32 %s891_s13, 4  ;;  %s246_s14 = int_to_ptr.vmem [resolvable:$true] %s245_s14 }
   0x8   : > { %276 = sbr.rel (%p947_p3) target bundleno = 191 (0xbf), region = 44 }
   0x9   : > { %p792_p5 = pnand %p943_p2, %p791_p4 }
   0xb   : > { %794 = dma.hbm_to_vmem [thread:$0]  (!%p792_p5), %s229_s27, 16, %s231_s9, [#allocation3]  }
   0xc   : > { %797 = dma.hbm_to_vmem [thread:$0]  (!%p792_p5), %s244_s12, 16, %s246_s14, [#allocation5]  }
   0xd   : > { %879 = dma.done.wait (%p943_p2), [#allocation3], 16  }
   0xe   : > { %881 = vsyncadd (%p943_p2), [#allocation3], 4294967280 }
   0xf   : > { %883 = dma.done.wait (%p943_p2), [#allocation5], 16  }
  0x10   : > { %885 = vsyncadd (%p943_p2), [#allocation5], 4294967280  ;;  %s702_s15 = sshll.u32 %s693_s28, 3  ;;  %v757_v0 = vld [vmem:[%s1073_s2 + $0x8] sm:$0xff]  ;;  %v756_v4 = vld [vmem:[%s1073_s2] sm:$0xff]  ;;  %vm413_vm0 = vcmask 261120  }
  0x11   : > { %p325_p6 = scmp.lt.s32.totalorder %s702_s15, 15  ;;  %v759_v1 = vld [vmem:[%s1075_s4 + $0x8] sm:$0xff]  ;;  %432 = vmatpush.bf16.msra.mxu0 %v757_v0  ;;  %779 = vmatpush.bf16.msra.mxu2 %v757_v0  ;;  %v758_v11 = vld [vmem:[%s1075_s4] sm:$0xff]  ;;  %vm463_vm1 = vcmask 257024  }
  0x12   : > { %530 = vmatpush.bf16.msra.mxu1 %v759_v1  ;;  %781 = vmatpush.bf16.msra.mxu3 %v759_v1  ;;  %v812_v44 = vld [vmem:[#allocation2] ss:$0 sm:$0xff]  ;;  %v1014_v45 = vld [vmem:[#allocation4] ss:$0 sm:$0xff] }
  0x13   : > { %s1082_s15 = smov (!%p325_p6, %s702_s15), 15 }
  0x14   : > { %s968_s16 = sshll.u32 %s1082_s15, 2 }
  0x15   : > { %s974_s19 = scalar_lea.vmem %s1071_s0, %s968_s16  ;;  %s980_s22 = scalar_lea.vmem %s1072_s1, %s968_s16  ;;  %433 = vmatpush.bf16.msra.mxu0 %v756_v4  ;;  %780 = vmatpush.bf16.msra.mxu2 %v756_v4 }
  0x16   : > { %v349_v2 = vld [vmem:[%s974_s19] sm:$0xff]   ;;  %v353_v9 = vld [vmem:[%s974_s19 + $0x10] sm:$0xff]   ;;  %531 = vmatpush.bf16.msra.mxu1 %v758_v11  ;;  %782 = vmatpush.bf16.msra.mxu3 %v758_v11  ;;  %v351_v24 = vld [vmem:[%s974_s19 + $0x8] sm:$0xff]   ;;  %s1020_s11 = scalar_lea.vmem %s1077_s6, %s968_s16  ;;  %s1027_s14 = scalar_lea.vmem %s1078_s7, %s968_s16 }
  0x17   : > { %v761_v3 = vld [vmem:[%s980_s22] sm:$0xff]   ;;  %v357_v5 = vunpack.c.l.bf16 %v349_v2  ;;  %v358_v6 = vunpack.c.h.bf16 %v349_v2  ;;  %v777_v10 = vld [vmem:[%s980_s22 + $0x10] sm:$0xff]   ;;  %v361_v12 = vunpack.c.l.bf16 %v353_v9  ;;  %v362_v13 = vunpack.c.h.bf16 %v353_v9  ;;  %v776_v25 = vld [vmem:[%s980_s22 + $0x8] sm:$0xff]  }
  0x18   : > { %v762_v7 = vunpack.c.l.bf16 %v761_v3  ;;  %v763_v8 = vunpack.c.h.bf16 %v761_v3  ;;  %v770_v14 = vunpack.c.l.bf16 %v777_v10  ;;  %v771_v15 = vunpack.c.h.bf16 %v777_v10  ;;  %v752_v21 = vld [vmem:[%s974_s19] sm:$0xff]  ;;  %v754_v22 = vld [vmem:[%s974_s19 + $0x10] sm:$0xff]  ;;  %v355_v26 = vld [vmem:[%s974_s19 + $0x18] sm:$0xff]  }
  0x19   : > { %746 = vmatmul.msk.bf16.vlgmr.msra.gmra.mxu1 %vm413_vm0, %v752_v21  ;;  %748 = vmatmul.msk.bf16.vlgmr.msra.gmra.mxu3 %vm413_vm0, %v754_v22  ;;  %v778_v27 = vld [vmem:[%s980_s22 + $0x18] sm:$0xff]   ;;  %v359_v28 = vunpack.c.l.bf16 %v351_v24  ;;  %v360_v29 = vunpack.c.h.bf16 %v351_v24  ;;  %v766_v30 = vunpack.c.l.bf16 %v776_v25  ;;  %v767_v31 = vunpack.c.h.bf16 %v776_v25  ;;  %v753_v42 = vld [vmem:[%s974_s19 + $0x8] sm:$0xff] }
  0x1a   : > { %v381_v16 = vadd.f32 %v762_v7, %v357_v5  ;;  %v382_v17 = vadd.f32 %v763_v8, %v358_v6  ;;  %v385_v18 = vadd.f32 %v770_v14, %v361_v12  ;;  %v386_v19 = vadd.f32 %v771_v15, %v362_v13  ;;  %v755_v43 = vld [vmem:[%s974_s19 + $0x18] sm:$0xff] }
  0x1b   : > { %v363_v32 = vunpack.c.l.bf16 %v355_v26  ;;  %v364_v33 = vunpack.c.h.bf16 %v355_v26  ;;  %v774_v34 = vunpack.c.l.bf16 %v778_v27  ;;  %v775_v35 = vunpack.c.h.bf16 %v778_v27 }
  0x1c   : > { %v389_v20 = vpack.c.bf16 %v382_v17, %v381_v16  ;;  %v391_v23 = vpack.c.bf16 %v386_v19, %v385_v18  ;;  %v383_v36 = vadd.f32 %v766_v30, %v359_v28  ;;  %v384_v37 = vadd.f32 %v767_v31, %v360_v29 }
  0x1d   : > { %v387_v38 = vadd.f32 %v774_v34, %v363_v32  ;;  %v388_v39 = vadd.f32 %v775_v35, %v364_v33 }
  0x1e   : > { %718 = vmatmul.msk.bf16.vlgmr.msra.gmra.mxu0 %vm413_vm0, %v389_v20  ;;  %720 = vmatmul.msk.bf16.vlgmr.msra.gmra.mxu2 %vm413_vm0, %v391_v23  ;;  %v390_v40 = vpack.c.bf16 %v384_v37, %v383_v36 }
  0x1f   : > { %v392_v41 = vpack.c.bf16 %v388_v39, %v387_v38 }
  0x29   : > { %747 = vmatmul.msk.bf16.gmra.mxu1 %vm413_vm0, %v753_v42  ;;  %749 = vmatmul.msk.bf16.gmra.mxu3 %vm413_vm0, %v755_v43 }
  0x2e   : > { %719 = vmatmul.msk.bf16.gmra.mxu0 %vm413_vm0, %v390_v40  ;;  %721 = vmatmul.msk.bf16.gmra.mxu2 %vm413_vm0, %v392_v41 }
  0x96   : > { %v533_v48 = vpop.f32.mrf.mxu1 }
  0x97   : > { %v534_v49 = vadd.f32 %v1014_v45, %v533_v48 }
  0x99   : > { %v553_v51 = vpack.c.bf16 %v534_v49, %v534_v49 }
  0x9b   : > { %v435_v46 = vpop.f32.mrf.mxu0  ;;  %561 = vst.msk [vmem:[%s1027_s14] sm:$0xf] %vm463_vm1, %v553_v51 }
  0x9c   : > { %v436_v47 = vadd.f32 %v812_v44, %v435_v46  ;;  %v543_v54 = vpop.f32.mrf.mxu3 }
  0x9d   : > { %v544_v55 = vadd.f32 %v1014_v45, %v543_v54 }
  0x9e   : > { %v455_v50 = vpack.c.bf16 %v436_v47, %v436_v47  ;;  %v535_v59 = vpop.f32.mrf.mxu1 }
  0x9f   : > { %v557_v60 = vpack.c.bf16 %v544_v55, %v544_v55  ;;  %v536_v61 = vadd.f32 %v1014_v45, %v535_v59 }
  0xa0   : > { %464 = vst.msk [vmem:[%s1020_s11] sm:$0xf] %vm463_vm1, %v455_v50 }
  0xa1   : > { %v445_v52 = vpop.f32.mrf.mxu2  ;;  %565 = vst.msk [vmem:[%s1027_s14 + $0x10] sm:$0xf] %vm463_vm1, %v557_v60  ;;  %v554_v63 = vpack.c.bf16 %v536_v61, %v536_v61 }
  0xa2   : > { %v446_v53 = vadd.f32 %v812_v44, %v445_v52 }
  0xa3   : > { %v437_v56 = vpop.f32.mrf.mxu0  ;;  %562 = vst.msk [vmem:[%s1027_s14 + $0x4] sm:$0xf] %vm463_vm1, %v554_v63 }
  0xa4   : > { %v459_v57 = vpack.c.bf16 %v446_v53, %v446_v53  ;;  %v438_v58 = vadd.f32 %v812_v44, %v437_v56  ;;  %v545_v2 = vpop.f32.mrf.mxu3 }
  0xa5   : > { %v546_v3 = vadd.f32 %v1014_v45, %v545_v2 }
  0xa6   : > { %468 = vst.msk [vmem:[%s1020_s11 + $0x10] sm:$0xf] %vm463_vm1, %v459_v57  ;;  %v456_v62 = vpack.c.bf16 %v438_v58, %v438_v58  ;;  %v538_v7 = vpop.f32.mrf.mxu1 }
  0xa7   : > { %v558_v8 = vpack.c.bf16 %v546_v3, %v546_v3  ;;  %v539_v9 = vadd.f32 %v1014_v45, %v538_v7 }
  0xa8   : > { %465 = vst.msk [vmem:[%s1020_s11 + $0x4] sm:$0xf] %vm463_vm1, %v456_v62 }
  0xa9   : > { %v447_v0 = vpop.f32.mrf.mxu2  ;;  %566 = vst.msk [vmem:[%s1027_s14 + $0x14] sm:$0xf] %vm463_vm1, %v558_v8  ;;  %v555_v11 = vpack.c.bf16 %v539_v9, %v539_v9 }
  0xaa   : > { %v448_v1 = vadd.f32 %v812_v44, %v447_v0 }
  0xab   : > { %v440_v4 = vpop.f32.mrf.mxu0  ;;  %563 = vst.msk [vmem:[%s1027_s14 + $0x8] sm:$0xf] %vm463_vm1, %v555_v11 }
  0xac   : > { %v460_v5 = vpack.c.bf16 %v448_v1, %v448_v1  ;;  %v441_v6 = vadd.f32 %v812_v44, %v440_v4  ;;  %v548_v14 = vpop.f32.mrf.mxu3 }
  0xad   : > { %v549_v15 = vadd.f32 %v1014_v45, %v548_v14 }
  0xae   : > { %469 = vst.msk [vmem:[%s1020_s11 + $0x14] sm:$0xf] %vm463_vm1, %v460_v5  ;;  %v457_v10 = vpack.c.bf16 %v441_v6, %v441_v6  ;;  %v540_v19 = vpop.f32.mrf.mxu1 }
  0xaf   : > { %v559_v20 = vpack.c.bf16 %v549_v15, %v549_v15  ;;  %v541_v21 = vadd.f32 %v1014_v45, %v540_v19 }
  0xb0   : > { %466 = vst.msk [vmem:[%s1020_s11 + $0x8] sm:$0xf] %vm463_vm1, %v457_v10 }
  0xb1   : > { %v450_v12 = vpop.f32.mrf.mxu2  ;;  %567 = vst.msk [vmem:[%s1027_s14 + $0x18] sm:$0xf] %vm463_vm1, %v559_v20  ;;  %v556_v23 = vpack.c.bf16 %v541_v21, %v541_v21 }
  0xb2   : > { %v451_v13 = vadd.f32 %v812_v44, %v450_v12 }
  0xb3   : > { %v442_v16 = vpop.f32.mrf.mxu0  ;;  %564 = vst.msk [vmem:[%s1027_s14 + $0xc] sm:$0xf] %vm463_vm1, %v556_v23 }
  0xb4   : > { %v461_v17 = vpack.c.bf16 %v451_v13, %v451_v13  ;;  %v443_v18 = vadd.f32 %v812_v44, %v442_v16  ;;  %v550_v26 = vpop.f32.mrf.mxu3 }
  0xb5   : > { %v551_v27 = vadd.f32 %v1014_v45, %v550_v26 }
  0xb6   : > { %470 = vst.msk [vmem:[%s1020_s11 + $0x18] sm:$0xf] %vm463_vm1, %v461_v17  ;;  %v458_v22 = vpack.c.bf16 %v443_v18, %v443_v18 }
  0xb7   : > { %v560_v29 = vpack.c.bf16 %v551_v27, %v551_v27 }
  0xb8   : > { %467 = vst.msk [vmem:[%s1020_s11 + $0xc] sm:$0xf] %vm463_vm1, %v458_v22 }
  0xb9   : > { %v452_v24 = vpop.f32.mrf.mxu2  ;;  %568 = vst.msk [vmem:[%s1027_s14 + $0x1c] sm:$0xf] %vm463_vm1, %v560_v29 }
  0xba   : > { %v453_v25 = vadd.f32 %v812_v44, %v452_v24 }
  0xbc   : > { %v462_v28 = vpack.c.bf16 %v453_v25, %v453_v25 }
  0xbe   : > { %471 = vst.msk [vmem:[%s1020_s11 + $0x1c] sm:$0xf] %vm463_vm1, %v462_v28 }
  0xbf PF: > { %s20_s24 = sadd.s32 1, %s888_s24  }
  0xc0   : > { %p17_p7 = scmp.ge.s32.totalorder %s20_s24, 4  }
  0xc2   :  { %19 = sbr.rel (!%p17_p7) target bundleno = 2 (0x2), region = 98 }
  0xc7   :  { %608 = vsyncpa [#allocation3], 1 }
  0xc8   :  { %610 = vsyncpa [#allocation3 + $0x1], 1 }
  0xc9   :  { %611 = vsyncpa [#allocation5], 1 }

// kernel: detr_forward.38
= control target key start
LH: loop header
LB: loop body
LE: loop exit
PB: predicated region body
PF: predicated region fallthrough
CT: control target
= control target key end

     0   :  { %s385_s15 = smov 0   ;;  %s414_s0 = inlined_call_operand.vmem [shape: bf16[16,32], index: 0, kind: input, shape index: {}]   ;;  %s415_s1 = inlined_call_operand.vmem [shape: bf16[16,32], index: 1, kind: input, shape index: {}]   ;;  %s416_s2 = inlined_call_operand.vmem [shape: bf16[32,32], index: 2, kind: input, shape index: {}]   ;;  %s417_s3 = inlined_call_operand.vmem [shape: f32[1,32], index: 3, kind: input, shape index: {}]   ;;  %s418_s4 = inlined_call_operand.vmem [shape: bf16[16,32], index: 4, kind: output, shape index: {}]  }
   0x1 LB: > { %s322_s16 = sadd.s32 4294967295, %s358_s15   ;;  %p326_p0 = scmp.ge.s32.totalorder %s358_s15, 1  ;;  %s358_s15 = sphi %s385_s15, %s14_s15  }
   0x2   : > { %p170_p1 = scmp.lt.s32.totalorder %s358_s15, 3 }
   0x4   : > { %p171_p2 = pnand %p326_p0, %p170_p1 }
   0x5   : > { %p198_p3 = scmp.lt.s32.totalorder (!%p171_p2), %s322_s16, 1 }
   0x6   : > { %174 = sbr.rel (%p171_p2) target bundleno = 156 (0x9c), region = 36 }
   0xb   : > { %v342_v0 = vld [vmem:[%s416_s2 + $0x8] sm:$0xff]  ;;  %v341_v1 = vld [vmem:[%s416_s2] sm:$0xff]  ;;  %s420_s16 = smov (!%p198_p3, %s322_s16), 1  ;;  %vm237_vm0 = vcmask 261120   ;;  %vm255_vm1 = vcmask 257024  }
   0xc   : > { %247 = vmatpush.bf16.msra.mxu0 %v342_v0  ;;  %s327_s21 = sshll.u32 %s420_s16, 2  ;;  %v351_v8 = vld [vmem:[%s417_s3] ss:$0 sm:$0xff] }
   0xd   : > { %s201_s24 = scalar_lea.vmem %s414_s0, %s327_s21  ;;  %s205_s27 = scalar_lea.vmem %s415_s1, %s327_s21 }
   0xe   : > { %v211_v2 = vld [vmem:[%s201_s24] sm:$0xf]  ;;  %s209_s6 = scalar_lea.vmem %s418_s4, %s327_s21 }
   0xf   : > { %v213_v3 = vld [vmem:[%s205_s27] sm:$0xf]  ;;  %v212_v4 = vunpack.c.l.bf16 %v211_v2 }
  0x10   : > { %248 = vmatpush.bf16.msra.mxu0 %v341_v1  ;;  %v214_v5 = vunpack.c.l.bf16 %v213_v3 }
  0x12   : > { %v215_v6 = vadd.f32 %v214_v5, %v212_v4 }
  0x14   : > { %v216_v7 = vpack.c.bf16 %v215_v6, %v215_v6 }
  0x16   : > { %338 = vmatmul.msk.bf16.vlgmr.msra.gmra.mxu0 %vm237_vm0, %v216_v7 }
  0x93   : > { %v250_v9 = vpop.f32.mrf.mxu0 }
  0x94   : > { %v251_v10 = vadd.f32 %v351_v8, %v250_v9 }
  0x96   : > { %v254_v11 = vpack.c.bf16 %v251_v10, %v251_v10 }
  0x98   : > { %256 = vst.msk [vmem:[%s209_s6] sm:$0xf] %vm255_vm1, %v254_v11 }
  0x9b   : > { %v252_v12 = vpop.f32.mrf.mxu0 }
  0x9c PF: > { %s14_s15 = sadd.s32 1, %s358_s15  }
  0x9d   : > { %p11_p4 = scmp.ge.s32.totalorder %s14_s15, 4  }
  0x9f   :  { %13 = sbr.rel (!%p11_p4) target bundleno = 1 (0x1), region = 69 }

// kernel: detr_forward.35
= control target key start
LH: loop header
LB: loop body
LE: loop exit
PB: predicated region body
PF: predicated region fallthrough
CT: control target
= control target key end

     0   :  { %14 = vsyncpa [#allocation3], 0  ;;  %s866_s0 = inlined_call_operand.vmem [shape: bf16[16,32], index: 0, kind: input, shape index: {}]   ;;  %s867_s1 = inlined_call_operand.vmem [shape: bf16[16,32], index: 1, kind: input, shape index: {}]   ;;  %s868_s2 = inlined_call_operand.vmem [shape: bf16[32,64], index: 2, kind: input, shape index: {}]   ;;  %s869_s3 = inlined_call_operand.hbm [shape: f32[1,64], index: 3, kind: input, shape index: {}]   ;;  %s870_s4 = inlined_call_operand.vmem [shape: bf16[32,32], index: 4, kind: input, shape index: {}]   ;;  %s871_s5 = inlined_call_operand.hbm [shape: f32[1,32], index: 5, kind: input, shape index: {}]   ;;  %s872_s6 = inlined_call_operand.vmem [shape: bf16[16,32], index: 6, kind: output, shape index: {0}]   ;;  %s873_s7 = inlined_call_operand.vmem [shape: bf16[16,32], index: 7, kind: output, shape index: {1}]   ;;  %s874_s8 = inlined_call_operand.vmem [shape: bf16[16,32], index: 8, kind: output, shape index: {2}]  }
   0x1   :  { %15 = vsyncpa [#allocation5], 0  ;;  %s802_s27 = smov 0  }
   0x2 LB: > { %s255_s30 = sshll.u32 %s869_s3, 4  ;;  %s608_s9 = sadd.s32 4294967295, %s752_s27   ;;  %s752_s27 = sphi %s802_s27, %s21_s27   ;;  %s256_s30 = int_to_ptr.hbm [resolvable:$true] %s255_s30 }
   0x3   : > { %p610_p0 = scmp.ge.s32.totalorder %s752_s27, 1  ;;  %p240_p1 = scmp.lt.s32.totalorder %s752_s27, 3 }
   0x4   : > { %p661_p2 = scmp.eq.s32.totalorder %s608_s9, 0  ;;  %s754_s11 = smov [#allocation2]  }
   0x5   : > { %p813_p3 = pnand %p610_p0, %p240_p1  ;;  %s257_s12 = sshll.u32 %s754_s11, 4  ;;  %s258_s12 = int_to_ptr.vmem [resolvable:$true] %s257_s12 }
   0x6   : > { %s270_s15 = sshll.u32 %s871_s5, 4  ;;  %s755_s16 = smov [#allocation4]   ;;  %s271_s15 = int_to_ptr.hbm [resolvable:$true] %s270_s15 }
   0x7   : > { %p654_p4 = pneg %p813_p3  ;;  %s272_s17 = sshll.u32 %s755_s16, 4  ;;  %s273_s17 = int_to_ptr.vmem [resolvable:$true] %s272_s17 }
   0x8   : > { %299 = sbr.rel (%p813_p3) target bundleno = 275 (0x113), region = 44 }
   0x9   : > { %p655_p5 = pnand %p661_p2, %p654_p4 }
   0xb   : > { %657 = dma.hbm_to_vmem [thread:$0]  (!%p655_p5), %s256_s30, 16, %s258_s12, [#allocation3]  }
   0xc   : > { %660 = dma.hbm_to_vmem [thread:$0]  (!%p655_p5), %s271_s15, 16, %s273_s17, [#allocation5]  }
   0xd   : > { %743 = dma.done.wait (%p661_p2), [#allocation3], 16  }
   0xe   : > { %745 = vsyncadd (%p661_p2), [#allocation3], 4294967280 }
   0xf   : > { %747 = dma.done.wait (%p661_p2), [#allocation5], 16  }
  0x10   : > { %749 = vsyncadd (%p661_p2), [#allocation5], 4294967280  ;;  %p349_p6 = scmp.lt.s32.totalorder %s608_s9, 1  ;;  %v643_v0 = vld [vmem:[%s868_s2 + $0x8] sm:$0xff]  ;;  %v642_v5 = vld [vmem:[%s868_s2] sm:$0xff]  ;;  %vm396_vm0 = vcmask 261120  }
  0x11   : > { %v645_v4 = vld [vmem:[%s870_s4 + $0x8] sm:$0xff]  ;;  %406 = vmatpush.bf16.msra.mxu0 %v643_v0  ;;  %v644_v7 = vld [vmem:[%s870_s4] sm:$0xff]  ;;  %vm414_vm1 = vcmask 257024   ;;  %s756_s19 = smov 96  }
  0x12   : > { %s877_s9 = smov (!%p349_p6, %s608_s9), 1  ;;  %450 = vmatpush.bf16.msra.mxu1 %v645_v4  ;;  %v676_v10 = vld [vmem:[#allocation2] ss:$0 sm:$0xff]  ;;  %v677_v11 = vld [vmem:[#allocation4] ss:$0 sm:$0xff] }
  0x13   : > { %s829_s18 = sshll.u32 %s877_s9, 2 }
  0x14   : > { %s352_s21 = scalar_lea.vmem %s866_s0, %s829_s18  ;;  %s356_s24 = scalar_lea.vmem %s867_s1, %s829_s18 }
  0x15   : > { %v370_v1 = vld [vmem:[%s352_s21] sm:$0xf]  ;;  %407 = vmatpush.bf16.msra.mxu0 %v642_v5  ;;  %s360_s14 = scalar_lea.vmem %s872_s6, %s829_s18  ;;  %s368_s17 = scalar_lea.vmem %s874_s8, %s829_s18 }
  0x16   : > { %v371_v2 = vunpack.c.l.bf16 %v370_v1  ;;  %v372_v3 = vld [vmem:[%s356_s24] sm:$0xf]  ;;  %451 = vmatpush.bf16.msra.mxu1 %v644_v7  ;;  %s364_s22 = scalar_lea.vmem %s873_s7, %s829_s18 }
  0x17   : > { %v373_v6 = vunpack.c.l.bf16 %v372_v3 }
  0x19   : > { %v374_v8 = vadd.f32 %v373_v6, %v371_v2  ;;  %639 = vmatmul.msk.bf16.vlgmr.msra.gmra.mxu1 %vm396_vm0, %v370_v1 }
  0x1b   : > { %v375_v9 = vpack.c.bf16 %v374_v8, %v374_v8 }
  0x1d   : > { %630 = vmatmul.msk.bf16.vlgmr.msra.gmra.mxu0 %vm396_vm0, %v375_v9 }
  0x96   : > { %v453_v14 = vpop.f32.mrf.mxu1 }
  0x97   : > { %v454_v15 = vadd.f32 %v677_v11, %v453_v14 }
  0x99   : > { %v457_v17 = vpack.c.bf16 %v454_v15, %v454_v15 }
  0x9a   : > { %v409_v12 = vpop.f32.mrf.mxu0 }
  0x9b   : > { %v410_v13 = vadd.f32 %v676_v10, %v409_v12  ;;  %458 = vst.msk [vmem:[%s368_s17] sm:$0xf] %vm414_vm1, %v457_v17 }
  0x9d   : > { %v413_v16 = vpack.c.bf16 %v410_v13, %v410_v13 }
  0x9e   : > { %v455_v19 = vpop.f32.mrf.mxu1 }
  0x9f   : > { %417 = vrot.lane.b32.xlu0 %v413_v16, %s756_s19  ;;  %415 = vst.msk [vmem:[%s360_s14] sm:$0xf] %vm414_vm1, %v413_v16 }
  0xa2   : > { %v411_v18 = vpop.f32.mrf.mxu0 }
 0x111   : > { %v418_v20 = vpop.permute.xlu0 %417 }
 0x112   : > { %420 = vst.msk [vmem:[%s364_s22] sm:$0xf] %vm414_vm1, %v418_v20 }
 0x113 PF: > { %s21_s27 = sadd.s32 1, %s752_s27  }
 0x114   : > { %p18_p7 = scmp.ge.s32.totalorder %s21_s27, 4  }
 0x116   :  { %20 = sbr.rel (!%p18_p7) target bundleno = 2 (0x2), region = 110 }
 0x11b   :  { %506 = vsyncpa [#allocation3], 1 }
 0x11c   :  { %508 = vsyncpa [#allocation3 + $0x1], 1 }
 0x11d   :  { %509 = vsyncpa [#allocation5], 1 }

// kernel: detr_forward.37
= control target key start
LH: loop header
LB: loop body
LE: loop exit
PB: predicated region body
PF: predicated region fallthrough
CT: control target
= control target key end

     0   :  { %11 = vsyncpa [#allocation3], 0  ;;  %s697_s0 = inlined_call_operand.vmem [shape: bf16[16,32], index: 0, kind: input, shape index: {}]   ;;  %s698_s1 = inlined_call_operand.vmem [shape: bf16[16,32], index: 1, kind: input, shape index: {}]   ;;  %s699_s2 = inlined_call_operand.vmem [shape: bf16[32,32], index: 2, kind: input, shape index: {}]   ;;  %s700_s3 = inlined_call_operand.vmem [shape: f32[1,32], index: 3, kind: input, shape index: {}]   ;;  %s701_s4 = inlined_call_operand.hbm [shape: f32[1,32], index: 4, kind: input, shape index: {}]   ;;  %s702_s5 = inlined_call_operand.hbm [shape: f32[1,32], index: 5, kind: input, shape index: {}]   ;;  %s703_s6 = inlined_call_operand.vmem [shape: bf16[16,32], index: 6, kind: output, shape index: {}]  }
   0x1   :  { %12 = vsyncpa [#allocation5], 0  ;;  %s641_s21 = smov 0  }
   0x2 LB: > { %s203_s24 = sshll.u32 %s701_s4, 4  ;;  %s465_s25 = sadd.s32 4294967295, %s601_s21   ;;  %s601_s21 = sphi %s641_s21, %s18_s21   ;;  %s204_s24 = int_to_ptr.hbm [resolvable:$true] %s203_s24 }
   0x3   : > { %p467_p0 = scmp.ge.s32.totalorder %s601_s21, 1  ;;  %p185_p1 = scmp.lt.s32.totalorder %s601_s21, 3 }
   0x4   : > { %p505_p2 = scmp.eq.s32.totalorder %s465_s25, 0  ;;  %s603_s27 = smov [#allocation2]  }
   0x5   : > { %p652_p3 = pnand %p467_p0, %p185_p1  ;;  %s205_s28 = sshll.u32 %s603_s27, 4  ;;  %s206_s28 = int_to_ptr.vmem [resolvable:$true] %s205_s28 }
   0x6   : > { %s215_s7 = sshll.u32 %s702_s5, 4  ;;  %s604_s8 = smov [#allocation4]   ;;  %s216_s7 = int_to_ptr.hbm [resolvable:$true] %s215_s7 }
   0x7   : > { %p498_p4 = pneg %p652_p3  ;;  %s217_s9 = sshll.u32 %s604_s8, 4  ;;  %s218_s9 = int_to_ptr.vmem [resolvable:$true] %s217_s9 }
   0x8   : > { %244 = sbr.rel (%p652_p3) target bundleno = 425 (0x1a9), region = 44 }
   0x9   : > { %p499_p5 = pnand %p505_p2, %p498_p4 }
   0xb   : > { %501 = dma.hbm_to_vmem [thread:$0]  (!%p499_p5), %s204_s24, 16, %s206_s28, [#allocation3]  }
   0xc   : > { %504 = dma.hbm_to_vmem [thread:$0]  (!%p499_p5), %s216_s7, 16, %s218_s9, [#allocation5]  }
   0xd   : > { %592 = dma.done.wait (%p505_p2), [#allocation3], 16  }
   0xe   : > { %594 = vsyncadd (%p505_p2), [#allocation3], 4294967280 }
   0xf   : > { %596 = dma.done.wait (%p505_p2), [#allocation5], 16  }
  0x10   : > { %598 = vsyncadd (%p505_p2), [#allocation5], 4294967280  ;;  %p282_p6 = scmp.lt.s32.totalorder %s465_s25, 1  ;;  %v489_v0 = vld [vmem:[%s699_s2 + $0x8] sm:$0xff]  ;;  %v488_v1 = vld [vmem:[%s699_s2] sm:$0xff]  ;;  %vm316_vm0 = vcmask 261120  }
  0x11   : > { %326 = vmatpush.bf16.msra.mxu0 %v489_v0  ;;  %v520_v4 = vld [vmem:[%s700_s3] ss:$0 sm:$0xff]  ;;  %v605_v11 = vmov 32.0   ;;  %v522_v34 = vld [vmem:[#allocation4] ss:$0 sm:$0xff]  ;;  %vm376_vm5 = vcmask 257024  }
  0x12   : > { %s706_s25 = smov (!%p282_p6, %s465_s25), 1  ;;  %523 = vrcp.f32 %v605_v11  ;;  %v521_v32 = vld [vmem:[#allocation2] ss:$0 sm:$0xff] }
  0x13   : > { %s671_s12 = sshll.u32 %s706_s25, 2 }
  0x14   : > { %s285_s17 = scalar_lea.vmem %s697_s0, %s671_s12  ;;  %s289_s20 = scalar_lea.vmem %s698_s1, %s671_s12 }
  0x15   : > { %327 = vmatpush.bf16.msra.mxu0 %v488_v1  ;;  %v295_v2 = vld [vmem:[%s285_s17] sm:$0xf]  ;;  %s293_s26 = scalar_lea.vmem %s703_s6, %s671_s12 }
  0x16   : > { %v333_v3 = vld [vmem:[%s289_s20] sm:$0xf] }
  0x17   : > { %v334_v5 = vunpack.c.l.bf16 %v333_v3 }
  0x18   : > { %485 = vmatmul.msk.bf16.vlgmr.msra.gmra.mxu0 %vm316_vm0, %v295_v2  ;;  %v524_v12 = vpop.eup %523 }
  0x19   : > { %v342_v13 = vmul.f32 32.0, %v524_v12  ;;  %vm346_vm1 = vweird.f32 %v524_v12 }
  0x1b   : > { %v343_v14 = vsub.f32 1.0, %v342_v13 }
  0x1d   : > { %v344_v15 = vmul.f32 %v524_v12, %v343_v14 }
  0x1f   : > { %v345_v16 = vadd.f32 %v524_v12, %v344_v15 }
  0x21   : > { %v347_v17 = vsel %vm346_vm1, %v524_v12, %v345_v16 }
  0x95   : > { %v329_v6 = vpop.f32.mrf.mxu0 }
  0x96   : > { %v330_v7 = vadd.f32 %v520_v4, %v329_v6 }
  0x98   : > { %v335_v8 = vadd.f32 %v334_v5, %v330_v7 }
  0x9a   : > { %v338_v9 = vsel %vm316_vm0, %v335_v8, 0.0 }
  0x9b   : > { %339 = vadd.xlane.f32.xlu0 %v338_v9 }
  0x9d   : > { %v331_v10 = vpop.f32.mrf.mxu0 }
 0x10e   : > { %v340_v18 = vpop.xlane.xlu0 %339 }
 0x10f   : > { %v348_v19 = vmul.f32 %v347_v17, %v340_v18 }
 0x111   : > { %v349_v20 = vsub.f32 %v335_v8, %v348_v19 }
 0x113   : > { %v350_v21 = vmul.f32 %v349_v20, %v349_v20 }
 0x115   : > { %v351_v22 = vsel %vm316_vm0, %v350_v21, 0.0 }
 0x116   : > { %352 = vadd.xlane.f32.xlu0 %v351_v22 }
 0x189   : > { %v353_v23 = vpop.xlane.xlu0 %352 }
 0x18a   : > { %v354_v24 = vmul.f32 %v353_v23, %v347_v17 }
 0x18c   : > { %v355_v25 = vadd.f32 1e-05, %v354_v24 }
 0x18e   : > { %525 = vrsqrt.f32 %v355_v25  ;;  %vm362_vm3 = vweird.f32 %v355_v25 }
 0x194   : > { %v526_v26 = vpop.eup %525 }
 0x195   : > { %v357_v27 = vmul.f32 %v526_v26, %v355_v25  ;;  %vm363_vm2 = vweird.f32 %v526_v26 }
 0x196   : > { %vm364_vm4 = vmor %vm362_vm3, %vm363_vm2 }
 0x197   : > { %v358_v28 = vmul.f32 %v526_v26, %v357_v27 }
 0x199   : > { %v359_v29 = vmul.f32 0.5, %v358_v28 }
 0x19b   : > { %v360_v30 = vsub.f32 1.5, %v359_v29 }
 0x19d   : > { %v361_v31 = vmul.f32 %v526_v26, %v360_v30 }
 0x19f   : > { %v365_v33 = vsel %vm364_vm4, %v526_v26, %v361_v31 }
 0x1a0   : > { %v366_v35 = vmul.f32 %v365_v33, %v349_v20 }
 0x1a2   : > { %v370_v36 = vmul.f32 %v521_v32, %v366_v35 }
 0x1a4   : > { %v374_v37 = vadd.f32 %v522_v34, %v370_v36 }
 0x1a6   : > { %v375_v38 = vpack.c.bf16 %v374_v37, %v374_v37 }
 0x1a8   : > { %377 = vst.msk [vmem:[%s293_s26] sm:$0xf] %vm376_vm5, %v375_v38 }
 0x1a9 PF: > { %s18_s21 = sadd.s32 1, %s601_s21  }
 0x1aa   : > { %p15_p7 = scmp.ge.s32.totalorder %s18_s21, 4  }
 0x1ac   :  { %17 = sbr.rel (!%p15_p7) target bundleno = 2 (0x2), region = 86 }
 0x1b1   :  { %397 = vsyncpa [#allocation3], 1 }
 0x1b2   :  { %399 = vsyncpa [#allocation3 + $0x1], 1 }
 0x1b3   :  { %400 = vsyncpa [#allocation5], 1 }

// kernel: detr_forward.36
= control target key start
LH: loop header
LB: loop body
LE: loop exit
PB: predicated region body
PF: predicated region fallthrough
CT: control target
= control target key end

     0   :  { %s697_s12 = smov 0   ;;  %s699_s13 = smov 0   ;;  %s779_s0 = inlined_call_operand.vmem [shape: bf16[2,8,32], index: 0, kind: input, shape index: {}]   ;;  %s780_s1 = inlined_call_operand.vmem [shape: bf16[2,8,32], index: 1, kind: input, shape index: {}]   ;;  %s781_s2 = inlined_call_operand.vmem [shape: bf16[2,8,32], index: 2, kind: input, shape index: {}]   ;;  %s782_s3 = inlined_call_operand.vmem [shape: bf16[2,8,32], index: 3, kind: output, shape index: {}]  }
   0x1   :  { %s701_s14 = smov 0  }
   0x2 LB: > { %s25_s15 = sadd.s32 1, %s665_s13  ;;  %p586_p0 = scmp.ge.s32.totalorder %s669_s14, 1  ;;  %s669_s14 = sphi %s701_s14, %s13_s14   ;;  %s665_s13 = sphi %s699_s13, %s784_s13   ;;  %s661_s12 = sphi %s697_s12, %s783_s12  }
   0x3   : > { %p27_p1 = scmp.ge.s32.totalorder %s25_s15, 2  ;;  %p173_p2 = scmp.lt.s32.totalorder %s669_s14, 3 }
   0x5   : > { %s786_s15 = smov (%p27_p1, %s25_s15), 0  ;;  %p174_p3 = pnand %p586_p0, %p173_p2 }
   0x6   : > { %p209_p4 = scmp.lt.s32.totalorder (!%p174_p3), %s661_s12, 1  ;;  %s671_s23 = smov (!%p174_p3), 112  }
   0x7   : > { %177 = sbr.rel (%p174_p3) target bundleno = 1078 (0x436), region = 32  ;;  %s672_s24 = smov (!%p174_p3), 104  }
   0x8   : > { %s673_s25 = smov (!%p174_p3), 120   ;;  %s674_s29 = smov (!%p174_p3), 8  }
   0x9   : > { %s675_s30 = smov (!%p174_p3), 16   ;;  %s676_s4 = smov (!%p174_p3), 24  }
   0xc   : > { %s788_s12 = smov (!%p209_p4, %s661_s12), 1  ;;  %vm235_vm0 = vcmask 64512   ;;  %vm270_vm1 = vcmask 1043456   ;;  %vm477_vm2 = vcmask 130048   ;;  %vm479_vm3 = vcmask 195584  }
   0xd   : > { %s715_s16 = sshll.u32 %s788_s12, 2  ;;  %vm482_vm4 = vcmask 257024  }
   0xe   : > { %s219_s19 = scalar_lea.vmem %s780_s1, %s715_s16  ;;  %s215_s22 = scalar_lea.vmem %s779_s0, %s715_s16 }
   0xf   : > { %v233_v0 = vld [vmem:[%s219_s19] sm:$0xf]  ;;  %s223_s28 = scalar_lea.vmem %s781_s2, %s715_s16  ;;  %s230_s7 = scalar_lea.vmem %s782_s3, %s715_s16 }
  0x10   : > { %v240_v1 = vsel %vm235_vm0, %v233_v0, 0  ;;  %v232_v2 = vld [vmem:[%s215_s22] sm:$0xf]  ;;  %v293_v3 = vunpack.c.l.b16 %v233_v0 }
  0x11   : > { %249 = vmatpush.bf16.xpose.msra.mxu0 %v240_v1  ;;  %v288_v5 = vunpack.c.l.b16 %v232_v2  ;;  %v234_v20 = vld [vmem:[%s223_s28] sm:$0xf] }
  0x12   : > { %v294_v4 = vpack.c.b16 %v293_v3, %v293_v3  ;;  %v272_v21 = vsel %vm270_vm1, %v234_v20, 0  ;;  %v329_v41 = vunpack.c.l.b16 %v234_v20 }
  0x13   : > { %v289_v6 = vpack.c.b16 %v288_v5, %v288_v5  ;;  %281 = vmatpush.bf16.msra.mxu1 %v272_v21 }
  0x14   : > { %354 = vrot.lane.b32.xlu2 %v294_v4, %s671_s23  ;;  %v330_v42 = vpack.c.b16 %v329_v41, %v329_v41 }
  0x18   : > { %591 = vmatmul.msk.bf16.vlgmr.msra.gmra.mxu0 %vm235_vm0, %v232_v2 }
  0x1c   : > { %410 = vrot.lane.b32.xlu2 %v294_v4, %s672_s24 }
  0x24   : > { %352 = vrot.lane.b32.xlu2 %v289_v6, %s671_s23 }
  0x2c   : > { %408 = vrot.lane.b32.xlu2 %v289_v6, %s672_s24 }
  0x6e   : > { %v355_v10 = vpop.permute.xlu2 %354 }
  0x6f   : > { %v360_v22 = vsel %vm235_vm0, %v355_v10, 0 }
  0x70   : > { %369 = vmatpush.bf16.xpose.msrb.mxu1 %v360_v22 }
  0x76   : > { %v411_v11 = vpop.permute.xlu2 %410 }
  0x77   : > { %v416_v16 = vsel %vm235_vm0, %v411_v11, 0 }
  0x78   : > { %425 = vmatpush.bf16.xpose.msrb.mxu0 %v416_v16 }
  0x7e   : > { %v353_v15 = vpop.permute.xlu2 %352 }
  0x86   : > { %v409_v19 = vpop.permute.xlu2 %408 }
  0x87   : > { %597 = vmatmul.msk.bf16.vlgmr.msrb.gmra.mxu0 %vm235_vm0, %v409_v19 }
  0x95   : > { %v251_v7 = vpop.f32.mrf.mxu0 }
  0x96   : > { %v255_v8 = vsel %vm235_vm0, %v251_v7, -inf }
  0x97   : > { %256 = vmax.xlane.f32.xlu0 %v255_v8 }
  0x9d   : > { %v253_v9 = vpop.f32.mrf.mxu0 }
  0xab   : > { %295 = vrot.lane.b32.xlu0 %v294_v4, %s673_s25 }
 0x104   : > { %v427_v29 = vpop.f32.mrf.mxu0 }
 0x105   : > { %v431_v30 = vsel %vm235_vm0, %v427_v29, -inf }
 0x10a   : > { %v257_v12 = vpop.xlane.xlu0 %256 }
 0x10b   : > { %v258_v13 = vsub.f32 %v251_v7, %v257_v12 }
 0x10c   : > { %v429_v31 = vpop.f32.mrf.mxu0 }
 0x10d   : > { %v259_v14 = vmul.f32 1.442695, %v258_v13 }
 0x10f   : > { %631 = vpow2.f32 %v259_v14 }
 0x115   : > { %v632_v17 = vpop.eup %631 }
 0x116   : > { %v261_v18 = vsel %vm235_vm0, %v632_v17, 0.0 }
 0x117   : > { %262 = vadd.xlane.f32.xlu1 %v261_v18 }
 0x11d   : > { %v296_v23 = vpop.permute.xlu0 %295 }
 0x11e   : > { %v301_v24 = vsel %vm235_vm0, %v296_v23, 0 }
 0x11f   : > { %310 = vmatpush.bf16.xpose.msra.mxu2 %v301_v24 }
 0x130   : > { %290 = vrot.lane.b32.xlu1 %v289_v6, %s673_s25 }
 0x15a   : > { %432 = vmax.xlane.f32.xlu1 %v431_v30 }
 0x18a   : > { %v263_v25 = vpop.xlane.xlu1 %262 }
 0x18b   : > { %633 = vrcp.f32 %v263_v25 }
 0x191   : > { %v634_v26 = vpop.eup %633 }
 0x192   : > { %v265_v27 = vmul.f32 %v634_v26, %v632_v17 }
 0x194   : > { %v266_v28 = vpack.c.bf16 %v265_v27, %v265_v27 }
 0x196   : > { %592 = vmatmul.msk.bf16.vlgmr.msra.gmra.mxu1 %vm235_vm0, %v266_v28 }
 0x1a2   : > { %v291_v32 = vpop.permute.xlu1 %290 }
 0x1a3   : > { %593 = vmatmul.msk.bf16.vlgmr.msra.gmra.mxu2 %vm235_vm0, %v291_v32 }
 0x1a6   : > { %595 = vmatmul.msk.bf16.vlgmr.msrb.gmra.mxu1 %vm235_vm0, %v353_v15 }
 0x1cd   : > { %v433_v45 = vpop.xlane.xlu1 %432 }
 0x1ce   : > { %v434_v49 = vsub.f32 %v427_v29, %v433_v45 }
 0x1d0   : > { %v435_v51 = vmul.f32 1.442695, %v434_v49 }
 0x213   : > { %v748_v33 = vpop.f32.mrf.mxu1 }
 0x21b   : > { %v285_v34 = vpop.f32.mrf.mxu1 }
 0x223   : > { %v371_v35 = vpop.f32.mrf.mxu1 }
 0x224   : > { %v375_v36 = vsel %vm235_vm0, %v371_v35, -inf }
 0x225   : > { %376 = vmax.xlane.f32.xlu2 %v375_v36 }
 0x226   : > { %v312_v37 = vpop.f32.mrf.mxu2 }
 0x227   : > { %v316_v38 = vsel %vm235_vm0, %v312_v37, -inf }
 0x228   : > { %317 = vmax.xlane.f32.xlu0 %v316_v38 }
 0x22b   : > { %v373_v39 = vpop.f32.mrf.mxu1 }
 0x22e   : > { %v314_v40 = vpop.f32.mrf.mxu2 }
 0x23d   : > { %331 = vrot.lane.b32.xlu2 %v330_v42, %s673_s25 }
 0x298   : > { %v377_v43 = vpop.xlane.xlu2 %376 }
 0x299   : > { %v378_v44 = vsub.f32 %v371_v35, %v377_v43 }
 0x29b   : > { %v379_v46 = vmul.f32 1.442695, %v378_v44  ;;  %v318_v47 = vpop.xlane.xlu0 %317 }
 0x29c   : > { %v319_v48 = vsub.f32 %v312_v37, %v318_v47 }
 0x29d   : > { %635 = vpow2.f32 %v379_v46 }
 0x29e   : > { %v320_v50 = vmul.f32 1.442695, %v319_v48 }
 0x2a0   : > { %637 = vpow2.f32 %v320_v50  ;;  %v332_v58 = vpop.permute.xlu2 %331 }
 0x2a1   : > { %639 = vpow2.f32 %v435_v51  ;;  %v337_v59 = vsel %vm270_vm1, %v332_v58, 0 }
 0x2a2   : > { %346 = vmatpush.bf16.msra.mxu3 %v337_v59 }
 0x2a3   : > { %v636_v52 = vpop.eup %635 }
 0x2a4   : > { %v381_v53 = vsel %vm235_vm0, %v636_v52, 0.0 }
 0x2a5   : > { %382 = vadd.xlane.f32.xlu1 %v381_v53 }
 0x2a6   : > { %v638_v54 = vpop.eup %637 }
 0x2a7   : > { %v322_v55 = vsel %vm235_vm0, %v638_v54, 0.0  ;;  %v640_v56 = vpop.eup %639 }
 0x2a8   : > { %323 = vadd.xlane.f32.xlu0 %v322_v55  ;;  %v437_v57 = vsel %vm235_vm0, %v640_v56, 0.0 }
 0x2b0   : > { %438 = vadd.xlane.f32.xlu0 %v437_v57 }
 0x2be   : > { %387 = vrot.lane.b32.xlu1 %v330_v42, %s671_s23 }
 0x2c4   : > { %443 = vrot.lane.b32.xlu0 %v330_v42, %s672_s24 }
 0x318   : > { %v383_v63 = vpop.xlane.xlu1 %382 }
 0x31b   : > { %v324_v60 = vpop.xlane.xlu0 %323 }
 0x31c   : > { %641 = vrcp.f32 %v324_v60 }
 0x31d   : > { %643 = vrcp.f32 %v383_v63 }
 0x322   : > { %v642_v61 = vpop.eup %641 }
 0x323   : > { %v326_v62 = vmul.f32 %v642_v61, %v638_v54  ;;  %v439_v1 = vpop.xlane.xlu0 %438  ;;  %v644_v2 = vpop.eup %643 }
 0x324   : > { %645 = vrcp.f32 %v439_v1  ;;  %v385_v4 = vmul.f32 %v644_v2, %v636_v52 }
 0x325   : > { %v327_v0 = vpack.c.bf16 %v326_v62, %v326_v62 }
 0x326   : > { %v386_v8 = vpack.c.bf16 %v385_v4, %v385_v4 }
 0x327   : > { %594 = vmatmul.msk.bf16.vlgmr.msra.gmra.mxu3 %vm235_vm0, %v327_v0 }
 0x32a   : > { %v646_v6 = vpop.eup %645 }
 0x32b   : > { %v441_v7 = vmul.f32 %v646_v6, %v640_v56 }
 0x32d   : > { %v442_v11 = vpack.c.bf16 %v441_v7, %v441_v7 }
 0x330   : > { %v388_v3 = vpop.permute.xlu1 %387 }
 0x331   : > { %v393_v5 = vsel %vm270_vm1, %v388_v3, 0 }
 0x332   : > { %402 = vmatpush.bf16.msrb.mxu3 %v393_v5 }
 0x336   : > { %v444_v9 = vpop.permute.xlu0 %443 }
 0x337   : > { %596 = vmatmul.msk.bf16.vlgmr.msrb.gmra.mxu3 %vm235_vm0, %v386_v8  ;;  %v449_v10 = vsel %vm270_vm1, %v444_v9, 0 }
 0x338   : > { %458 = vmatpush.bf16.msrb.mxu2 %v449_v10 }
 0x33b   : > { %598 = vmatmul.msk.bf16.vlgmr.msrb.gmra.mxu2 %vm235_vm0, %v442_v11 }
 0x3aa   : > { %v348_v12 = vpop.f32.mrf.mxu3 }
 0x3ab   : > { %465 = vrot.lane.b32.xlu2 %v348_v12, %s674_s29 }
 0x3b2   : > { %v350_v13 = vpop.f32.mrf.mxu3 }
 0x3ba   : > { %v404_v14 = vpop.f32.mrf.mxu3 }
 0x3bb   : > { %469 = vrot.lane.b32.xlu2 %v404_v14, %s675_s30 }
 0x3be   : > { %v460_v15 = vpop.f32.mrf.mxu2 }
 0x3bf   : > { %473 = vrot.lane.b32.xlu0 %v460_v15, %s676_s4 }
 0x3c2   : > { %v406_v16 = vpop.f32.mrf.mxu3 }
 0x3c6   : > { %v462_v17 = vpop.f32.mrf.mxu2 }
 0x405   : > { %v466_v18 = vpop.permute.xlu2 %465 }
 0x406   : > { %v476_v20 = vsel %vm235_vm0, %v748_v33, %v466_v18 }
 0x415   : > { %v470_v19 = vpop.permute.xlu2 %469 }
 0x416   : > { %v478_v21 = vsel %vm477_vm2, %v476_v20, %v470_v19 }
 0x431   : > { %v474_v22 = vpop.permute.xlu0 %473 }
 0x432   : > { %v480_v23 = vsel %vm479_vm3, %v478_v21, %v474_v22 }
 0x433   : > { %v481_v24 = vpack.c.bf16 %v480_v23, %v480_v23 }
 0x435   : > { %483 = vst.msk [vmem:[%s230_s7] sm:$0xf] %vm482_vm4, %v481_v24 }
 0x436 PF: > { %s13_s14 = sadd.s32 1, %s669_s14   ;;  %s783_s12 = smov %s665_s13 }
 0x437   : > { %p10_p5 = scmp.ge.s32.totalorder %s13_s14, 4   ;;  %s784_s13 = smov %s786_s15 }
 0x439   :  { %12 = sbr.rel (!%p10_p5) target bundleno = 2 (0x2), region = 68 }

// kernel: detr_forward.41
= control target key start
LH: loop header
LB: loop body
LE: loop exit
PB: predicated region body
PF: predicated region fallthrough
CT: control target
= control target key end

     0   :  { %s494_s21 = smov 0   ;;  %s537_s0 = inlined_call_operand.vmem [shape: bf16[16,32], index: 0, kind: input, shape index: {}]   ;;  %s538_s1 = inlined_call_operand.vmem [shape: bf16[16,32], index: 1, kind: input, shape index: {}]   ;;  %s539_s2 = inlined_call_operand.vmem [shape: bf16[32,32], index: 2, kind: input, shape index: {}]   ;;  %s540_s3 = inlined_call_operand.vmem [shape: f32[1,32], index: 3, kind: input, shape index: {}]   ;;  %s541_s4 = inlined_call_operand.vmem [shape: f32[1,32], index: 4, kind: input, shape index: {}]   ;;  %s542_s5 = inlined_call_operand.vmem [shape: f32[1,32], index: 5, kind: input, shape index: {}]   ;;  %s543_s6 = inlined_call_operand.vmem [shape: bf16[16,32], index: 6, kind: output, shape index: {}]  }
   0x1 LB: > { %s413_s22 = sadd.s32 4294967295, %s456_s21   ;;  %p417_p0 = scmp.ge.s32.totalorder %s456_s21, 1  ;;  %s456_s21 = sphi %s494_s21, %s16_s21  }
   0x2   : > { %p220_p1 = scmp.lt.s32.totalorder %s456_s21, 3 }
   0x4   : > { %p221_p2 = pnand %p417_p0, %p220_p1 }
   0x5   : > { %p252_p3 = scmp.lt.s32.totalorder (!%p221_p2), %s413_s22, 1 }
   0x6   : > { %224 = sbr.rel (%p221_p2) target bundleno = 420 (0x1a4), region = 44 }
   0xb   : > { %v433_v0 = vld [vmem:[%s539_s2 + $0x8] sm:$0xff]  ;;  %v432_v1 = vld [vmem:[%s539_s2] sm:$0xff]  ;;  %s545_s22 = smov (!%p252_p3, %s413_s22), 1  ;;  %vm286_vm0 = vcmask 261120   ;;  %v458_v11 = vmov 32.0   ;;  %vm346_vm5 = vcmask 257024  }
   0xc   : > { %296 = vmatpush.bf16.msra.mxu0 %v433_v0  ;;  %s508_s27 = sshll.u32 %s545_s22, 2  ;;  %v443_v4 = vld [vmem:[%s540_s3] ss:$0 sm:$0xff]  ;;  %446 = vrcp.f32 %v458_v11 }
   0xd   : > { %s255_s30 = scalar_lea.vmem %s537_s0, %s508_s27  ;;  %s259_s9 = scalar_lea.vmem %s538_s1, %s508_s27  ;;  %v444_v32 = vld [vmem:[%s541_s4] ss:$0 sm:$0xff] }
   0xe   : > { %v265_v2 = vld [vmem:[%s255_s30] sm:$0xf]  ;;  %s263_s18 = scalar_lea.vmem %s543_s6, %s508_s27 }
   0xf   : > { %v303_v3 = vld [vmem:[%s259_s9] sm:$0xf] }
  0x10   : > { %297 = vmatpush.bf16.msra.mxu0 %v432_v1  ;;  %v304_v5 = vunpack.c.l.bf16 %v303_v3  ;;  %v445_v34 = vld [vmem:[%s542_s5] ss:$0 sm:$0xff] }
  0x12   : > { %v447_v12 = vpop.eup %446 }
  0x13   : > { %429 = vmatmul.msk.bf16.vlgmr.msra.gmra.mxu0 %vm286_vm0, %v265_v2  ;;  %v312_v13 = vmul.f32 32.0, %v447_v12  ;;  %vm316_vm1 = vweird.f32 %v447_v12 }
  0x15   : > { %v313_v14 = vsub.f32 1.0, %v312_v13 }
  0x17   : > { %v314_v15 = vmul.f32 %v447_v12, %v313_v14 }
  0x19   : > { %v315_v16 = vadd.f32 %v447_v12, %v314_v15 }
  0x1b   : > { %v317_v17 = vsel %vm316_vm1, %v447_v12, %v315_v16 }
  0x90   : > { %v299_v6 = vpop.f32.mrf.mxu0 }
  0x91   : > { %v300_v7 = vadd.f32 %v443_v4, %v299_v6 }
  0x93   : > { %v305_v8 = vadd.f32 %v304_v5, %v300_v7 }
  0x95   : > { %v308_v9 = vsel %vm286_vm0, %v305_v8, 0.0 }
  0x96   : > { %309 = vadd.xlane.f32.xlu0 %v308_v9 }
  0x98   : > { %v301_v10 = vpop.f32.mrf.mxu0 }
 0x109   : > { %v310_v18 = vpop.xlane.xlu0 %309 }
 0x10a   : > { %v318_v19 = vmul.f32 %v317_v17, %v310_v18 }
 0x10c   : > { %v319_v20 = vsub.f32 %v305_v8, %v318_v19 }
 0x10e   : > { %v320_v21 = vmul.f32 %v319_v20, %v319_v20 }
 0x110   : > { %v321_v22 = vsel %vm286_vm0, %v320_v21, 0.0 }
 0x111   : > { %322 = vadd.xlane.f32.xlu0 %v321_v22 }
 0x184   : > { %v323_v23 = vpop.xlane.xlu0 %322 }
 0x185   : > { %v324_v24 = vmul.f32 %v323_v23, %v317_v17 }
 0x187   : > { %v325_v25 = vadd.f32 1e-05, %v324_v24 }
 0x189   : > { %448 = vrsqrt.f32 %v325_v25  ;;  %vm332_vm3 = vweird.f32 %v325_v25 }
 0x18f   : > { %v449_v26 = vpop.eup %448 }
 0x190   : > { %v327_v27 = vmul.f32 %v449_v26, %v325_v25  ;;  %vm333_vm2 = vweird.f32 %v449_v26 }
 0x191   : > { %vm334_vm4 = vmor %vm332_vm3, %vm333_vm2 }
 0x192   : > { %v328_v28 = vmul.f32 %v449_v26, %v327_v27 }
 0x194   : > { %v329_v29 = vmul.f32 0.5, %v328_v28 }
 0x196   : > { %v330_v30 = vsub.f32 1.5, %v329_v29 }
 0x198   : > { %v331_v31 = vmul.f32 %v449_v26, %v330_v30 }
 0x19a   : > { %v335_v33 = vsel %vm334_vm4, %v449_v26, %v331_v31 }
 0x19b   : > { %v336_v35 = vmul.f32 %v335_v33, %v319_v20 }
 0x19d   : > { %v340_v36 = vmul.f32 %v444_v32, %v336_v35 }
 0x19f   : > { %v344_v37 = vadd.f32 %v445_v34, %v340_v36 }
 0x1a1   : > { %v345_v38 = vpack.c.bf16 %v344_v37, %v344_v37 }
 0x1a3   : > { %347 = vst.msk [vmem:[%s263_s18] sm:$0xf] %vm346_vm5, %v345_v38 }
 0x1a4 PF: > { %s16_s21 = sadd.s32 1, %s456_s21  }
 0x1a5   : > { %p13_p4 = scmp.ge.s32.totalorder %s16_s21, 4  }
 0x1a7   :  { %15 = sbr.rel (!%p13_p4) target bundleno = 1 (0x1), region = 77 }

// kernel: detr_forward.40
= control target key start
LH: loop header
LB: loop body
LE: loop exit
PB: predicated region body
PF: predicated region fallthrough
CT: control target
= control target key end

     0   :  { %s931_s15 = smov 0   ;;  %s933_s16 = smov 0   ;;  %s1084_s0 = inlined_call_operand.vmem [shape: bf16[2,8,32], index: 0, kind: input, shape index: {}]   ;;  %s1085_s1 = inlined_call_operand.vmem [shape: bf16[2,64,32], index: 1, kind: input, shape index: {}]   ;;  %s1086_s2 = inlined_call_operand.vmem [shape: bf16[2,64,32], index: 2, kind: input, shape index: {}]   ;;  %s1087_s3 = inlined_call_operand.vmem [shape: f32[2,1,64], index: 3, kind: input, shape index: {}]   ;;  %s1088_s4 = inlined_call_operand.vmem [shape: bf16[2,8,32], index: 4, kind: output, shape index: {}]  }
   0x1   :  { %s935_s17 = smov 0  }
   0x2 LB: > { %s26_s18 = sadd.s32 1, %s894_s16  ;;  %p770_p0 = scmp.ge.s32.totalorder %s898_s17, 1  ;;  %s898_s17 = sphi %s935_s17, %s14_s17   ;;  %s894_s16 = sphi %s933_s16, %s1090_s16   ;;  %s890_s15 = sphi %s931_s15, %s1089_s15  }
   0x3   : > { %p28_p1 = scmp.ge.s32.totalorder %s26_s18, 2  ;;  %p208_p2 = scmp.lt.s32.totalorder %s898_s17, 3 }
   0x5   : > { %s1092_s18 = smov (%p28_p1, %s26_s18), 0  ;;  %p209_p3 = pnand %p770_p0, %p208_p2 }
   0x6   : > { %p251_p4 = scmp.lt.s32.totalorder (!%p209_p3), %s890_s15, 1  ;;  %s900_s30 = smov (!%p209_p3), 120  }
   0x7   : > { %212 = sbr.rel (%p209_p3) target bundleno = 1100 (0x44c), region = 36  ;;  %s901_s5 = smov (!%p209_p3), 112  }
   0x8   : > { %s902_s6 = smov (!%p209_p3), 104   ;;  %s903_s12 = smov (!%p209_p3), 8  }
   0x9   : > { %s904_s13 = smov (!%p209_p3), 24   ;;  %s905_s14 = smov (!%p209_p3), 16  }
   0xc   : > { %s1094_s15 = smov (!%p251_p4, %s890_s15), 1  ;;  %vm320_vm0 = vcmask 64512   ;;  %vm349_vm1 = vcmask 523264   ;;  %vm652_vm2 = vcmask 130048   ;;  %vm654_vm3 = vcmask 195584  }
   0xd   : > { %s819_s19 = sshll.u32 %s1094_s15, 5  ;;  %s270_s25 = scalar_lea.vmem %s1087_s3, %s1094_s15  ;;  %vm657_vm4 = vcmask 257024  }
   0xe   : > { %s262_s22 = scalar_lea.vmem %s1085_s1, %s819_s19  ;;  %s771_s26 = sshll.u32 %s1094_s15, 2  ;;  %v987_v11 = vld [vmem:[%s270_s25] ss:$0 sm:$0xff] }
   0xf   : > { %v824_v0 = vld [vmem:[%s262_s22 + $0x18] sm:$0xff]  ;;  %v823_v2 = vld [vmem:[%s262_s22 + $0x10] sm:$0xff]  ;;  %v822_v4 = vld [vmem:[%s262_s22 + $0x8] sm:$0xff]  ;;  %s257_s29 = scalar_lea.vmem %s1084_s0, %s771_s26  ;;  %s267_s11 = scalar_lea.vmem %s1086_s2, %s819_s19 }
  0x10   : > { %v334_v1 = vsel %vm320_vm0, %v824_v0, 0  ;;  %v331_v3 = vsel %vm320_vm0, %v823_v2, 0  ;;  %v328_v5 = vsel %vm320_vm0, %v822_v4, 0  ;;  %v821_v6 = vld [vmem:[%s262_s22] sm:$0xff]  ;;  %411 = vrot.lane.b32.xlu1 %v823_v2, %s900_s30  ;;  %491 = vrot.lane.b32.xlu2 %v824_v0, %s901_s5  ;;  %v1001_v23 = vld [vmem:[%s267_s11 + $0x18] sm:$0xff]  ;;  %s277_s21 = scalar_lea.vmem %s1088_s4, %s771_s26 }
  0x11   : > { %340 = vmatpush.bf16.xpose.msra.mxu0 %v334_v1  ;;  %v325_v7 = vsel %vm320_vm0, %v821_v6, 0  ;;  %v279_v8 = vld [vmem:[%s257_s29] sm:$0xf]  ;;  %393 = vmatpush.bf16.msra.mxu1 %v1001_v23  ;;  %v1006_v29 = vld [vmem:[%s267_s11 + $0x10] sm:$0xff]  ;;  %v1009_v30 = vld [vmem:[%s267_s11 + $0x8] sm:$0xff] }
  0x12   : > { %v403_v9 = vunpack.c.l.b16 %v279_v8  ;;  %v1015_v34 = vld [vmem:[%s267_s11] sm:$0xff] }
  0x14   : > { %v404_v10 = vpack.c.b16 %v403_v9, %v403_v9 }
  0x15   : > { %394 = vmatpush.bf16.msra.mxu1 %v1006_v29 }
  0x18   : > { %409 = vrot.lane.b32.xlu1 %v822_v4, %s900_s30  ;;  %569 = vrot.lane.b32.xlu2 %v824_v0, %s902_s6 }
  0x19   : > { %341 = vmatpush.bf16.xpose.msra.mxu0 %v331_v3  ;;  %395 = vmatpush.bf16.msra.mxu1 %v1009_v30 }
  0x1d   : > { %396 = vmatpush.bf16.msra.mxu1 %v1015_v34 }
  0x20   : > { %407 = vrot.lane.b32.xlu1 %v821_v6, %s900_s30 }
  0x21   : > { %342 = vmatpush.bf16.xpose.msra.mxu0 %v328_v5 }
  0x28   : > { %489 = vrot.lane.b32.xlu1 %v823_v2, %s901_s5 }
  0x29   : > { %343 = vmatpush.bf16.xpose.msra.mxu0 %v325_v7 }
  0x30   : > { %793 = vmatmul.msk.bf16.vlgmr.msra.gmra.mxu0 %vm320_vm0, %v279_v8  ;;  %405 = vrot.lane.b32.xlu1 %v404_v10, %s900_s30 }
  0x38   : > { %565 = vrot.lane.b32.xlu1 %v822_v4, %s902_s6 }
  0x40   : > { %563 = vrot.lane.b32.xlu1 %v821_v6, %s902_s6 }
  0x48   : > { %561 = vrot.lane.b32.xlu1 %v404_v10, %s902_s6 }
  0x6a   : > { %v492_v20 = vpop.permute.xlu2 %491 }
  0x6b   : > { %v506_v35 = vsel %vm320_vm0, %v492_v20, 0 }
  0x6c   : > { %512 = vmatpush.bf16.xpose.msrb.mxu1 %v506_v35 }
  0x72   : > { %v570_v25 = vpop.permute.xlu2 %569 }
  0x73   : > { %v584_v28 = vsel %vm320_vm0, %v570_v25, 0 }
  0x74   : > { %590 = vmatpush.bf16.xpose.msrb.mxu0 %v584_v28 }
  0x82   : > { %v412_v16 = vpop.permute.xlu1 %411 }
  0x83   : > { %v425_v36 = vsel %vm320_vm0, %v412_v16, 0 }
  0x8a   : > { %v410_v17 = vpop.permute.xlu1 %409 }
  0x8b   : > { %v422_v40 = vsel %vm320_vm0, %v410_v17, 0 }
  0x92   : > { %v408_v18 = vpop.permute.xlu1 %407 }
  0x93   : > { %v419_v43 = vsel %vm320_vm0, %v408_v18, 0 }
  0x9a   : > { %v490_v24 = vpop.permute.xlu1 %489 }
  0x9b   : > { %v503_v46 = vsel %vm320_vm0, %v490_v24, 0 }
  0x9c   : > { %513 = vmatpush.bf16.xpose.msrb.mxu1 %v503_v46 }
  0xa2   : > { %v406_v32 = vpop.permute.xlu1 %405 }
  0xaa   : > { %v566_v39 = vpop.permute.xlu1 %565 }
  0xab   : > { %v578_v41 = vsel %vm320_vm0, %v566_v39, 0 }
  0xad   : > { %v345_v12 = vpop.f32.mrf.mxu0 }
  0xae   : > { %v346_v13 = vadd.f32 %v987_v11, %v345_v12 }
  0xb0   : > { %v350_v14 = vsel %vm349_vm1, %v346_v13, -inf }
  0xb1   : > { %351 = vmax.xlane.f32.xlu0 %v350_v14 }
  0xb2   : > { %v564_v42 = vpop.permute.xlu1 %563 }
  0xb3   : > { %v575_v44 = vsel %vm320_vm0, %v564_v42, 0 }
  0xb5   : > { %v347_v15 = vpop.f32.mrf.mxu0 }
  0xba   : > { %v562_v45 = vpop.permute.xlu1 %561 }
  0xc5   : > { %413 = vrot.lane.b32.xlu0 %v824_v0, %s900_s30 }
  0xcd   : > { %567 = vrot.lane.b32.xlu0 %v823_v2, %s902_s6 }
  0xd5   : > { %487 = vrot.lane.b32.xlu0 %v822_v4, %s901_s5 }
  0xdd   : > { %485 = vrot.lane.b32.xlu0 %v821_v6, %s901_s5 }
  0xe5   : > { %483 = vrot.lane.b32.xlu0 %v404_v10, %s901_s5 }
  0xed   : > { %459 = vrot.lane.b32.xlu0 %v1006_v29, %s900_s30 }
  0xf5   : > { %455 = vrot.lane.b32.xlu0 %v1015_v34, %s900_s30 }
  0xfd   : > { %539 = vrot.lane.b32.xlu0 %v1001_v23, %s901_s5 }
 0x124   : > { %v352_v19 = vpop.xlane.xlu0 %351 }
 0x125   : > { %v353_v21 = vsub.f32 %v346_v13, %v352_v19 }
 0x127   : > { %v354_v22 = vmul.f32 1.442695, %v353_v21 }
 0x129   : > { %860 = vpow2.f32 %v354_v22 }
 0x12f   : > { %v861_v26 = vpop.eup %860 }
 0x130   : > { %v356_v27 = vsel %vm349_vm1, %v861_v26, 0.0 }
 0x131   : > { %357 = vadd.xlane.f32.xlu2 %v356_v27 }
 0x137   : > { %v414_v31 = vpop.permute.xlu0 %413 }
 0x138   : > { %v428_v33 = vsel %vm320_vm0, %v414_v31, 0 }
 0x139   : > { %434 = vmatpush.bf16.xpose.msra.mxu2 %v428_v33 }
 0x13f   : > { %v568_v37 = vpop.permute.xlu0 %567 }
 0x140   : > { %v581_v38 = vsel %vm320_vm0, %v568_v37, 0 }
 0x141   : > { %435 = vmatpush.bf16.xpose.msra.mxu2 %v425_v36  ;;  %591 = vmatpush.bf16.xpose.msrb.mxu0 %v581_v38 }
 0x147   : > { %v488_v47 = vpop.permute.xlu0 %487 }
 0x148   : > { %v500_v48 = vsel %vm320_vm0, %v488_v47, 0 }
 0x149   : > { %436 = vmatpush.bf16.xpose.msra.mxu2 %v422_v40  ;;  %592 = vmatpush.bf16.xpose.msrb.mxu0 %v578_v41 }
 0x14a   : > { %514 = vmatpush.bf16.xpose.msrb.mxu1 %v500_v48 }
 0x14f   : > { %v486_v49 = vpop.permute.xlu0 %485 }
 0x150   : > { %v497_v50 = vsel %vm320_vm0, %v486_v49, 0 }
 0x151   : > { %437 = vmatpush.bf16.xpose.msra.mxu2 %v419_v43  ;;  %593 = vmatpush.bf16.xpose.msrb.mxu0 %v575_v44 }
 0x152   : > { %515 = vmatpush.bf16.xpose.msrb.mxu1 %v497_v50 }
 0x157   : > { %v484_v55 = vpop.permute.xlu0 %483 }
 0x158   : > { %811 = vmatmul.msk.bf16.vlgmr.msra.gmra.mxu2 %vm320_vm0, %v406_v32  ;;  %815 = vmatmul.msk.bf16.vlgmr.msrb.gmra.mxu0 %vm320_vm0, %v562_v45 }
 0x15f   : > { %v460_v9 = vpop.permute.xlu0 %459 }
 0x1a4   : > { %v358_v51 = vpop.xlane.xlu2 %357 }
 0x1a5   : > { %862 = vrcp.f32 %v358_v51 }
 0x1ab   : > { %v863_v52 = vpop.eup %862 }
 0x1ac   : > { %v360_v53 = vmul.f32 %v863_v52, %v861_v26 }
 0x1ae   : > { %v361_v54 = vpack.c.bf16 %v360_v53, %v360_v53 }
 0x1b0   : > { %810 = vmatmul.msk.bf16.vlgmr.msra.gmra.mxu1 %vm349_vm1, %v361_v54 }
 0x1c0   : > { %813 = vmatmul.msk.bf16.vlgmr.msrb.gmra.mxu1 %vm320_vm0, %v484_v55 }
 0x1d5   : > { %v595_v56 = vpop.f32.mrf.mxu0 }
 0x1d6   : > { %v596_v57 = vadd.f32 %v987_v11, %v595_v56 }
 0x1d8   : > { %v599_v58 = vsel %vm349_vm1, %v596_v57, -inf }
 0x1d9   : > { %600 = vmax.xlane.f32.xlu1 %v599_v58 }
 0x1db   : > { %v439_v59 = vpop.f32.mrf.mxu2 }
 0x1dc   : > { %v440_v60 = vadd.f32 %v987_v11, %v439_v59 }
 0x1dd   : > { %v597_v61 = vpop.f32.mrf.mxu0 }
 0x1de   : > { %v443_v62 = vsel %vm349_vm1, %v440_v60, -inf }
 0x1df   : > { %444 = vmax.xlane.f32.xlu2 %v443_v62 }
 0x1e3   : > { %v441_v63 = vpop.f32.mrf.mxu2 }
 0x1f2   : > { %457 = vrot.lane.b32.xlu1 %v1009_v30, %s900_s30 }
 0x1f7   : > { %461 = vrot.lane.b32.xlu2 %v1001_v23, %s900_s30 }
 0x1ff   : > { %617 = vrot.lane.b32.xlu2 %v1001_v23, %s902_s6 }
 0x22d   : > { %v1046_v0 = vpop.f32.mrf.mxu1 }
 0x235   : > { %v400_v1 = vpop.f32.mrf.mxu1 }
 0x23d   : > { %v517_v2 = vpop.f32.mrf.mxu1 }
 0x23e   : > { %v518_v3 = vadd.f32 %v987_v11, %v517_v2  ;;  %v456_v11 = vpop.permute.xlu0 %455 }
 0x240   : > { %v521_v4 = vsel %vm349_vm1, %v518_v3, -inf }
 0x241   : > { %522 = vmax.xlane.f32.xlu0 %v521_v4 }
 0x245   : > { %v519_v5 = vpop.f32.mrf.mxu1 }
 0x246   : > { %v540_v16 = vpop.permute.xlu0 %539 }
 0x24c   : > { %v601_v12 = vpop.xlane.xlu1 %600 }
 0x24d   : > { %v602_v17 = vsub.f32 %v596_v57, %v601_v12 }
 0x24f   : > { %v603_v18 = vmul.f32 1.442695, %v602_v17 }
 0x252   : > { %v445_v6 = vpop.xlane.xlu2 %444 }
 0x253   : > { %v446_v7 = vsub.f32 %v440_v60, %v445_v6 }
 0x255   : > { %v447_v8 = vmul.f32 1.442695, %v446_v7  ;;  %537 = vrot.lane.b32.xlu0 %v1006_v29, %s901_s5 }
 0x257   : > { %864 = vpow2.f32 %v447_v8 }
 0x258   : > { %866 = vpow2.f32 %v603_v18 }
 0x25a   : > { %v462_v10 = vpop.permute.xlu2 %461 }
 0x25b   : > { %474 = vmatpush.bf16.msra.mxu3 %v462_v10 }
 0x25d   : > { %v865_v13 = vpop.eup %864 }
 0x25e   : > { %v449_v14 = vsel %vm349_vm1, %v865_v13, 0.0  ;;  %v867_v19 = vpop.eup %866 }
 0x25f   : > { %450 = vadd.xlane.f32.xlu2 %v449_v14  ;;  %475 = vmatpush.bf16.msra.mxu3 %v460_v9  ;;  %v605_v20 = vsel %vm349_vm1, %v867_v19, 0.0 }
 0x262   : > { %v618_v21 = vpop.permute.xlu2 %617 }
 0x263   : > { %630 = vmatpush.bf16.msrb.mxu2 %v618_v21 }
 0x264   : > { %v458_v15 = vpop.permute.xlu1 %457 }
 0x265   : > { %476 = vmatpush.bf16.msra.mxu3 %v458_v15 }
 0x269   : > { %477 = vmatpush.bf16.msra.mxu3 %v456_v11 }
 0x26d   : > { %552 = vmatpush.bf16.msrb.mxu3 %v540_v16 }
 0x277   : > { %615 = vrot.lane.b32.xlu2 %v1006_v29, %s902_s6 }
 0x27f   : > { %606 = vadd.xlane.f32.xlu0 %v605_v20  ;;  %535 = vrot.lane.b32.xlu2 %v1009_v30, %s901_s5 }
 0x287   : > { %613 = vrot.lane.b32.xlu2 %v1009_v30, %s902_s6 }
 0x28f   : > { %611 = vrot.lane.b32.xlu2 %v1015_v34, %s902_s6 }
 0x2b4   : > { %v523_v22 = vpop.xlane.xlu0 %522 }
 0x2b5   : > { %v524_v23 = vsub.f32 %v518_v3, %v523_v22 }
 0x2b7   : > { %v525_v24 = vmul.f32 1.442695, %v524_v23 }
 0x2b9   : > { %868 = vpow2.f32 %v525_v24 }
 0x2bf   : > { %v869_v25 = vpop.eup %868 }
 0x2c0   : > { %v527_v26 = vsel %vm349_vm1, %v869_v25, 0.0 }
 0x2c1   : > { %528 = vadd.xlane.f32.xlu1 %v527_v26 }
 0x2c7   : > { %v538_v27 = vpop.permute.xlu0 %537 }
 0x2c8   : > { %553 = vmatpush.bf16.msrb.mxu3 %v538_v27 }
 0x2d2   : > { %v451_v28 = vpop.xlane.xlu2 %450 }
 0x2d3   : > { %870 = vrcp.f32 %v451_v28 }
 0x2d9   : > { %v871_v29 = vpop.eup %870 }
 0x2da   : > { %533 = vrot.lane.b32.xlu1 %v1015_v34, %s901_s5  ;;  %v453_v30 = vmul.f32 %v871_v29, %v865_v13  ;;  %v616_v31 = vpop.permute.xlu2 %615 }
 0x2db   : > { %631 = vmatpush.bf16.msrb.mxu2 %v616_v31 }
 0x2dc   : > { %v454_v32 = vpack.c.bf16 %v453_v30, %v453_v30 }
 0x2de   : > { %812 = vmatmul.msk.bf16.vlgmr.msra.gmra.mxu3 %vm349_vm1, %v454_v32 }
 0x2e2   : > { %v536_v33 = vpop.permute.xlu2 %535 }
 0x2e3   : > { %554 = vmatpush.bf16.msrb.mxu3 %v536_v33 }
 0x2ea   : > { %v614_v35 = vpop.permute.xlu2 %613 }
 0x2eb   : > { %632 = vmatpush.bf16.msrb.mxu2 %v614_v35 }
 0x2f2   : > { %v607_v36 = vpop.xlane.xlu0 %606  ;;  %v612_v37 = vpop.permute.xlu2 %611 }
 0x2f3   : > { %872 = vrcp.f32 %v607_v36  ;;  %633 = vmatpush.bf16.msrb.mxu2 %v612_v37 }
 0x2f9   : > { %v873_v38 = vpop.eup %872 }
 0x2fa   : > { %v609_v39 = vmul.f32 %v873_v38, %v867_v19 }
 0x2fc   : > { %v610_v40 = vpack.c.bf16 %v609_v39, %v609_v39 }
 0x2fe   : > { %816 = vmatmul.msk.bf16.vlgmr.msrb.gmra.mxu2 %vm349_vm1, %v610_v40 }
 0x334   : > { %v529_v34 = vpop.xlane.xlu1 %528 }
 0x335   : > { %874 = vrcp.f32 %v529_v34 }
 0x33b   : > { %v875_v41 = vpop.eup %874 }
 0x33c   : > { %v531_v42 = vmul.f32 %v875_v41, %v869_v25 }
 0x33e   : > { %v532_v44 = vpack.c.bf16 %v531_v42, %v531_v42 }
 0x34c   : > { %v534_v43 = vpop.permute.xlu1 %533 }
 0x34d   : > { %555 = vmatpush.bf16.msrb.mxu3 %v534_v43 }
 0x350   : > { %814 = vmatmul.msk.bf16.vlgmr.msrb.gmra.mxu3 %vm349_vm1, %v532_v44 }
 0x361   : > { %v479_v45 = vpop.f32.mrf.mxu3 }
 0x362   : > { %640 = vrot.lane.b32.xlu2 %v479_v45, %s903_s12 }
 0x369   : > { %v481_v46 = vpop.f32.mrf.mxu3 }
 0x381   : > { %v635_v47 = vpop.f32.mrf.mxu2 }
 0x382   : > { %648 = vrot.lane.b32.xlu2 %v635_v47, %s904_s13 }
 0x389   : > { %v637_v48 = vpop.f32.mrf.mxu2 }
 0x3bc   : > { %v641_v51 = vpop.permute.xlu2 %640 }
 0x3bd   : > { %v651_v52 = vsel %vm320_vm0, %v1046_v0, %v641_v51 }
 0x3d3   : > { %v557_v49 = vpop.f32.mrf.mxu3 }
 0x3d4   : > { %644 = vrot.lane.b32.xlu0 %v557_v49, %s905_s14 }
 0x3db   : > { %v559_v50 = vpop.f32.mrf.mxu3 }
 0x3dc   : > { %v649_v54 = vpop.permute.xlu2 %648 }
 0x446   : > { %v645_v53 = vpop.permute.xlu0 %644 }
 0x447   : > { %v653_v55 = vsel %vm652_vm2, %v651_v52, %v645_v53 }
 0x448   : > { %v655_v56 = vsel %vm654_vm3, %v653_v55, %v649_v54 }
 0x449   : > { %v656_v57 = vpack.c.bf16 %v655_v56, %v655_v56 }
 0x44b   : > { %658 = vst.msk [vmem:[%s277_s21] sm:$0xf] %vm657_vm4, %v656_v57 }
 0x44c PF: > { %s14_s17 = sadd.s32 1, %s898_s17   ;;  %s1089_s15 = smov %s894_s16 }
 0x44d   : > { %p11_p5 = scmp.ge.s32.totalorder %s14_s17, 4   ;;  %s1090_s16 = smov %s1092_s18 }
 0x44f   :  { %13 = sbr.rel (!%p11_p5) target bundleno = 2 (0x2), region = 75 }

// kernel: detr_forward.42
= control target key start
LH: loop header
LB: loop body
LE: loop exit
PB: predicated region body
PF: predicated region fallthrough
CT: control target
= control target key end

     0   :  { %12 = vsyncpa [#allocation3], 0  ;;  %s647_s24 = smov 0   ;;  %s704_s0 = inlined_call_operand.vmem [shape: bf16[16,32], index: 0, kind: input, shape index: {}]   ;;  %s705_s1 = inlined_call_operand.vmem [shape: bf16[32,64], index: 1, kind: input, shape index: {}]   ;;  %s706_s2 = inlined_call_operand.vmem [shape: f32[1,64], index: 2, kind: input, shape index: {}]   ;;  %s707_s3 = inlined_call_operand.vmem [shape: bf16[64,32], index: 3, kind: input, shape index: {}]   ;;  %s708_s4 = inlined_call_operand.vmem [shape: f32[1,32], index: 4, kind: input, shape index: {}]   ;;  %s709_s5 = inlined_call_operand.vmem [shape: f32[1,32], index: 5, kind: input, shape index: {}]   ;;  %s710_s6 = inlined_call_operand.hbm [shape: f32[1,32], index: 6, kind: input, shape index: {}]   ;;  %s711_s7 = inlined_call_operand.vmem [shape: bf16[16,32], index: 7, kind: output, shape index: {}]  }
   0x1 LB: > { %s492_s25 = sadd.s32 4294967295, %s603_s24   ;;  %p494_p0 = scmp.ge.s32.totalorder %s603_s24, 1  ;;  %s603_s24 = sphi %s647_s24, %s18_s24  }
   0x2   : > { %p201_p1 = scmp.lt.s32.totalorder %s603_s24, 3  ;;  %s228_s28 = sshll.u32 %s710_s6, 4  ;;  %s229_s28 = int_to_ptr.hbm [resolvable:$true] %s228_s28 }
   0x3   : > { %p543_p3 = scmp.eq.s32.totalorder %s492_s25, 0  ;;  %s605_s29 = smov [#allocation2]  }
   0x4   : > { %p202_p2 = pnand %p494_p0, %p201_p1  ;;  %s230_s30 = sshll.u32 %s605_s29, 4  ;;  %s231_s30 = int_to_ptr.vmem [resolvable:$true] %s230_s30 }
   0x6   : > { %p539_p4 = pneg %p202_p2  ;;  %250 = sbr.rel (%p202_p2) target bundleno = 553 (0x229), region = 48 }
   0x8   : > { %p540_p5 = pnand %p543_p3, %p539_p4 }
   0xa   : > { %542 = dma.hbm_to_vmem [thread:$0]  (!%p540_p5), %s229_s28, 16, %s231_s30, [#allocation3]  }
   0xb   : > { %598 = dma.done.wait (%p543_p3), [#allocation3], 16  }
   0xc   : > { %600 = vsyncadd (%p543_p3), [#allocation3], 4294967280  ;;  %p281_p6 = scmp.lt.s32.totalorder %s492_s25, 1  ;;  %v530_v0 = vld [vmem:[%s705_s1 + $0x8] sm:$0xff]  ;;  %v534_v1 = vld [vmem:[%s707_s3 + $0x18] sm:$0xff]  ;;  %vm311_vm0 = vcmask 261120  }
   0xd   : > { %321 = vmatpush.bf16.msra.mxu0 %v530_v0  ;;  %v529_v2 = vld [vmem:[%s705_s1] sm:$0xff]  ;;  %374 = vmatpush.bf16.msra.mxu1 %v534_v1  ;;  %v533_v3 = vld [vmem:[%s707_s3 + $0x10] sm:$0xff]  ;;  %v532_v5 = vld [vmem:[%s707_s3 + $0x8] sm:$0xff]  ;;  %vm366_vm1 = vcmask 523264   ;;  %v606_v20 = vmov 32.0   ;;  %vm425_vm6 = vcmask 257024  }
   0xe   : > { %s713_s25 = smov (!%p281_p6, %s492_s25), 1  ;;  %v531_v6 = vld [vmem:[%s707_s3] sm:$0xff]  ;;  %559 = vrcp.f32 %v606_v20 }
   0xf   : > { %s499_s10 = sshll.u32 %s713_s25, 2  ;;  %v555_v7 = vld [vmem:[%s706_s2] ss:$0 sm:$0xff] }
  0x10   : > { %s284_s17 = scalar_lea.vmem %s704_s0, %s499_s10  ;;  %v556_v13 = vld [vmem:[%s708_s4] ss:$0 sm:$0xff]  ;;  %s288_s12 = scalar_lea.vmem %s711_s7, %s499_s10 }
  0x11   : > { %322 = vmatpush.bf16.msra.mxu0 %v529_v2  ;;  %v290_v4 = vld [vmem:[%s284_s17] sm:$0xf]  ;;  %375 = vmatpush.bf16.msra.mxu1 %v533_v3 }
  0x12   : > { %v383_v14 = vunpack.c.l.bf16 %v290_v4  ;;  %v557_v41 = vld [vmem:[%s709_s5] ss:$0 sm:$0xff] }
  0x13   : > { %v558_v43 = vld [vmem:[#allocation2] ss:$0 sm:$0xff] }
  0x14   : > { %509 = vmatmul.msk.bf16.vlgmr.msra.gmra.mxu0 %vm311_vm0, %v290_v4  ;;  %v560_v21 = vpop.eup %559 }
  0x15   : > { %376 = vmatpush.bf16.msra.mxu1 %v532_v5  ;;  %v391_v22 = vmul.f32 32.0, %v560_v21  ;;  %vm395_vm2 = vweird.f32 %v560_v21 }
  0x17   : > { %v392_v23 = vsub.f32 1.0, %v391_v22 }
  0x19   : > { %377 = vmatpush.bf16.msra.mxu1 %v531_v6  ;;  %v393_v24 = vmul.f32 %v560_v21, %v392_v23 }
  0x1b   : > { %v394_v25 = vadd.f32 %v560_v21, %v393_v24 }
  0x1d   : > { %v396_v26 = vsel %vm395_vm2, %v560_v21, %v394_v25 }
  0x91   : > { %v324_v8 = vpop.f32.mrf.mxu0 }
  0x92   : > { %v325_v9 = vadd.f32 %v555_v7, %v324_v8 }
  0x94   : > { %v328_v10 = vmax.f32 %v325_v9, 0.0 }
  0x96   : > { %v329_v11 = vpack.c.bf16 %v328_v10, %v328_v10 }
  0x98   : > { %526 = vmatmul.msk.bf16.vlgmr.msra.gmra.mxu1 %vm366_vm1, %v329_v11 }
  0x99   : > { %v326_v12 = vpop.f32.mrf.mxu0 }
 0x115   : > { %v379_v15 = vpop.f32.mrf.mxu1 }
 0x116   : > { %v380_v16 = vadd.f32 %v556_v13, %v379_v15 }
 0x118   : > { %v384_v17 = vadd.f32 %v383_v14, %v380_v16 }
 0x11a   : > { %v387_v18 = vsel %vm311_vm0, %v384_v17, 0.0 }
 0x11b   : > { %388 = vadd.xlane.f32.xlu0 %v387_v18 }
 0x11d   : > { %v381_v19 = vpop.f32.mrf.mxu1 }
 0x18e   : > { %v389_v27 = vpop.xlane.xlu0 %388 }
 0x18f   : > { %v397_v28 = vmul.f32 %v396_v26, %v389_v27 }
 0x191   : > { %v398_v29 = vsub.f32 %v384_v17, %v397_v28 }
 0x193   : > { %v399_v30 = vmul.f32 %v398_v29, %v398_v29 }
 0x195   : > { %v400_v31 = vsel %vm311_vm0, %v399_v30, 0.0 }
 0x196   : > { %401 = vadd.xlane.f32.xlu0 %v400_v31 }
 0x209   : > { %v402_v32 = vpop.xlane.xlu0 %401 }
 0x20a   : > { %v403_v33 = vmul.f32 %v402_v32, %v396_v26 }
 0x20c   : > { %v404_v34 = vadd.f32 1e-05, %v403_v33 }
 0x20e   : > { %561 = vrsqrt.f32 %v404_v34  ;;  %vm411_vm4 = vweird.f32 %v404_v34 }
 0x214   : > { %v562_v35 = vpop.eup %561 }
 0x215   : > { %v406_v36 = vmul.f32 %v562_v35, %v404_v34  ;;  %vm412_vm3 = vweird.f32 %v562_v35 }
 0x216   : > { %vm413_vm5 = vmor %vm411_vm4, %vm412_vm3 }
 0x217   : > { %v407_v37 = vmul.f32 %v562_v35, %v406_v36 }
 0x219   : > { %v408_v38 = vmul.f32 0.5, %v407_v37 }
 0x21b   : > { %v409_v39 = vsub.f32 1.5, %v408_v38 }
 0x21d   : > { %v410_v40 = vmul.f32 %v562_v35, %v409_v39 }
 0x21f   : > { %v414_v42 = vsel %vm413_vm5, %v562_v35, %v410_v40 }
 0x220   : > { %v415_v44 = vmul.f32 %v414_v42, %v398_v29 }
 0x222   : > { %v419_v45 = vmul.f32 %v557_v41, %v415_v44 }
 0x224   : > { %v423_v46 = vadd.f32 %v558_v43, %v419_v45 }
 0x226   : > { %v424_v47 = vpack.c.bf16 %v423_v46, %v423_v46 }
 0x228   : > { %426 = vst.msk [vmem:[%s288_s12] sm:$0xf] %vm425_vm6, %v424_v47 }
 0x229 PF: > { %s18_s24 = sadd.s32 1, %s603_s24  }
 0x22a   : > { %p15_p7 = scmp.ge.s32.totalorder %s18_s24, 4  }
 0x22c   :  { %17 = sbr.rel (!%p15_p7) target bundleno = 1 (0x1), region = 83 }
 0x231   :  { %446 = vsyncpa [#allocation3], 1 }
 0x232   :  { %448 = vsyncpa [#allocation3 + $0x1], 1 }

// kernel: detr_forward.43
= control target key start
LH: loop header
LB: loop body
LE: loop exit
PB: predicated region body
PF: predicated region fallthrough
CT: control target
= control target key end

     0   :  { %s655_s27 = smov 0   ;;  %s706_s0 = inlined_call_operand.vmem [shape: bf16[16,32], index: 0, kind: input, shape index: {}]   ;;  %s707_s1 = inlined_call_operand.vmem [shape: bf16[16,32], index: 1, kind: input, shape index: {}]   ;;  %s708_s2 = inlined_call_operand.vmem [shape: bf16[32,64], index: 2, kind: input, shape index: {}]   ;;  %s709_s3 = inlined_call_operand.vmem [shape: f32[1,64], index: 3, kind: input, shape index: {}]   ;;  %s710_s4 = inlined_call_operand.vmem [shape: bf16[32,32], index: 4, kind: input, shape index: {}]   ;;  %s711_s5 = inlined_call_operand.vmem [shape: f32[1,32], index: 5, kind: input, shape index: {}]   ;;  %s712_s6 = inlined_call_operand.vmem [shape: bf16[16,32], index: 6, kind: output, shape index: {0}]   ;;  %s713_s7 = inlined_call_operand.vmem [shape: bf16[16,32], index: 7, kind: output, shape index: {1}]   ;;  %s714_s8 = inlined_call_operand.vmem [shape: bf16[16,32], index: 8, kind: output, shape index: {2}]  }
   0x1 LB: > { %s556_s28 = sadd.s32 4294967295, %s607_s27   ;;  %p560_p0 = scmp.ge.s32.totalorder %s607_s27, 1  ;;  %s607_s27 = sphi %s655_s27, %s19_s27  }
   0x2   : > { %p275_p1 = scmp.lt.s32.totalorder %s607_s27, 3 }
   0x4   : > { %p276_p2 = pnand %p560_p0, %p275_p1 }
   0x5   : > { %p319_p3 = scmp.lt.s32.totalorder (!%p276_p2), %s556_s28, 1  ;;  %s609_s11 = smov (!%p276_p2), 96  }
   0x6   : > { %279 = sbr.rel (%p276_p2) target bundleno = 268 (0x10c), region = 44 }
   0xb   : > { %v587_v0 = vld [vmem:[%s708_s2 + $0x8] sm:$0xff]  ;;  %v586_v2 = vld [vmem:[%s708_s2] sm:$0xff]  ;;  %s716_s28 = smov (!%p319_p3, %s556_s28), 1  ;;  %vm366_vm0 = vcmask 261120   ;;  %vm384_vm1 = vcmask 257024  }
   0xc   : > { %v589_v1 = vld [vmem:[%s710_s4 + $0x8] sm:$0xff]  ;;  %376 = vmatpush.bf16.msra.mxu0 %v587_v0  ;;  %v588_v3 = vld [vmem:[%s710_s4] sm:$0xff]  ;;  %s675_s15 = sshll.u32 %s716_s28, 2 }
   0xd   : > { %420 = vmatpush.bf16.msra.mxu1 %v589_v1  ;;  %s322_s18 = scalar_lea.vmem %s706_s0, %s675_s15  ;;  %s326_s21 = scalar_lea.vmem %s707_s1, %s675_s15  ;;  %v600_v10 = vld [vmem:[%s711_s5] ss:$0 sm:$0xff] }
   0xe   : > { %v340_v4 = vld [vmem:[%s322_s18] sm:$0xf]  ;;  %s338_s29 = scalar_lea.vmem %s714_s8, %s675_s15  ;;  %s330_s10 = scalar_lea.vmem %s712_s6, %s675_s15 }
   0xf   : > { %v342_v5 = vld [vmem:[%s326_s21] sm:$0xf]  ;;  %v341_v6 = vunpack.c.l.bf16 %v340_v4  ;;  %s334_s14 = scalar_lea.vmem %s713_s7, %s675_s15 }
  0x10   : > { %377 = vmatpush.bf16.msra.mxu0 %v586_v2  ;;  %v343_v7 = vunpack.c.l.bf16 %v342_v5  ;;  %v599_v12 = vld [vmem:[%s709_s3] ss:$0 sm:$0xff] }
  0x11   : > { %421 = vmatpush.bf16.msra.mxu1 %v588_v3 }
  0x12   : > { %v344_v8 = vadd.f32 %v343_v7, %v341_v6 }
  0x14   : > { %583 = vmatmul.msk.bf16.vlgmr.msra.gmra.mxu1 %vm366_vm0, %v340_v4  ;;  %v345_v9 = vpack.c.bf16 %v344_v8, %v344_v8 }
  0x16   : > { %574 = vmatmul.msk.bf16.vlgmr.msra.gmra.mxu0 %vm366_vm0, %v345_v9 }
  0x91   : > { %v423_v11 = vpop.f32.mrf.mxu1 }
  0x92   : > { %v424_v13 = vadd.f32 %v600_v10, %v423_v11 }
  0x93   : > { %v379_v15 = vpop.f32.mrf.mxu0 }
  0x94   : > { %v427_v14 = vpack.c.bf16 %v424_v13, %v424_v13  ;;  %v380_v16 = vadd.f32 %v599_v12, %v379_v15 }
  0x96   : > { %428 = vst.msk [vmem:[%s338_s29] sm:$0xf] %vm384_vm1, %v427_v14  ;;  %v383_v17 = vpack.c.bf16 %v380_v16, %v380_v16 }
  0x98   : > { %387 = vrot.lane.b32.xlu0 %v383_v17, %s609_s11  ;;  %385 = vst.msk [vmem:[%s330_s10] sm:$0xf] %vm384_vm1, %v383_v17 }
  0x99   : > { %v425_v18 = vpop.f32.mrf.mxu1 }
  0x9b   : > { %v381_v19 = vpop.f32.mrf.mxu0 }
 0x10a   : > { %v388_v20 = vpop.permute.xlu0 %387 }
 0x10b   : > { %390 = vst.msk [vmem:[%s334_s14] sm:$0xf] %vm384_vm1, %v388_v20 }
 0x10c PF: > { %s19_s27 = sadd.s32 1, %s607_s27  }
 0x10d   : > { %p16_p4 = scmp.ge.s32.totalorder %s19_s27, 4  }
 0x10f   :  { %18 = sbr.rel (!%p16_p4) target bundleno = 1 (0x1), region = 101 }

// kernel: detr_forward.51
= control target key start
LH: loop header
LB: loop body
LE: loop exit
PB: predicated region body
PF: predicated region fallthrough
CT: control target
= control target key end

     0   :  { %16 = vsyncpa [#allocation3], 0  ;;  %s1241_s0 = inlined_call_operand.vmem [shape: bf16[16,32], index: 0, kind: input, shape index: {}]   ;;  %s1242_s1 = inlined_call_operand.vmem [shape: f32[1,32], index: 1, kind: input, shape index: {}]   ;;  %s1243_s2 = inlined_call_operand.hbm [shape: f32[1,32], index: 2, kind: input, shape index: {}]   ;;  %s1244_s3 = inlined_call_operand.vmem [shape: bf16[32,128], index: 3, kind: input, shape index: {}]   ;;  %s1245_s4 = inlined_call_operand.hbm [shape: f32[1,128], index: 4, kind: input, shape index: {}]   ;;  %s1246_s5 = inlined_call_operand.vmem [shape: bf16[32,32], index: 5, kind: input, shape index: {}]   ;;  %s1247_s6 = inlined_call_operand.hbm [shape: f32[1,32], index: 6, kind: input, shape index: {}]   ;;  %s1248_s7 = inlined_call_operand.vmem [shape: bf16[32,32], index: 7, kind: input, shape index: {}]   ;;  %s1249_s8 = inlined_call_operand.hbm [shape: f32[1,32], index: 8, kind: input, shape index: {}]   ;;  %s1250_s9 = inlined_call_operand.vmem [shape: bf16[32,128], index: 9, kind: input, shape index: {}]   ;;  %s1251_s10 = inlined_call_operand.hbm [shape: f32[1,128], index: 10, kind: input, shape index: {}]   ;;  %s1252_s11 = inlined_call_operand.vmem [shape: f32[16,128], index: 11, kind: output, shape index: {}]  }
   0x1   :  { %17 = vsyncpa [#allocation5], 0 }
   0x2   :  { %18 = vsyncpa [#allocation8], 0  ;;  %s1131_s17 = smov 0  }
   0x3 LB: > { %s321_s20 = sshll.u32 %s1245_s4, 4  ;;  %s1140_s21 = sadd.s32 4294967295, %s1063_s17   ;;  %s1063_s17 = sphi %s1131_s17, %s24_s17   ;;  %s322_s20 = int_to_ptr.hbm [resolvable:$true] %s321_s20 }
   0x4   : > { %p762_p0 = scmp.ge.s32.totalorder %s1063_s17, 1  ;;  %p291_p1 = scmp.lt.s32.totalorder %s1063_s17, 3 }
   0x5   : > { %p859_p2 = scmp.eq.s32.totalorder %s1140_s21, 0  ;;  %s1065_s23 = smov [#allocation4]  }
   0x6   : > { %p1145_p3 = pnand %p762_p0, %p291_p1  ;;  %s323_s24 = sshll.u32 %s1065_s23, 4  ;;  %s324_s24 = int_to_ptr.vmem [resolvable:$true] %s323_s24 }
   0x7   : > { %s351_s27 = sshll.u32 %s1249_s8, 4  ;;  %s306_s30 = sshll.u32 %s1243_s2, 4  ;;  %s352_s27 = int_to_ptr.hbm [resolvable:$true] %s351_s27  ;;  %s307_s30 = int_to_ptr.hbm [resolvable:$true] %s306_s30 }
   0x8   : > { %p843_p4 = pneg %p1145_p3  ;;  %s1066_s13 = smov [#allocation7]  }
   0x9   : > { %s353_s14 = sshll.u32 %s1066_s13, 4  ;;  %s1067_s15 = smov [#allocation2]   ;;  %s354_s14 = int_to_ptr.vmem [resolvable:$true] %s353_s14 }
   0xa   : > { %p1159_p5 = pnand %p859_p2, %p843_p4  ;;  %s308_s16 = sshll.u32 %s1067_s15, 4  ;;  %s309_s16 = int_to_ptr.vmem [resolvable:$true] %s308_s16 }
   0xb   : > { %s336_s23 = sshll.u32 %s1247_s6, 4  ;;  %s366_s28 = sshll.u32 %s1251_s10, 4  ;;  %s337_s23 = int_to_ptr.hbm [resolvable:$true] %s336_s23  ;;  %s367_s28 = int_to_ptr.hbm [resolvable:$true] %s366_s28 }
   0xc   : > { %849 = dma.hbm_to_vmem [thread:$0]  (!%p1159_p5), %s322_s20, 16, %s324_s24, [#allocation5]  }
   0xd   : > { %855 = dma.hbm_to_vmem [thread:$0]  (!%p1159_p5), %s352_s27, 16, %s354_s14, [#allocation8]  }
   0xe   : > { %846 = dma.hbm_to_vmem [thread:$0]  (!%p1159_p5), %s307_s30, 16, %s309_s16, [#allocation3]  }
   0xf   : > { %s1068_s29 = smov [#allocation6]   ;;  %s1069_s20 = smov [#allocation9]  }
  0x10   : > { %s338_s13 = sshll.u32 %s1068_s29, 4  ;;  %s368_s24 = sshll.u32 %s1069_s20, 4  ;;  %s339_s13 = int_to_ptr.vmem [resolvable:$true] %s338_s13  ;;  %s369_s24 = int_to_ptr.vmem [resolvable:$true] %s368_s24 }
  0x11   : > { %852 = dma.hbm_to_vmem [thread:$0]  (!%p1159_p5), %s337_s23, 16, %s339_s13, [#allocation5]  }
  0x12   : > { %858 = dma.hbm_to_vmem [thread:$0]  (!%p1159_p5), %s367_s28, 16, %s369_s24, [#allocation8]  }
  0x13   : > { %388 = sbr.rel (%p1145_p3) target bundleno = 726 (0x2d6), region = 64 }
  0x18   : > { %1050 = dma.done.wait (%p859_p2), [#allocation3], 16  }
  0x19   : > { %1052 = vsyncadd (%p859_p2), [#allocation3], 4294967280 }
  0x1a   : > { %1054 = dma.done.wait (%p859_p2), [#allocation5], 32  }
  0x1b   : > { %1056 = vsyncadd (%p859_p2), [#allocation5], 4294967264 }
  0x1c   : > { %1058 = dma.done.wait (%p859_p2), [#allocation8], 32  }
  0x1d   : > { %1060 = vsyncadd (%p859_p2), [#allocation8], 4294967264  ;;  %p447_p6 = scmp.lt.s32.totalorder %s1140_s21, 1  ;;  %vm460_vm0 = vcmask 261120   ;;  %v1070_v3 = vmov 32.0   ;;  %v816_v15 = vld [vmem:[%s1244_s3 + $0x8] sm:$0xff]  ;;  %v648_v56 = vlaneseq }
  0x1e   : > { %889 = vrcp.f32 %v1070_v3  ;;  %v818_v16 = vld [vmem:[%s1246_s5 + $0x8] sm:$0xff]  ;;  %528 = vmatpush.bf16.msra.mxu0 %v816_v15  ;;  %v815_v17 = vld [vmem:[%s1244_s3] sm:$0xff] }
  0x1f   : > { %s1256_s21 = smov (!%p447_p6, %s1140_s21), 1  ;;  %561 = vmatpush.bf16.msra.mxu1 %v818_v16  ;;  %v817_v18 = vld [vmem:[%s1246_s5] sm:$0xff]  ;;  %v820_v35 = vld [vmem:[%s1248_s7 + $0x8] sm:$0xff]  ;;  %v649_v58 = vand.u32 127, %v648_v56 }
  0x20   : > { %s775_s22 = sshll.u32 %s1256_s21, 2  ;;  %v883_v28 = vld [vmem:[%s1242_s1] ss:$0 sm:$0xff]  ;;  %599 = vmatpush.bf16.msra.mxu2 %v820_v35  ;;  %v886_v37 = vld [vmem:[#allocation6] ss:$0 sm:$0xff]  ;;  %v822_v45 = vld [vmem:[%s1250_s9 + $0x8] sm:$0xff] }
  0x21   : > { %s450_s12 = scalar_lea.vmem %s1241_s0, %s775_s22  ;;  %v884_v31 = vld [vmem:[#allocation2] ss:$0 sm:$0xff]  ;;  %637 = vmatpush.bf16.msra.mxu3 %v822_v45  ;;  %v887_v47 = vld [vmem:[#allocation7] ss:$0 sm:$0xff]  ;;  %v888_v53 = vld [vmem:[#allocation9] ss:$0 sm:$0xff] }
  0x22   : > { %v456_v0 = vld [vmem:[%s450_s12] sm:$0xf]  ;;  %529 = vmatpush.bf16.msra.mxu0 %v815_v17  ;;  %vm650_vm5 = vcmp.ge.s32.totalorder %v649_v58, 5  ;;  %vm651_vm6 = vcmp.lt.s32.totalorder %v649_v58, 9  ;;  %s776_s15 = sshll.u32 %s1256_s21, 3 }
  0x23   : > { %v457_v1 = vunpack.c.l.bf16 %v456_v0  ;;  %562 = vmatpush.bf16.msra.mxu1 %v817_v18  ;;  %v819_v36 = vld [vmem:[%s1248_s7] sm:$0xff]  ;;  %vm652_vm7 = vmand %vm650_vm5, %vm651_vm6  ;;  %s454_s19 = scalar_lea.vmem %s1252_s11, %s776_s15 }
  0x24   : > { %v890_v4 = vpop.eup %889  ;;  %600 = vmatpush.bf16.msra.mxu2 %v819_v36  ;;  %v821_v46 = vld [vmem:[%s1250_s9] sm:$0xff] }
  0x25   : > { %v461_v2 = vsel %vm460_vm0, %v457_v1, 0.0  ;;  %v465_v5 = vmul.f32 32.0, %v890_v4  ;;  %vm469_vm1 = vweird.f32 %v890_v4  ;;  %638 = vmatpush.bf16.msra.mxu3 %v821_v46  ;;  %v885_v60 = vld [vmem:[#allocation4] ss:$0 sm:$0xff] }
  0x26   : > { %462 = vadd.xlane.f32.xlu0 %v461_v2 }
  0x27   : > { %v466_v6 = vsub.f32 1.0, %v465_v5 }
  0x29   : > { %v467_v7 = vmul.f32 %v890_v4, %v466_v6 }
  0x2b   : > { %v468_v8 = vadd.f32 %v890_v4, %v467_v7 }
  0x2d   : > { %v470_v9 = vsel %vm469_vm1, %v890_v4, %v468_v8 }
  0x99   : > { %v463_v10 = vpop.xlane.xlu0 %462 }
  0x9a   : > { %v471_v11 = vmul.f32 %v470_v9, %v463_v10 }
  0x9c   : > { %v472_v12 = vsub.f32 %v457_v1, %v471_v11 }
  0x9e   : > { %v473_v13 = vmul.f32 %v472_v12, %v472_v12 }
  0xa0   : > { %v474_v14 = vsel %vm460_vm0, %v473_v13, 0.0 }
  0xa1   : > { %475 = vadd.xlane.f32.xlu0 %v474_v14 }
 0x114   : > { %v476_v19 = vpop.xlane.xlu0 %475 }
 0x115   : > { %v477_v20 = vmul.f32 %v476_v19, %v470_v9 }
 0x117   : > { %v478_v21 = vadd.f32 1e-05, %v477_v20 }
 0x119   : > { %891 = vrsqrt.f32 %v478_v21  ;;  %vm485_vm3 = vweird.f32 %v478_v21 }
 0x11f   : > { %v892_v22 = vpop.eup %891 }
 0x120   : > { %v480_v23 = vmul.f32 %v892_v22, %v478_v21  ;;  %vm486_vm2 = vweird.f32 %v892_v22 }
 0x121   : > { %vm487_vm4 = vmor %vm485_vm3, %vm486_vm2 }
 0x122   : > { %v481_v24 = vmul.f32 %v892_v22, %v480_v23 }
 0x124   : > { %v482_v25 = vmul.f32 0.5, %v481_v24 }
 0x126   : > { %v483_v26 = vsub.f32 1.5, %v482_v25 }
 0x128   : > { %v484_v27 = vmul.f32 %v892_v22, %v483_v26 }
 0x12a   : > { %v488_v29 = vsel %vm487_vm4, %v892_v22, %v484_v27 }
 0x12b   : > { %v489_v30 = vmul.f32 %v488_v29, %v472_v12 }
 0x12d   : > { %v493_v32 = vmul.f32 %v883_v28, %v489_v30 }
 0x12f   : > { %v497_v33 = vadd.f32 %v884_v31, %v493_v32 }
 0x131   : > { %v498_v34 = vpack.c.bf16 %v497_v33, %v497_v33 }
 0x133   : > { %785 = vmatmul.msk.bf16.vlgmr.msra.gmra.mxu0 %vm460_vm0, %v498_v34  ;;  %794 = vmatmul.msk.bf16.vlgmr.msra.gmra.mxu1 %vm460_vm0, %v498_v34 }
 0x1b0   : > { %v531_v38 = vpop.f32.mrf.mxu0  ;;  %v564_v39 = vpop.f32.mrf.mxu1 }
 0x1b1   : > { %v565_v40 = vadd.f32 %v886_v37, %v564_v39  ;;  %v532_v63 = vadd.f32 %v885_v60, %v531_v38 }
 0x1b3   : > { %v568_v41 = vmax.f32 %v565_v40, 0.0 }
 0x1b5   : > { %v569_v42 = vpack.c.bf16 %v568_v41, %v568_v41 }
 0x1b7   : > { %803 = vmatmul.msk.bf16.vlgmr.msra.gmra.mxu2 %vm460_vm0, %v569_v42 }
 0x1b8   : > { %v533_v43 = vpop.f32.mrf.mxu0  ;;  %v566_v44 = vpop.f32.mrf.mxu1 }
 0x23a   : > { %v602_v48 = vpop.f32.mrf.mxu2 }
 0x23b   : > { %v603_v49 = vadd.f32 %v887_v47, %v602_v48 }
 0x23d   : > { %v606_v50 = vmax.f32 %v603_v49, 0.0 }
 0x23f   : > { %v607_v51 = vpack.c.bf16 %v606_v50, %v606_v50 }
 0x241   : > { %812 = vmatmul.msk.bf16.vlgmr.msra.gmra.mxu3 %vm460_vm0, %v607_v51 }
 0x242   : > { %v604_v52 = vpop.f32.mrf.mxu2 }
 0x2c4   : > { %v640_v54 = vpop.f32.mrf.mxu3 }
 0x2c5   : > { %v641_v55 = vadd.f32 %v888_v53, %v640_v54 }
 0x2c7   : > { %v644_v57 = vmul.f32 0.5, %v641_v55 }
 0x2c9   : > { %893 = vtanh.f32 %v644_v57 }
 0x2cc   : > { %v642_v59 = vpop.f32.mrf.mxu3 }
 0x2cf   : > { %v894_v61 = vpop.eup %893 }
 0x2d0   : > { %v646_v62 = vadd.f32 1.0, %v894_v61 }
 0x2d2   : > { %v647_v0 = vmul.f32 0.5, %v646_v62 }
 0x2d4   : > { %v655_v1 = vsel %vm652_vm7, %v647_v0, %v532_v63 }
 0x2d5   : > { %656 = vst [vmem:[%s454_s19] sm:$0xff] %v655_v1 }
 0x2d6 PF: > { %s24_s17 = sadd.s32 1, %s1063_s17  }
 0x2d7   : > { %p21_p7 = scmp.ge.s32.totalorder %s24_s17, 4  }
 0x2d9   :  { %23 = sbr.rel (!%p21_p7) target bundleno = 3 (0x3), region = 115 }
 0x2de   :  { %676 = vsyncpa [#allocation3], 1 }
 0x2df   :  { %678 = vsyncpa [#allocation3 + $0x1], 1 }
 0x2e0   :  { %679 = vsyncpa [#allocation5], 1 }
 0x2e1   :  { %680 = vsyncpa [#allocation8], 1 }

</bundles_post_ra>
